<compile_context>
chip_gen: v6e
topology: v6e:2x2x1
jax: 0.10.0
libtpu: 0.0.40
codegen_flags: <defaults>
</compile_context>

<pallas_src>
import functools

import numpy as np

import jax
import jax.numpy as jnp
from jax import lax
from jax.experimental import pallas as pl
from jax.experimental.pallas import tpu as pltpu


# ---------------------------------------------------------------------------
# Sublane-roll helper.  pltpu.roll is the fast path (XLU rotate); a tiny probe
# kernel determines its sign convention once, and we fall back to jnp.roll
# (with a loud warning) if the sublane rotate does not lower.
# ---------------------------------------------------------------------------
_ROLL_MODE = None  # "tpu" | "tpu_flipped" | "jnp"


def _probe_roll_kernel(x_ref, o_ref):
    o_ref[...] = pltpu.roll(x_ref[...], 1, 0)


def _detect_roll_mode():
    global _ROLL_MODE
    if _ROLL_MODE is not None:
        return _ROLL_MODE
    rows = 16
    x = jnp.arange(rows * 128, dtype=jnp.float32).reshape(rows, 128)
    try:
        y = np.asarray(
            pl.pallas_call(
                _probe_roll_kernel,
                out_shape=jax.ShapeDtypeStruct((rows, 128), jnp.float32),
            )(x)
        )
        xn = np.asarray(x)
        if np.array_equal(y, np.roll(xn, 1, axis=0)):
            _ROLL_MODE = "tpu"
        elif np.array_equal(y, np.roll(xn, -1, axis=0)):
            _ROLL_MODE = "tpu_flipped"
        else:
            _ROLL_MODE = "jnp"
    except Exception:
        _ROLL_MODE = "jnp"
    if _ROLL_MODE == "jnp":
        print("WARNING: pltpu.roll probe failed; falling back to jnp.roll inside "
              "the kernel (correct, but the XLU rotate fast path is not used).")
    return _ROLL_MODE


def _roll_rows(x, shift, mode):
    """np.roll(x, shift, axis=0) semantics; `shift` is a static non-negative int."""
    n = x.shape[0]
    shift = shift % n
    if shift == 0:
        return x
    if mode == "tpu":
        return pltpu.roll(x, shift, 0)
    if mode == "tpu_flipped":
        return pltpu.roll(x, n - shift, 0)
    return jnp.roll(x, shift, axis=0)


# ---------------------------------------------------------------------------
# Kernel: one (batch n, TD output depth-planes) per grid step.
# ---------------------------------------------------------------------------
def conv3d_bn_gelu_kernel(x_lo_ref, x_body_ref, x_hi_ref, w_ref, scale_ref,
                          shift_ref, o_ref, s_ref, *, H, W, TD, roll_mode):
    """Refs (per grid step):
      x_lo_ref   : (H*W, C_in)        bf16   input plane d0-1 (zero at D edge)
      x_body_ref : (TD, H*W, C_in)    bf16   input planes d0 .. d0+TD-1
      x_hi_ref   : (H*W, C_in)        bf16   input plane d0+TD (zero at D edge)
      w_ref      : (3, 9*C_in, C_out) bf16   rows ordered (kh*3+kw)*C_in + ci
      scale_ref  : (1, C_out)         f32    folded BN scale
      shift_ref  : (1, C_out)         f32    folded BN shift (+ conv bias)
      o_ref      : (TD*H*W, C_out)           output (flat, lane-dense)
      s_ref      : ((TD+2)*H*W, 9*C_in) bf16 staged-LHS VMEM scratch
    """
    C_in = x_body_ref.shape[-1]
    C_out = o_ref.shape[-1]
    HW = H * W

    # Boolean keep-masks for the in-register H/W halos (hoisted; computed once).
    r = lax.broadcasted_iota(jnp.int32, (HW, 1), 0)
    col = r % W
    keep_l = jnp.broadcast_to(col != 0, (HW, C_in))            # w-1 valid
    keep_r = jnp.broadcast_to(col != (W - 1), (HW, C_in))      # w+1 valid
    keep_t = jnp.broadcast_to(r >= W, (HW, 3 * C_in))          # h-1 valid
    keep_b = jnp.broadcast_to(r < (HW - W), (HW, 3 * C_in))    # h+1 valid

    zc = jnp.zeros((HW, C_in), jnp.float32)
    z3c = jnp.zeros((HW, 3 * C_in), jnp.float32)

    def stage_plane(plane_bf16, p):
        # Prep in f32 (no bf16 VALU on v5e); exactly one up-cast per plane and
        # one down-cast per staged slab.
        plane = plane_bf16.astype(jnp.float32)                             # (HW, C)
        s_m = jnp.where(keep_l, _roll_rows(plane, 1, roll_mode), zc)       # x[.., w-1]
        s_p = jnp.where(keep_r, _roll_rows(plane, HW - 1, roll_mode), zc)  # x[.., w+1]
        buf3 = jnp.concatenate([s_m, plane, s_p], axis=1)                  # kw = 0,1,2
        h_m = jnp.where(keep_t, _roll_rows(buf3, W, roll_mode), z3c)       # x[h-1, ..]
        h_p = jnp.where(keep_b, _roll_rows(buf3, HW - W, roll_mode), z3c)  # x[h+1, ..]
        rows = pl.ds(p * HW, HW)
        s_ref[rows, pl.ds(0, 3 * C_in)] = h_m.astype(jnp.bfloat16)         # kh = 0
        s_ref[rows, pl.ds(3 * C_in, 3 * C_in)] = buf3.astype(jnp.bfloat16)  # kh = 1
        s_ref[rows, pl.ds(6 * C_in, 3 * C_in)] = h_p.astype(jnp.bfloat16)   # kh = 2

    # Stage the TD+2 input planes (D halo included) once.
    stage_plane(x_lo_ref[...], 0)
    for t in range(TD):
        stage_plane(x_body_ref[t], t + 1)
    stage_plane(x_hi_ref[...], TD + 1)

    # kd-fused matmuls: each kd tap is a contiguous row-slice of the scratch.
    acc = jnp.zeros((TD * HW, C_out), jnp.float32)
    for kd in range(3):
        lhs = s_ref[pl.ds(kd * HW, TD * HW), :]                 # (TD*HW, 9*C_in)
        acc = acc + jnp.dot(lhs, w_ref[kd],
                            preferred_element_type=jnp.float32)

    # Folded BatchNorm (eval) + conv bias, then exact GELU (nn.GELU default).
    y = acc * scale_ref[...] + shift_ref[...]
    inv_sqrt2 = jnp.float32(0.7071067811865476)
    y = 0.5 * y * (1.0 + lax.erf(y * inv_sqrt2))
    o_ref[...] = y.astype(o_ref.dtype)


def _choose_td(D, HW, C_in, *, max_rows=2048, scratch_budget=8 << 20):
    """Largest divisor of D whose staged scratch / matmul M stay reasonable."""
    best = 1
    for td in range(1, D + 1):
        if D % td:
            continue
        scratch = (td + 2) * HW * 9 * C_in * 2          # bf16 bytes
        if td * HW <= max_rows and scratch <= scratch_budget:
            best = td
    return best


def conv3d_bn_gelu(x_ndhwc, w_cat, scale, shift, *, out_dtype=jnp.float32, td=None):
    """x_ndhwc: (N, D, H, W, C_in);  w_cat: (3, 9*C_in, C_out) bf16."""
    N, D, H, W, C_in = x_ndhwc.shape
    C_out = w_cat.shape[-1]
    HW = H * W

    if td is None:
        td = _choose_td(D, HW, C_in)
    assert D % td == 0, (D, td)
    D_t = D // td

    # bf16 activations in HBM (halves DMA bytes); flat (H*W) spatial layout.
    x_flat = x_ndhwc.astype(jnp.bfloat16).reshape(N, D, HW, C_in)

    # D-halo side arrays (small strided gathers; no full padded-tensor copy).
    zero_plane = jnp.zeros((N, 1, HW, C_in), jnp.bfloat16)
    if D_t > 1:
        x_lo = jnp.concatenate([zero_plane, x_flat[:, td - 1:D - 1:td]], axis=1)
        x_hi = jnp.concatenate([x_flat[:, td:D:td], zero_plane], axis=1)
    else:
        x_lo = zero_plane
        x_hi = zero_plane

    roll_mode = _detect_roll_mode()
    kernel = functools.partial(conv3d_bn_gelu_kernel, H=H, W=W, TD=td,
                               roll_mode=roll_mode)

    out_bytes = np.dtype(out_dtype).itemsize
    vmem_est = (2 * (2 * HW * C_in * 2 + td * HW * C_in * 2
                     + td * HW * C_out * out_bytes)
                + 2 * 27 * C_in * C_out * 2
                + (td + 2) * HW * 9 * C_in * 2
                + (8 << 20))
    vmem_limit = max(32 << 20, min(int(vmem_est), 64 << 20))   # v7x-safe cap

    cost = pl.CostEstimate(
        flops=2 * N * D * HW * 27 * C_in * C_out,
        transcendentals=N * D * HW * C_out,
        bytes_accessed=(x_flat.size * 2
                        + N * D * HW * C_out * out_bytes
                        + w_cat.size * 2))

    out = pl.pallas_call(
        kernel,
        out_shape=jax.ShapeDtypeStruct((N, D_t, td * HW, C_out), out_dtype),
        grid=(N, D_t),
        in_specs=[
            pl.BlockSpec((None, None, HW, C_in), lambda n, d: (n, d, 0, 0)),   # x_lo
            pl.BlockSpec((None, td, HW, C_in), lambda n, d: (n, d, 0, 0)),     # x_body
            pl.BlockSpec((None, None, HW, C_in), lambda n, d: (n, d, 0, 0)),   # x_hi
            pl.BlockSpec((3, 9 * C_in, C_out), lambda n, d: (0, 0, 0)),        # weights
            pl.BlockSpec((1, C_out), lambda n, d: (0, 0)),                     # scale
            pl.BlockSpec((1, C_out), lambda n, d: (0, 0)),                     # shift
        ],
        out_specs=pl.BlockSpec((None, None, td * HW, C_out),
                               lambda n, d: (n, d, 0, 0)),
        scratch_shapes=[pltpu.VMEM(((td + 2) * HW, 9 * C_in), jnp.bfloat16)],
        compiler_params=pltpu.CompilerParams(
            dimension_semantics=("parallel", "parallel"),
            vmem_limit_bytes=vmem_limit),
        cost_estimate=cost,
    )(x_lo, x_flat, x_hi, w_cat, scale, shift)

    return out.reshape(N, D, H, W, C_out)


def conv_3d_forward(x_ncdhw, params, *, out_dtype=None):
    """Mirrors the conv_dy_3d net_3d body (3x3x3 case): NCDHW in, NCDHW out."""
    w_pt = params["conv_w"]          # (C_out, C_in, 3, 3, 3) (PyTorch layout)
    b = params["conv_b"]
    gamma, beta = params["bn_gamma"], params["bn_beta"]
    rmean, rvar, eps = params["bn_mean"], params["bn_var"], params["bn_eps"]
    C_out, C_in = w_pt.shape[0], w_pt.shape[1]

    # Fold BN (eval) + conv bias into per-channel affine.
    scale = gamma / jnp.sqrt(rvar + eps)                 # (C_out,)
    shift = (b - rmean) * scale + beta                   # (C_out,)

    x_ndhwc = jnp.transpose(x_ncdhw, (0, 2, 3, 4, 1))
    # (kd, kh, kw, C_in, C_out) -> (kd, (kh*3+kw)*C_in + ci, C_out), bf16.
    w_cat = jnp.transpose(w_pt, (2, 3, 4, 1, 0)).reshape(
        3, 9 * C_in, C_out).astype(jnp.bfloat16)

    if out_dtype is None:
        out_dtype = x_ncdhw.dtype
    y_ndhwc = conv3d_bn_gelu(
        x_ndhwc, w_cat,
        scale.reshape(1, -1).astype(jnp.float32),
        shift.reshape(1, -1).astype(jnp.float32),
        out_dtype=out_dtype)
    return jnp.transpose(y_ndhwc, (0, 4, 1, 2, 3))       # back to NCDHW


# ---------------------------------------------------------------------------
# Pure-JAX references (lax conv) for the correctness check.
# ---------------------------------------------------------------------------
def reference_forward(x_ncdhw, params, *, cast_bf16):
    w_pt = params["conv_w"]
    x_ndhwc = jnp.transpose(x_ncdhw, (0, 2, 3, 4, 1))
    w_dhwio = jnp.transpose(w_pt, (2, 3, 4, 1, 0))
    if cast_bf16:
        lhs, rhs, prec = x_ndhwc.astype(jnp.bfloat16), w_dhwio.astype(jnp.bfloat16), None
    else:
        lhs, rhs, prec = x_ndhwc, w_dhwio, lax.Precision.HIGHEST
    y = lax.conv_general_dilated(
        lhs, rhs, window_strides=(1, 1, 1), padding="SAME",
        dimension_numbers=("NDHWC", "DHWIO", "NDHWC"),
        preferred_element_type=jnp.float32, precision=prec)
    y = y + params["conv_b"]
    y = (y - params["bn_mean"]) / jnp.sqrt(params["bn_var"] + params["bn_eps"])
    y = y * params["bn_gamma"] + params["bn_beta"]
    y = 0.5 * y * (1.0 + lax.erf(y * jnp.float32(0.7071067811865476)))
    return jnp.transpose(y, (0, 4, 1, 2, 3))


if __name__ == "__main__":
    # Small, TPU-friendly shapes consistent with the module (channel//2 = 128).
    N, C_IN, C_OUT, D, H, W = 2, 128, 128, 4, 8, 8

    _detect_roll_mode()  # resolve the roll convention once, eagerly

    key = jax.random.PRNGKey(0)
    kx, kw, kb = jax.random.split(key, 3)

    x = jax.random.normal(kx, (N, C_IN, D, H, W), dtype=jnp.float32)  # NCDHW

    params = {
        "conv_w": 0.05 * jax.random.normal(kw, (C_OUT, C_IN, 3, 3, 3), jnp.float32),
        "conv_b": 0.05 * jax.random.normal(kb, (C_OUT,), jnp.float32),
        "bn_gamma": jnp.ones((C_OUT,), jnp.float32),
        "bn_beta": jnp.zeros((C_OUT,), jnp.float32),
        "bn_mean": jnp.zeros((C_OUT,), jnp.float32),
        "bn_var": jnp.ones((C_OUT,), jnp.float32),
        "bn_eps": jnp.float32(1e-5),
    }

    out = jax.block_until_ready(conv_3d_forward(x, params))
    ref_bf16 = jax.block_until_ready(reference_forward(x, params, cast_bf16=True))
    ref_f32 = jax.block_until_ready(reference_forward(x, params, cast_bf16=False))

    assert out.shape == (N, C_OUT, D, H, W), out.shape

    # Tight check vs. a bf16-consistent reference (same operand rounding).
    err_b = float(jnp.max(jnp.abs(out - ref_bf16)))
    assert jnp.allclose(out, ref_bf16, atol=2e-3, rtol=2e-3), err_b
    # Loose check vs. the exact-f32 reference (bf16 single-pass MXU tolerance).
    err_f = float(jnp.max(jnp.abs(out - ref_f32)))
    assert jnp.allclose(out, ref_f32, atol=5e-2, rtol=5e-2), err_f

    print("KERNEL_OK")
</pallas_src>

<mosaic_0001>
module attributes {stable_mosaic.version = 11 : i64} {
  func.func @_probe_roll_kernel(%arg0: memref<16x128xf32, #tpu.memory_space<vmem>>, %arg1: memref<16x128xf32, #tpu.memory_space<vmem>>) attributes {dimension_semantics = [], scalar_prefetch = 0 : i64, scratch_operands = 0 : i64, tpu.core_type = #tpu.core_type<tc>} {
    %c0 = arith.constant 0 : index
    %c0_0 = arith.constant 0 : index
    %0 = vector.load %arg0[%c0, %c0_0] : memref<16x128xf32, #tpu.memory_space<vmem>>, vector<16x128xf32>
    %c1_i32 = arith.constant 1 : i32
    %1 = tpu.dynamic_rotate %0 by %c1_i32 dim 0 : vector<16x128xf32>, i32 -> vector<16x128xf32>
    %c0_1 = arith.constant 0 : index
    %c0_2 = arith.constant 0 : index
    %2 = vector.load %arg1[%c0_1, %c0_2] : memref<16x128xf32, #tpu.memory_space<vmem>>, vector<16x128xf32>
    tpu.vector_store %arg1[%c0_1, %c0_2], %1 {strides = array<i32>} : memref<16x128xf32, #tpu.memory_space<vmem>>, vector<16x128xf32>,
    return
  }
}

module attributes {stable_mosaic.version = 11 : i64} {
  func.func @conv3d_bn_gelu_kernel(%arg0: i32, %arg1: i32, %arg2: memref<1x1x64x128xbf16, #tpu.memory_space<vmem>>, %arg3: memref<1x4x64x128xbf16, #tpu.memory_space<vmem>>, %arg4: memref<1x1x64x128xbf16, #tpu.memory_space<vmem>>, %arg5: memref<3x1152x128xbf16, #tpu.memory_space<vmem>>, %arg6: memref<1x128xf32, #tpu.memory_space<vmem>>, %arg7: memref<1x128xf32, #tpu.memory_space<vmem>>, %arg8: memref<1x1x256x128xf32, #tpu.memory_space<vmem>>, %arg9: memref<384x1152xbf16, #tpu.memory_space<vmem>>) attributes {dimension_semantics = [#tpu.dimension_semantics<parallel>, #tpu.dimension_semantics<parallel>], iteration_bounds = array<i64: 2, 1>, scalar_prefetch = 0 : i64, scratch_operands = 1 : i64, tpu.core_type = #tpu.core_type<tc>, window_params = [{transform_indices = @transform_0, window_bounds = array<i64: 1, 1, 64, 128>}, {transform_indices = @transform_1, window_bounds = array<i64: 1, 4, 64, 128>}, {transform_indices = @transform_2, window_bounds = array<i64: 1, 1, 64, 128>}, {pipeline_mode = #tpu.pipeline_mode<synchronous>, transform_indices = @transform_3, window_bounds = array<i64: 3, 1152, 128>}, {pipeline_mode = #tpu.pipeline_mode<synchronous>, transform_indices = @transform_4, window_bounds = array<i64: 1, 128>}, {pipeline_mode = #tpu.pipeline_mode<synchronous>, transform_indices = @transform_5, window_bounds = array<i64: 1, 128>}, {transform_indices = @transform_6, window_bounds = array<i64: 1, 1, 256, 128>}]} {
    %0 = tpu.iota {dimensions = array<i32: 0>} : vector<64x1xi32>
    %c8_i32 = arith.constant 8 : i32
    %c0_i32 = arith.constant 0 : i32
    %1 = arith.cmpi eq, %c8_i32, %c0_i32 : i32
    %c1_i32 = arith.constant 1 : i32
    %2 = arith.select %1, %c1_i32, %c8_i32 : i32
    %3 = vector.broadcast %2 : i32 to vector<64x1xi32>
    %4 = arith.remsi %0, %3 : vector<64x1xi32>
    %c0_i32_0 = arith.constant 0 : i32
    %5 = vector.broadcast %c0_i32_0 : i32 to vector<64x1xi32>
    %6 = arith.cmpi ne, %4, %5 : vector<64x1xi32>
    %c0_i32_1 = arith.constant 0 : i32
    %7 = vector.broadcast %c0_i32_1 : i32 to vector<64x1xi32>
    %8 = arith.cmpi slt, %4, %7 : vector<64x1xi32>
    %c0_i32_2 = arith.constant 0 : i32
    %9 = arith.cmpi slt, %2, %c0_i32_2 : i32
    %10 = vector.broadcast %9 : i1 to vector<64x1xi1>
    %11 = vector.broadcast %10 : vector<64x1xi1> to vector<64x1xi1>
    %12 = arith.xori %8, %11 : vector<64x1xi1>
    %13 = arith.andi %12, %6 : vector<64x1xi1>
    %14 = vector.broadcast %2 : i32 to vector<64x1xi32>
    %15 = arith.addi %4, %14 : vector<64x1xi32>
    %16 = arith.select %13, %15, %4 : vector<64x1xi1>, vector<64x1xi32>
    %c0_i32_3 = arith.constant 0 : i32
    %17 = vector.broadcast %c0_i32_3 : i32 to vector<64x1xi32>
    %18 = arith.cmpi ne, %16, %17 : vector<64x1xi32>
    %19 = vector.shape_cast %18 : vector<64x1xi1> to vector<64x1xi1>
    %20 = vector.broadcast %19 : vector<64x1xi1> to vector<64x128xi1>
    %c7_i32 = arith.constant 7 : i32
    %21 = vector.broadcast %c7_i32 : i32 to vector<64x1xi32>
    %22 = arith.cmpi ne, %16, %21 : vector<64x1xi32>
    %23 = vector.shape_cast %22 : vector<64x1xi1> to vector<64x1xi1>
    %24 = vector.broadcast %23 : vector<64x1xi1> to vector<64x128xi1>
    %c8_i32_4 = arith.constant 8 : i32
    %25 = vector.broadcast %c8_i32_4 : i32 to vector<64x1xi32>
    %26 = arith.cmpi sge, %0, %25 : vector<64x1xi32>
    %27 = vector.shape_cast %26 : vector<64x1xi1> to vector<64x1xi1>
    %28 = vector.broadcast %27 : vector<64x1xi1> to vector<64x384xi1>
    %c56_i32 = arith.constant 56 : i32
    %29 = vector.broadcast %c56_i32 : i32 to vector<64x1xi32>
    %30 = arith.cmpi slt, %0, %29 : vector<64x1xi32>
    %31 = vector.shape_cast %30 : vector<64x1xi1> to vector<64x1xi1>
    %32 = vector.broadcast %31 : vector<64x1xi1> to vector<64x384xi1>
    %cst = arith.constant 0.000000e+00 : f32
    %33 = vector.broadcast %cst : f32 to vector<64x128xf32>
    %cst_5 = arith.constant 0.000000e+00 : f32
    %34 = vector.broadcast %cst_5 : f32 to vector<64x384xf32>
    %c0 = arith.constant 0 : index
    %c0_6 = arith.constant 0 : index
    %c0_7 = arith.constant 0 : index
    %c0_8 = arith.constant 0 : index
    %35 = vector.load %arg2[%c0, %c0_6, %c0_7, %c0_8] : memref<1x1x64x128xbf16, #tpu.memory_space<vmem>>, vector<1x1x64x128xbf16>
    %36 = vector.shape_cast %35 : vector<1x1x64x128xbf16> to vector<64x128xbf16>
    %37 = arith.extf %36 : vector<64x128xbf16> to vector<64x128xf32>
    %38 = vector.extract_strided_slice %37 {offsets = [63, 0], sizes = [1, 128], strides = [1, 1]} : vector<64x128xf32> to vector<1x128xf32>
    %39 = vector.extract_strided_slice %37 {offsets = [0, 0], sizes = [63, 128], strides = [1, 1]} : vector<64x128xf32> to vector<63x128xf32>
    %40 = tpu.concatenate %38, %39 in 0 : vector<1x128xf32>, vector<63x128xf32> -> vector<64x128xf32>
    %41 = arith.select %20, %40, %33 : vector<64x128xi1>, vector<64x128xf32>
    %42 = vector.extract_strided_slice %37 {offsets = [1, 0], sizes = [63, 128], strides = [1, 1]} : vector<64x128xf32> to vector<63x128xf32>
    %43 = vector.extract_strided_slice %37 {offsets = [0, 0], sizes = [1, 128], strides = [1, 1]} : vector<64x128xf32> to vector<1x128xf32>
    %44 = tpu.concatenate %42, %43 in 0 : vector<63x128xf32>, vector<1x128xf32> -> vector<64x128xf32>
    %45 = arith.select %24, %44, %33 : vector<64x128xi1>, vector<64x128xf32>
    %46 = tpu.concatenate %41, %37, %45 in 1 : vector<64x128xf32>, vector<64x128xf32>, vector<64x128xf32> -> vector<64x384xf32>
    %47 = vector.extract_strided_slice %46 {offsets = [56, 0], sizes = [8, 384], strides = [1, 1]} : vector<64x384xf32> to vector<8x384xf32>
    %48 = vector.extract_strided_slice %46 {offsets = [0, 0], sizes = [56, 384], strides = [1, 1]} : vector<64x384xf32> to vector<56x384xf32>
    %49 = tpu.concatenate %47, %48 in 0 : vector<8x384xf32>, vector<56x384xf32> -> vector<64x384xf32>
    %50 = arith.select %28, %49, %34 : vector<64x384xi1>, vector<64x384xf32>
    %51 = vector.extract_strided_slice %46 {offsets = [8, 0], sizes = [56, 384], strides = [1, 1]} : vector<64x384xf32> to vector<56x384xf32>
    %52 = vector.extract_strided_slice %46 {offsets = [0, 0], sizes = [8, 384], strides = [1, 1]} : vector<64x384xf32> to vector<8x384xf32>
    %53 = tpu.concatenate %51, %52 in 0 : vector<56x384xf32>, vector<8x384xf32> -> vector<64x384xf32>
    %54 = arith.select %32, %53, %34 : vector<64x384xi1>, vector<64x384xf32>
    %55 = arith.truncf %50 : vector<64x384xf32> to vector<64x384xbf16>
    %c0_9 = arith.constant 0 : index
    %c0_10 = arith.constant 0 : index
    %56 = vector.load %arg9[%c0_9, %c0_10] : memref<384x1152xbf16, #tpu.memory_space<vmem>>, vector<64x384xbf16>
    tpu.vector_store %arg9[%c0_9, %c0_10], %55 {strides = array<i32>} : memref<384x1152xbf16, #tpu.memory_space<vmem>>, vector<64x384xbf16>,
    %57 = arith.truncf %46 : vector<64x384xf32> to vector<64x384xbf16>
    %c0_11 = arith.constant 0 : index
    %c384 = arith.constant 384 : index
    %58 = vector.load %arg9[%c0_11, %c384] : memref<384x1152xbf16, #tpu.memory_space<vmem>>, vector<64x384xbf16>
    tpu.vector_store %arg9[%c0_11, %c384], %57 {strides = array<i32>} : memref<384x1152xbf16, #tpu.memory_space<vmem>>, vector<64x384xbf16>,
    %59 = arith.truncf %54 : vector<64x384xf32> to vector<64x384xbf16>
    %c0_12 = arith.constant 0 : index
    %c768 = arith.constant 768 : index
    %60 = vector.load %arg9[%c0_12, %c768] : memref<384x1152xbf16, #tpu.memory_space<vmem>>, vector<64x384xbf16>
    tpu.vector_store %arg9[%c0_12, %c768], %59 {strides = array<i32>} : memref<384x1152xbf16, #tpu.memory_space<vmem>>, vector<64x384xbf16>,
    %c0_13 = arith.constant 0 : index
    %c0_14 = arith.constant 0 : index
    %c0_15 = arith.constant 0 : index
    %c0_16 = arith.constant 0 : index
    %61 = vector.load %arg3[%c0_13, %c0_14, %c0_15, %c0_16] : memref<1x4x64x128xbf16, #tpu.memory_space<vmem>>, vector<1x1x64x128xbf16>
    %62 = vector.shape_cast %61 : vector<1x1x64x128xbf16> to vector<64x128xbf16>
    %63 = arith.extf %62 : vector<64x128xbf16> to vector<64x128xf32>
    %64 = vector.extract_strided_slice %63 {offsets = [63, 0], sizes = [1, 128], strides = [1, 1]} : vector<64x128xf32> to vector<1x128xf32>
    %65 = vector.extract_strided_slice %63 {offsets = [0, 0], sizes = [63, 128], strides = [1, 1]} : vector<64x128xf32> to vector<63x128xf32>
    %66 = tpu.concatenate %64, %65 in 0 : vector<1x128xf32>, vector<63x128xf32> -> vector<64x128xf32>
    %67 = arith.select %20, %66, %33 : vector<64x128xi1>, vector<64x128xf32>
    %68 = vector.extract_strided_slice %63 {offsets = [1, 0], sizes = [63, 128], strides = [1, 1]} : vector<64x128xf32> to vector<63x128xf32>
    %69 = vector.extract_strided_slice %63 {offsets = [0, 0], sizes = [1, 128], strides = [1, 1]} : vector<64x128xf32> to vector<1x128xf32>
    %70 = tpu.concatenate %68, %69 in 0 : vector<63x128xf32>, vector<1x128xf32> -> vector<64x128xf32>
    %71 = arith.select %24, %70, %33 : vector<64x128xi1>, vector<64x128xf32>
    %72 = tpu.concatenate %67, %63, %71 in 1 : vector<64x128xf32>, vector<64x128xf32>, vector<64x128xf32> -> vector<64x384xf32>
    %73 = vector.extract_strided_slice %72 {offsets = [56, 0], sizes = [8, 384], strides = [1, 1]} : vector<64x384xf32> to vector<8x384xf32>
    %74 = vector.extract_strided_slice %72 {offsets = [0, 0], sizes = [56, 384], strides = [1, 1]} : vector<64x384xf32> to vector<56x384xf32>
    %75 = tpu.concatenate %73, %74 in 0 : vector<8x384xf32>, vector<56x384xf32> -> vector<64x384xf32>
    %76 = arith.select %28, %75, %34 : vector<64x384xi1>, vector<64x384xf32>
    %77 = vector.extract_strided_slice %72 {offsets = [8, 0], sizes = [56, 384], strides = [1, 1]} : vector<64x384xf32> to vector<56x384xf32>
    %78 = vector.extract_strided_slice %72 {offsets = [0, 0], sizes = [8, 384], strides = [1, 1]} : vector<64x384xf32> to vector<8x384xf32>
    %79 = tpu.concatenate %77, %78 in 0 : vector<56x384xf32>, vector<8x384xf32> -> vector<64x384xf32>
    %80 = arith.select %32, %79, %34 : vector<64x384xi1>, vector<64x384xf32>
    %81 = arith.truncf %76 : vector<64x384xf32> to vector<64x384xbf16>
    %c64 = arith.constant 64 : index
    %c0_17 = arith.constant 0 : index
    %82 = vector.load %arg9[%c64, %c0_17] : memref<384x1152xbf16, #tpu.memory_space<vmem>>, vector<64x384xbf16>
    tpu.vector_store %arg9[%c64, %c0_17], %81 {strides = array<i32>} : memref<384x1152xbf16, #tpu.memory_space<vmem>>, vector<64x384xbf16>,
    %83 = arith.truncf %72 : vector<64x384xf32> to vector<64x384xbf16>
    %c64_18 = arith.constant 64 : index
    %c384_19 = arith.constant 384 : index
    %84 = vector.load %arg9[%c64_18, %c384_19] : memref<384x1152xbf16, #tpu.memory_space<vmem>>, vector<64x384xbf16>
    tpu.vector_store %arg9[%c64_18, %c384_19], %83 {strides = array<i32>} : memref<384x1152xbf16, #tpu.memory_space<vmem>>, vector<64x384xbf16>,
    %85 = arith.truncf %80 : vector<64x384xf32> to vector<64x384xbf16>
    %c64_20 = arith.constant 64 : index
    %c768_21 = arith.constant 768 : index
    %86 = vector.load %arg9[%c64_20, %c768_21] : memref<384x1152xbf16, #tpu.memory_space<vmem>>, vector<64x384xbf16>
    tpu.vector_store %arg9[%c64_20, %c768_21], %85 {strides = array<i32>} : memref<384x1152xbf16, #tpu.memory_space<vmem>>, vector<64x384xbf16>,
    %c0_22 = arith.constant 0 : index
    %c1 = arith.constant 1 : index
    %c0_23 = arith.constant 0 : index
    %c0_24 = arith.constant 0 : index
    %87 = vector.load %arg3[%c0_22, %c1, %c0_23, %c0_24] : memref<1x4x64x128xbf16, #tpu.memory_space<vmem>>, vector<1x1x64x128xbf16>
    %88 = vector.shape_cast %87 : vector<1x1x64x128xbf16> to vector<64x128xbf16>
    %89 = arith.extf %88 : vector<64x128xbf16> to vector<64x128xf32>
    %90 = vector.extract_strided_slice %89 {offsets = [63, 0], sizes = [1, 128], strides = [1, 1]} : vector<64x128xf32> to vector<1x128xf32>
    %91 = vector.extract_strided_slice %89 {offsets = [0, 0], sizes = [63, 128], strides = [1, 1]} : vector<64x128xf32> to vector<63x128xf32>
    %92 = tpu.concatenate %90, %91 in 0 : vector<1x128xf32>, vector<63x128xf32> -> vector<64x128xf32>
    %93 = arith.select %20, %92, %33 : vector<64x128xi1>, vector<64x128xf32>
    %94 = vector.extract_strided_slice %89 {offsets = [1, 0], sizes = [63, 128], strides = [1, 1]} : vector<64x128xf32> to vector<63x128xf32>
    %95 = vector.extract_strided_slice %89 {offsets = [0, 0], sizes = [1, 128], strides = [1, 1]} : vector<64x128xf32> to vector<1x128xf32>
    %96 = tpu.concatenate %94, %95 in 0 : vector<63x128xf32>, vector<1x128xf32> -> vector<64x128xf32>
    %97 = arith.select %24, %96, %33 : vector<64x128xi1>, vector<64x128xf32>
    %98 = tpu.concatenate %93, %89, %97 in 1 : vector<64x128xf32>, vector<64x128xf32>, vector<64x128xf32> -> vector<64x384xf32>
    %99 = vector.extract_strided_slice %98 {offsets = [56, 0], sizes = [8, 384], strides = [1, 1]} : vector<64x384xf32> to vector<8x384xf32>
    %100 = vector.extract_strided_slice %98 {offsets = [0, 0], sizes = [56, 384], strides = [1, 1]} : vector<64x384xf32> to vector<56x384xf32>
    %101 = tpu.concatenate %99, %100 in 0 : vector<8x384xf32>, vector<56x384xf32> -> vector<64x384xf32>
    %102 = arith.select %28, %101, %34 : vector<64x384xi1>, vector<64x384xf32>
    %103 = vector.extract_strided_slice %98 {offsets = [8, 0], sizes = [56, 384], strides = [1, 1]} : vector<64x384xf32> to vector<56x384xf32>
    %104 = vector.extract_strided_slice %98 {offsets = [0, 0], sizes = [8, 384], strides = [1, 1]} : vector<64x384xf32> to vector<8x384xf32>
    %105 = tpu.concatenate %103, %104 in 0 : vector<56x384xf32>, vector<8x384xf32> -> vector<64x384xf32>
    %106 = arith.select %32, %105, %34 : vector<64x384xi1>, vector<64x384xf32>
    %107 = arith.truncf %102 : vector<64x384xf32> to vector<64x384xbf16>
    %c128 = arith.constant 128 : index
    %c0_25 = arith.constant 0 : index
    %108 = vector.load %arg9[%c128, %c0_25] : memref<384x1152xbf16, #tpu.memory_space<vmem>>, vector<64x384xbf16>
    tpu.vector_store %arg9[%c128, %c0_25], %107 {strides = array<i32>} : memref<384x1152xbf16, #tpu.memory_space<vmem>>, vector<64x384xbf16>,
    %109 = arith.truncf %98 : vector<64x384xf32> to vector<64x384xbf16>
    %c128_26 = arith.constant 128 : index
    %c384_27 = arith.constant 384 : index
    %110 = vector.load %arg9[%c128_26, %c384_27] : memref<384x1152xbf16, #tpu.memory_space<vmem>>, vector<64x384xbf16>
    tpu.vector_store %arg9[%c128_26, %c384_27], %109 {strides = array<i32>} : memref<384x1152xbf16, #tpu.memory_space<vmem>>, vector<64x384xbf16>,
    %111 = arith.truncf %106 : vector<64x384xf32> to vector<64x384xbf16>
    %c128_28 = arith.constant 128 : index
    %c768_29 = arith.constant 768 : index
    %112 = vector.load %arg9[%c128_28, %c768_29] : memref<384x1152xbf16, #tpu.memory_space<vmem>>, vector<64x384xbf16>
    tpu.vector_store %arg9[%c128_28, %c768_29], %111 {strides = array<i32>} : memref<384x1152xbf16, #tpu.memory_space<vmem>>, vector<64x384xbf16>,
    %c0_30 = arith.constant 0 : index
    %c2 = arith.constant 2 : index
    %c0_31 = arith.constant 0 : index
    %c0_32 = arith.constant 0 : index
    %113 = vector.load %arg3[%c0_30, %c2, %c0_31, %c0_32] : memref<1x4x64x128xbf16, #tpu.memory_space<vmem>>, vector<1x1x64x128xbf16>
    %114 = vector.shape_cast %113 : vector<1x1x64x128xbf16> to vector<64x128xbf16>
    %115 = arith.extf %114 : vector<64x128xbf16> to vector<64x128xf32>
    %116 = vector.extract_strided_slice %115 {offsets = [63, 0], sizes = [1, 128], strides = [1, 1]} : vector<64x128xf32> to vector<1x128xf32>
    %117 = vector.extract_strided_slice %115 {offsets = [0, 0], sizes = [63, 128], strides = [1, 1]} : vector<64x128xf32> to vector<63x128xf32>
    %118 = tpu.concatenate %116, %117 in 0 : vector<1x128xf32>, vector<63x128xf32> -> vector<64x128xf32>
    %119 = arith.select %20, %118, %33 : vector<64x128xi1>, vector<64x128xf32>
    %120 = vector.extract_strided_slice %115 {offsets = [1, 0], sizes = [63, 128], strides = [1, 1]} : vector<64x128xf32> to vector<63x128xf32>
    %121 = vector.extract_strided_slice %115 {offsets = [0, 0], sizes = [1, 128], strides = [1, 1]} : vector<64x128xf32> to vector<1x128xf32>
    %122 = tpu.concatenate %120, %121 in 0 : vector<63x128xf32>, vector<1x128xf32> -> vector<64x128xf32>
    %123 = arith.select %24, %122, %33 : vector<64x128xi1>, vector<64x128xf32>
    %124 = tpu.concatenate %119, %115, %123 in 1 : vector<64x128xf32>, vector<64x128xf32>, vector<64x128xf32> -> vector<64x384xf32>
    %125 = vector.extract_strided_slice %124 {offsets = [56, 0], sizes = [8, 384], strides = [1, 1]} : vector<64x384xf32> to vector<8x384xf32>
    %126 = vector.extract_strided_slice %124 {offsets = [0, 0], sizes = [56, 384], strides = [1, 1]} : vector<64x384xf32> to vector<56x384xf32>
    %127 = tpu.concatenate %125, %126 in 0 : vector<8x384xf32>, vector<56x384xf32> -> vector<64x384xf32>
    %128 = arith.select %28, %127, %34 : vector<64x384xi1>, vector<64x384xf32>
    %129 = vector.extract_strided_slice %124 {offsets = [8, 0], sizes = [56, 384], strides = [1, 1]} : vector<64x384xf32> to vector<56x384xf32>
    %130 = vector.extract_strided_slice %124 {offsets = [0, 0], sizes = [8, 384], strides = [1, 1]} : vector<64x384xf32> to vector<8x384xf32>
    %131 = tpu.concatenate %129, %130 in 0 : vector<56x384xf32>, vector<8x384xf32> -> vector<64x384xf32>
    %132 = arith.select %32, %131, %34 : vector<64x384xi1>, vector<64x384xf32>
    %133 = arith.truncf %128 : vector<64x384xf32> to vector<64x384xbf16>
    %c192 = arith.constant 192 : index
    %c0_33 = arith.constant 0 : index
    %134 = vector.load %arg9[%c192, %c0_33] : memref<384x1152xbf16, #tpu.memory_space<vmem>>, vector<64x384xbf16>
    tpu.vector_store %arg9[%c192, %c0_33], %133 {strides = array<i32>} : memref<384x1152xbf16, #tpu.memory_space<vmem>>, vector<64x384xbf16>,
    %135 = arith.truncf %124 : vector<64x384xf32> to vector<64x384xbf16>
    %c192_34 = arith.constant 192 : index
    %c384_35 = arith.constant 384 : index
    %136 = vector.load %arg9[%c192_34, %c384_35] : memref<384x1152xbf16, #tpu.memory_space<vmem>>, vector<64x384xbf16>
    tpu.vector_store %arg9[%c192_34, %c384_35], %135 {strides = array<i32>} : memref<384x1152xbf16, #tpu.memory_space<vmem>>, vector<64x384xbf16>,
    %137 = arith.truncf %132 : vector<64x384xf32> to vector<64x384xbf16>
    %c192_36 = arith.constant 192 : index
    %c768_37 = arith.constant 768 : index
    %138 = vector.load %arg9[%c192_36, %c768_37] : memref<384x1152xbf16, #tpu.memory_space<vmem>>, vector<64x384xbf16>
    tpu.vector_store %arg9[%c192_36, %c768_37], %137 {strides = array<i32>} : memref<384x1152xbf16, #tpu.memory_space<vmem>>, vector<64x384xbf16>,
    %c0_38 = arith.constant 0 : index
    %c3 = arith.constant 3 : index
    %c0_39 = arith.constant 0 : index
    %c0_40 = arith.constant 0 : index
    %139 = vector.load %arg3[%c0_38, %c3, %c0_39, %c0_40] : memref<1x4x64x128xbf16, #tpu.memory_space<vmem>>, vector<1x1x64x128xbf16>
    %140 = vector.shape_cast %139 : vector<1x1x64x128xbf16> to vector<64x128xbf16>
    %141 = arith.extf %140 : vector<64x128xbf16> to vector<64x128xf32>
    %142 = vector.extract_strided_slice %141 {offsets = [63, 0], sizes = [1, 128], strides = [1, 1]} : vector<64x128xf32> to vector<1x128xf32>
    %143 = vector.extract_strided_slice %141 {offsets = [0, 0], sizes = [63, 128], strides = [1, 1]} : vector<64x128xf32> to vector<63x128xf32>
    %144 = tpu.concatenate %142, %143 in 0 : vector<1x128xf32>, vector<63x128xf32> -> vector<64x128xf32>
    %145 = arith.select %20, %144, %33 : vector<64x128xi1>, vector<64x128xf32>
    %146 = vector.extract_strided_slice %141 {offsets = [1, 0], sizes = [63, 128], strides = [1, 1]} : vector<64x128xf32> to vector<63x128xf32>
    %147 = vector.extract_strided_slice %141 {offsets = [0, 0], sizes = [1, 128], strides = [1, 1]} : vector<64x128xf32> to vector<1x128xf32>
    %148 = tpu.concatenate %146, %147 in 0 : vector<63x128xf32>, vector<1x128xf32> -> vector<64x128xf32>
    %149 = arith.select %24, %148, %33 : vector<64x128xi1>, vector<64x128xf32>
    %150 = tpu.concatenate %145, %141, %149 in 1 : vector<64x128xf32>, vector<64x128xf32>, vector<64x128xf32> -> vector<64x384xf32>
    %151 = vector.extract_strided_slice %150 {offsets = [56, 0], sizes = [8, 384], strides = [1, 1]} : vector<64x384xf32> to vector<8x384xf32>
    %152 = vector.extract_strided_slice %150 {offsets = [0, 0], sizes = [56, 384], strides = [1, 1]} : vector<64x384xf32> to vector<56x384xf32>
    %153 = tpu.concatenate %151, %152 in 0 : vector<8x384xf32>, vector<56x384xf32> -> vector<64x384xf32>
    %154 = arith.select %28, %153, %34 : vector<64x384xi1>, vector<64x384xf32>
    %155 = vector.extract_strided_slice %150 {offsets = [8, 0], sizes = [56, 384], strides = [1, 1]} : vector<64x384xf32> to vector<56x384xf32>
    %156 = vector.extract_strided_slice %150 {offsets = [0, 0], sizes = [8, 384], strides = [1, 1]} : vector<64x384xf32> to vector<8x384xf32>
    %157 = tpu.concatenate %155, %156 in 0 : vector<56x384xf32>, vector<8x384xf32> -> vector<64x384xf32>
    %158 = arith.select %32, %157, %34 : vector<64x384xi1>, vector<64x384xf32>
    %159 = arith.truncf %154 : vector<64x384xf32> to vector<64x384xbf16>
    %c256 = arith.constant 256 : index
    %c0_41 = arith.constant 0 : index
    %160 = vector.load %arg9[%c256, %c0_41] : memref<384x1152xbf16, #tpu.memory_space<vmem>>, vector<64x384xbf16>
    tpu.vector_store %arg9[%c256, %c0_41], %159 {strides = array<i32>} : memref<384x1152xbf16, #tpu.memory_space<vmem>>, vector<64x384xbf16>,
    %161 = arith.truncf %150 : vector<64x384xf32> to vector<64x384xbf16>
    %c256_42 = arith.constant 256 : index
    %c384_43 = arith.constant 384 : index
    %162 = vector.load %arg9[%c256_42, %c384_43] : memref<384x1152xbf16, #tpu.memory_space<vmem>>, vector<64x384xbf16>
    tpu.vector_store %arg9[%c256_42, %c384_43], %161 {strides = array<i32>} : memref<384x1152xbf16, #tpu.memory_space<vmem>>, vector<64x384xbf16>,
    %163 = arith.truncf %158 : vector<64x384xf32> to vector<64x384xbf16>
    %c256_44 = arith.constant 256 : index
    %c768_45 = arith.constant 768 : index
    %164 = vector.load %arg9[%c256_44, %c768_45] : memref<384x1152xbf16, #tpu.memory_space<vmem>>, vector<64x384xbf16>
    tpu.vector_store %arg9[%c256_44, %c768_45], %163 {strides = array<i32>} : memref<384x1152xbf16, #tpu.memory_space<vmem>>, vector<64x384xbf16>,
    %c0_46 = arith.constant 0 : index
    %c0_47 = arith.constant 0 : index
    %c0_48 = arith.constant 0 : index
    %c0_49 = arith.constant 0 : index
    %165 = vector.load %arg4[%c0_46, %c0_47, %c0_48, %c0_49] : memref<1x1x64x128xbf16, #tpu.memory_space<vmem>>, vector<1x1x64x128xbf16>
    %166 = vector.shape_cast %165 : vector<1x1x64x128xbf16> to vector<64x128xbf16>
    %167 = arith.extf %166 : vector<64x128xbf16> to vector<64x128xf32>
    %168 = vector.extract_strided_slice %167 {offsets = [63, 0], sizes = [1, 128], strides = [1, 1]} : vector<64x128xf32> to vector<1x128xf32>
    %169 = vector.extract_strided_slice %167 {offsets = [0, 0], sizes = [63, 128], strides = [1, 1]} : vector<64x128xf32> to vector<63x128xf32>
    %170 = tpu.concatenate %168, %169 in 0 : vector<1x128xf32>, vector<63x128xf32> -> vector<64x128xf32>
    %171 = arith.select %20, %170, %33 : vector<64x128xi1>, vector<64x128xf32>
    %172 = vector.extract_strided_slice %167 {offsets = [1, 0], sizes = [63, 128], strides = [1, 1]} : vector<64x128xf32> to vector<63x128xf32>
    %173 = vector.extract_strided_slice %167 {offsets = [0, 0], sizes = [1, 128], strides = [1, 1]} : vector<64x128xf32> to vector<1x128xf32>
    %174 = tpu.concatenate %172, %173 in 0 : vector<63x128xf32>, vector<1x128xf32> -> vector<64x128xf32>
    %175 = arith.select %24, %174, %33 : vector<64x128xi1>, vector<64x128xf32>
    %176 = tpu.concatenate %171, %167, %175 in 1 : vector<64x128xf32>, vector<64x128xf32>, vector<64x128xf32> -> vector<64x384xf32>
    %177 = vector.extract_strided_slice %176 {offsets = [56, 0], sizes = [8, 384], strides = [1, 1]} : vector<64x384xf32> to vector<8x384xf32>
    %178 = vector.extract_strided_slice %176 {offsets = [0, 0], sizes = [56, 384], strides = [1, 1]} : vector<64x384xf32> to vector<56x384xf32>
    %179 = tpu.concatenate %177, %178 in 0 : vector<8x384xf32>, vector<56x384xf32> -> vector<64x384xf32>
    %180 = arith.select %28, %179, %34 : vector<64x384xi1>, vector<64x384xf32>
    %181 = vector.extract_strided_slice %176 {offsets = [8, 0], sizes = [56, 384], strides = [1, 1]} : vector<64x384xf32> to vector<56x384xf32>
    %182 = vector.extract_strided_slice %176 {offsets = [0, 0], sizes = [8, 384], strides = [1, 1]} : vector<64x384xf32> to vector<8x384xf32>
    %183 = tpu.concatenate %181, %182 in 0 : vector<56x384xf32>, vector<8x384xf32> -> vector<64x384xf32>
    %184 = arith.select %32, %183, %34 : vector<64x384xi1>, vector<64x384xf32>
    %185 = arith.truncf %180 : vector<64x384xf32> to vector<64x384xbf16>
    %c320 = arith.constant 320 : index
    %c0_50 = arith.constant 0 : index
    %186 = vector.load %arg9[%c320, %c0_50] : memref<384x1152xbf16, #tpu.memory_space<vmem>>, vector<64x384xbf16>
    tpu.vector_store %arg9[%c320, %c0_50], %185 {strides = array<i32>} : memref<384x1152xbf16, #tpu.memory_space<vmem>>, vector<64x384xbf16>,
    %187 = arith.truncf %176 : vector<64x384xf32> to vector<64x384xbf16>
    %c320_51 = arith.constant 320 : index
    %c384_52 = arith.constant 384 : index
    %188 = vector.load %arg9[%c320_51, %c384_52] : memref<384x1152xbf16, #tpu.memory_space<vmem>>, vector<64x384xbf16>
    tpu.vector_store %arg9[%c320_51, %c384_52], %187 {strides = array<i32>} : memref<384x1152xbf16, #tpu.memory_space<vmem>>, vector<64x384xbf16>,
    %189 = arith.truncf %184 : vector<64x384xf32> to vector<64x384xbf16>
    %c320_53 = arith.constant 320 : index
    %c768_54 = arith.constant 768 : index
    %190 = vector.load %arg9[%c320_53, %c768_54] : memref<384x1152xbf16, #tpu.memory_space<vmem>>, vector<64x384xbf16>
    tpu.vector_store %arg9[%c320_53, %c768_54], %189 {strides = array<i32>} : memref<384x1152xbf16, #tpu.memory_space<vmem>>, vector<64x384xbf16>,
    %cst_55 = arith.constant 0.000000e+00 : f32
    %191 = vector.broadcast %cst_55 : f32 to vector<256x128xf32>
    %c0_56 = arith.constant 0 : index
    %c0_57 = arith.constant 0 : index
    %192 = vector.load %arg9[%c0_56, %c0_57] : memref<384x1152xbf16, #tpu.memory_space<vmem>>, vector<256x1152xbf16>
    %c0_58 = arith.constant 0 : index
    %c0_59 = arith.constant 0 : index
    %c0_60 = arith.constant 0 : index
    %193 = vector.load %arg5[%c0_58, %c0_59, %c0_60] : memref<3x1152x128xbf16, #tpu.memory_space<vmem>>, vector<1x1152x128xbf16>
    %194 = vector.shape_cast %193 : vector<1x1152x128xbf16> to vector<1152x128xbf16>
    %cst_61 = arith.constant dense<0.000000e+00> : vector<256x128xf32>
    %195 = tpu.matmul %192, %194, %cst_61 {dimension_numbers = #tpu.dot_dimension_numbers<[1], [0], [0], [1], [0, 0, 1, 1], [], []>} : vector<256x1152xbf16>, vector<1152x128xbf16>, vector<256x128xf32> -> vector<256x128xf32>
    %196 = arith.addf %191, %195 : vector<256x128xf32>
    %c64_62 = arith.constant 64 : index
    %c0_63 = arith.constant 0 : index
    %197 = vector.load %arg9[%c64_62, %c0_63] : memref<384x1152xbf16, #tpu.memory_space<vmem>>, vector<256x1152xbf16>
    %c1_64 = arith.constant 1 : index
    %c0_65 = arith.constant 0 : index
    %c0_66 = arith.constant 0 : index
    %198 = vector.load %arg5[%c1_64, %c0_65, %c0_66] : memref<3x1152x128xbf16, #tpu.memory_space<vmem>>, vector<1x1152x128xbf16>
    %199 = vector.shape_cast %198 : vector<1x1152x128xbf16> to vector<1152x128xbf16>
    %cst_67 = arith.constant dense<0.000000e+00> : vector<256x128xf32>
    %200 = tpu.matmul %197, %199, %cst_67 {dimension_numbers = #tpu.dot_dimension_numbers<[1], [0], [0], [1], [0, 0, 1, 1], [], []>} : vector<256x1152xbf16>, vector<1152x128xbf16>, vector<256x128xf32> -> vector<256x128xf32>
    %201 = arith.addf %196, %200 : vector<256x128xf32>
    %c128_68 = arith.constant 128 : index
    %c0_69 = arith.constant 0 : index
    %202 = vector.load %arg9[%c128_68, %c0_69] : memref<384x1152xbf16, #tpu.memory_space<vmem>>, vector<256x1152xbf16>
    %c2_70 = arith.constant 2 : index
    %c0_71 = arith.constant 0 : index
    %c0_72 = arith.constant 0 : index
    %203 = vector.load %arg5[%c2_70, %c0_71, %c0_72] : memref<3x1152x128xbf16, #tpu.memory_space<vmem>>, vector<1x1152x128xbf16>
    %204 = vector.shape_cast %203 : vector<1x1152x128xbf16> to vector<1152x128xbf16>
    %cst_73 = arith.constant dense<0.000000e+00> : vector<256x128xf32>
    %205 = tpu.matmul %202, %204, %cst_73 {dimension_numbers = #tpu.dot_dimension_numbers<[1], [0], [0], [1], [0, 0, 1, 1], [], []>} : vector<256x1152xbf16>, vector<1152x128xbf16>, vector<256x128xf32> -> vector<256x128xf32>
    %206 = arith.addf %201, %205 : vector<256x128xf32>
    %c0_74 = arith.constant 0 : index
    %c0_75 = arith.constant 0 : index
    %207 = vector.load %arg6[%c0_74, %c0_75] : memref<1x128xf32, #tpu.memory_space<vmem>>, vector<1x128xf32>
    %208 = vector.broadcast %207 : vector<1x128xf32> to vector<256x128xf32>
    %209 = arith.mulf %206, %208 : vector<256x128xf32>
    %c0_76 = arith.constant 0 : index
    %c0_77 = arith.constant 0 : index
    %210 = vector.load %arg7[%c0_76, %c0_77] : memref<1x128xf32, #tpu.memory_space<vmem>>, vector<1x128xf32>
    %211 = vector.broadcast %210 : vector<1x128xf32> to vector<256x128xf32>
    %212 = arith.addf %209, %211 : vector<256x128xf32>
    %cst_78 = arith.constant 5.000000e-01 : f32
    %213 = vector.broadcast %cst_78 : f32 to vector<256x128xf32>
    %214 = arith.mulf %213, %212 : vector<256x128xf32>
    %cst_79 = arith.constant 0.707106769 : f32
    %215 = vector.broadcast %cst_79 : f32 to vector<256x128xf32>
    %216 = arith.mulf %212, %215 : vector<256x128xf32>
    %217 = math.erf %216 : vector<256x128xf32>
    %cst_80 = arith.constant 1.000000e+00 : f32
    %218 = vector.broadcast %cst_80 : f32 to vector<256x128xf32>
    %219 = arith.addf %218, %217 : vector<256x128xf32>
    %220 = arith.mulf %214, %219 : vector<256x128xf32>
    %c0_81 = arith.constant 0 : index
    %c0_82 = arith.constant 0 : index
    %c0_83 = arith.constant 0 : index
    %c0_84 = arith.constant 0 : index
    %221 = vector.load %arg8[%c0_81, %c0_82, %c0_83, %c0_84] : memref<1x1x256x128xf32, #tpu.memory_space<vmem>>, vector<1x1x256x128xf32>
    %222 = vector.shape_cast %221 : vector<1x1x256x128xf32> to vector<256x128xf32>
    %223 = vector.shape_cast %220 : vector<256x128xf32> to vector<1x1x256x128xf32>
    tpu.vector_store %arg8[%c0_81, %c0_82, %c0_83, %c0_84], %223 {strides = array<i32>} : memref<1x1x256x128xf32, #tpu.memory_space<vmem>>, vector<1x1x256x128xf32>,
    return
  }
  func.func @transform_0(%arg0: i32, %arg1: i32) -> (i32, i32, i32, i32) {
    %c0_i32 = arith.constant 0 : i32
    %c0_i32_0 = arith.constant 0 : i32
    %c0_i32_1 = arith.constant 0 : i32
    return %arg0, %arg1, %c0_i32, %c0_i32_0 : i32, i32, i32, i32
  }
  func.func @transform_1(%arg0: i32, %arg1: i32) -> (i32, i32, i32, i32) {
    %c0_i32 = arith.constant 0 : i32
    %c0_i32_0 = arith.constant 0 : i32
    %c0_i32_1 = arith.constant 0 : i32
    return %arg0, %arg1, %c0_i32, %c0_i32_0 : i32, i32, i32, i32
  }
  func.func @transform_2(%arg0: i32, %arg1: i32) -> (i32, i32, i32, i32) {
    %c0_i32 = arith.constant 0 : i32
    %c0_i32_0 = arith.constant 0 : i32
    %c0_i32_1 = arith.constant 0 : i32
    return %arg0, %arg1, %c0_i32, %c0_i32_0 : i32, i32, i32, i32
  }
  func.func @transform_3(%arg0: i32, %arg1: i32) -> (i32, i32, i32) {
    %c0_i32 = arith.constant 0 : i32
    %c0_i32_0 = arith.constant 0 : i32
    %c0_i32_1 = arith.constant 0 : i32
    %c0_i32_2 = arith.constant 0 : i32
    return %c0_i32, %c0_i32_0, %c0_i32_1 : i32, i32, i32
  }
  func.func @transform_4(%arg0: i32, %arg1: i32) -> (i32, i32) {
    %c0_i32 = arith.constant 0 : i32
    %c0_i32_0 = arith.constant 0 : i32
    %c0_i32_1 = arith.constant 0 : i32
    return %c0_i32, %c0_i32_0 : i32, i32
  }
  func.func @transform_5(%arg0: i32, %arg1: i32) -> (i32, i32) {
    %c0_i32 = arith.constant 0 : i32
    %c0_i32_0 = arith.constant 0 : i32
    %c0_i32_1 = arith.constant 0 : i32
    return %c0_i32, %c0_i32_0 : i32, i32
  }
  func.func @transform_6(%arg0: i32, %arg1: i32) -> (i32, i32, i32, i32) {
    %c0_i32 = arith.constant 0 : i32
    %c0_i32_0 = arith.constant 0 : i32
    %c0_i32_1 = arith.constant 0 : i32
    return %arg0, %arg1, %c0_i32, %c0_i32_0 : i32, i32, i32, i32
  }
}

</mosaic_0001>

<bundles_post_ra>
// kernel: tpu_custom_call.1
= control target key start
LH: loop header
LB: loop body
LE: loop exit
PB: predicated region body
PF: predicated region fallthrough
CT: control target
= control target key end

     0   :  { %6 = vsyncpa [#allocation3], 0  ;;  %s119_s0 = inlined_call_operand.hbm [shape: f32[16,128], index: 0, kind: input, shape index: {}]   ;;  %s120_s1 = inlined_call_operand.hbm [shape: f32[16,128], index: 1, kind: output, shape index: {}]  }
   0x1   :  { %7 = vsyncpa [#allocation4], 0  ;;  %s99_s6 = smov [#allocation2]  }
   0x2   :  { %s13_s7 = sshll.u32 %s99_s6, 4  ;;  %s14_s7 = int_to_ptr.vmem [resolvable:$true] %s13_s7 }
   0x3   :  { %s63_s8 = scalar_lea.vmem %s14_s7, 256  ;;  %p68_p1 = scmp.lt.s32.totalorder %s14_s7, %s14_s7 }
   0x4   :  { %p64_p0 = scmp.ne.s32.totalorder %s14_s7, %s63_s8  ;;  %p69_p2 = scmp.lt.s32.totalorder %s63_s8, %s63_s8 }
   0x6   :  { %p70_p3 = por %p69_p2, %p68_p1 }
   0x8   :  { %p71_p4 = pnand %p70_p3, %p64_p0 }
   0xa   :  { %74 = shalt.err (!%p71_p4)
}
   0xb   :  { %s100_s9 = smov 128   ;;  %s101_s10 = smov 8  }
   0xc   :  { %19 = dma.hbm_to_vmem [thread:$0]  %s119_s0, 256, %s14_s7, [#allocation3], %s100_s9, %s100_s9, %s101_s10  }
   0xd   :  { %95 = dma.done.wait [#allocation3], 256  }
   0xe   :  { %96 = vsyncadd [#allocation3], 4294967040  ;;  %v27_v0 = vlaneseq  ;;  %s102_s13 = smov [#allocation5]   ;;  %v23_v2 = vld [vmem:[#allocation2] sm:$0xff]  ;;  %v24_v3 = vld [vmem:[#allocation2 + $0x8] sm:$0xff] }
   0xf   :  { %s39_s14 = sshll.u32 %s102_s13, 4  ;;  %v25_v4 = vrot.slane %v23_v2, 7  ;;  %v26_v5 = vrot.slane %v24_v3, 7  ;;  %s40_s14 = int_to_ptr.vmem [resolvable:$true] %s39_s14 }
  0x10   :  { %v28_v1 = vshrl.u32 %v27_v0, 7  ;;  %s75_s15 = scalar_lea.vmem %s40_s14, 256  ;;  %p80_p6 = scmp.lt.s32.totalorder %s40_s14, %s40_s14 }
  0x11   :  { %p76_p5 = scmp.ne.s32.totalorder %s40_s14, %s75_s15  ;;  %p81_p7 = scmp.lt.s32.totalorder %s75_s15, %s75_s15 }
  0x12   :  { %vm29_vm0 = vcmp.lt.s32.totalorder %v28_v1, 1 }
  0x13   :  { %v31_v6 = vsel %vm29_vm0, %v26_v5, %v25_v4  ;;  %v30_v7 = vsel %vm29_vm0, %v25_v4, %v26_v5  ;;  %p82_p8 = por %p81_p7, %p80_p6 }
  0x14   :  { %32 = vst [vmem:[#allocation5] sm:$0xff] %v31_v6  ;;  %33 = vst [vmem:[#allocation5 + $0x8] sm:$0xff] %v30_v7 }
  0x15   :  { %p83_p9 = pnand %p82_p8, %p76_p5 }
  0x17   :  { %86 = shalt.err (!%p83_p9)
}
  0x18   :  { %45 = dma.vmem_to_hbm [thread:$0]  %s40_s14, 256, %s120_s1, [#allocation4], %s100_s9, %s100_s9, %s101_s10  }
  0x19   :  { %97 = dma.done.wait [#allocation4], 256  }
  0x1a   :  { %98 = vsyncadd [#allocation4], 4294967040 }
  0x1b   :  { %49 = vsyncpa [#allocation3], 1 }
  0x1c   :  { %50 = vsyncpa [#allocation4], 1 }

// kernel: tpu_custom_call.1
= control target key start
LH: loop header
LB: loop body
LE: loop exit
PB: predicated region body
PF: predicated region fallthrough
CT: control target
= control target key end

     0   :  { %s17017_s0 = inlined_call_operand.hbm [shape: bf16[2,1,64,128], index: 0, kind: input, shape index: {}]   ;;  %s17018_s1 = inlined_call_operand.hbm [shape: bf16[2,4,64,128], index: 1, kind: input, shape index: {}]   ;;  %s17019_s2 = inlined_call_operand.hbm [shape: bf16[2,1,64,128], index: 2, kind: input, shape index: {}]   ;;  %s17020_s3 = inlined_call_operand.hbm [shape: bf16[3,1152,128], index: 3, kind: input, shape index: {}]   ;;  %s17021_s4 = inlined_call_operand.vmem [shape: f32[1,128], index: 4, kind: input, shape index: {}]   ;;  %s17022_s5 = inlined_call_operand.vmem [shape: f32[1,128], index: 5, kind: input, shape index: {}]   ;;  %s17023_s6 = inlined_call_operand.hbm [shape: f32[2,1,256,128], index: 6, kind: output, shape index: {}]  }
   0x1   :  { %17193 = sst [smem:[#allocation79_spill]] %s17017_s0 }
   0x2   :  { %17194 = sst [smem:[#allocation80_spill]] %s17018_s1 }
   0x3   :  { %17195 = sst [smem:[#allocation81_spill]] %s17020_s3 }
   0x4   :  { %11 = vsyncpa [#allocation4], 0 }
   0x5   :  { %13 = vsyncpa [#allocation4 + $0x1], 0 }
   0x6   :  { %14 = vsyncpa [#allocation7], 0 }
   0x7   :  { %16 = vsyncpa [#allocation7 + $0x1], 0 }
   0x8   :  { %17 = vsyncpa [#allocation10], 0 }
   0x9   :  { %18 = vsyncpa [#allocation5], 0 }
   0xa   :  { %20 = vsyncpa [#allocation5 + $0x1], 0  ;;  %s13733_s21 = smov 0   ;;  %s13735_s22 = smov 0  }
   0xb   :  { %s13737_s23 = smov 0   ;;  %s13739_s24 = smov 0  }
   0xc   :  { %s13741_s25 = smov 0   ;;  %s13743_s26 = smov 0  }
   0xd LB: > { %17196 = sst [smem:[#allocation16_spill]] %s13674_s23  ;;  %s38_s27 = sadd.s32 1, %s13682_s25  ;;  %s13686_s26 = sphi %s13743_s26, %s26_s26   ;;  %s13682_s25 = sphi %s13741_s25, %s17683_s25   ;;  %s13678_s24 = sphi %s13739_s24, %s17682_s24   ;;  %s13674_s23 = sphi %s13737_s23, %s17678_s23   ;;  %s13670_s22 = sphi %s13735_s22, %s17681_s22   ;;  %s13666_s21 = sphi %s13733_s21, %s17680_s21  }
   0xe   : > { %17197 = sst [smem:[#allocation17_spill]] %s13686_s26  ;;  %s47_s28 = sadd.s32 1, %s13674_s23 }
   0xf   : > { %p40_p0 = scmp.ge.s32.totalorder %s38_s27, 2  ;;  %p54_p1 = scmp.ne.s32.totalorder %s13674_s23, %s13670_s22 }
  0x10   : > { %p55_p2 = scmp.eq.s32.totalorder %s13686_s26, 0  ;;  %p12556_p6 = scmp.lt.s32.totalorder %s13686_s26, 2 }
  0x11   : > { %s17685_s27 = smov (%p40_p0, %s38_s27), 0  ;;  %s13778_s30 = sand.u32 1, %s13674_s23  }
  0x12   : > { %17198 = sst [smem:[#allocation18_spill]] %s17685_s27  ;;  %p56_p3 = por %p55_p2, %p54_p1 }
  0x13   : > { %s42_s29 = ssub.s32 %s13682_s25, %s17685_s27  ;;  %s273_s7 = sand.u32 1, %s13686_s26  }
  0x14   : > { %p45_p5 = scmp.eq.s32.totalorder %s42_s29, 0  ;;  %p13784_p7 = pnand %p12556_p6, %p56_p3 }
  0x15   : > { %s9786_s10 = sshll.u32 %s13778_s30, 7  ;;  %s10718_s11 = sshll.u32 %s13682_s25, 11 }
  0x16   : > { %s13782_s8 = scalar_select %p45_p5, %s13674_s23, %s47_s28  }
  0x17   : > { %s17201_s1 = sld [smem:[#allocation80_spill]]  ;;  %s277_s15 = scalar_lea.vmem [#allocation6], %s9786_s10 }
  0x18   : > { %17199 = sst [smem:[#allocation19_spill]] %s13782_s8  ;;  %s287_s16 = sshll.u32 %s277_s15, 4  ;;  %s288_s16 = int_to_ptr.vmem [resolvable:$true] %s287_s16 }
  0x19   : > { %s13793_s17 = scalar_lea.sflag [#allocation7], %s273_s7  ;;  %p17030_p8 = pneg %p13784_p7 }
  0x1a   : > { %s13501_s18 = scalar_lea.vmem %s288_s16, 2048  ;;  %s13688_s19 = smov [#allocation6]  }
  0x1b   : > { %p13502_p9 = scmp.ne.s32.totalorder %s288_s16, %s13501_s18  ;;  %s13506_s20 = sshll.u32 %s13688_s19, 4  ;;  %s13507_s20 = int_to_ptr.vmem [resolvable:$false] %s13506_s20 }
  0x1c   : > { %s13508_s28 = scalar_lea.vmem %s13507_s20, 4096  ;;  %p13509_p12 = scmp.lt.s32.totalorder %s288_s16, %s13507_s20 }
  0x1d   : > { %s286_s14 = scalar_lea.hbm %s17201_s1, %s10718_s11  ;;  %p13504_p10 = pnand %p13502_p9, %p17030_p8 }
  0x1e   : > { %p13510_p13 = scmp.lt.s32.totalorder %s13508_s28, %s13501_s18 }
  0x1f   : > { %p13505_p11 = pneg %p13504_p10 }
  0x20   : > { %p13511_p0 = por %p13510_p13, %p13509_p12 }
  0x22   : > { %p13512_p2 = pnand %p13511_p0, %p13505_p11 }
  0x24   : > { %13515 = shalt.err (!%p13512_p2)
}
  0x25   : > { %s17024_s29 = smov 64   ;;  %s17026_s7 = smov 4  }
  0x26   : > { %12547 = dma.hbm_to_vmem [thread:$0]  (!%p13784_p7), %s286_s14, 2048, %s288_s16, %s13793_s17, %s17024_s29, %s17024_s29, %s17026_s7  }
  0x27   : > { %s13807_s10 = sadd.s32 4294967295, %s13686_s26   ;;  %s9779_s11 = sadd.s32 4294967294, %s13686_s26  }
  0x28   : > { %p60_p3 = scmp.ne.s32.totalorder %s13670_s22, %s13666_s21  ;;  %p17029_p5 = scmp.eq.s32.totalorder %s13807_s10, 0 }
  0x29   : > { %p205_p6 = scmp.eq.s32.totalorder %s13807_s10, 1  ;;  %p211_p9 = scmp.eq.s32.totalorder %s9779_s11, 1 }
  0x2a   : > { %p9780_p10 = scmp.ge.s32.totalorder %s13686_s26, 1  ;;  %p13817_p11 = por %p17029_p5, %p60_p3 }
  0x2b   : > { %p13824_p12 = por %p205_p6, %p54_p1  ;;  %p13828_p13 = por %p211_p9, %p60_p3 }
  0x2c   : > { %p218_p0 = scmp.lt.s32.totalorder %s13686_s26, 3  ;;  %s13691_s16 = smov [#allocation9]  }
  0x2d   : > { %s17204_s14 = scalar_select %p13828_p13, 1, 0 }
  0x2e   : > { %p13833_p2 = pnand %p9780_p10, %p218_p0  ;;  %s230_s18 = sshll.u32 %s13691_s16, 4  ;;  %s231_s18 = int_to_ptr.vmem [resolvable:$true] %s230_s18 }
  0x2f   : > { %17205 = sst [smem:[#allocation20_spill]] %s17204_s14  ;;  %s17031_s19 = sshll.u32 %s13778_s30, 5 }
  0x30   : > { %p12537_p4 = pneg %p13833_p2  ;;  %s17032_s20 = sshll.u32 %s13682_s25, 9 }
  0x31   : > { %s17208_s0 = sld [smem:[#allocation79_spill]]  ;;  %s254_s1 = scalar_lea.vmem [#allocation3], %s17031_s19 }
  0x32   : > { %p13843_p1 = pnand %p12537_p4, %p17029_p5  ;;  %s263_s16 = sshll.u32 %s254_s1, 4  ;;  %s13856_s16 = int_to_ptr.vmem [resolvable:$true] %s263_s16 }
  0x33   : > { %s13527_s27 = scalar_lea.vmem %s231_s18, 27648  ;;  %p13535_p10 = scmp.lt.s32.totalorder %s231_s18, %s231_s18 }
  0x34   : > { %p13518_p3 = pneg %p13843_p1  ;;  %p13528_p6 = scmp.ne.s32.totalorder %s231_s18, %s13527_s27 }
  0x35   : > { %p13536_p0 = scmp.lt.s32.totalorder %s13527_s27, %s13527_s27 }
  0x36   : > { %p13530_p4 = pnand %p13528_p6, %p13518_p3 }
  0x37   : > { %s13852_s7 = scalar_lea.hbm %s17208_s0, %s17032_s20  ;;  %p13537_p5 = por %p13536_p0, %p13535_p10 }
  0x38   : > { %p13531_p9 = pneg %p13530_p4 }
  0x3a   : > { %p13538_p8 = pnand %p13537_p5, %p13531_p9 }
  0x3c   : > { %13541 = shalt.err (!%p13538_p8)
}
  0x3d   : > { %s17209_s29 = smov 4   ;;  %s17210_s11 = smov 64  }
  0x3e   : > { %s17211_s3 = sld [smem:[#allocation81_spill]]  ;;  %s251_s20 = scalar_lea.sflag [#allocation4], %s13778_s30 }
  0x3f   : > { %s13555_s0 = scalar_lea.vmem %s13856_s16, 512  ;;  %p17212_p5 = pneg %p13784_p7 }
  0x40   : > { %p13556_p3 = scmp.ne.s32.totalorder %s13856_s16, %s13555_s0  ;;  %s13692_s27 = smov [#allocation3]  }
  0x41   : > { %s13560_s28 = sshll.u32 %s13692_s27, 4  ;;  %s13561_s28 = int_to_ptr.vmem [resolvable:$false] %s13560_s28 }
  0x42   : > { %p13558_p8 = pnand %p13556_p3, %p17212_p5  ;;  %s13562_s8 = scalar_lea.vmem %s13561_s28, 1024 }
  0x43   : > { %p13563_p4 = scmp.lt.s32.totalorder %s13856_s16, %s13561_s28  ;;  %p13564_p9 = scmp.lt.s32.totalorder %s13562_s8, %s13555_s0 }
  0x44   : > { %12540 = dma.hbm_to_vmem [thread:$0]  (!%p13843_p1), %s17211_s3, 27648, %s231_s18, [#allocation10], %s17210_s11, %s17210_s11, %s17209_s29  }
  0x45   : > { %p13559_p6 = pneg %p13558_p8  ;;  %p13565_p10 = por %p13564_p9, %p13563_p4 }
  0x47   : > { %p13566_p0 = pnand %p13565_p10, %p13559_p6 }
  0x49   : > { %13569 = shalt.err (!%p13566_p0)
}
  0x4a   : > { %12544 = dma.hbm_to_vmem [thread:$0]  (!%p13784_p7), %s13852_s7, 512, %s13856_s16, %s251_s20, %s17210_s11, %s17210_s11, %s17209_s29  }
  0x4b   : > { %s17213_s18 = sshll.u32 %s13682_s25, 9  ;;  %s17214_s0 = sshll.u32 %s13778_s30, 5 }
  0x4c   : > { %s309_s27 = scalar_lea.hbm %s17019_s2, %s17213_s18  ;;  %s301_s8 = scalar_lea.vmem [#allocation8], %s17214_s0 }
  0x4d   : > { %s310_s28 = sshll.u32 %s301_s8, 4  ;;  %p17215_p3 = pmov %p17212_p5  ;;  %s311_s28 = int_to_ptr.vmem [resolvable:$true] %s310_s28 }
  0x4e   : > { %s13583_s3 = scalar_lea.vmem %s311_s28, 512  ;;  %s13693_s23 = smov [#allocation8]  }
  0x4f   : > { %p13584_p1 = scmp.ne.s32.totalorder %s311_s28, %s13583_s3  ;;  %s13588_s26 = sshll.u32 %s13693_s23, 4  ;;  %s13589_s26 = int_to_ptr.vmem [resolvable:$false] %s13588_s26 }
  0x50   : > { %s13590_s14 = scalar_lea.vmem %s13589_s26, 1024  ;;  %p13591_p6 = scmp.lt.s32.totalorder %s311_s28, %s13589_s26 }
  0x51   : > { %p13586_p5 = pnand %p13584_p1, %p17215_p3  ;;  %p13592_p4 = scmp.lt.s32.totalorder %s13590_s14, %s13583_s3 }
  0x53   : > { %p13587_p8 = pneg %p13586_p5  ;;  %p13593_p9 = por %p13592_p4, %p13591_p6 }
  0x55   : > { %p13594_p10 = pnand %p13593_p9, %p13587_p8 }
  0x57   : > { %13597 = shalt.err (!%p13594_p10)
}
  0x58   : > { %12550 = dma.hbm_to_vmem [thread:$0]  (!%p13784_p7), %s309_s27, 512, %s311_s28, %s13793_s17, %s17210_s11, %s17210_s11, %s17209_s29  }
  0x59   : > { %322 = sbr.rel (%p13833_p2) target bundleno = 1274 (0x4fa), region = 44 }
  0x5e   : > { %s13901_s23 = sand.u32 1, %s13670_s22  }
  0x5f   : > { %s9793_s3 = sshll.u32 %s13901_s23, 5  ;;  %s325_s26 = scalar_lea.sflag [#allocation4], %s13901_s23 }
  0x60   : > { %s13905_s30 = scalar_lea.vmem [#allocation3], %s9793_s3 }
  0x61   : > { %13649 = dma.done.wait (%p13817_p11), %s325_s26, 512  }
  0x62   : > { %13651 = vsyncadd (%p13817_p11), %s325_s26, 4294966784  ;;  %s333_s9 = sand.u32 1, %s13807_s10   ;;  %s9794_s17 = sshll.u32 %s13901_s23, 7 }
  0x63   : > { %s334_s7 = scalar_lea.sflag [#allocation7], %s333_s9  ;;  %s13913_s14 = scalar_lea.vmem [#allocation6], %s9794_s17 }
  0x64   : > { %13653 = dma.done.wait (%p13817_p11), %s334_s7, 2560  }
  0x65   : > { %13655 = vsyncadd (%p13817_p11), %s334_s7, 4294964736  ;;  %s13919_s15 = scalar_lea.vmem [#allocation8], %s9793_s3  ;;  %p17216_p7 = scmp.eq.s32.totalorder %s13807_s10, 0 }
  0x67   : > { %13657 = dma.done.wait (%p17216_p7), [#allocation10], 27648   ;;  %p17217_p2 = pmov %p17216_p7 }
  0x68   : > { %v17041_v0 = vmov 0.0|0.0   ;;  %v391_v1 = vlaneseq  ;;  %v12613_v2 = vld [vmem:[#allocation9 + $0x2b8] sm:$0xff]   ;;  %v12615_v4 = vld [vmem:[#allocation9 + $0x2b0] sm:$0xff]   ;;  %v12617_v7 = vld [vmem:[#allocation9 + $0x2a8] sm:$0xff]   ;;  %vm17072_vm0 = vcmask 1040384   ;;  %v17219_v23 = vmov 0 }
  0x69   : > { %13659 = vsyncadd (%p17217_p2), [#allocation10], 4294939648  ;;  %1238 = vst [vmem:[#allocation2 + $0x120] sm:$0xff] %v17041_v0  ;;  %v12614_v3 = vld [vmem:[#allocation9 + $0x278] sm:$0xff]   ;;  %10949 = vmatprep.subr.bf16.mxu0 %v12613_v2  ;;  %12509 = vmatprep.subr.bf16.mxu1 %v12613_v2  ;;  %v12616_v6 = vld [vmem:[#allocation9 + $0x270] sm:$0xff]   ;;  %v17222_v25 = vmov 0 }
  0x6a   : > { %813 = vst [vmem:[#allocation2 + $0x8] sm:$0xf] %v17041_v0  ;;  %1019 = vst [vmem:[#allocation2 + $0x11c] sm:$0xf] %v17041_v0  ;;  %v13938_v5 = vshrl.u32 %v391_v1, 7  ;;  %10950 = vmatpush3.bf16.msra.mxu0 %v12614_v3  ;;  %12517 = vmatpush3.bf16.msra.mxu1 %v12614_v3  ;;  %v12618_v12 = vld [vmem:[#allocation9 + $0x268] sm:$0xff]  }
  0x6b   : > { %1239 = vst [vmem:[#allocation2 + $0x128] sm:$0xf] %v17041_v0  ;;  %1445 = vst [vmem:[#allocation2 + $0x23c] sm:$0xf] %v17041_v0  ;;  %10951 = vmatprep.subr.bf16.mxu0 %v12615_v4  ;;  %12510 = vmatprep.subr.bf16.mxu1 %v12615_v4  ;;  %v12619_v14 = vld [vmem:[#allocation9 + $0x2a0] sm:$0xff]   ;;  %v12621_v22 = vld [vmem:[#allocation9 + $0x298] sm:$0xff]  }
  0x6c   : > { %1666 = vst [vmem:[#allocation2 + $0x248] sm:$0xf] %v17041_v0  ;;  %1872 = vst [vmem:[#allocation2 + $0x35c] sm:$0xf] %v17041_v0  ;;  %v13941_v8 = vadd.s32 8, %v13938_v5  ;;  %v13944_v9 = vadd.s32 16, %v13938_v5 }
  0x6d   : > { %2093 = vst [vmem:[#allocation2 + $0x368] sm:$0xf] %v17041_v0  ;;  %2299 = vst [vmem:[#allocation2 + $0x47c] sm:$0xf] %v17041_v0  ;;  %v404_v10 = vand.u32 7, %v13938_v5  ;;  %v13948_v11 = vadd.s32 24, %v13938_v5 }
  0x6e   : > { %2520 = vst [vmem:[#allocation2 + $0x488] sm:$0xf] %v17041_v0  ;;  %2726 = vst [vmem:[#allocation2 + $0x59c] sm:$0xf] %v17041_v0  ;;  %10952 = vmatpush3.bf16.msra.mxu0 %v12616_v6  ;;  %12518 = vmatpush3.bf16.msra.mxu1 %v12616_v6  ;;  %v13951_v13 = vadd.s32 32, %v13938_v5  ;;  %v13954_v15 = vadd.s32 40, %v13938_v5 }
  0x6f   : > { %2946 = vst [vmem:[#allocation2 + $0x5a8] sm:$0xf] %v17041_v0  ;;  %3152 = vst [vmem:[#allocation2 + $0x6bc] sm:$0xf] %v17041_v0  ;;  %10953 = vmatprep.subr.bf16.mxu0 %v12617_v7  ;;  %12511 = vmatprep.subr.bf16.mxu1 %v12617_v7  ;;  %v411_v16 = vand.u32 7, %v13941_v8  ;;  %v17052_v17 = vand.u32 7, %v13944_v9 }
  0x70   : > { %v13959_v18 = vadd.s32 48, %v13938_v5  ;;  %v13962_v19 = vadd.s32 56, %v13938_v5  ;;  %v12620_v20 = vld [vmem:[#allocation9 + $0x260] sm:$0xff]   ;;  %v17046_v21 = vand.u32 7, %v13948_v11  ;;  %vm13967_vm1 = vcmp.ne.s32.totalorder %v404_v10, 0  ;;  %v12622_v27 = vld [vmem:[#allocation9 + $0x258] sm:$0xff]  }
  0x71   : > { %v17220_v23 = vsel %vm13967_vm1, 4294967295, %v17219_v23  ;;  %v17043_v24 = vand.u32 7, %v13951_v13  ;;  %vm13974_vm2 = vcmp.ne.s32.totalorder %v411_v16, 0  ;;  %vm13980_vm3 = vcmp.ne.s32.totalorder %v17052_v17, 0  ;;  %v12623_v29 = vld [vmem:[#allocation9 + $0x290] sm:$0xff]   ;;  %v12625_v51 = vld [vmem:[#allocation9 + $0x288] sm:$0xff]  }
  0x72   : > { %17218 = vst [vmem:[#allocation21_spill] sm:$0xff] %v13962_v19  ;;  %10954 = vmatpush3.bf16.msra.mxu0 %v12618_v12  ;;  %12519 = vmatpush3.bf16.msra.mxu1 %v12618_v12  ;;  %17221 = vst [vmem:[#allocation22_spill] sm:$0xff] %v17220_v23  ;;  %v17223_v25 = vsel %vm13974_vm2, 4294967295, %v17222_v25  ;;  %v17225_v26 = vmov 0  ;;  %v17047_v28 = vand.u32 7, %v13954_v15  ;;  %v17049_v30 = vand.u32 7, %v13959_v18 }
  0x73   : > { %10955 = vmatprep.subr.bf16.mxu0 %v12619_v14  ;;  %12512 = vmatprep.subr.bf16.mxu1 %v12619_v14  ;;  %17224 = vst [vmem:[#allocation23_spill] sm:$0xff] %v17223_v25  ;;  %v17226_v26 = vsel %vm13980_vm3, 4294967295, %v17225_v26  ;;  %v13987_v31 = vld [vmem:[%s13913_s14] sm:$0xf]  ;;  %v13990_v32 = vld [vmem:[%s13913_s14 + $0x4] sm:$0xf]  ;;  %vm14286_vm12 = vmpackc.low %vm13980_vm3, %vm13974_vm2 }
  0x74   : > { %17227 = vst [vmem:[#allocation24_spill] sm:$0xff] %v17226_v26  ;;  %v13993_v33 = vld [vmem:[%s13913_s14 + $0x8] sm:$0xf]  ;;  %v13996_v34 = vld [vmem:[%s13913_s14 + $0x1c] sm:$0xf]  ;;  %v13999_v35 = vunpack.c.l.bf16 %v13987_v31  ;;  %v1029_v36 = vunpack.c.l.bf16 %v13990_v32  ;;  %v12624_v46 = vld [vmem:[#allocation9 + $0x250] sm:$0xff]   ;;  %v9875_v59 = vcombine.low %v13987_v31, %v13990_v32 }
  0x75   : > { %v1030_v37 = vunpack.c.l.bf16 %v13993_v33  ;;  %v14004_v38 = vld [vmem:[%s13913_s14 + $0x60] sm:$0xf]  ;;  %v14007_v39 = vld [vmem:[%s13913_s14 + $0x64] sm:$0xf]  ;;  %v14010_v40 = vunpack.c.l.bf16 %v13996_v34  ;;  %v14013_v41 = vld [vmem:[%s13913_s14 + $0x68] sm:$0xf]  ;;  %v14022_v45 = vcombine.low %v13990_v32, %v13993_v33 }
  0x76   : > { %10956 = vmatpush3.bf16.msra.mxu0 %v12620_v20  ;;  %12520 = vmatpush3.bf16.msra.mxu1 %v12620_v20  ;;  %17228 = vst [vmem:[#allocation25_spill] sm:$0xff] %v13999_v35  ;;  %17229 = vst [vmem:[#allocation26_spill] sm:$0xff] %v14007_v39  ;;  %v10053_v42 = vld [vmem:[%s13913_s14 + $0x7c] sm:$0xf]  ;;  %v14017_v43 = vunpack.c.l.bf16 %v14004_v38  ;;  %v17039_v44 = vunpack.c.l.bf16 %v14007_v39  ;;  %v1046_v47 = vrot.slane %v13999_v35, 7  ;;  %v1047_v48 = vrot.slane %v1029_v36, 7 }
  0x77   : > { %10957 = vmatprep.subr.bf16.mxu0 %v12621_v22  ;;  %12513 = vmatprep.subr.bf16.mxu1 %v12621_v22  ;;  %17230 = vst [vmem:[#allocation27_spill] sm:$0xff] %v14010_v40  ;;  %17231 = vst [vmem:[#allocation28_spill] sm:$0xff] %v14013_v41  ;;  %v14029_v49 = vrot.slane %v1030_v37, 7  ;;  %v17038_v50 = vunpack.c.l.bf16 %v14013_v41  ;;  %v17040_v52 = vrot.slane %v14010_v40, 7  ;;  %v14033_v53 = vunpack.c.l.bf16 %v10053_v42  ;;  %v12626_v1 = vld [vmem:[#allocation9 + $0x248] sm:$0xff]   ;;  %v12627_v7 = vld [vmem:[#allocation9 + $0x280] sm:$0xff]  }
  0x78   : > { %17232 = vst [vmem:[#allocation29_spill] sm:$0xff] %v14017_v43  ;;  %17233 = vst [vmem:[#allocation30_spill] sm:$0xff] %v14022_v45  ;;  %v2327_v54 = vrot.slane %v14017_v43, 7  ;;  %v2328_v55 = vrot.slane %v17039_v44, 7  ;;  %vm17085_vm4 = vcmask 1046528   ;;  %v14039_v56 = vsel %vm17072_vm0, %v1046_v47, %v1047_v48  ;;  %s9797_s29 = sshll.u32 %s13901_s23, 8 }
  0x79   : > { %17234 = vst [vmem:[#allocation31_spill] sm:$0xff] %v14033_v53  ;;  %v14043_v57 = vsel %vm17072_vm0, %v1047_v48, %v14029_v49  ;;  %v14047_v58 = vrot.slane %v17038_v50, 7  ;;  %v1068_v60 = vsel %vm17072_vm0, %v17040_v52, %v1046_v47  ;;  %v1070_v61 = vsel %vm13974_vm2, %v14039_v56, 0.0  ;;  %v14131_v52 = vld [vmem:[%s13913_s14 + $0xc] sm:$0xf]  ;;  %s16739_s11 = scalar_lea.vmem [#allocation11], %s9797_s29 }
  0x7a   : > { %10958 = vmatpush3.bf16.msra.mxu0 %v12622_v27  ;;  %12521 = vmatpush3.bf16.msra.mxu1 %v12622_v27  ;;  %v14060_v62 = vsel %vm13980_vm3, %v14043_v57, 0.0  ;;  %v17037_v63 = vrot.slane %v14033_v53, 7  ;;  %v1069_v2 = vsel %vm13967_vm1, %v1068_v60, 0.0  ;;  %v14067_v4 = vsel %vm17072_vm0, %v2327_v54, %v2328_v55  ;;  %v12629_v60 = vld [vmem:[#allocation9 + $0x338] sm:$0xff]   ;;  %s10948_s18 = sshll.u32 %s13678_s24, 12  ;;  %s9632_s19 = sshll.u32 %s16739_s11, 4  ;;  %s16967_s19 = int_to_ptr.vmem [resolvable:$true] %s9632_s19 }
  0x7b   : > { %10959 = vmatprep.subr.bf16.mxu0 %v12623_v29  ;;  %12514 = vmatprep.subr.bf16.mxu1 %v12623_v29  ;;  %v1161_v3 = vpack.c.bf16 %v14060_v62, %v1070_v61  ;;  %v14071_v6 = vsel %vm17072_vm0, %v2328_v55, %v14047_v58  ;;  %v10760_v12 = vpack.c.bf16 %v13999_v35, %v1069_v2  ;;  %v2351_v22 = vsel %vm13974_vm2, %v14067_v4, 0.0  ;;  %v12628_v29 = vld [vmem:[#allocation9 + $0x240] sm:$0xff]   ;;  %s16965_s0 = scalar_lea.hbm %s17023_s6, %s10948_s18  ;;  %s9617_s24 = scalar_lea.sflag [#allocation5], %s13901_s23 }
  0x7c   : > { %v1254_v14 = vpack.c.bf16 %v1070_v61, %v1069_v2  ;;  %v2349_v20 = vsel %vm17072_vm0, %v17037_v63, %v2327_v54  ;;  %vm14082_vm5 = vcmp.ne.s32.totalorder %v404_v10, 7  ;;  %v17235_v27 = vmov 0  ;;  %v12632_v2 = vld [vmem:[#allocation9 + $0x3b8] sm:$0xff]   ;;  %s13598_s8 = scalar_lea.vmem %s16967_s19, 4096  ;;  %s13695_s28 = smov [#allocation11]  }
  0x7d   : > { %v17236_v27 = vsel %vm14082_vm5, 4294967295, %v17235_v27  ;;  %v2350_v42 = vsel %vm13967_vm1, %v2349_v20, 0.0  ;;  %v10762_v47 = vcombine.low %v1161_v3, %v13990_v32  ;;  %v9865_v48 = vcombine.high %v1161_v3, %v14022_v45  ;;  %v12634_v61 = vld [vmem:[#allocation9 + $0x378] sm:$0xff]   ;;  %v14134_v32 = vld [vmem:[%s13913_s14 + $0x10] sm:$0xf]  ;;  %p13599_p11 = scmp.ne.s32.totalorder %s16967_s19, %s13598_s8  ;;  %s13602_s3 = sshll.u32 %s13695_s28, 4  ;;  %s13603_s3 = int_to_ptr.vmem [resolvable:$false] %s13602_s3 }
  0x7e   : > { %10960 = vmatpush3.bf16.msra.mxu0 %v12624_v46  ;;  %12522 = vmatpush3.bf16.msra.mxu1 %v12624_v46  ;;  %17237 = vst [vmem:[#allocation32_spill] sm:$0xff] %v17236_v27  ;;  %v14091_v46 = vsel %vm13980_vm3, %v14071_v6, 0.0  ;;  %vm14097_vm6 = vcmp.ne.s32.totalorder %v17046_v21, 0  ;;  %v17238_v5 = vmov 0  ;;  %vm14103_vm7 = vcmp.ne.s32.totalorder %v17043_v24, 0  ;;  %v12849_v27 = vld [vmem:[#allocation9 + $0xf0] sm:$0xff]   ;;  %p13605_p3 = scmp.lt.s32.totalorder %s16967_s19, %s13603_s3 }
  0x7f   : > { %10961 = vmatprep.subr.bf16.mxu0 %v12625_v51  ;;  %12515 = vmatprep.subr.bf16.mxu1 %v12625_v51  ;;  %v17239_v5 = vsel %vm14097_vm6, 4294967295, %v17238_v5  ;;  %v17241_v10 = vmov 0  ;;  %v14108_v51 = vcombine.high %v17041_v0, %v10760_v12  ;;  %v2442_v54 = vpack.c.bf16 %v14091_v46, %v2351_v22  ;;  %1430 = vst [vmem:[#allocation2 + $0x138] sm:$0xff] %v10762_v47  ;;  %1432 = vst [vmem:[#allocation2 + $0x15c] sm:$0xff] %v9865_v48  ;;  %v12630_v47 = vld [vmem:[#allocation9 + $0x2f8] sm:$0xff]   ;;  %p13600_p0 = pnand %p13599_p11, %p13824_p12  ;;  %s13604_s26 = scalar_lea.vmem %s13603_s3, 8192 }
  0x80   : > { %17240 = vst [vmem:[#allocation33_spill] sm:$0xff] %v17239_v5  ;;  %v17242_v10 = vsel %vm14103_vm7, 4294967295, %v17241_v10  ;;  %v10874_v55 = vpack.c.bf16 %v14017_v43, %v2350_v42  ;;  %v2535_v3 = vpack.c.bf16 %v2351_v22, %v2350_v42  ;;  %v14116_v20 = vcombine.low %v14007_v39, %v14013_v41  ;;  %vm14403_vm15 = vmpackc.low %vm14103_vm7, %vm14097_vm6  ;;  %p13606_p5 = scmp.lt.s32.totalorder %s13604_s26, %s13598_s8 }
  0x81   : > { %17243 = vst [vmem:[#allocation34_spill] sm:$0xff] %v17242_v10  ;;  %17244 = vst [vmem:[#allocation35_spill] sm:$0xff] %v14108_v51  ;;  %v17044_v63 = vrot.slane %v13999_v35, 1  ;;  %v14120_v50 = vcombine.low %v17041_v0, %v10760_v12  ;;  %v10876_v22 = vcombine.low %v2442_v54, %v14007_v39  ;;  %v1078_v42 = vrot.slane %v1029_v36, 1  ;;  %4842 = vmatprep.mubr.bf16.mxu0 %v14108_v51  ;;  %v14258_v51 = vld [vmem:[%s13913_s14 + $0x74] sm:$0xf]  ;;  %p13601_p1 = pneg %p13600_p0 }
  0x82   : > { %10962 = vmatpush3.bf16.msra.mxu0 %v12626_v1  ;;  %12523 = vmatpush3.bf16.msra.mxu1 %v12626_v1  ;;  %2521 = vst [vmem:[#allocation2 + $0x4a4] sm:$0xff] %v10874_v55  ;;  %v10279_v1 = vcombine.high %v17041_v0, %v10874_v55  ;;  %v10063_v48 = vcombine.high %v2442_v54, %v14116_v20  ;;  %v14138_v36 = vrot.slane %v1030_v37, 1  ;;  %v17045_v54 = vunpack.c.l.bf16 %v14134_v32  ;;  %v12678_v35 = vld [vmem:[#allocation9 + $0x358] sm:$0xff]   ;;  %p13607_p8 = por %p13606_p5, %p13605_p3 }
  0x83   : > { %10963 = vmatprep.subr.bf16.mxu0 %v12627_v7  ;;  %12516 = vmatprep.subr.bf16.mxu1 %v12627_v7  ;;  %17245 = vst [vmem:[#allocation36_spill] sm:$0xff] %v14120_v50  ;;  %v10771_v7 = vcombine.low %v1254_v14, %v13987_v31  ;;  %v9881_v12 = vcombine.high %v1254_v14, %v9875_v59  ;;  %2523 = vst [vmem:[#allocation2 + $0x4c8] sm:$0xff] %v10876_v22  ;;  %v17048_v14 = vunpack.c.l.bf16 %v14131_v52 }
  0x84   : > { %v10278_v44 = vcombine.low %v17041_v0, %v10874_v55  ;;  %4938 = vmatprep.mubr.bf16.mxu1 %v10279_v1  ;;  %2711 = vst [vmem:[#allocation2 + $0x498] sm:$0xff] %v10876_v22  ;;  %v10073_v31 = vcombine.low %v14004_v38, %v14007_v39  ;;  %v10885_v59 = vcombine.low %v2535_v3, %v14004_v38  ;;  %2525 = vst [vmem:[#allocation2 + $0x4ec] sm:$0xff] %v10063_v48  ;;  %v14146_v55 = vld [vmem:[%s13913_s14 + $0x6c] sm:$0xf]  ;;  %v14149_v1 = vld [vmem:[%s13913_s14 + $0x70] sm:$0xf]  ;;  %p13608_p6 = pnand %p13607_p8, %p13601_p1 }
  0x85   : > { %2713 = vst [vmem:[#allocation2 + $0x4bc] sm:$0xff] %v10063_v48  ;;  %17246 = vst [vmem:[#allocation37_spill] sm:$0xff] %v14146_v55  ;;  %v1079_v37 = vsel %vm17085_vm4, %v17044_v63, %v1078_v42  ;;  %v12631_v38 = vld [vmem:[#allocation9 + $0x330] sm:$0xff]   ;;  %v17051_v22 = vunpack.c.l.bf16 %v14149_v1  ;;  %v1051_v0 = vrot.slane %v17048_v14, 7  ;;  %v14160_v24 = vrot.slane %v17045_v54, 7  ;;  %v12637_v63 = vld [vmem:[#allocation9 + $0x328] sm:$0xff]  }
  0x86   : > { %10964 = vmatpush3.bf16.msra.mxu0 %v12628_v29  ;;  %12524 = vmatpush3.bf16.msra.mxu1 %v12628_v29  ;;  %17247 = vst [vmem:[#allocation38_spill] sm:$0xff] %v14149_v1  ;;  %1334 = vst [vmem:[#allocation2 + $0x12c] sm:$0xff] %v10771_v7  ;;  %v17050_v29 = vunpack.c.l.bf16 %v14146_v55  ;;  %v12633_v48 = vld [vmem:[#allocation9 + $0x2f0] sm:$0xff]   ;;  %v14164_v7 = vcombine.low %v14131_v52, %v14134_v32  ;;  %vm14172_vm8 = vcmp.ne.s32.totalorder %v17047_v28, 0  ;;  %vm14178_vm9 = vcmp.ne.s32.totalorder %v17049_v30, 0 }
  0x87   : > { %1336 = vst [vmem:[#allocation2 + $0x150] sm:$0xff] %v9881_v12  ;;  %11061 = vmatprep.subr.bf16.mxu1 %v12629_v60  ;;  %11173 = vmatprep.subr.bf16.mxu0 %v12632_v2  ;;  %2615 = vst [vmem:[#allocation2 + $0x48c] sm:$0xff] %v10885_v59  ;;  %v14168_v60 = vcombine.low %v14146_v55, %v14149_v1  ;;  %v12644_v2 = vld [vmem:[#allocation9 + $0x3b0] sm:$0xff]   ;;  %v17249_v12 = vmov 0  ;;  %v17252_v59 = vmov 0  ;;  %v14187_v21 = vrot.slane %v17051_v22, 7 }
  0x88   : > { %17248 = vst [vmem:[#allocation39_spill] sm:$0xff] %v14164_v7  ;;  %v17250_v12 = vsel %vm14172_vm8, 4294967295, %v17249_v12  ;;  %v17253_v59 = vsel %vm14178_vm9, 4294967295, %v17252_v59  ;;  %v2332_v54 = vrot.slane %v17050_v29, 7  ;;  %v14191_v28 = vsel %vm17085_vm4, %v1078_v42, %v14138_v36  ;;  %v12646_v29 = vld [vmem:[#allocation9 + $0x370] sm:$0xff]   ;;  %v12638_v42 = vld [vmem:[#allocation9 + $0x2e8] sm:$0xff]  }
  0x89   : > { %17251 = vst [vmem:[#allocation40_spill] sm:$0xff] %v17250_v12  ;;  %17254 = vst [vmem:[#allocation41_spill] sm:$0xff] %v17253_v59  ;;  %4843 = vmatmul.mubr.bf16.vlgmr.msra.gmra.mxu0 %v14120_v50  ;;  %4939 = vmatmul.mubr.bf16.vlgmr.msra.gmra.mxu1 %v10278_v44  ;;  %v10079_v14 = vcombine.high %v2535_v3, %v10073_v31  ;;  %v14195_v30 = vsel %vm17072_vm0, %v14029_v49, %v1051_v0  ;;  %v1102_v22 = vsel %vm14082_vm5, %v1079_v37, 0.0  ;;  %v12640_v50 = vld [vmem:[#allocation9 + $0x2e0] sm:$0xff]  }
  0x8a   : > { %11062 = vmatpush3.bf16.msra.mxu1 %v12630_v47  ;;  %11174 = vmatpush3.bf16.msra.mxu0 %v12634_v61  ;;  %v14199_v44 = vsel %vm17072_vm0, %v1051_v0, %v14160_v24  ;;  %v1072_v49 = vsel %vm14097_vm6, %v14195_v30, 0.0  ;;  %v14216_v61 = vsel %vm17072_vm0, %v14047_v58, %v2332_v54  ;;  %v14220_v3 = vsel %vm17072_vm0, %v2332_v54, %v14187_v21  ;;  %v14240_v54 = vld [vmem:[%s13913_s14 + $0x14] sm:$0xf] }
  0x8b   : > { %11063 = vmatprep.subr.bf16.mxu1 %v12631_v38  ;;  %4850 = vmatprep.mubr.bf16.mxu0 %v14022_v45  ;;  %v14212_v0 = vsel %vm14103_vm7, %v14199_v44, 0.0  ;;  %2617 = vst [vmem:[#allocation2 + $0x4b0] sm:$0xff] %v10079_v14  ;;  %v2353_v31 = vsel %vm14097_vm6, %v14216_v61, 0.0  ;;  %v14230_v37 = vsel %vm14103_vm7, %v14220_v3, 0.0  ;;  %v10761_v58 = vpack.c.bf16 %v1102_v22, %v1102_v22  ;;  %v14243_v38 = vld [vmem:[%s13913_s14 + $0x18] sm:$0xf] }
  0x8c   : > { %4946 = vmatprep.mubr.bf16.mxu1 %v14116_v20  ;;  %v1164_v47 = vpack.c.bf16 %v14212_v0, %v1072_v49  ;;  %17255 = vst [vmem:[#allocation42_spill] sm:$0xff] %v14230_v37  ;;  %11175 = vmatprep.subr.bf16.mxu0 %v12644_v2  ;;  %vm14234_vm10 = vcmp.ne.s32.totalorder %v411_v16, 7  ;;  %v17256_v20 = vmov 0  ;;  %v2445_v14 = vpack.c.bf16 %v14230_v37, %v2353_v31  ;;  %17260 = vst [vmem:[#allocation45_spill] sm:$0xff] %v14258_v51 }
  0x8d   : > { %v17257_v20 = vsel %vm14234_vm10, 4294967295, %v17256_v20  ;;  %v14246_v17 = vpack.c.bf16 %v1072_v49, %v14060_v62  ;;  %v14249_v45 = vpack.c.bf16 %v2353_v31, %v14091_v46  ;;  %v17057_v2 = vunpack.c.l.bf16 %v14240_v54  ;;  %v14261_v62 = vld [vmem:[%s13913_s14 + $0x78] sm:$0xf]  ;;  %1241 = vst [vmem:[#allocation2 + $0x14c] sm:$0xf] %v10761_v58 }
  0x8e   : > { %17258 = vst [vmem:[#allocation43_spill] sm:$0xff] %v17257_v20  ;;  %11064 = vmatpush3.bf16.msra.mxu1 %v12633_v48  ;;  %v10765_v8 = vcombine.low %v1164_v47, %v14131_v52  ;;  %v9869_v16 = vcombine.high %v1164_v47, %v14164_v7  ;;  %11176 = vmatpush3.bf16.msra.mxu0 %v12646_v29  ;;  %17261 = vst [vmem:[#allocation46_spill] sm:$0xff] %v14261_v62  ;;  %v17262_v46 = vand.u32 7, %v13944_v9  ;;  %v17263_v49 = vmov 0  ;;  %v12639_v48 = vld [vmem:[#allocation9 + $0x320] sm:$0xff]   ;;  %v12843_v20 = vld [vmem:[#allocation9 + $0xb8] sm:$0xff]  }
  0x8f   : > { %17259 = vst [vmem:[#allocation44_spill] sm:$0xff] %v14249_v45  ;;  %1335 = vst [vmem:[#allocation2 + $0x134] sm:$0xf] %v10761_v58  ;;  %11065 = vmatprep.subr.bf16.mxu1 %v12637_v63  ;;  %v10879_v29 = vcombine.low %v2445_v14, %v14146_v55  ;;  %v10067_v47 = vcombine.high %v2445_v14, %v14168_v60  ;;  %v14273_v31 = vcombine.low %v14240_v54, %v14243_v38  ;;  %v17268_v14 = vmov 0  ;;  %v12660_v37 = vld [vmem:[#allocation2 + $0x12c] ss:$36 sps:$4 sm:$0xff]  }
  0x90   : > { %vm14265_vm11 = vcmp.ne.s32.totalorder %v17262_v46, 7  ;;  %v17056_v22 = vunpack.c.l.bf16 %v14258_v51  ;;  %1434 = vst [vmem:[#allocation2 + $0x180] sm:$0xff] %v10765_v8  ;;  %1436 = vst [vmem:[#allocation2 + $0x1a4] sm:$0xff] %v9869_v16  ;;  %v1055_v9 = vrot.slane %v17057_v2, 7  ;;  %v17267_v58 = vunpack.c.l.bf16 %v14243_v38 }
  0x91   : > { %v17264_v49 = vsel %vm14265_vm11, 4294967295, %v17263_v49  ;;  %17266 = vst [vmem:[#allocation48_spill] sm:$0xff] %v14273_v31  ;;  %v17269_v14 = vsel %vm14286_vm12, 4294967295, %v17268_v14  ;;  %v14292_v46 = vpack.c.bf16 %v14043_v57, %v14039_v56  ;;  %v13390_v8 = vpack.c.bf16 %v14071_v6, %v14067_v4  ;;  %2527 = vst [vmem:[#allocation2 + $0x510] sm:$0xff] %v10879_v29  ;;  %v12654_v57 = vld [vmem:[#allocation9 + $0x3a8] sm:$0xff]  }
  0x92   : > { %17265 = vst [vmem:[#allocation47_spill] sm:$0xff] %v17264_v49  ;;  %v14280_v63 = vrot.slane %v17267_v58, 7  ;;  %17270 = vst [vmem:[#allocation49_spill] sm:$0xff] %v17269_v14  ;;  %v17058_v16 = vunpack.c.l.bf16 %v14261_v62  ;;  %v2336_v56 = vrot.slane %v17056_v22, 7  ;;  %11066 = vmatpush3.bf16.msra.mxu1 %v12638_v42  ;;  %v14307_v58 = vsel %vm17072_vm0, %v14160_v24, %v1055_v9  ;;  %v12643_v42 = vld [vmem:[#allocation9 + $0x318] sm:$0xff]   ;;  %11177 = vmatprep.subr.bf16.mxu0 %v12654_v57 }
  0x93   : > { %17271 = vst [vmem:[#allocation50_spill] sm:$0xff] %v14292_v46  ;;  %13388 = vmatmul.mubr.msk.bf16.gmra.mxu0 %vm14286_vm12, %v14292_v46  ;;  %13391 = vmatmul.mubr.msk.bf16.gmra.mxu1 %vm14286_vm12, %v13390_v8  ;;  %2529 = vst [vmem:[#allocation2 + $0x534] sm:$0xff] %v10067_v47  ;;  %v14315_v6 = vcombine.low %v14258_v51, %v14261_v62  ;;  %v12656_v8 = vld [vmem:[#allocation9 + $0x368] sm:$0xff]   ;;  %v10774_v22 = vcombine.low %v14246_v17, %v13993_v33  ;;  %v14354_v46 = vld [vmem:[%s13913_s14 + $0x3c] sm:$0xf]  ;;  %v17276_v62 = vunpack.c.l.bf16 %v14131_v52  ;;  %v17301_v45 = vmov 0 }
  0x94   : > { %2715 = vst [vmem:[#allocation2 + $0x4e0] sm:$0xff] %v10879_v29  ;;  %2717 = vst [vmem:[#allocation2 + $0x504] sm:$0xff] %v10067_v47  ;;  %4858 = vmatprep.mubr.bf16.mxu0 %v14164_v7  ;;  %v14311_v4 = vsel %vm17072_vm0, %v1055_v9, %v14280_v63  ;;  %11067 = vmatprep.subr.bf16.mxu1 %v12639_v48  ;;  %v1074_v29 = vsel %vm14172_vm8, %v14307_v58, 0.0  ;;  %v14328_v47 = vsel %vm17072_vm0, %v14187_v21, %v2336_v56  ;;  %v14351_v7 = vld [vmem:[%s13913_s14 + $0x20] sm:$0xf] }
  0x95   : > { %4954 = vmatprep.mubr.bf16.mxu1 %v14168_v60  ;;  %v14324_v24 = vsel %vm14178_vm9, %v14311_v4, 0.0  ;;  %v14332_v9 = vrot.slane %v17058_v16, 7  ;;  %v14338_v48 = vsel %vm14172_vm8, %v14328_v47, 0.0  ;;  %v17274_v21 = vcombine.low %v13993_v33, %v14131_v52  ;;  %17275 = vst [vmem:[#allocation53_spill] sm:$0xff] %v14354_v46  ;;  %11178 = vmatpush3.bf16.msra.mxu0 %v12656_v8  ;;  %1338 = vst [vmem:[#allocation2 + $0x174] sm:$0xff] %v10774_v22  ;;  %v12668_v33 = vld [vmem:[#allocation9 + $0x3a0] sm:$0xff]  }
  0x96   : > { %v1167_v60 = vpack.c.bf16 %v14324_v24, %v1074_v29  ;;  %17273 = vst [vmem:[#allocation52_spill] sm:$0xff] %v14338_v48  ;;  %v14358_v57 = vrot.slane %v17276_v62, 1  ;;  %v14361_v53 = vpack.c.bf16 %v1074_v29, %v14212_v0  ;;  %11068 = vmatpush3.bf16.msra.mxu1 %v12640_v50  ;;  %v14373_v52 = vunpack.c.l.bf16 %v14351_v7  ;;  %11179 = vmatprep.subr.bf16.mxu0 %v12668_v33 }
  0x97   : > { %17272 = vst [vmem:[#allocation51_spill] sm:$0xff] %v14332_v9  ;;  %v9885_v2 = vcombine.high %v14246_v17, %v17274_v21  ;;  %v14348_v16 = vsel %vm17072_vm0, %v2336_v56, %v14332_v9  ;;  %v12645_v17 = vld [vmem:[#allocation9 + $0x2d8] sm:$0xff]   ;;  %v17278_v0 = vand.u32 7, %v13948_v11  ;;  %v17279_v50 = vmov 0  ;;  %11069 = vmatprep.subr.bf16.mxu1 %v12643_v42 }
  0x98   : > { %v10768_v21 = vcombine.low %v1167_v60, %v14240_v54  ;;  %v9873_v56 = vcombine.high %v1167_v60, %v14273_v31  ;;  %v14370_v9 = vsel %vm14178_vm9, %v14348_v16, 0.0  ;;  %v17282_v62 = vand.u32 7, %v13951_v13  ;;  %v12647_v60 = vld [vmem:[#allocation9 + $0x310] sm:$0xff]  }
  0x99   : > { %17277 = vst [vmem:[#allocation54_spill] sm:$0xff] %v14370_v9  ;;  %1340 = vst [vmem:[#allocation2 + $0x198] sm:$0xff] %v9885_v2  ;;  %vm14377_vm13 = vcmp.ne.s32.totalorder %v17278_v0, 7  ;;  %v17283_v29 = vmov 0  ;;  %v2448_v8 = vpack.c.bf16 %v14370_v9, %v14338_v48  ;;  %v14390_v22 = vunpack.c.l.bf16 %v14354_v46  ;;  %v12648_v2 = vld [vmem:[#allocation9 + $0x2d0] sm:$0xff]  }
  0x9a   : > { %v17280_v50 = vsel %vm14377_vm13, 4294967295, %v17279_v50  ;;  %vm14383_vm14 = vcmp.ne.s32.totalorder %v17282_v62, 7  ;;  %v1083_v11 = vsel %vm17085_vm4, %v14138_v36, %v14358_v57  ;;  %v1103_v13 = vsel %vm14234_vm10, %v14191_v28, 0.0  ;;  %1438 = vst [vmem:[#allocation2 + $0x1c8] sm:$0xff] %v10768_v21  ;;  %1440 = vst [vmem:[#allocation2 + $0x1ec] sm:$0xff] %v9873_v56  ;;  %11070 = vmatpush3.bf16.msra.mxu1 %v12645_v17 }
  0x9b   : > { %17281 = vst [vmem:[#allocation55_spill] sm:$0xff] %v17280_v50  ;;  %v17284_v29 = vsel %vm14383_vm14, 4294967295, %v17283_v29  ;;  %v1473_v42 = vrot.slane %v14373_v52, 7  ;;  %v10763_v0 = vpack.c.bf16 %v1103_v13, %v1103_v13  ;;  %v17286_v62 = vmov 0  ;;  %v12651_v13 = vld [vmem:[#allocation9 + $0x308] sm:$0xff]   ;;  %11071 = vmatprep.subr.bf16.mxu1 %v12647_v60 }
  0x9c   : > { %17285 = vst [vmem:[#allocation56_spill] sm:$0xff] %v17284_v29  ;;  %v17287_v62 = vsel %vm14403_vm15, 4294967295, %v17286_v62  ;;  %v14409_v36 = vpack.c.bf16 %v14199_v44, %v14195_v30  ;;  %v13398_v28 = vpack.c.bf16 %v14220_v3, %v14216_v61  ;;  %v10882_v21 = vcombine.low %v2448_v8, %v14258_v51  ;;  %v14422_v9 = vld [vmem:[%s13913_s14 + $0x24] sm:$0xf]  ;;  %v14425_v30 = vld [vmem:[%s13913_s14 + $0x28] sm:$0xf] }
  0x9d   : > { %17288 = vst [vmem:[#allocation57_spill] sm:$0xff] %v17287_v62  ;;  %v10071_v56 = vcombine.high %v2448_v8, %v14315_v6  ;;  %v1104_v44 = vsel %vm14265_vm11, %v1083_v11, 0.0  ;;  %v14434_v8 = vcombine.low %v14422_v9, %v14425_v30  ;;  %1243 = vst [vmem:[#allocation2 + $0x170] sm:$0xf] %v10763_v0  ;;  %v17291_v17 = vrot.slane %v14390_v22, 7  ;;  %v12669_v3 = vld [vmem:[#allocation9 + $0x360] sm:$0xff]  }
  0x9e   : > { %17289 = vst [vmem:[#allocation58_spill] sm:$0xff] %v14409_v36  ;;  %13396 = vmatmul.mubr.msk.bf16.gmra.mxu0 %vm14403_vm15, %v14409_v36  ;;  %13399 = vmatmul.mubr.msk.bf16.gmra.mxu1 %vm14403_vm15, %v13398_v28  ;;  %v10764_v28 = vpack.c.bf16 %v1104_v44, %v1104_v44  ;;  %1337 = vst [vmem:[#allocation2 + $0x158] sm:$0xf] %v10763_v0  ;;  %v17292_v61 = vunpack.c.l.bf16 %v14134_v32  ;;  %v12652_v44 = vld [vmem:[#allocation9 + $0x2c8] sm:$0xff]   ;;  %v17293_v60 = vunpack.c.l.bf16 %v14422_v9  ;;  %v17295_v48 = vunpack.c.l.bf16 %v14240_v54  ;;  %v14597_v46 = vld [vmem:[%s13913_s14 + $0x40] sm:$0xf] }
  0x9f   : > { %4866 = vmatprep.mubr.bf16.mxu0 %v14273_v31  ;;  %17290 = vst [vmem:[#allocation59_spill] sm:$0xff] %v14434_v8  ;;  %1431 = vst [vmem:[#allocation2 + $0x140] sm:$0xf] %v10763_v0  ;;  %v1495_v11 = vsel %vm17072_vm0, %v17291_v17, %v1473_v42  ;;  %v14450_v17 = vld [vmem:[%s13913_s14 + $0x2c] sm:$0xf]  ;;  %4962 = vmatprep.mubr.bf16.mxu1 %v14315_v6  ;;  %v10777_v33 = vcombine.low %v14361_v53, %v14134_v32 }
  0xa0   : > { %2531 = vst [vmem:[#allocation2 + $0x558] sm:$0xff] %v10882_v21  ;;  %2533 = vst [vmem:[#allocation2 + $0x57c] sm:$0xff] %v10071_v56  ;;  %v1084_v31 = vrot.slane %v17292_v61, 1  ;;  %v14443_v0 = vsel %vm13967_vm1, %v1495_v11, 0.0  ;;  %v1474_v36 = vrot.slane %v17293_v60, 7  ;;  %v14454_v61 = vrot.slane %v17295_v48, 1  ;;  %11180 = vmatpush3.bf16.msra.mxu0 %v12669_v3  ;;  %11072 = vmatpush3.bf16.msra.mxu1 %v12648_v2 }
  0xa1   : > { %2719 = vst [vmem:[#allocation2 + $0x528] sm:$0xff] %v10882_v21  ;;  %2721 = vst [vmem:[#allocation2 + $0x54c] sm:$0xff] %v10071_v56  ;;  %v17294_v21 = vunpack.c.l.bf16 %v14425_v30  ;;  %v10798_v11 = vpack.c.bf16 %v14373_v52, %v14443_v0  ;;  %v14460_v60 = vld [vmem:[%s13913_s14 + $0x30] sm:$0xf]  ;;  %11073 = vmatprep.subr.bf16.mxu1 %v12651_v13  ;;  %v12677_v13 = vld [vmem:[#allocation9 + $0x398] sm:$0xff]   ;;  %v17300_v3 = vand.u32 7, %v13954_v15  ;;  %v17304_v55 = vunpack.c.l.bf16 %v14450_v17 }
  0xa2   : > { %1245 = vst [vmem:[#allocation2 + $0x194] sm:$0xf] %v10764_v28  ;;  %1339 = vst [vmem:[#allocation2 + $0x17c] sm:$0xf] %v10764_v28  ;;  %v14468_v48 = vsel %vm17072_vm0, %v1473_v42, %v1474_v36  ;;  %v14476_v51 = vcombine.low %v14450_v17, %v14460_v60  ;;  %v17305_v41 = vunpack.c.l.bf16 %v14460_v60  ;;  %v17306_v15 = vmov 0  ;;  %11181 = vmatprep.subr.bf16.mxu0 %v12677_v13 }
  0xa3   : > { %v1476_v56 = vrot.slane %v17294_v21, 7  ;;  %1433 = vst [vmem:[#allocation2 + $0x164] sm:$0xf] %v10764_v28  ;;  %v1085_v28 = vsel %vm17085_vm4, %v14358_v57, %v1084_v31  ;;  %v12653_v21 = vld [vmem:[#allocation9 + $0x300] sm:$0xff]   ;;  %1667 = vst [vmem:[#allocation2 + $0x264] sm:$0xff] %v10798_v11  ;;  %v17297_v57 = vmov 0.0|0.0  }
  0xa4   : > { %17296 = vst [vmem:[#allocation60_spill] sm:$0xff] %v14476_v51  ;;  %v14479_v1 = vcombine.high %v17297_v57, %v10798_v11  ;;  %v14482_v2 = vcombine.low %v17297_v57, %v10798_v11  ;;  %v14487_v42 = vsel %vm13974_vm2, %v14468_v48, 0.0  ;;  %1342 = vst [vmem:[#allocation2 + $0x1bc] sm:$0xff] %v10777_v33  ;;  %v12655_v11 = vld [vmem:[#allocation9 + $0x2c0] sm:$0xff]   ;;  %v1478_v43 = vrot.slane %v17304_v55, 7  ;;  %11074 = vmatpush3.bf16.msra.mxu1 %v12652_v44  ;;  %v12661_v44 = vld [vmem:[#allocation9 + $0x438] sm:$0xff]  }
  0xa5   : > { %v14471_v6 = vsel %vm17072_vm0, %v1474_v36, %v1476_v56  ;;  %vm14496_vm0 = vcmp.ne.s32.totalorder %v17300_v3, 7  ;;  %v14506_v39 = vrot.slane %v17305_v41, 7  ;;  %v1087_v33 = vsel %vm17085_vm4, %v1084_v31, %v14454_v61  ;;  %vm14514_vm15 = vmpackc.low %vm14178_vm9, %vm14172_vm8  ;;  %11075 = vmatprep.subr.bf16.mxu1 %v12653_v21  ;;  %v12665_v21 = vld [vmem:[#allocation2 + $0x174] ss:$36 sps:$4 sm:$0xff]   ;;  %11182 = vmatpush3.bf16.msra.mxu0 %v12678_v35 }
  0xa6   : > { %17298 = vst [vmem:[#allocation61_spill] sm:$0xff] %v14479_v1  ;;  %17299 = vst [vmem:[#allocation62_spill] sm:$0xff] %v14482_v2  ;;  %v14492_v36 = vsel %vm13980_vm3, %v14471_v6, 0.0  ;;  %v17302_v45 = vsel %vm14496_vm0, 4294967295, %v17301_v45  ;;  %v17307_v15 = vsel %vm14514_vm15, 4294967295, %v17306_v15  ;;  %v14520_v55 = vpack.c.bf16 %v14311_v4, %v14307_v58 }
  0xa7   : > { %17303 = vst [vmem:[#allocation63_spill] sm:$0xff] %v17302_v45  ;;  %v1588_v57 = vpack.c.bf16 %v14492_v36, %v14487_v42  ;;  %17308 = vst [vmem:[#allocation64_spill] sm:$0xff] %v17307_v15  ;;  %v13405_v41 = vpack.c.bf16 %v14348_v16, %v14328_v47  ;;  %v1105_v31 = vsel %vm14377_vm13, %v1085_v28, 0.0  ;;  %v1106_v3 = vsel %vm14383_vm14, %v1087_v33, 0.0  ;;  %v12676_v15 = vld [vmem:[#allocation9 + $0x3f0] sm:$0xff]  }
  0xa8   : > { %17309 = vst [vmem:[#allocation65_spill] sm:$0xff] %v14520_v55  ;;  %13403 = vmatmul.mubr.msk.bf16.gmra.mxu0 %vm14514_vm15, %v14520_v55  ;;  %v17310_v58 = vcombine.low %v14134_v32, %v14240_v54  ;;  %v17311_v55 = vrot.slane %v14010_v40, 7  ;;  %vm17312_vm4 = vcmask 1040384   ;;  %v14551_v32 = vld [vmem:[%s13913_s14 + $0x38] sm:$0xf]  ;;  %v17315_v54 = vmov 0  ;;  %11076 = vmatpush3.bf16.msra.mxu1 %v12655_v11 }
  0xa9   : > { %13406 = vmatmul.mubr.msk.bf16.gmra.mxu1 %vm14514_vm15, %v13405_v41  ;;  %4874 = vmatprep.mubr.bf16.mxu0 %v14479_v1  ;;  %v10800_v47 = vcombine.low %v1588_v57, %v14422_v9  ;;  %v9931_v28 = vcombine.high %v1588_v57, %v14434_v8  ;;  %vm17313_vm15 = vmmov %vm17312_vm4  ;;  %v14548_v41 = vld [vmem:[%s13913_s14 + $0x34] sm:$0xf]  ;;  %v14561_v57 = vsel %vm17312_vm4, %v1478_v43, %v14506_v39  ;;  %v12662_v1 = vld [vmem:[#allocation9 + $0x3f8] sm:$0xff]   ;;  %v17324_v35 = vunpack.c.l.bf16 %v14243_v38 }
  0xaa   : > { %v9889_v4 = vcombine.high %v14361_v53, %v17310_v58  ;;  %v1059_v16 = vsel %vm17312_vm4, %v14280_v63, %v17311_v55  ;;  %v14545_v33 = vsel %vm17313_vm15, %v1476_v56, %v1478_v43  ;;  %v17314_v53 = vand.u32 7, %v13962_v19  ;;  %v12688_v63 = vld [vmem:[#allocation9 + $0x390] sm:$0xff]   ;;  %5003 = vmatprep.mubr.bf16.mxu1 %v12660_v37  ;;  %11285 = vmatprep.subr.bf16.mxu1 %v12661_v44 }
  0xab   : > { %v14566_v56 = vsel %vm14097_vm6, %v14545_v33, 0.0  ;;  %v10766_v55 = vpack.c.bf16 %v1105_v31, %v1105_v31  ;;  %v10767_v58 = vpack.c.bf16 %v1106_v3, %v1106_v3  ;;  %1669 = vst [vmem:[#allocation2 + $0x288] sm:$0xff] %v10800_v47  ;;  %1671 = vst [vmem:[#allocation2 + $0x2ac] sm:$0xff] %v9931_v28  ;;  %v14571_v37 = vsel %vm14103_vm7, %v14561_v57, 0.0  ;;  %v12675_v3 = vld [vmem:[#allocation9 + $0x430] sm:$0xff]   ;;  %11183 = vmatprep.subr.bf16.mxu0 %v12688_v63 }
  0xac   : > { %vm14555_vm14 = vcmp.ne.s32.totalorder %v17314_v53, 0  ;;  %1344 = vst [vmem:[#allocation2 + $0x1e0] sm:$0xff] %v9889_v4  ;;  %v12658_v53 = vld [vmem:[#allocation2 + $0x128] ss:$36 sps:$4 sm:$0xff]   ;;  %1857 = vst [vmem:[#allocation2 + $0x258] sm:$0xff] %v10800_v47  ;;  %v17093_v43 = vunpack.c.l.bf16 %v14548_v41  ;;  %v1591_v31 = vpack.c.bf16 %v14571_v37, %v14566_v56  ;;  %v14579_v13 = vcombine.low %v14548_v41, %v14551_v32 }
  0xad   : > { %v17316_v54 = vsel %vm14555_vm14, 4294967295, %v17315_v54  ;;  %1859 = vst [vmem:[#allocation2 + $0x27c] sm:$0xff] %v9931_v28  ;;  %1247 = vst [vmem:[#allocation2 + $0x1b8] sm:$0xf] %v10766_v55  ;;  %v17319_v47 = vand.u32 7, %v13959_v18  ;;  %v17320_v28 = vmov 0 }
  0xae   : > { %17317 = vst [vmem:[#allocation66_spill] sm:$0xff] %v17316_v54  ;;  %1249 = vst [vmem:[#allocation2 + $0x1dc] sm:$0xf] %v10767_v58  ;;  %v1482_v19 = vrot.slane %v17093_v43, 7  ;;  %v10803_v18 = vcombine.low %v1591_v31, %v14450_v17  ;;  %v9935_v11 = vcombine.high %v1591_v31, %v14476_v51  ;;  %v17327_v44 = vrot.slane %v14010_v40, 1 }
  0xaf   : > { %1435 = vst [vmem:[#allocation2 + $0x188] sm:$0xf] %v10766_v55  ;;  %1437 = vst [vmem:[#allocation2 + $0x1ac] sm:$0xf] %v10767_v58  ;;  %vm14583_vm15 = vcmp.ne.s32.totalorder %v17319_v47, 7  ;;  %v17325_v47 = vunpack.c.l.bf16 %v14551_v32 }
  0xb0   : > { %1341 = vst [vmem:[#allocation2 + $0x1a0] sm:$0xf] %v10766_v55  ;;  %1343 = vst [vmem:[#allocation2 + $0x1c4] sm:$0xf] %v10767_v58  ;;  %v17321_v28 = vsel %vm14583_vm15, 4294967295, %v17320_v28  ;;  %v14591_v55 = vsel %vm14555_vm14, %v1059_v16, 0.0  ;;  %v14609_v4 = vsel %vm17312_vm4, %v14506_v39, %v1482_v19  ;;  %4875 = vmatmul.mubr.bf16.gmra.mxu0 %v14482_v2 }
  0xb1   : > { %17318 = vst [vmem:[#allocation67_spill] sm:$0xff] %v14579_v13  ;;  %17322 = vst [vmem:[#allocation68_spill] sm:$0xff] %v17321_v28  ;;  %v1088_v58 = vrot.slane %v17324_v35, 1  ;;  %v14603_v43 = vrot.slane %v17325_v47, 7  ;;  %v1263_v16 = vpack.c.bf16 %v14591_v55, %v14324_v24  ;;  %v12690_v35 = vld [vmem:[#allocation9 + $0x350] sm:$0xff]   ;;  %vm17326_vm14 = vcmask 1046528   ;;  %5004 = vmatmul.mubr.bf16.vlgmr.msra.gmra.mxu1 %v12658_v53  ;;  %4882 = vmatprep.mubr.bf16.mxu0 %v14434_v8 }
  0xb2   : > { %17323 = vst [vmem:[#allocation69_spill] sm:$0xff] %v14591_v55  ;;  %vm17328_vm13 = vmmov %vm17326_vm14  ;;  %v9878_v47 = vcombine.low %v14243_v38, %v13996_v34  ;;  %v14626_v24 = vsel %vm14172_vm8, %v14609_v4, 0.0  ;;  %v12697_v34 = vld [vmem:[#allocation9 + $0x388] sm:$0xff]   ;;  %11286 = vmatpush3.bf16.msra.mxu1 %v12662_v1  ;;  %5011 = vmatprep.mubr.bf16.mxu1 %v12665_v21  ;;  %v14648_v55 = vunpack.c.l.bf16 %v14597_v46  ;;  %v12667_v28 = vld [vmem:[#allocation2 + $0x170] ss:$36 sps:$4 sm:$0xff]  }
  0xb3   : > { %v1089_v63 = vsel %vm17326_vm14, %v14454_v61, %v1088_v58  ;;  %v1091_v31 = vsel %vm17328_vm13, %v1088_v58, %v17327_v44  ;;  %1673 = vst [vmem:[#allocation2 + $0x2d0] sm:$0xff] %v10803_v18  ;;  %1675 = vst [vmem:[#allocation2 + $0x2f4] sm:$0xff] %v9935_v11  ;;  %v14621_v39 = vsel %vm17312_vm4, %v1482_v19, %v14603_v43  ;;  %v14629_v61 = vld [vmem:[%s13913_s14 + $0x5c] sm:$0xf]  ;;  %v14632_v58 = vld [vmem:[%s13913_s14 + $0x44] sm:$0xf]  ;;  %11287 = vmatprep.subr.bf16.mxu1 %v12675_v3 }
  0xb4   : > { %1861 = vst [vmem:[#allocation2 + $0x2a0] sm:$0xff] %v10803_v18  ;;  %1863 = vst [vmem:[#allocation2 + $0x2c4] sm:$0xff] %v9935_v11  ;;  %v14638_v53 = vsel %vm14178_vm9, %v14621_v39, 0.0  ;;  %v1107_v19 = vsel %vm14496_vm0, %v1089_v63, 0.0  ;;  %v1108_v18 = vsel %vm14583_vm15, %v1091_v31, 0.0  ;;  %v10780_v11 = vcombine.low %v1263_v16, %v14243_v38  ;;  %v12689_v44 = vld [vmem:[#allocation9 + $0x428] sm:$0xff]   ;;  %11184 = vmatpush3.bf16.msra.mxu0 %v12690_v35 }
  0xb5   : > { %17329 = vst [vmem:[#allocation70_spill] sm:$0xff] %v14629_v61  ;;  %v1594_v1 = vpack.c.bf16 %v14638_v53, %v14626_v24  ;;  %v10769_v8 = vpack.c.bf16 %v1107_v19, %v1107_v19  ;;  %v10770_v2 = vpack.c.bf16 %v1108_v18, %v1108_v18  ;;  %v9893_v40 = vcombine.high %v1263_v16, %v9878_v47  ;;  %v12698_v3 = vld [vmem:[#allocation9 + $0x348] sm:$0xff]   ;;  %v12672_v35 = vld [vmem:[#allocation2 + $0x1bc] ss:$36 sps:$4 sm:$0xff]   ;;  %vm17331_vm14 = vmmov %vm17312_vm4 }
  0xb6   : > { %1346 = vst [vmem:[#allocation2 + $0x204] sm:$0xff] %v10780_v11  ;;  %v14651_v63 = vunpack.c.l.bf16 %v14629_v61  ;;  %v17108_v31 = vrot.slane %v14373_v52, 1  ;;  %v17330_v38 = vunpack.c.l.bf16 %v14422_v9  ;;  %v1900_v16 = vrot.slane %v14648_v55, 7  ;;  %v14662_v11 = vld [vmem:[%s13913_s14 + $0x48] sm:$0xf]  ;;  %11185 = vmatprep.subr.bf16.mxu0 %v12697_v34  ;;  %11288 = vmatpush3.bf16.msra.mxu1 %v12676_v15 }
  0xb7   : > { %v10806_v19 = vcombine.low %v1594_v1, %v14548_v41  ;;  %v9939_v18 = vcombine.high %v1594_v1, %v14579_v13  ;;  %1251 = vst [vmem:[#allocation2 + $0x200] sm:$0xf] %v10769_v8  ;;  %1253 = vst [vmem:[#allocation2 + $0x224] sm:$0xf] %v10770_v2  ;;  %v1681_v47 = vpack.c.bf16 %v14487_v42, %v14443_v0  ;;  %11289 = vmatprep.subr.bf16.mxu1 %v12689_v44  ;;  %v12711_v42 = vld [vmem:[#allocation9 + $0x380] sm:$0xff]  }
  0xb8   : > { %v1505_v21 = vrot.slane %v17330_v38, 1  ;;  %1345 = vst [vmem:[#allocation2 + $0x1e8] sm:$0xf] %v10769_v8  ;;  %1347 = vst [vmem:[#allocation2 + $0x20c] sm:$0xf] %v10770_v2  ;;  %v17109_v38 = vrot.slane %v14651_v63, 7  ;;  %11186 = vmatpush3.bf16.msra.mxu0 %v12698_v3  ;;  %v17333_v44 = vunpack.c.l.bf16 %v14632_v58 }
  0xb9   : > { %1439 = vst [vmem:[#allocation2 + $0x1d0] sm:$0xf] %v10769_v8  ;;  %1441 = vst [vmem:[#allocation2 + $0x1f4] sm:$0xf] %v10770_v2  ;;  %v9941_v8 = vcombine.low %v14351_v7, %v14422_v9  ;;  %v12691_v2 = vld [vmem:[#allocation9 + $0x3e8] sm:$0xff]   ;;  %v10809_v0 = vcombine.low %v1681_v47, %v14351_v7  ;;  %5012 = vmatmul.mubr.bf16.gmra.mxu1 %v12667_v28  ;;  %11187 = vmatprep.subr.bf16.mxu0 %v12711_v42 }
  0xba   : > { %1348 = vst [vmem:[#allocation2 + $0x228] sm:$0xff] %v9893_v40  ;;  %v1506_v1 = vsel %vm17328_vm13, %v17108_v31, %v1505_v21  ;;  %1677 = vst [vmem:[#allocation2 + $0x318] sm:$0xff] %v10806_v19  ;;  %v1922_v9 = vsel %vm17331_vm14, %v17109_v38, %v1900_v16  ;;  %v17110_v31 = vunpack.c.l.bf16 %v14662_v11  ;;  %v14679_v61 = vld [vmem:[%s13913_s14 + $0x4c] sm:$0xf]  ;;  %v1901_v3 = vrot.slane %v17333_v44, 7  ;;  %5019 = vmatprep.mubr.bf16.mxu1 %v12672_v35 }
  0xbb   : > { %1679 = vst [vmem:[#allocation2 + $0x33c] sm:$0xff] %v9939_v18  ;;  %1865 = vst [vmem:[#allocation2 + $0x2e8] sm:$0xff] %v10806_v19  ;;  %v1529_v40 = vsel %vm14082_vm5, %v1506_v1, 0.0  ;;  %v9947_v34 = vcombine.high %v1681_v47, %v9941_v8  ;;  %v12704_v19 = vld [vmem:[#allocation9 + $0x420] sm:$0xff]   ;;  %v14690_v7 = vsel %vm13967_vm1, %v1922_v9, 0.0  ;;  %v14696_v47 = vcombine.low %v14632_v58, %v14662_v11  ;;  %11290 = vmatpush3.bf16.msra.mxu1 %v12691_v2 }
  0xbc   : > { %1867 = vst [vmem:[#allocation2 + $0x30c] sm:$0xff] %v9939_v18  ;;  %v10799_v15 = vpack.c.bf16 %v1529_v40, %v1529_v40  ;;  %v14683_v18 = vpack.c.bf16 %v14471_v6, %v14468_v48  ;;  %1761 = vst [vmem:[#allocation2 + $0x24c] sm:$0xff] %v10809_v0  ;;  %v17335_v48 = vunpack.c.l.bf16 %v14425_v30  ;;  %v14701_v1 = vld [vmem:[%s13913_s14 + $0x50] sm:$0xf]  ;;  %v12705_v8 = vld [vmem:[#allocation9 + $0x3e0] sm:$0xff]   ;;  %v10836_v28 = vpack.c.bf16 %v14648_v55, %v14690_v7 }
  0xbd   : > { %17334 = vst [vmem:[#allocation72_spill] sm:$0xff] %v14696_v47  ;;  %v12712_v40 = vld [vmem:[#allocation9 + $0x340] sm:$0xff]   ;;  %1763 = vst [vmem:[#allocation2 + $0x270] sm:$0xff] %v9947_v34  ;;  %v1903_v0 = vrot.slane %v17110_v31, 7  ;;  %v17336_v9 = vunpack.c.l.bf16 %v14450_v17  ;;  %v14715_v38 = vsel %vm17312_vm4, %v1900_v16, %v1901_v3  ;;  %v9942_v34 = vcombine.low %v14425_v30, %v14450_v17  ;;  %11291 = vmatprep.subr.bf16.mxu1 %v12704_v19  ;;  %v12674_v17 = vld [vmem:[#allocation2 + $0x1b8] ss:$36 sps:$4 sm:$0xff]  }
  0xbe   : > { %17332 = vst [vmem:[#allocation71_spill] sm:$0xff] %v14683_v18  ;;  %13412 = vmatmul.mubr.msk.bf16.gmra.mxu0 %vm14286_vm12, %v14683_v18  ;;  %v1507_v6 = vrot.slane %v17335_v48, 1  ;;  %1668 = vst [vmem:[#allocation2 + $0x26c] sm:$0xf] %v10799_v15  ;;  %v1684_v48 = vpack.c.bf16 %v14566_v56, %v14492_v36  ;;  %v13289_v31 = vld [vmem:[#allocation2 + $0x120] sm:$0xff]  ;;  %v14731_v56 = vsel %vm13974_vm2, %v14715_v38, 0.0 }
  0xbf   : > { %4890 = vmatprep.mubr.bf16.mxu0 %v14476_v51  ;;  %1762 = vst [vmem:[#allocation2 + $0x254] sm:$0xf] %v10799_v15  ;;  %v14710_v44 = vrot.slane %v17336_v9, 1  ;;  %2094 = vst [vmem:[#allocation2 + $0x384] sm:$0xff] %v10836_v28  ;;  %v14721_v51 = vcombine.high %v13289_v31, %v10836_v28  ;;  %v14723_v9 = vcombine.low %v13289_v31, %v10836_v28  ;;  %11188 = vmatpush3.bf16.msra.mxu0 %v12712_v40  ;;  %vm17362_vm1 = vcmask 1046528  }
  0xc0   : > { %v1508_v35 = vsel %vm17328_vm13, %v1505_v21, %v1507_v6  ;;  %vm17339_vm14 = vmmov %vm17312_vm4  ;;  %v10812_v2 = vcombine.low %v1684_v48, %v14425_v30  ;;  %v9951_v42 = vcombine.high %v1684_v48, %v9942_v34  ;;  %v17119_v28 = vunpack.c.l.bf16 %v14701_v1  ;;  %11292 = vmatpush3.bf16.msra.mxu1 %v12705_v8  ;;  %v12720_v48 = vld [vmem:[#allocation9 + $0x418] sm:$0xff]  }
  0xc1   : > { %17337 = vst [vmem:[#allocation73_spill] sm:$0xff] %v14721_v51  ;;  %17338 = vst [vmem:[#allocation74_spill] sm:$0xff] %v14723_v9  ;;  %v14726_v36 = vsel %vm17339_vm14, %v1901_v3, %v1903_v0  ;;  %v12681_v21 = vld [vmem:[#allocation2 + $0x204] ss:$36 sps:$4 sm:$0xff]   ;;  %v1530_v19 = vsel %vm14234_vm10, %v1508_v35, 0.0  ;;  %v14752_v30 = vcombine.low %v14679_v61, %v14701_v1  ;;  %5020 = vmatmul.mubr.bf16.gmra.mxu1 %v12674_v17  ;;  %11293 = vmatprep.subr.bf16.mxu1 %v12720_v48 }
  0xc2   : > { %v14736_v16 = vsel %vm13980_vm3, %v14726_v36, 0.0  ;;  %vm17340_vm4 = vmmov %vm17328_vm13  ;;  %v10801_v15 = vpack.c.bf16 %v1530_v19, %v1530_v19  ;;  %1765 = vst [vmem:[#allocation2 + $0x294] sm:$0xff] %v10812_v2  ;;  %v17343_v2 = vunpack.c.l.bf16 %v14460_v60  ;;  %v12721_v19 = vld [vmem:[#allocation9 + $0x3d8] sm:$0xff]   ;;  %vm17345_vm13 = vnez %v17287_v62  ;;  %5027 = vmatprep.mubr.bf16.mxu1 %v12681_v21  ;;  %v12683_v21 = vld [vmem:[#allocation2 + $0x200] ss:$36 sps:$4 sm:$0xff]  }
  0xc3   : > { %v1510_v31 = vsel %vm17340_vm4, %v1507_v6, %v14710_v44  ;;  %v2015_v3 = vpack.c.bf16 %v14736_v16, %v14731_v56  ;;  %1767 = vst [vmem:[#allocation2 + $0x2b8] sm:$0xff] %v9951_v42  ;;  %v17341_v6 = vunpack.c.l.bf16 %v14679_v61  ;;  %17342 = vst [vmem:[#allocation75_spill] sm:$0xff] %v14752_v30  ;;  %v14782_v17 = vld [vmem:[%s13913_s14 + $0x58] sm:$0xf] }
  0xc4   : > { %v1531_v40 = vsel %vm14265_vm11, %v1510_v31, 0.0  ;;  %v14758_v31 = vrot.slane %v17119_v28, 7  ;;  %v1511_v42 = vrot.slane %v17343_v2, 1  ;;  %1670 = vst [vmem:[#allocation2 + $0x290] sm:$0xf] %v10801_v15  ;;  %vm17347_vm4 = vmmov %vm17339_vm14  ;;  %11294 = vmatpush3.bf16.msra.mxu1 %v12721_v19  ;;  %v17130_v48 = vunpack.c.l.bf16 %v14782_v17 }
  0xc5   : > { %v10802_v18 = vpack.c.bf16 %v1531_v40, %v1531_v40  ;;  %v1905_v26 = vrot.slane %v17341_v6, 7  ;;  %v10838_v35 = vcombine.low %v2015_v3, %v14632_v58  ;;  %v9997_v34 = vcombine.high %v2015_v3, %v14696_v47  ;;  %1764 = vst [vmem:[#allocation2 + $0x278] sm:$0xf] %v10801_v15  ;;  %1858 = vst [vmem:[#allocation2 + $0x260] sm:$0xf] %v10801_v15 }
  0xc6   : > { %v14764_v40 = vpack.c.bf16 %v14561_v57, %v14545_v33  ;;  %v17346_v3 = vunpack.c.l.bf16 %v14548_v41  ;;  %v1687_v33 = vpack.c.bf16 %v14626_v24, %v14571_v37  ;;  %v9943_v57 = vcombine.low %v14460_v60, %v14548_v41  ;;  %v14779_v2 = vld [vmem:[%s13913_s14 + $0x54] sm:$0xf]  ;;  %v14794_v41 = vld [vmem:[#allocation9 + $0x478] sm:$0xff]  }
  0xc7   : > { %1672 = vst [vmem:[#allocation2 + $0x2b4] sm:$0xf] %v10802_v18  ;;  %1766 = vst [vmem:[#allocation2 + $0x29c] sm:$0xf] %v10802_v18  ;;  %v14770_v8 = vsel %vm17339_vm14, %v1903_v0, %v1905_v26  ;;  %vm17348_vm14 = vcmask 1046528   ;;  %12365 = vmatprep.subr.bf16.mxu0 %v14794_v41  ;;  %v17353_v19 = vrot.slane %v14390_v22, 7 }
  0xc8   : > { %17344 = vst [vmem:[#allocation76_spill] sm:$0xff] %v14764_v40  ;;  %13415 = vmatmul.mubr.msk.bf16.gmra.mxu0 %vm17345_vm13, %v14764_v40  ;;  %1860 = vst [vmem:[#allocation2 + $0x284] sm:$0xf] %v10802_v18  ;;  %v1513_v6 = vrot.slane %v17346_v3, 1  ;;  %v14787_v18 = vsel %vm17347_vm4, %v1905_v26, %v14758_v31  ;;  %v14792_v37 = vsel %vm14097_vm6, %v14770_v8, 0.0  ;;  %v1512_v0 = vsel %vm17348_vm14, %v14710_v44, %v1511_v42 }
  0xc9   : > { %4898 = vmatprep.mubr.bf16.mxu0 %v14579_v13  ;;  %2096 = vst [vmem:[#allocation2 + $0x3a8] sm:$0xff] %v10838_v35  ;;  %2098 = vst [vmem:[#allocation2 + $0x3cc] sm:$0xff] %v9997_v34  ;;  %v14799_v24 = vsel %vm14103_vm7, %v14787_v18, 0.0  ;;  %v10815_v26 = vcombine.low %v1687_v33, %v14460_v60  ;;  %vm17350_vm4 = vnez %v17280_v50  ;;  %vm17351_vm6 = vnez %v17284_v29  ;;  %v12685_v44 = vld [vmem:[#allocation2 + $0x24c] ss:$36 sps:$4 sm:$0xff]   ;;  %5028 = vmatmul.mubr.bf16.gmra.mxu1 %v12683_v21 }
  0xca   : > { %2284 = vst [vmem:[#allocation2 + $0x378] sm:$0xff] %v10838_v35  ;;  %2286 = vst [vmem:[#allocation2 + $0x39c] sm:$0xff] %v9997_v34  ;;  %v2018_v35 = vpack.c.bf16 %v14799_v24, %v14792_v37  ;;  %v1532_v34 = vsel %vm17350_vm4, %v1512_v0, 0.0  ;;  %v9955_v28 = vcombine.high %v1687_v33, %v9943_v57  ;;  %v17131_v60 = vunpack.c.l.bf16 %v14779_v2  ;;  %v12737_v57 = vld [vmem:[#allocation9 + $0x410] sm:$0xff]   ;;  %5035 = vmatprep.mubr.bf16.mxu1 %v12685_v44 }
  0xcb   : > { %vm17349_vm3 = vmmov %vm17348_vm14  ;;  %v10804_v13 = vpack.c.bf16 %v1532_v34, %v1532_v34  ;;  %1769 = vst [vmem:[#allocation2 + $0x2dc] sm:$0xff] %v10815_v26  ;;  %v14818_v0 = vcombine.low %v14779_v2, %v14782_v17  ;;  %vm17355_vm14 = vnez %v17316_v54  ;;  %v12738_v34 = vld [vmem:[#allocation9 + $0x3d0] sm:$0xff]   ;;  %11295 = vmatprep.subr.bf16.mxu1 %v12737_v57  ;;  %vm17360_vm7 = vcmask 1040384  }
  0xcc   : > { %v1514_v15 = vsel %vm17349_vm3, %v1511_v42, %v1513_v6  ;;  %v10841_v40 = vcombine.low %v2018_v35, %v14679_v61  ;;  %v10001_v10 = vcombine.high %v2018_v35, %v14752_v30  ;;  %1771 = vst [vmem:[#allocation2 + $0x300] sm:$0xff] %v9955_v28  ;;  %vm17354_vm3 = vcmask 1040384   ;;  %vm17361_vm2 = vmmov %vm17360_vm7  ;;  %11296 = vmatpush3.bf16.msra.mxu1 %v12738_v34 }
  0xcd   : > { %v1533_v3 = vsel %vm17351_vm6, %v1514_v15, 0.0  ;;  %17352 = vst [vmem:[#allocation77_spill] sm:$0xff] %v14818_v0  ;;  %v1486_v33 = vsel %vm17354_vm3, %v14603_v43, %v17353_v19  ;;  %1674 = vst [vmem:[#allocation2 + $0x2d8] sm:$0xf] %v10804_v13  ;;  %v1909_v15 = vrot.slane %v17131_v60, 7  ;;  %v14828_v28 = vrot.slane %v17130_v48, 7 }
  0xce   : > { %v10805_v42 = vpack.c.bf16 %v1533_v3, %v1533_v3  ;;  %1768 = vst [vmem:[#allocation2 + $0x2c0] sm:$0xf] %v10804_v13  ;;  %1862 = vst [vmem:[#allocation2 + $0x2a8] sm:$0xf] %v10804_v13  ;;  %v14832_v26 = vsel %vm17355_vm14, %v1486_v33, 0.0  ;;  %v17356_v43 = vunpack.c.l.bf16 %v14551_v32  ;;  %v17133_v13 = vrot.slane %v14390_v22, 1 }
  0xcf   : > { %2100 = vst [vmem:[#allocation2 + $0x3f0] sm:$0xff] %v10841_v40  ;;  %2102 = vst [vmem:[#allocation2 + $0x414] sm:$0xff] %v10001_v10  ;;  %v1690_v3 = vpack.c.bf16 %v14832_v26, %v14638_v53  ;;  %v17358_v19 = vld [vmem:[#allocation64_spill] sm:$0xff]  ;;  %v14848_v33 = vsel %vm17360_vm7, %v14758_v31, %v1909_v15  ;;  %v12687_v60 = vld [vmem:[#allocation2 + $0x248] ss:$36 sps:$4 sm:$0xff]   ;;  %v10007_v34 = vcombine.low %v14597_v46, %v14632_v58 }
  0xd0   : > { %1676 = vst [vmem:[#allocation2 + $0x2fc] sm:$0xf] %v10805_v42  ;;  %1770 = vst [vmem:[#allocation2 + $0x2e4] sm:$0xf] %v10805_v42  ;;  %v1515_v35 = vrot.slane %v17356_v43, 1  ;;  %vm17359_vm3 = vnez %v17358_v19  ;;  %v17365_v43 = vld [vmem:[#allocation53_spill] sm:$0xff] }
  0xd1   : > { %1864 = vst [vmem:[#allocation2 + $0x2cc] sm:$0xf] %v10805_v42  ;;  %2288 = vst [vmem:[#allocation2 + $0x3c0] sm:$0xff] %v10841_v40  ;;  %v14841_v42 = vpack.c.bf16 %v14621_v39, %v14609_v4  ;;  %v14860_v4 = vsel %vm14172_vm8, %v14848_v33, 0.0  ;;  %v9944_v48 = vcombine.low %v14551_v32, %v17365_v43  ;;  %5036 = vmatmul.mubr.bf16.gmra.mxu1 %v12687_v60 }
  0xd2   : > { %2290 = vst [vmem:[#allocation2 + $0x3e4] sm:$0xff] %v10001_v10  ;;  %v14852_v10 = vsel %vm17361_vm2, %v1909_v15, %v14828_v28  ;;  %v1516_v53 = vsel %vm17362_vm1, %v1513_v6, %v1515_v35  ;;  %vm17363_vm2 = vmmov %vm17362_vm1 }
  0xd3   : > { %17357 = vst [vmem:[#allocation78_spill] sm:$0xff] %v14841_v42  ;;  %13420 = vmatmul.mubr.msk.bf16.gmra.mxu0 %vm17359_vm3, %v14841_v42  ;;  %v14865_v39 = vsel %vm14178_vm9, %v14852_v10, 0.0  ;;  %v1518_v31 = vsel %vm17363_vm2, %v1515_v35, %v17133_v13  ;;  %v1534_v6 = vsel %vm14496_vm0, %v1516_v53, 0.0  ;;  %v17366_v35 = vunpack.c.l.bf16 %v14632_v58  ;;  %v12754_v42 = vld [vmem:[#allocation9 + $0x408] sm:$0xff]   ;;  %vm17370_vm7 = vmmov %vm17362_vm1 }
  0xd4   : > { %4906 = vmatprep.mubr.bf16.mxu0 %v14721_v51  ;;  %v2021_v21 = vpack.c.bf16 %v14865_v39, %v14860_v4  ;;  %v1535_v57 = vsel %vm14583_vm15, %v1518_v31, 0.0  ;;  %v10807_v15 = vpack.c.bf16 %v1534_v6, %v1534_v6  ;;  %v10818_v51 = vcombine.low %v1690_v3, %v14551_v32  ;;  %11297 = vmatprep.subr.bf16.mxu1 %v12754_v42  ;;  %vm17371_vm2 = vmmov %vm17362_vm1 }
  0xd5   : > { %v10808_v40 = vpack.c.bf16 %v1535_v57, %v1535_v57  ;;  %v1932_v13 = vrot.slane %v17366_v35, 1  ;;  %v2108_v53 = vpack.c.bf16 %v14731_v56, %v14690_v7  ;;  %v9959_v6 = vcombine.high %v1690_v3, %v9944_v48  ;;  %v12694_v57 = vld [vmem:[#allocation2 + $0x294] ss:$36 sps:$4 sm:$0xff]  }
  0xd6   : > { %v10844_v59 = vcombine.low %v2021_v21, %v14779_v2  ;;  %v10005_v31 = vcombine.high %v2021_v21, %v14818_v0  ;;  %1678 = vst [vmem:[#allocation2 + $0x320] sm:$0xf] %v10807_v15  ;;  %1772 = vst [vmem:[#allocation2 + $0x308] sm:$0xf] %v10807_v15  ;;  %v17367_v32 = vrot.slane %v14648_v55, 1  ;;  %v17368_v21 = vunpack.c.l.bf16 %v14662_v11  ;;  %5043 = vmatprep.mubr.bf16.mxu1 %v12694_v57  ;;  %v12771_v57 = vld [vmem:[#allocation9 + $0x400] sm:$0xff]  }
  0xd7   : > { %1866 = vst [vmem:[#allocation2 + $0x2f0] sm:$0xf] %v10807_v15  ;;  %1680 = vst [vmem:[#allocation2 + $0x344] sm:$0xf] %v10808_v40  ;;  %v10847_v56 = vcombine.low %v2108_v53, %v14597_v46  ;;  %v17369_v48 = vunpack.c.l.bf16 %v14679_v61  ;;  %v10013_v58 = vcombine.high %v2108_v53, %v10007_v34  ;;  %v10008_v53 = vcombine.low %v14662_v11, %v14679_v61 }
  0xd8   : > { %1773 = vst [vmem:[#allocation2 + $0x324] sm:$0xff] %v10818_v51  ;;  %1774 = vst [vmem:[#allocation2 + $0x32c] sm:$0xf] %v10808_v40  ;;  %v1933_v7 = vsel %vm17362_vm1, %v17367_v32, %v1932_v13  ;;  %v1934_v43 = vrot.slane %v17368_v21, 1  ;;  %v2111_v32 = vpack.c.bf16 %v14792_v37, %v14736_v16  ;;  %v2114_v61 = vpack.c.bf16 %v14860_v4, %v14799_v24 }
  0xd9   : > { %1868 = vst [vmem:[#allocation2 + $0x314] sm:$0xf] %v10808_v40  ;;  %v1936_v3 = vrot.slane %v17369_v48, 1  ;;  %2104 = vst [vmem:[#allocation2 + $0x438] sm:$0xff] %v10844_v59  ;;  %v1956_v51 = vsel %vm14082_vm5, %v1933_v7, 0.0  ;;  %v12755_v40 = vld [vmem:[#allocation9 + $0x3c8] sm:$0xff]   ;;  %v10009_v21 = vcombine.low %v14701_v1, %v14779_v2 }
  0xda   : > { %2106 = vst [vmem:[#allocation2 + $0x45c] sm:$0xff] %v10005_v31  ;;  %2292 = vst [vmem:[#allocation2 + $0x408] sm:$0xff] %v10844_v59  ;;  %v10837_v15 = vpack.c.bf16 %v1956_v51, %v1956_v51  ;;  %v1935_v46 = vsel %vm17370_vm7, %v1932_v13, %v1934_v43  ;;  %v17372_v13 = vunpack.c.l.bf16 %v14701_v1  ;;  %v10850_v60 = vcombine.low %v2111_v32, %v14662_v11  ;;  %v12696_v51 = vld [vmem:[#allocation2 + $0x290] ss:$36 sps:$4 sm:$0xff]  }
  0xdb   : > { %2294 = vst [vmem:[#allocation2 + $0x42c] sm:$0xff] %v10005_v31  ;;  %1775 = vst [vmem:[#allocation2 + $0x348] sm:$0xff] %v9959_v6  ;;  %v1937_v35 = vsel %vm17371_vm2, %v1934_v43, %v1936_v3  ;;  %4907 = vmatmul.mubr.bf16.gmra.mxu0 %v14723_v9  ;;  %v1957_v59 = vsel %vm14234_vm10, %v1935_v46, 0.0  ;;  %v17373_v6 = vunpack.c.l.bf16 %v14779_v2  ;;  %v10017_v7 = vcombine.high %v2111_v32, %v10008_v53 }
  0xdc   : > { %2188 = vst [vmem:[#allocation2 + $0x36c] sm:$0xff] %v10847_v56  ;;  %2190 = vst [vmem:[#allocation2 + $0x390] sm:$0xff] %v10013_v58  ;;  %v1958_v42 = vsel %vm14265_vm11, %v1937_v35, 0.0  ;;  %v1938_v31 = vrot.slane %v17372_v13, 1  ;;  %4914 = vmatprep.mubr.bf16.mxu0 %v14696_v47  ;;  %v10839_v16 = vpack.c.bf16 %v1957_v59, %v1957_v59  ;;  %11298 = vmatpush3.bf16.msra.mxu1 %v12755_v40  ;;  %v17375_v48 = vrot.slane %v14651_v63, 7 }
  0xdd   : > { %2095 = vst [vmem:[#allocation2 + $0x38c] sm:$0xf] %v10837_v15  ;;  %2189 = vst [vmem:[#allocation2 + $0x374] sm:$0xf] %v10837_v15  ;;  %v10840_v37 = vpack.c.bf16 %v1958_v42, %v1958_v42  ;;  %v1940_v34 = vrot.slane %v17373_v6, 1  ;;  %vm17376_vm2 = vcmask 1040384   ;;  %v17377_v2 = vunpack.c.l.bf16 %v14782_v17  ;;  %11299 = vmatprep.subr.bf16.mxu1 %v12771_v57  ;;  %5044 = vmatmul.mubr.bf16.gmra.mxu1 %v12696_v51 }
  0xde   : > { %v1939_v56 = vsel %vm17362_vm1, %v1936_v3, %v1938_v31  ;;  %2097 = vst [vmem:[#allocation2 + $0x3b0] sm:$0xf] %v10839_v16  ;;  %2192 = vst [vmem:[#allocation2 + $0x3b4] sm:$0xff] %v10850_v60  ;;  %v1913_v24 = vsel %vm17376_vm2, %v14828_v28, %v17375_v48  ;;  %v12772_v3 = vld [vmem:[#allocation9 + $0x3c0] sm:$0xff]   ;;  %v10853_v15 = vcombine.low %v2114_v61, %v14701_v1  ;;  %v17378_v42 = vld [vmem:[#allocation70_spill] sm:$0xff]  ;;  %v1944_v1 = vrot.slane %v14651_v63, 1 }
  0xdf   : > { %2099 = vst [vmem:[#allocation2 + $0x3d4] sm:$0xf] %v10840_v37  ;;  %2191 = vst [vmem:[#allocation2 + $0x398] sm:$0xf] %v10839_v16  ;;  %v1959_v43 = vsel %vm17350_vm4, %v1939_v56, 0.0  ;;  %v1942_v4 = vrot.slane %v17377_v2, 1  ;;  %v10021_v46 = vcombine.high %v2114_v61, %v10009_v21  ;;  %v10010_v53 = vcombine.low %v14782_v17, %v17378_v42 }
  0xe0   : > { %2193 = vst [vmem:[#allocation2 + $0x3bc] sm:$0xf] %v10840_v37  ;;  %2285 = vst [vmem:[#allocation2 + $0x380] sm:$0xf] %v10839_v16  ;;  %v10842_v40 = vpack.c.bf16 %v1959_v43, %v1959_v43  ;;  %v12701_v35 = vld [vmem:[#allocation2 + $0x2dc] ss:$36 sps:$4 sm:$0xff]   ;;  %11300 = vmatpush3.bf16.msra.mxu1 %v12772_v3  ;;  %v14960_v2 = vpack.c.bf16 %v14726_v36, %v14715_v38 }
  0xe1   : > { %2287 = vst [vmem:[#allocation2 + $0x3a4] sm:$0xf] %v10840_v37  ;;  %vm17374_vm7 = vmmov %vm17362_vm1  ;;  %v14933_v59 = vsel %vm17355_vm14, %v1913_v24, 0.0  ;;  %v1943_v28 = vsel %vm17362_vm1, %v1940_v34, %v1942_v4  ;;  %v17379_v16 = vld [vmem:[#allocation21_spill] sm:$0xff]  ;;  %v17381_v60 = vmov 0  ;;  %v17386_v56 = vld [vmem:[#allocation27_spill] sm:$0xff]  ;;  %v1945_v3 = vsel %vm17362_vm1, %v1942_v4, %v1944_v1  ;;  %5051 = vmatprep.mubr.bf16.mxu1 %v12701_v35 }
  0xe2   : > { %v1941_v11 = vsel %vm17374_vm7, %v1938_v31, %v1940_v34  ;;  %2194 = vst [vmem:[#allocation2 + $0x3d8] sm:$0xff] %v10017_v7  ;;  %2101 = vst [vmem:[#allocation2 + $0x3f8] sm:$0xf] %v10842_v40  ;;  %v1961_v13 = vsel %vm14496_vm0, %v1943_v28, 0.0  ;;  %v2117_v31 = vpack.c.bf16 %v14933_v59, %v14865_v39  ;;  %v17380_v37 = vand.u32 7, %v17379_v16  ;;  %v17384_v34 = vld [vmem:[#allocation25_spill] sm:$0xff] }
  0xe3   : > { %v1960_v58 = vsel %vm17351_vm6, %v1941_v11, 0.0  ;;  %2196 = vst [vmem:[#allocation2 + $0x3fc] sm:$0xff] %v10853_v15  ;;  %2198 = vst [vmem:[#allocation2 + $0x420] sm:$0xff] %v10021_v46  ;;  %v10845_v6 = vpack.c.bf16 %v1961_v13, %v1961_v13  ;;  %v17385_v7 = vrot.slane %v17384_v34, 1  ;;  %v17387_v61 = vrot.slane %v17386_v56, 1  ;;  %v17389_v57 = vld [vmem:[#allocation26_spill] sm:$0xff]  ;;  %13424 = vmatmul.mubr.msk.bf16.gmra.mxu0 %vm14286_vm12, %v14960_v2 }
  0xe4   : > { %v10843_v32 = vpack.c.bf16 %v1960_v58, %v1960_v58  ;;  %2195 = vst [vmem:[#allocation2 + $0x3e0] sm:$0xf] %v10842_v40  ;;  %2289 = vst [vmem:[#allocation2 + $0x3c8] sm:$0xf] %v10842_v40  ;;  %vm14945_vm7 = vcmp.ne.s32.totalorder %v17380_v37, 7  ;;  %v17390_v11 = vunpack.c.l.bf16 %v17389_v57  ;;  %v17391_v43 = vld [vmem:[#allocation28_spill] sm:$0xff]  ;;  %v10856_v58 = vcombine.low %v2117_v31, %v14782_v17  ;;  %4922 = vmatprep.mubr.bf16.mxu0 %v14752_v30 }
  0xe5   : > { %v17382_v60 = vsel %vm14945_vm7, 4294967295, %v17381_v60  ;;  %vm17388_vm2 = vmmov %vm17362_vm1  ;;  %v17392_v48 = vunpack.c.l.bf16 %v17391_v43  ;;  %17393 = vst [vmem:[#allocation70_spill] sm:$0xff] %v14960_v2  ;;  %v10025_v40 = vcombine.high %v2117_v31, %v10010_v53  ;;  %v1962_v38 = vsel %vm14583_vm15, %v1945_v3, 0.0  ;;  %v17394_v51 = vld [vmem:[#allocation29_spill] sm:$0xff]  ;;  %v12787_v31 = vld [vmem:[#allocation9 + $0x78] sm:$0xff]  }
  0xe6   : > { %17383 = vst [vmem:[#allocation53_spill] sm:$0xff] %v17382_v60  ;;  %2103 = vst [vmem:[#allocation2 + $0x41c] sm:$0xf] %v10843_v32  ;;  %v1101_v21 = vsel %vm17388_vm2, %v17387_v61, %v17385_v7  ;;  %v2359_v39 = vrot.slane %v17390_v11, 1  ;;  %v17395_v46 = vrot.slane %v17394_v51, 1  ;;  %v17397_v28 = vld [vmem:[#allocation37_spill] sm:$0xff]  ;;  %11421 = vmatprep.subr.bf16.mxu1 %v12787_v31 }
  0xe7   : > { %2197 = vst [vmem:[#allocation2 + $0x404] sm:$0xf] %v10843_v32  ;;  %2291 = vst [vmem:[#allocation2 + $0x3ec] sm:$0xf] %v10843_v32  ;;  %v2361_v24 = vrot.slane %v17392_v48, 1  ;;  %v1109_v15 = vsel %vm14945_vm7, %v1101_v21, 0.0  ;;  %v10846_v32 = vpack.c.bf16 %v1962_v38, %v1962_v38  ;;  %v17398_v42 = vunpack.c.l.bf16 %v17397_v28 }
  0xe8   : > { %2105 = vst [vmem:[#allocation2 + $0x440] sm:$0xf] %v10845_v6  ;;  %2199 = vst [vmem:[#allocation2 + $0x428] sm:$0xf] %v10845_v6  ;;  %v10782_v36 = vpack.c.bf16 %v1109_v15, %v1109_v15  ;;  %v17399_v34 = vld [vmem:[#allocation44_spill] sm:$0xff]  ;;  %v17400_v61 = vcombine.low %v17391_v43, %v17397_v28  ;;  %v17406_v38 = vld [vmem:[#allocation42_spill] sm:$0xff] }
  0xe9   : > { %2293 = vst [vmem:[#allocation2 + $0x410] sm:$0xf] %v10845_v6  ;;  %vm17396_vm2 = vmmov %vm17362_vm1  ;;  %v2362_v17 = vsel %vm17362_vm1, %v2359_v39, %v2361_v24  ;;  %v2363_v53 = vrot.slane %v17398_v42, 1  ;;  %v13290_v6 = vld [vmem:[%s13913_s14 + $0x68] sm:$0xf]  ;;  %v17410_v42 = vld [vmem:[#allocation51_spill] sm:$0xff] }
  0xea   : > { %v2360_v4 = vsel %vm17396_vm2, %v17395_v46, %v2359_v39  ;;  %2200 = vst [vmem:[#allocation2 + $0x444] sm:$0xff] %v10856_v58  ;;  %2202 = vst [vmem:[#allocation2 + $0x468] sm:$0xff] %v10025_v40  ;;  %v2384_v13 = vsel %vm14234_vm10, %v2362_v17, 0.0  ;;  %v10888_v7 = vcombine.low %v17399_v34, %v13290_v6  ;;  %v10083_v21 = vcombine.high %v17399_v34, %v17400_v61  ;;  %v12703_v57 = vld [vmem:[#allocation2 + $0x2d8] ss:$36 sps:$4 sm:$0xff]   ;;  %v17402_v39 = vld [vmem:[#allocation38_spill] sm:$0xff] }
  0xeb   : > { %v2383_v35 = vsel %vm14082_vm5, %v2360_v4, 0.0  ;;  %1349 = vst [vmem:[#allocation2 + $0x230] sm:$0xf] %v10782_v36  ;;  %1443 = vst [vmem:[#allocation2 + $0x218] sm:$0xf] %v10782_v36  ;;  %v10877_v37 = vpack.c.bf16 %v2384_v13, %v2384_v13  ;;  %v17403_v48 = vunpack.c.l.bf16 %v17402_v39  ;;  %v17404_v58 = vld [vmem:[#allocation45_spill] sm:$0xff]  ;;  %5052 = vmatmul.mubr.bf16.gmra.mxu1 %v12703_v57 }
  0xec   : > { %v10875_v16 = vpack.c.bf16 %v2383_v35, %v2383_v35  ;;  %2107 = vst [vmem:[#allocation2 + $0x464] sm:$0xf] %v10846_v32  ;;  %2201 = vst [vmem:[#allocation2 + $0x44c] sm:$0xf] %v10846_v32  ;;  %v17405_v40 = vunpack.c.l.bf16 %v17404_v58  ;;  %v17407_v36 = vld [vmem:[#allocation52_spill] sm:$0xff]  ;;  %v17408_v35 = vld [vmem:[#allocation31_spill] sm:$0xff]  ;;  %v15019_v58 = vpack.c.bf16 %v14787_v18, %v14770_v8 }
  0xed   : > { %2295 = vst [vmem:[#allocation2 + $0x434] sm:$0xf] %v10846_v32  ;;  %vm17401_vm2 = vmmov %vm17362_vm1  ;;  %v2365_v3 = vrot.slane %v17403_v48, 1  ;;  %v2541_v46 = vpack.c.bf16 %v17407_v36, %v17406_v38  ;;  %v12708_v43 = vld [vmem:[#allocation2 + $0x324] ss:$36 sps:$4 sm:$0xff]   ;;  %v17409_v28 = vrot.slane %v17408_v35, 7 }
  0xee   : > { %v2364_v11 = vsel %vm17401_vm2, %v2361_v24, %v2363_v53  ;;  %v2367_v15 = vrot.slane %v17405_v40, 1  ;;  %2522 = vst [vmem:[#allocation2 + $0x4ac] sm:$0xf] %v10875_v16  ;;  %2616 = vst [vmem:[#allocation2 + $0x494] sm:$0xf] %v10875_v16  ;;  %vm17411_vm1 = vcmask 1040384   ;;  %13427 = vmatmul.mubr.msk.bf16.gmra.mxu0 %vm17345_vm13, %v15019_v58  ;;  %5059 = vmatprep.mubr.bf16.mxu1 %v12708_v43 }
  0xef   : > { %v2385_v4 = vsel %vm14265_vm11, %v2364_v11, 0.0  ;;  %2524 = vst [vmem:[#allocation2 + $0x4d0] sm:$0xf] %v10877_v37  ;;  %2619 = vst [vmem:[#allocation2 + $0x4d4] sm:$0xff] %v10888_v7  ;;  %v13291_v24 = vld [vmem:[%s13913_s14 + $0x70] sm:$0xf]  ;;  %v2340_v13 = vsel %vm17411_vm1, %v17410_v42, %v17409_v28  ;;  %v2366_v61 = vsel %vm17401_vm2, %v2363_v53, %v2365_v3  ;;  %4930 = vmatprep.mubr.bf16.mxu0 %v14818_v0 }
  0xf0   : > { %2621 = vst [vmem:[#allocation2 + $0x4f8] sm:$0xff] %v10083_v21  ;;  %2618 = vst [vmem:[#allocation2 + $0x4b8] sm:$0xf] %v10877_v37  ;;  %v13292_v17 = vld [vmem:[%s13913_s14 + $0x74] sm:$0xf]  ;;  %v17412_v31 = vld [vmem:[#allocation46_spill] sm:$0xff]  ;;  %v10878_v16 = vpack.c.bf16 %v2385_v4, %v2385_v4  ;;  %v10891_v7 = vcombine.low %v2541_v46, %v13291_v24 }
  0xf1   : > { %2712 = vst [vmem:[#allocation2 + $0x4a0] sm:$0xf] %v10877_v37  ;;  %v10075_v32 = vcombine.low %v13291_v24, %v13292_v17  ;;  %v17413_v6 = vunpack.c.l.bf16 %v17412_v31  ;;  %vm17414_vm12 = vmmov %vm17401_vm2  ;;  %v2386_v37 = vsel %vm17350_vm4, %v2366_v61, 0.0  ;;  %v15015_v48 = vsel %vm17355_vm14, %v2340_v13, 0.0  ;;  %v17417_v18 = vld [vmem:[#allocation54_spill] sm:$0xff] }
  0xf2   : > { %v2368_v11 = vsel %vm17414_vm12, %v2365_v3, %v2367_v15  ;;  %17415 = vst [vmem:[#allocation21_spill] sm:$0xff] %v15019_v58  ;;  %2526 = vst [vmem:[#allocation2 + $0x4f4] sm:$0xf] %v10878_v16  ;;  %v10880_v53 = vpack.c.bf16 %v2386_v37, %v2386_v37  ;;  %v2371_v38 = vrot.slane %v17408_v35, 1  ;;  %v2544_v57 = vpack.c.bf16 %v15015_v48, %v17417_v18  ;;  %v13293_v36 = vld [vmem:[%s13913_s14 + $0x7c] sm:$0xf] }
  0xf3   : > { %v2369_v34 = vrot.slane %v17413_v6, 1  ;;  %v2387_v21 = vsel %vm17351_vm6, %v2368_v11, 0.0  ;;  %v10087_v39 = vcombine.high %v2541_v46, %v10075_v32  ;;  %2620 = vst [vmem:[#allocation2 + $0x4dc] sm:$0xf] %v10878_v16  ;;  %2714 = vst [vmem:[#allocation2 + $0x4c4] sm:$0xf] %v10878_v16 }
  0xf4   : > { %v10881_v3 = vpack.c.bf16 %v2387_v21, %v2387_v21  ;;  %2623 = vst [vmem:[#allocation2 + $0x51c] sm:$0xff] %v10891_v7  ;;  %vm17416_vm12 = vmmov %vm17401_vm2  ;;  %v13294_v46 = vld [vmem:[%s13913_s14 + $0x78] sm:$0xf]  ;;  %v17418_v24 = vrot.slane %v14373_v52, 1  ;;  %v17419_v17 = vrot.slane %v14390_v22, 1  ;;  %v17422_v42 = vrot.slane %v14648_v55, 1 }
  0xf5   : > { %v2370_v40 = vsel %vm17416_vm12, %v2367_v15, %v2369_v34  ;;  %2625 = vst [vmem:[#allocation2 + $0x540] sm:$0xff] %v10087_v39  ;;  %v10076_v4 = vcombine.low %v13294_v46, %v13293_v36  ;;  %vm17420_vm1 = vmmov %vm17401_vm2  ;;  %v12718_v13 = vld [vmem:[#allocation2 + $0x134] ss:$36 sps:$4 sm:$0xff]   ;;  %v10894_v6 = vcombine.low %v2544_v57, %v13294_v46  ;;  %v12710_v11 = vld [vmem:[#allocation2 + $0x320] ss:$36 sps:$4 sm:$0xff]  }
  0xf6   : > { %v2388_v8 = vsel %vm14496_vm0, %v2370_v40, 0.0  ;;  %v1528_v15 = vsel %vm17420_vm1, %v17419_v17, %v17418_v24  ;;  %2528 = vst [vmem:[#allocation2 + $0x518] sm:$0xf] %v10880_v53  ;;  %2530 = vst [vmem:[#allocation2 + $0x53c] sm:$0xf] %v10881_v3  ;;  %v17424_v37 = vld [vmem:[#allocation69_spill] sm:$0xff]  ;;  %v10830_v40 = vpack.c.bf16 %v14390_v22, %v14832_v26  ;;  %5060 = vmatmul.mubr.bf16.gmra.mxu1 %v12710_v11 }
  0xf7   : > { %2622 = vst [vmem:[#allocation2 + $0x500] sm:$0xf] %v10880_v53  ;;  %2624 = vst [vmem:[#allocation2 + $0x524] sm:$0xf] %v10881_v3  ;;  %v10883_v32 = vpack.c.bf16 %v2388_v8, %v2388_v8  ;;  %v1536_v28 = vsel %vm14945_vm7, %v1528_v15, 0.0  ;;  %v10091_v16 = vcombine.high %v2544_v57, %v10076_v4  ;;  %v15052_v21 = vpack.c.bf16 %v17386_v56, %v17424_v37  ;;  %v12739_v18 = vld [vmem:[#allocation9 + $0x470] sm:$0xff]  }
  0xf8   : > { %2716 = vst [vmem:[#allocation2 + $0x4e8] sm:$0xf] %v10880_v53  ;;  %2718 = vst [vmem:[#allocation2 + $0x50c] sm:$0xf] %v10881_v3  ;;  %v10820_v61 = vpack.c.bf16 %v1536_v28, %v1536_v28  ;;  %v12714_v7 = vld [vmem:[#allocation2 + $0x36c] ss:$36 sps:$4 sm:$0xff]  }
  0xf9   : > { %vm17421_vm2 = vmmov %vm17420_vm1  ;;  %2532 = vst [vmem:[#allocation2 + $0x560] sm:$0xf] %v10883_v32  ;;  %5067 = vmatprep.mubr.bf16.mxu1 %v12714_v7  ;;  %v12716_v22 = vld [vmem:[#allocation2 + $0x130] ss:$36 sps:$4 sm:$0xff]   ;;  %v12719_v26 = vld [vmem:[#allocation2 + $0x368] ss:$36 sps:$4 sm:$0xff]  }
  0xfa   : > { %v2372_v43 = vsel %vm17421_vm2, %v2369_v34, %v2371_v38  ;;  %vm17423_vm12 = vmmov %vm17420_vm1  ;;  %2626 = vst [vmem:[#allocation2 + $0x548] sm:$0xf] %v10883_v32  ;;  %v12726_v8 = vld [vmem:[#allocation2 + $0x17c] ss:$36 sps:$4 sm:$0xff]   ;;  %v12733_v57 = vld [vmem:[#allocation2 + $0x1c4] ss:$36 sps:$4 sm:$0xff]  }
  0xfb   : > { %v1955_v52 = vsel %vm17423_vm12, %v1944_v1, %v17422_v42  ;;  %v2389_v31 = vsel %vm14583_vm15, %v2372_v43, 0.0  ;;  %2720 = vst [vmem:[#allocation2 + $0x530] sm:$0xf] %v10883_v32  ;;  %v17425_v1 = vrot.slane %v17394_v51, 1  ;;  %2627 = vst [vmem:[#allocation2 + $0x564] sm:$0xff] %v10894_v6  ;;  %v15063_v51 = vpack.c.bf16 %v14852_v10, %v14848_v33  ;;  %v12756_v33 = vld [vmem:[#allocation9 + $0x468] sm:$0xff]  }
  0xfc   : > { %v10884_v34 = vpack.c.bf16 %v2389_v31, %v2389_v31  ;;  %v1963_v55 = vsel %vm14945_vm7, %v1955_v52, 0.0  ;;  %2629 = vst [vmem:[#allocation2 + $0x588] sm:$0xff] %v10091_v16  ;;  %1776 = vst [vmem:[#allocation2 + $0x350] sm:$0xf] %v10820_v61  ;;  %v12729_v10 = vld [vmem:[#allocation2 + $0x178] ss:$36 sps:$4 sm:$0xff]   ;;  %v10868_v52 = vpack.c.bf16 %v14651_v63, %v14933_v59  ;;  %vm17428_vm12 = vnez %v17220_v23 }
  0xfd   : > { %v2382_v39 = vsel %vm17420_vm1, %v2371_v38, %v17425_v1  ;;  %1870 = vst [vmem:[#allocation2 + $0x338] sm:$0xf] %v10820_v61  ;;  %v10858_v53 = vpack.c.bf16 %v1963_v55, %v1963_v55  ;;  %1869 = vst [vmem:[#allocation2 + $0x330] sm:$0xff] %v10830_v40  ;;  %13430 = vmatmul.mubr.msk.bf16.gmra.mxu0 %vm17359_vm3, %v15063_v51  ;;  %v12724_v38 = vld [vmem:[#allocation2 + $0x3b4] ss:$36 sps:$4 sm:$0xff]   ;;  %v12773_v4 = vld [vmem:[#allocation9 + $0x460] sm:$0xff]  }
  0xfe   : > { %v2390_v3 = vsel %vm14945_vm7, %v2382_v39, 0.0  ;;  %2534 = vst [vmem:[#allocation2 + $0x584] sm:$0xf] %v10884_v34  ;;  %2628 = vst [vmem:[#allocation2 + $0x56c] sm:$0xf] %v10884_v34  ;;  %5164 = vmatprep.mubr.bf16.mxu0 %v12718_v13  ;;  %5068 = vmatmul.mubr.bf16.gmra.mxu1 %v12719_v26  ;;  %v12804_v32 = vld [vmem:[#allocation9 + $0x450] sm:$0xff]   ;;  %v10906_v26 = vpack.c.bf16 %v17408_v35, %v15015_v48 }
  0xff   : > { %2722 = vst [vmem:[#allocation2 + $0x554] sm:$0xf] %v10884_v34  ;;  %v10896_v56 = vpack.c.bf16 %v2390_v3, %v2390_v3  ;;  %2203 = vst [vmem:[#allocation2 + $0x470] sm:$0xf] %v10858_v53  ;;  %5075 = vmatprep.mubr.bf16.mxu1 %v12724_v38  ;;  %v12728_v36 = vld [vmem:[#allocation2 + $0x3b0] ss:$36 sps:$4 sm:$0xff]  }
 0x100   : > { %2297 = vst [vmem:[#allocation2 + $0x458] sm:$0xf] %v10858_v53  ;;  %17426 = vst [vmem:[#allocation25_spill] sm:$0xff] %v15063_v51  ;;  %v12731_v46 = vld [vmem:[#allocation2 + $0x3fc] ss:$36 sps:$4 sm:$0xff]   ;;  %v12816_v42 = vld [vmem:[#allocation9 + $0x448] sm:$0xff]  }
 0x101   : > { %2630 = vst [vmem:[#allocation2 + $0x590] sm:$0xf] %v10896_v56  ;;  %2724 = vst [vmem:[#allocation2 + $0x578] sm:$0xf] %v10896_v56  ;;  %v12736_v24 = vld [vmem:[#allocation2 + $0x1c0] ss:$36 sps:$4 sm:$0xff]  }
 0x102   : > { %v12735_v17 = vld [vmem:[#allocation2 + $0x3f8] ss:$36 sps:$4 sm:$0xff]   ;;  %v12743_v15 = vld [vmem:[#allocation2 + $0x20c] ss:$36 sps:$4 sm:$0xff]   ;;  %v12741_v43 = vld [vmem:[#allocation2 + $0x444] ss:$36 sps:$4 sm:$0xff]  }
 0x103   : > { %v12750_v28 = vld [vmem:[#allocation2 + $0x254] ss:$36 sps:$4 sm:$0xff]   ;;  %v12745_v13 = vld [vmem:[#allocation2 + $0x440] ss:$36 sps:$4 sm:$0xff]   ;;  %v12746_v31 = vld [vmem:[#allocation2 + $0x208] ss:$36 sps:$4 sm:$0xff]  }
 0x104   : > { %v12748_v6 = vld [vmem:[#allocation2 + $0x48c] ss:$36 sps:$4 sm:$0xff]   ;;  %2296 = vst [vmem:[#allocation2 + $0x450] sm:$0xff] %v10868_v52  ;;  %v12831_v16 = vld [vmem:[#allocation9 + $0x440] sm:$0xff]   ;;  %v12842_v7 = vld [vmem:[#allocation9 + $0xf8] sm:$0xff]   ;;  %vm17427_vm2 = vcmask 1040384  }
 0x105   : > { %5165 = vmatmul.mubr.bf16.vlgmr.msra.gmra.mxu0 %v12716_v22  ;;  %v12753_v61 = vld [vmem:[#allocation2 + $0x250] ss:$36 sps:$4 sm:$0xff]   ;;  %v12760_v11 = vld [vmem:[#allocation2 + $0x29c] ss:$36 sps:$4 sm:$0xff]   ;;  %v12752_v34 = vld [vmem:[#allocation2 + $0x488] ss:$36 sps:$4 sm:$0xff]  }
 0x106   : > { %12366 = vmatpush3.bf16.msra.mxu0 %v14794_v41  ;;  %5172 = vmatprep.mubr.bf16.mxu0 %v12726_v8  ;;  %v12789_v41 = vld [vmem:[#allocation9 + $0x458] sm:$0xff]   ;;  %v12767_v59 = vld [vmem:[#allocation2 + $0x2e4] ss:$36 sps:$4 sm:$0xff]   ;;  %v12762_v37 = vld [vmem:[#allocation2 + $0x4d0] ss:$36 sps:$4 sm:$0xff]   ;;  %2723 = vst [vmem:[#allocation2 + $0x570] sm:$0xff] %v10906_v26 }
 0x107   : > { %12367 = vmatprep.subr.bf16.mxu0 %v12739_v18  ;;  %5076 = vmatmul.mubr.bf16.gmra.mxu1 %v12728_v36  ;;  %v12758_v55 = vld [vmem:[#allocation2 + $0x4d4] ss:$36 sps:$4 sm:$0xff]   ;;  %v12765_v1 = vld [vmem:[#allocation2 + $0x51c] ss:$36 sps:$4 sm:$0xff]   ;;  %v12777_v3 = vld [vmem:[#allocation2 + $0x32c] ss:$36 sps:$4 sm:$0xff]  }
 0x108   : > { %5083 = vmatprep.mubr.bf16.mxu1 %v12731_v46  ;;  %v12763_v63 = vld [vmem:[#allocation2 + $0x298] ss:$36 sps:$4 sm:$0xff]   ;;  %v12770_v39 = vld [vmem:[#allocation2 + $0x2e0] ss:$36 sps:$4 sm:$0xff]   ;;  %v12780_v38 = vld [vmem:[#allocation2 + $0x328] ss:$36 sps:$4 sm:$0xff]  }
 0x109   : > { %v12769_v53 = vld [vmem:[#allocation2 + $0x518] ss:$36 sps:$4 sm:$0xff]   ;;  %v12775_v40 = vld [vmem:[#allocation2 + $0x564] ss:$36 sps:$4 sm:$0xff]   ;;  %v12802_v46 = vld [vmem:[#allocation9 + $0x70] sm:$0xff]   ;;  %vm17430_vm3 = vcmask 1046528  }
 0x10a   : > { %12368 = vmatpush3.bf16.msra.mxu0 %v12739_v18  ;;  %v12779_v56 = vld [vmem:[#allocation2 + $0x560] ss:$36 sps:$4 sm:$0xff]   ;;  %v12781_v22 = vld [vmem:[#allocation2 + $0x374] ss:$36 sps:$4 sm:$0xff]   ;;  %vm17429_vm1 = vmmov %vm17427_vm2 }
 0x10b   : > { %12369 = vmatprep.subr.bf16.mxu0 %v12756_v33  ;;  %v12785_v8 = vld [vmem:[#allocation2 + $0x13c] ss:$36 sps:$4 sm:$0xff]   ;;  %v12792_v36 = vld [vmem:[#allocation2 + $0x184] ss:$36 sps:$4 sm:$0xff]   ;;  %v12803_v35 = vld [vmem:[#allocation9 + $0x30] sm:$0xff]  }
 0x10c   : > { %v12783_v18 = vld [vmem:[#allocation2 + $0x138] ss:$36 sps:$4 sm:$0xff]   ;;  %v15112_v26 = vld [vmem:[#allocation2 + $0x120] sm:$0xff]  ;;  %v12889_v2 = vld [vmem:[#allocation2 + $0x530] ss:$36 sps:$4 sm:$0xff]  }
 0x10d   : > { %5173 = vmatmul.mubr.bf16.gmra.mxu0 %v12729_v10  ;;  %v12788_v10 = vld [vmem:[#allocation9 + $0x38] sm:$0xff]  }
 0x10e   : > { %5180 = vmatprep.mubr.bf16.mxu0 %v12733_v57  ;;  %12370 = vmatpush3.bf16.msra.mxu0 %v12756_v33  ;;  %v12786_v33 = vld [vmem:[#allocation2 + $0x370] ss:$36 sps:$4 sm:$0xff]   ;;  %v12790_v57 = vld [vmem:[#allocation2 + $0x3bc] ss:$36 sps:$4 sm:$0xff]  }
 0x10f   : > { %12371 = vmatprep.subr.bf16.mxu0 %v12773_v4  ;;  %5084 = vmatmul.mubr.bf16.gmra.mxu1 %v12735_v17  ;;  %v12794_v48 = vld [vmem:[#allocation2 + $0x3b8] ss:$36 sps:$4 sm:$0xff]   ;;  %v12796_v17 = vld [vmem:[#allocation2 + $0x404] ss:$36 sps:$4 sm:$0xff]  }
 0x110   : > { %5091 = vmatprep.mubr.bf16.mxu1 %v12741_v43  ;;  %v12861_v51 = vld [vmem:[#allocation2 + $0x338] ss:$36 sps:$4 sm:$0xff]  }
 0x111   : > { %v12864_v58 = vld [vmem:[#allocation2 + $0x498] ss:$36 sps:$4 sm:$0xff]  }
 0x112   : > { %12372 = vmatpush3.bf16.msra.mxu0 %v12773_v4  ;;  %v12795_v4 = vld [vmem:[#allocation2 + $0x180] ss:$36 sps:$4 sm:$0xff]  }
 0x113   : > { %12373 = vmatprep.subr.bf16.mxu0 %v12789_v41 }
 0x115   : > { %5181 = vmatmul.mubr.bf16.gmra.mxu0 %v12736_v24  ;;  %v12814_v24 = vld [vmem:[#allocation9 + $0x68] sm:$0xff]  }
 0x116   : > { %5188 = vmatprep.mubr.bf16.mxu0 %v12743_v15  ;;  %12374 = vmatpush3.bf16.msra.mxu0 %v12789_v41  ;;  %v15074_v41 = vld [vmem:[%s13905_s30] sm:$0xf]  ;;  %v15077_v15 = vld [vmem:[%s13905_s30 + $0x1c] sm:$0xf] }
 0x117   : > { %12375 = vmatprep.subr.bf16.mxu0 %v12804_v32  ;;  %5092 = vmatmul.mubr.bf16.gmra.mxu1 %v12745_v13  ;;  %v15080_v43 = vunpack.c.l.bf16 %v15074_v41  ;;  %v12815_v13 = vld [vmem:[#allocation9 + $0x28] sm:$0xff]  }
 0x118   : > { %5099 = vmatprep.mubr.bf16.mxu1 %v12748_v6 }
 0x119   : > { %v619_v6 = vrot.slane %v15080_v43, 7 }
 0x11a   : > { %12376 = vmatpush3.bf16.msra.mxu0 %v12804_v32  ;;  %v15083_v32 = vunpack.c.l.bf16 %v15077_v15 }
 0x11b   : > { %12377 = vmatprep.subr.bf16.mxu0 %v12816_v42 }
 0x11d   : > { %5189 = vmatmul.mubr.bf16.gmra.mxu0 %v12746_v31  ;;  %v17144_v31 = vrot.slane %v15083_v32, 7 }
 0x11e   : > { %5196 = vmatprep.mubr.bf16.mxu0 %v12750_v28  ;;  %12378 = vmatpush3.bf16.msra.mxu0 %v12816_v42  ;;  %v15086_v28 = vld [vmem:[%s13905_s30 + $0x4] sm:$0xf]  ;;  %v12798_v42 = vld [vmem:[#allocation2 + $0x1cc] ss:$36 sps:$4 sm:$0xff]  }
 0x11f   : > { %12379 = vmatprep.subr.bf16.mxu0 %v12831_v16  ;;  %5100 = vmatmul.mubr.bf16.gmra.mxu1 %v12752_v34  ;;  %v601_v52 = vunpack.c.l.bf16 %v15086_v28  ;;  %v12830_v34 = vld [vmem:[#allocation9 + $0x20] sm:$0xff]  }
 0x120   : > { %5107 = vmatprep.mubr.bf16.mxu1 %v12758_v55  ;;  %v641_v55 = vsel %vm17427_vm2, %v17144_v31, %v619_v6  ;;  %vm17432_vm2 = vnez %v17223_v25 }
 0x122   : > { %12380 = vmatpush3.bf16.msra.mxu0 %v12831_v16  ;;  %v17141_v16 = vrot.slane %v15080_v43, 1 }
 0x123   : > { %11533 = vmatprep.subr.bf16.mxu0 %v12842_v7  ;;  %v652_v7 = vrot.slane %v601_v52, 1 }
 0x125   : > { %5197 = vmatmul.mubr.bf16.gmra.mxu0 %v12753_v61  ;;  %v12829_v61 = vld [vmem:[#allocation9 + $0x60] sm:$0xff]  }
 0x126   : > { %5204 = vmatprep.mubr.bf16.mxu0 %v12760_v11  ;;  %v620_v11 = vrot.slane %v601_v52, 7 }
 0x127   : > { %5108 = vmatmul.mubr.bf16.gmra.mxu1 %v12762_v37  ;;  %v12840_v37 = vld [vmem:[#allocation9 + $0x58] sm:$0xff]  }
 0x128   : > { %5115 = vmatprep.mubr.bf16.mxu1 %v12765_v1  ;;  %v642_v1 = vsel %vm17428_vm12, %v641_v55, 0.0 }
 0x12d   : > { %5205 = vmatmul.mubr.bf16.gmra.mxu0 %v12763_v63  ;;  %v9817_v63 = vcombine.low %v15074_v41, %v15086_v28 }
 0x12e   : > { %5212 = vmatprep.mubr.bf16.mxu0 %v12767_v59  ;;  %v15098_v59 = vld [vmem:[%s13905_s30 + $0x8] sm:$0xf] }
 0x12f   : > { %5116 = vmatmul.mubr.bf16.gmra.mxu1 %v12769_v53  ;;  %v653_v53 = vsel %vm17430_vm3, %v17141_v16, %v652_v7  ;;  %vm17434_vm3 = vmmov %vm17429_vm1  ;;  %v15148_v16 = vld [vmem:[%s13905_s30 + $0x14] sm:$0xf] }
 0x130   : > { %5123 = vmatprep.mubr.bf16.mxu1 %v12775_v40  ;;  %v15110_v40 = vld [vmem:[%s13905_s30 + $0xc] sm:$0xf] }
 0x131   : > { %v9818_v52 = vcombine.low %v15098_v59, %v15110_v40 }
 0x135   : > { %5213 = vmatmul.mubr.bf16.gmra.mxu0 %v12770_v39  ;;  %v15103_v39 = vsel %vm17429_vm1, %v619_v6, %v620_v11 }
 0x136   : > { %5220 = vmatprep.mubr.bf16.mxu0 %v12777_v3  ;;  %v602_v3 = vunpack.c.l.bf16 %v15098_v59 }
 0x137   : > { %5124 = vmatmul.mubr.bf16.gmra.mxu1 %v12779_v56  ;;  %v12800_v56 = vld [vmem:[#allocation2 + $0x400] ss:$36 sps:$4 sm:$0xff]  }
 0x138   : > { %5325 = vmatprep.mubr.bf16.mxu1 %v12785_v8  ;;  %v10722_v8 = vpack.c.bf16 %v15080_v43, %v642_v1 }
 0x13a   : > { %814 = vst [vmem:[#allocation2 + $0x24] sm:$0xff] %v10722_v8 }
 0x13d   : > { %5221 = vmatmul.mubr.bf16.gmra.mxu0 %v12780_v38  ;;  %v15116_v38 = vcombine.high %v15052_v21, %v15112_v26 }
 0x13e   : > { %5228 = vmatprep.mubr.bf16.mxu0 %v12781_v22  ;;  %v12801_v22 = vld [vmem:[#allocation2 + $0x1c8] ss:$36 sps:$4 sm:$0xff]  }
 0x13f   : > { %5326 = vmatmul.mubr.bf16.vlgmr.msra.gmra.mxu1 %v12783_v18  ;;  %17431 = vst [vmem:[#allocation27_spill] sm:$0xff] %v15116_v38  ;;  %v643_v18 = vsel %vm17432_vm2, %v15103_v39, 0.0  ;;  %vm17438_vm2 = vmmov %vm17434_vm3 }
 0x140   : > { %11422 = vmatpush3.bf16.msra.mxu1 %v12788_v10  ;;  %5333 = vmatprep.mubr.bf16.mxu1 %v12792_v36  ;;  %v15125_v10 = vld [vmem:[%s13905_s30 + $0x10] sm:$0xf] }
 0x141   : > { %11423 = vmatprep.subr.bf16.mxu1 %v12802_v46  ;;  %v828_v46 = vpack.c.bf16 %v643_v18, %v642_v1  ;;  %v17435_v1 = vld [vmem:[#allocation24_spill] sm:$0xff] }
 0x142   : > { %vm17436_vm1 = vnez %v17435_v1  ;;  %v12848_v1 = vld [vmem:[#allocation2 + $0x218] ss:$36 sps:$4 sm:$0xff]  }
 0x143   : > { %v10733_v6 = vcombine.low %v828_v46, %v15074_v41 }
 0x144   : > { %11424 = vmatpush3.bf16.msra.mxu1 %v12803_v35  ;;  %v622_v35 = vrot.slane %v602_v3, 7 }
 0x145   : > { %5229 = vmatmul.mubr.bf16.gmra.mxu0 %v12786_v33  ;;  %11425 = vmatprep.subr.bf16.mxu1 %v12814_v24  ;;  %v676_v33 = vsel %vm14082_vm5, %v653_v53, 0.0  ;;  %v12841_v24 = vld [vmem:[#allocation9 + $0x18] sm:$0xff]   ;;  %vm17437_vm5 = vcmask 1046528   ;;  %908 = vst [vmem:[#allocation2 + $0xc] sm:$0xff] %v10733_v6 }
 0x146   : > { %5236 = vmatprep.mubr.bf16.mxu0 %v12790_v57  ;;  %v12805_v57 = vld [vmem:[#allocation2 + $0x44c] ss:$36 sps:$4 sm:$0xff]   ;;  %v10723_v36 = vpack.c.bf16 %v676_v33, %v676_v33  ;;  %v604_v33 = vunpack.c.l.bf16 %v15125_v10  ;;  %v15169_v6 = vld [vmem:[%s13905_s30 + $0x18] sm:$0xf] }
 0x147   : > { %5334 = vmatmul.mubr.bf16.gmra.mxu1 %v12795_v4  ;;  %v15130_v4 = vcombine.low %v15052_v21, %v15112_v26  ;;  %v15140_v21 = vsel %vm17434_vm3, %v620_v11, %v622_v35  ;;  %vm17440_vm3 = vcmask 1046528  }
 0x148   : > { %5341 = vmatprep.mubr.bf16.mxu1 %v12798_v42  ;;  %11426 = vmatpush3.bf16.msra.mxu1 %v12815_v13  ;;  %v654_v42 = vrot.slane %v602_v3, 1  ;;  %v12856_v13 = vld [vmem:[#allocation9 + $0x50] sm:$0xff]   ;;  %815 = vst [vmem:[#allocation2 + $0x2c] sm:$0xf] %v10723_v36  ;;  %909 = vst [vmem:[#allocation2 + $0x14] sm:$0xf] %v10723_v36 }
 0x149   : > { %11427 = vmatprep.subr.bf16.mxu1 %v12829_v61  ;;  %17433 = vst [vmem:[#allocation26_spill] sm:$0xff] %v15130_v4  ;;  %v9823_v61 = vcombine.high %v828_v46, %v9817_v63  ;;  %v644_v53 = vsel %vm17436_vm1, %v15140_v21, 0.0  ;;  %v15157_v63 = vcombine.low %v15110_v40, %v15125_v10  ;;  %v626_v46 = vrot.slane %v604_v33, 7 }
 0x14a   : > { %v655_v3 = vsel %vm17437_vm5, %v652_v7, %v654_v42  ;;  %v735_v41 = vpack.c.bf16 %v644_v53, %v643_v18  ;;  %v12857_v7 = vld [vmem:[#allocation9 + $0x10] sm:$0xff]   ;;  %vm17439_vm5 = vnez %v17239_v5  ;;  %v12844_v5 = vld [vmem:[#allocation2 + $0x3c0] ss:$36 sps:$4 sm:$0xff]  }
 0x14b   : > { %910 = vst [vmem:[#allocation2 + $0x30] sm:$0xff] %v9823_v61  ;;  %v12807_v61 = vld [vmem:[#allocation2 + $0x448] ss:$36 sps:$4 sm:$0xff]  }
 0x14c   : > { %11428 = vmatpush3.bf16.msra.mxu1 %v12830_v34  ;;  %v677_v34 = vsel %vm14234_vm10, %v655_v3, 0.0 }
 0x14d   : > { %5237 = vmatmul.mubr.bf16.gmra.mxu0 %v12794_v48  ;;  %v603_v48 = vunpack.c.l.bf16 %v15110_v40  ;;  %11429 = vmatprep.subr.bf16.mxu1 %v12840_v37  ;;  %v10725_v36 = vpack.c.bf16 %v677_v34, %v677_v34  ;;  %v12808_v34 = vld [vmem:[#allocation2 + $0x494] ss:$36 sps:$4 sm:$0xff]  }
 0x14e   : > { %5244 = vmatprep.mubr.bf16.mxu0 %v12796_v17  ;;  %v15134_v17 = vcombine.low %v15086_v28, %v15098_v59 }
 0x14f   : > { %v624_v55 = vrot.slane %v603_v48, 7  ;;  %v656_v8 = vrot.slane %v603_v48, 1  ;;  %5342 = vmatmul.mubr.bf16.gmra.mxu1 %v12801_v22  ;;  %v10724_v48 = vcombine.low %v735_v41, %v15086_v28  ;;  %817 = vst [vmem:[#allocation2 + $0x50] sm:$0xf] %v10725_v36  ;;  %911 = vst [vmem:[#allocation2 + $0x38] sm:$0xf] %v10725_v36 }
 0x150   : > { %5349 = vmatprep.mubr.bf16.mxu1 %v15116_v38  ;;  %v9807_v40 = vcombine.high %v735_v41, %v15134_v17  ;;  %11430 = vmatpush3.bf16.msra.mxu1 %v12841_v24  ;;  %1005 = vst [vmem:[#allocation2 + $0x20] sm:$0xf] %v10725_v36  ;;  %v658_v28 = vrot.slane %v604_v33, 1  ;;  %v17441_v24 = vld [vmem:[#allocation34_spill] sm:$0xff] }
 0x151   : > { %v15151_v11 = vsel %vm17438_vm2, %v622_v35, %v624_v55  ;;  %v657_v18 = vsel %vm17440_vm3, %v654_v42, %v656_v8  ;;  %v12869_v35 = vld [vmem:[#allocation9 + $0x48] sm:$0xff]   ;;  %v605_v42 = vunpack.c.l.bf16 %v15148_v16  ;;  %11431 = vmatprep.subr.bf16.mxu1 %v12856_v13  ;;  %1004 = vst [vmem:[#allocation2 + $0x18] sm:$0xff] %v10724_v48  ;;  %vm17442_vm3 = vnez %v17441_v24 }
 0x152   : > { %v645_v37 = vsel %vm17439_vm5, %v15151_v11, 0.0  ;;  %1006 = vst [vmem:[#allocation2 + $0x3c] sm:$0xff] %v9807_v40  ;;  %v12870_v33 = vld [vmem:[#allocation9 + $0x8] sm:$0xff]  }
 0x153   : > { %v831_v22 = vpack.c.bf16 %v645_v37, %v644_v53  ;;  %v660_v36 = vrot.slane %v605_v42, 1 }
 0x154   : > { %11432 = vmatpush3.bf16.msra.mxu1 %v12857_v7 }
 0x155   : > { %5245 = vmatmul.mubr.bf16.gmra.mxu0 %v12800_v56  ;;  %v678_v56 = vsel %vm14265_vm11, %v657_v18, 0.0  ;;  %v10736_v53 = vcombine.low %v831_v22, %v15098_v59  ;;  %v9827_v41 = vcombine.high %v831_v22, %v9818_v52  ;;  %v628_v18 = vrot.slane %v605_v42, 7  ;;  %11433 = vmatprep.subr.bf16.mxu1 %v12869_v35  ;;  %v12897_v35 = vld [vmem:[#allocation9 + $0x178] sm:$0xff]  }
 0x156   : > { %5252 = vmatprep.mubr.bf16.mxu0 %v12805_v57  ;;  %v10726_v3 = vpack.c.bf16 %v678_v56, %v678_v56  ;;  %v15172_v57 = vsel %vm17438_vm2, %v624_v55, %v626_v46  ;;  %vm17443_vm2 = vcmask 1046528   ;;  %v12810_v56 = vld [vmem:[#allocation2 + $0x25c] ss:$36 sps:$4 sm:$0xff]   ;;  %v9819_v59 = vcombine.low %v15125_v10, %v15148_v16 }
 0x157   : > { %v646_v37 = vsel %vm17442_vm3, %v15172_v57, 0.0  ;;  %v659_v55 = vsel %vm17443_vm2, %v656_v8, %v658_v28  ;;  %912 = vst [vmem:[#allocation2 + $0x54] sm:$0xff] %v10736_v53  ;;  %914 = vst [vmem:[#allocation2 + $0x78] sm:$0xff] %v9827_v41  ;;  %v606_v52 = vunpack.c.l.bf16 %v15169_v6  ;;  %vm17444_vm11 = vcmask 1040384   ;;  %5350 = vmatmul.mubr.bf16.gmra.mxu1 %v15130_v4  ;;  %v12855_v4 = vld [vmem:[#allocation2 + $0x2a8] ss:$36 sps:$4 sm:$0xff]  }
 0x158   : > { %819 = vst [vmem:[#allocation2 + $0x74] sm:$0xf] %v10726_v3  ;;  %913 = vst [vmem:[#allocation2 + $0x5c] sm:$0xf] %v10726_v3  ;;  %v679_v13 = vsel %vm17350_vm4, %v659_v55, 0.0  ;;  %v15186_v48 = vsel %vm17444_vm11, %v626_v46, %v628_v18  ;;  %v15191_v22 = vcombine.low %v15148_v16, %v15169_v6  ;;  %v12886_v46 = vld [vmem:[#allocation9] sm:$0xff]   ;;  %5357 = vmatprep.mubr.bf16.mxu1 %v12810_v56  ;;  %11434 = vmatpush3.bf16.msra.mxu1 %v12870_v33 }
 0x159   : > { %1007 = vst [vmem:[#allocation2 + $0x44] sm:$0xf] %v10726_v3  ;;  %vm17445_vm10 = vmmov %vm17443_vm2  ;;  %v10728_v8 = vpack.c.bf16 %v679_v13, %v679_v13  ;;  %v12885_v3 = vld [vmem:[#allocation9 + $0x40] sm:$0xff]   ;;  %v647_v42 = vsel %vm14172_vm8, %v15186_v48, 0.0  ;;  %v630_v16 = vrot.slane %v606_v52, 7  ;;  %v662_v41 = vrot.slane %v606_v52, 1 }
 0x15a   : > { %v661_v40 = vsel %vm17445_vm10, %v658_v28, %v660_v36  ;;  %v834_v28 = vpack.c.bf16 %v647_v42, %v646_v37  ;;  %v17146_v55 = vrot.slane %v15083_v32, 1  ;;  %v9820_v13 = vcombine.low %v15169_v6, %v15077_v15  ;;  %vm17446_vm10 = vmmov %vm17444_vm11  ;;  %11435 = vmatprep.subr.bf16.mxu1 %v12885_v3 }
 0x15b   : > { %v680_v7 = vsel %vm17351_vm6, %v661_v40, 0.0  ;;  %821 = vst [vmem:[#allocation2 + $0x98] sm:$0xf] %v10728_v8  ;;  %1009 = vst [vmem:[#allocation2 + $0x68] sm:$0xf] %v10728_v8  ;;  %v15204_v37 = vsel %vm17446_vm10, %v628_v18, %v630_v16 }
 0x15c   : > { %v10729_v53 = vpack.c.bf16 %v680_v7, %v680_v7  ;;  %915 = vst [vmem:[#allocation2 + $0x80] sm:$0xf] %v10728_v8  ;;  %v12812_v40 = vld [vmem:[#allocation2 + $0x490] ss:$36 sps:$4 sm:$0xff]   ;;  %v10739_v7 = vcombine.low %v834_v28, %v15125_v10  ;;  %v9831_v31 = vcombine.high %v834_v28, %v9819_v59  ;;  %vm17448_vm11 = vmmov %vm17446_vm10  ;;  %v648_v15 = vsel %vm14178_vm9, %v15204_v37, 0.0  ;;  %11436 = vmatpush3.bf16.msra.mxu1 %v12886_v46 }
 0x15d   : > { %5253 = vmatmul.mubr.bf16.gmra.mxu0 %v12807_v61  ;;  %v12813_v61 = vld [vmem:[#allocation2 + $0x258] ss:$36 sps:$4 sm:$0xff]   ;;  %v663_v10 = vsel %vm17443_vm2, %v660_v36, %v662_v41  ;;  %vm17450_vm6 = vmmov %vm17443_vm2  ;;  %11645 = vmatprep.subr.bf16.mxu1 %v12897_v35 }
 0x15e   : > { %5260 = vmatprep.mubr.bf16.mxu0 %v12808_v34  ;;  %823 = vst [vmem:[#allocation2 + $0xbc] sm:$0xf] %v10729_v53  ;;  %1011 = vst [vmem:[#allocation2 + $0x8c] sm:$0xf] %v10729_v53  ;;  %v17447_v34 = vrot.slane %v15083_v32, 7  ;;  %v665_v18 = vsel %vm17450_vm6, %v662_v41, %v17146_v55  ;;  %v681_v8 = vsel %vm14496_vm0, %v663_v10, 0.0  ;;  %v11037_v41 = vpop.f32.mrf.mxu1  ;;  %vm17461_vm6 = vnez %v17269_v14 }
 0x15f   : > { %917 = vst [vmem:[#allocation2 + $0xa4] sm:$0xf] %v10729_v53  ;;  %v12817_v59 = vld [vmem:[#allocation2 + $0x4dc] ss:$36 sps:$4 sm:$0xff]   ;;  %916 = vst [vmem:[#allocation2 + $0x9c] sm:$0xff] %v10739_v7  ;;  %v682_v3 = vsel %vm14583_vm15, %v665_v18, 0.0  ;;  %v10731_v28 = vpack.c.bf16 %v681_v8, %v681_v8  ;;  %5358 = vmatmul.mubr.bf16.gmra.mxu1 %v12813_v61 }
 0x160   : > { %v632_v56 = vsel %vm17448_vm11, %v630_v16, %v17447_v34  ;;  %918 = vst [vmem:[#allocation2 + $0xc0] sm:$0xff] %v9831_v31  ;;  %v12819_v53 = vld [vmem:[#allocation2 + $0x2a4] ss:$36 sps:$4 sm:$0xff]   ;;  %v10732_v16 = vpack.c.bf16 %v682_v3, %v682_v3  ;;  %v10965_v31 = vpop.f32.mrf.mxu0  ;;  %v11038_v46 = vpop.f32.mrf.mxu1  ;;  %v12821_v35 = vld [vmem:[#allocation2 + $0x4d8] ss:$36 sps:$4 sm:$0xff]   ;;  %vm17464_vm10 = vmmov %vm17443_vm2  ;;  %vm17465_vm11 = vnez %v17358_v19  ;;  %vm17502_vm2 = vcmask 1040384  }
 0x161   : > { %v15214_v33 = vsel %vm17355_vm14, %v632_v56, 0.0  ;;  %825 = vst [vmem:[#allocation2 + $0xe0] sm:$0xf] %v10731_v28  ;;  %919 = vst [vmem:[#allocation2 + $0xc8] sm:$0xf] %v10731_v28  ;;  %5365 = vmatprep.mubr.bf16.mxu1 %v12819_v53 }
 0x162   : > { %v837_v42 = vpack.c.bf16 %v15214_v33, %v648_v15  ;;  %827 = vst [vmem:[#allocation2 + $0x104] sm:$0xf] %v10732_v16  ;;  %921 = vst [vmem:[#allocation2 + $0xec] sm:$0xf] %v10732_v16  ;;  %v10966_v7 = vpop.f32.mrf.mxu0  ;;  %v11040_v15 = vpop.f32.mrf.mxu1  ;;  %v12822_v10 = vld [vmem:[#allocation2 + $0x2a0] ss:$36 sps:$4 sm:$0xff]  }
 0x163   : > { %1013 = vst [vmem:[#allocation2 + $0xb0] sm:$0xf] %v10731_v28  ;;  %1015 = vst [vmem:[#allocation2 + $0xd4] sm:$0xf] %v10732_v16  ;;  %v15226_v56 = vadd.f32 %v10966_v7, %v10965_v31  ;;  %v12823_v18 = vld [vmem:[#allocation2 + $0x524] ss:$36 sps:$4 sm:$0xff]  }
 0x164   : > { %v10742_v36 = vcombine.low %v837_v42, %v15169_v6  ;;  %v9835_v34 = vcombine.high %v837_v42, %v9820_v13  ;;  %v15228_v6 = vadd.f32 %v11038_v46, %v11037_v41  ;;  %v10968_v13 = vpop.f32.mrf.mxu0  ;;  %v12825_v8 = vld [vmem:[#allocation2 + $0x2ec] ss:$36 sps:$4 sm:$0xff]   ;;  %v11041_v42 = vpop.f32.mrf.mxu1 }
 0x165   : > { %5261 = vmatmul.mubr.bf16.gmra.mxu0 %v12812_v40  ;;  %v15232_v61 = vadd.f32 %v11041_v42, %v11040_v15  ;;  %v12832_v7 = vld [vmem:[#allocation2 + $0x56c] ss:$36 sps:$4 sm:$0xff]  }
 0x166   : > { %920 = vst [vmem:[#allocation2 + $0xe4] sm:$0xff] %v10742_v36  ;;  %922 = vst [vmem:[#allocation2 + $0x108] sm:$0xff] %v9835_v34  ;;  %5268 = vmatprep.mubr.bf16.mxu0 %v12817_v59  ;;  %v10969_v3 = vpop.f32.mrf.mxu0  ;;  %v11043_v53 = vpop.f32.mrf.mxu1  ;;  %v12827_v36 = vld [vmem:[#allocation2 + $0x520] ss:$36 sps:$4 sm:$0xff]   ;;  %v12828_v34 = vld [vmem:[#allocation2 + $0x2e8] ss:$36 sps:$4 sm:$0xff]  }
 0x167   : > { %v15230_v40 = vadd.f32 %v10969_v3, %v10968_v13  ;;  %5366 = vmatmul.mubr.bf16.gmra.mxu1 %v12822_v10  ;;  %v13296_v3 = vld [vmem:[#allocation2 + $0x330] sm:$0xff] }
 0x168   : > { %v10971_v59 = vpop.f32.mrf.mxu0  ;;  %5373 = vmatprep.mubr.bf16.mxu1 %v12825_v8  ;;  %v11044_v16 = vpop.f32.mrf.mxu1  ;;  %v15239_v15 = vcombine.high %v13296_v3, %v15112_v26 }
 0x169   : > { %v15236_v41 = vadd.f32 %v11044_v16, %v11043_v53 }
 0x16a   : > { %v10972_v28 = vpop.f32.mrf.mxu0  ;;  %v11046_v13 = vpop.f32.mrf.mxu1  ;;  %17451 = vst [vmem:[#allocation28_spill] sm:$0xff] %v15239_v15 }
 0x16b   : > { %v15234_v31 = vadd.f32 %v10972_v28, %v10971_v59  ;;  %v12834_v28 = vld [vmem:[#allocation2 + $0x568] ss:$36 sps:$4 sm:$0xff]  }
 0x16c   : > { %v10974_v46 = vpop.f32.mrf.mxu0 }
 0x16d   : > { %5269 = vmatmul.mubr.bf16.gmra.mxu0 %v12821_v35  ;;  %v11047_v35 = vpop.f32.mrf.mxu1 }
 0x16e   : > { %5276 = vmatprep.mubr.bf16.mxu0 %v12823_v18  ;;  %v10975_v42 = vpop.f32.mrf.mxu0  ;;  %v15243_v18 = vadd.f32 %v11047_v35, %v11046_v13  ;;  %v12837_v13 = vld [vmem:[#allocation2 + $0x37c] ss:$36 sps:$4 sm:$0xff]  }
 0x16f   : > { %v15241_v10 = vadd.f32 %v10975_v42, %v10974_v46  ;;  %v11049_v55 = vpop.f32.mrf.mxu1  ;;  %5374 = vmatmul.mubr.bf16.gmra.mxu1 %v12828_v34  ;;  %v15251_v46 = vcombine.low %v13296_v3, %v15112_v26  ;;  %v12838_v42 = vld [vmem:[#allocation2 + $0x140] ss:$36 sps:$4 sm:$0xff]   ;;  %v12839_v3 = vld [vmem:[#allocation2 + $0x188] ss:$36 sps:$4 sm:$0xff]  }
 0x170   : > { %v10977_v8 = vpop.f32.mrf.mxu0  ;;  %5381 = vmatprep.mubr.bf16.mxu1 %v15239_v15 }
 0x171   : > { %v11050_v53 = vpop.f32.mrf.mxu1  ;;  %17452 = vst [vmem:[#allocation29_spill] sm:$0xff] %v15251_v46 }
 0x172   : > { %v10978_v59 = vpop.f32.mrf.mxu0  ;;  %v15248_v44 = vadd.f32 %v11050_v53, %v11049_v55 }
 0x173   : > { %v15246_v16 = vadd.f32 %v10978_v59, %v10977_v8  ;;  %v11052_v54 = vpop.f32.mrf.mxu1  ;;  %v12835_v59 = vld [vmem:[#allocation2 + $0x378] ss:$36 sps:$4 sm:$0xff]  }
 0x174   : > { %v10980_v45 = vpop.f32.mrf.mxu0 }
 0x175   : > { %5277 = vmatmul.mubr.bf16.gmra.mxu0 %v12827_v36  ;;  %v11053_v36 = vpop.f32.mrf.mxu1 }
 0x176   : > { %5284 = vmatprep.mubr.bf16.mxu0 %v12832_v7  ;;  %v10981_v35 = vpop.f32.mrf.mxu0  ;;  %v15255_v7 = vadd.f32 %v11053_v36, %v11052_v54  ;;  %v12847_v36 = vld [vmem:[#allocation2 + $0x1d0] ss:$36 sps:$4 sm:$0xff]  }
 0x177   : > { %v15253_v34 = vadd.f32 %v10981_v35, %v10980_v45  ;;  %v11055_v50 = vpop.f32.mrf.mxu1  ;;  %5382 = vmatmul.mubr.bf16.gmra.mxu1 %v15251_v46  ;;  %v12846_v45 = vld [vmem:[#allocation2 + $0x3c4] ss:$36 sps:$4 sm:$0xff]  }
 0x178   : > { %17453 = vst [vmem:[#allocation37_spill] sm:$0xff] %v15255_v7  ;;  %v10983_v29 = vpop.f32.mrf.mxu0  ;;  %5389 = vmatprep.mubr.bf16.mxu1 %v12837_v13 }
 0x179   : > { %v11056_v8 = vpop.f32.mrf.mxu1 }
 0x17a   : > { %v10984_v55 = vpop.f32.mrf.mxu0  ;;  %v15260_v49 = vadd.f32 %v11056_v8, %v11055_v50  ;;  %v12850_v50 = vld [vmem:[#allocation9 + $0xb0] sm:$0xff]  }
 0x17b   : > { %v15258_v53 = vadd.f32 %v10984_v55, %v10983_v29  ;;  %v11058_v54 = vpop.f32.mrf.mxu1  ;;  %v12858_v29 = vld [vmem:[#allocation9 + $0xe8] sm:$0xff]  }
 0x17c   : > { %17454 = vst [vmem:[#allocation44_spill] sm:$0xff] %v15260_v49  ;;  %v10986_v35 = vpop.f32.mrf.mxu0  ;;  %v12898_v49 = vld [vmem:[#allocation9 + $0x138] sm:$0xff]  }
 0x17d   : > { %5285 = vmatmul.mubr.bf16.gmra.mxu0 %v12834_v28  ;;  %v11059_v28 = vpop.f32.mrf.mxu1 }
 0x17e   : > { %12381 = vmatprep.mubr.bf16.mxu0 %v12838_v42  ;;  %v10987_v52 = vpop.f32.mrf.mxu0  ;;  %v15264_v13 = vadd.f32 %v11059_v28, %v11058_v54  ;;  %v12854_v54 = vld [vmem:[#allocation2 + $0x260] ss:$36 sps:$4 sm:$0xff]  }
 0x17f   : > { %v15262_v12 = vadd.f32 %v10987_v52, %v10986_v35  ;;  %v11077_v24 = vpop.f32.mrf.mxu1  ;;  %5390 = vmatmul.mubr.bf16.gmra.mxu1 %v12835_v59  ;;  %v12853_v35 = vld [vmem:[#allocation2 + $0x40c] ss:$36 sps:$4 sm:$0xff]  }
 0x180   : > { %17455 = vst [vmem:[#allocation38_spill] sm:$0xff] %v15264_v13  ;;  %v10989_v42 = vpop.f32.mrf.mxu0  ;;  %5397 = vmatprep.mubr.bf16.mxu1 %v12846_v45 }
 0x181   : > { %v11078_v8 = vpop.f32.mrf.mxu1 }
 0x182   : > { %v10990_v55 = vpop.f32.mrf.mxu0  ;;  %v11079_v52 = vadd.f32 %v11078_v8, %v11077_v24  ;;  %v12863_v24 = vld [vmem:[#allocation9 + $0xa0] sm:$0xff]  }
 0x183   : > { %v15266_v25 = vadd.f32 %v10990_v55, %v10989_v42  ;;  %v11080_v23 = vpop.f32.mrf.mxu1 }
 0x184   : > { %v10992_v28 = vpop.f32.mrf.mxu0  ;;  %v15269_v59 = vadd.f32 %v11079_v52, %v15226_v56  ;;  %v12871_v56 = vld [vmem:[#allocation9 + $0xd8] sm:$0xff]   ;;  %v12851_v52 = vld [vmem:[#allocation2 + $0x408] ss:$36 sps:$4 sm:$0xff]  }
 0x185   : > { %12382 = vmatmul.mubr.bf16.vlgmr.msra.gmra.mxu0 %v12839_v3  ;;  %v12862_v3 = vld [vmem:[#allocation9 + $0xe0] sm:$0xff]   ;;  %v11081_v46 = vpop.f32.mrf.mxu1 }
 0x186   : > { %11534 = vmatpush3.bf16.msra.mxu0 %v12843_v20  ;;  %12385 = vmatprep.mubr.bf16.mxu0 %v12847_v36  ;;  %v12859_v20 = vld [vmem:[#allocation9 + $0xa8] sm:$0xff]   ;;  %v10993_v45 = vpop.f32.mrf.mxu0  ;;  %v11082_v36 = vadd.f32 %v11081_v46, %v11080_v23  ;;  %v12860_v23 = vld [vmem:[#allocation2 + $0x2f0] ss:$36 sps:$4 sm:$0xff]  }
 0x187   : > { %11535 = vmatprep.subr.bf16.mxu0 %v12849_v27  ;;  %v15271_v15 = vadd.f32 %v10993_v45, %v10992_v28  ;;  %v11083_v42 = vpop.f32.mrf.mxu1  ;;  %5398 = vmatmul.mubr.bf16.gmra.mxu1 %v12844_v5 }
 0x188   : > { %v10995_v27 = vpop.f32.mrf.mxu0  ;;  %v15274_v55 = vadd.f32 %v11082_v36, %v15230_v40  ;;  %5405 = vmatprep.mubr.bf16.mxu1 %v12853_v35  ;;  %v13297_v40 = vld [vmem:[#allocation2 + $0x450] sm:$0xff] }
 0x189   : > { %v11084_v8 = vpop.f32.mrf.mxu1  ;;  %v15282_v35 = vcombine.high %v13297_v40, %v15112_v26  ;;  %v12879_v26 = vld [vmem:[#allocation9 + $0x90] sm:$0xff]  }
 0x18a   : > { %11536 = vmatpush3.bf16.msra.mxu0 %v12850_v50  ;;  %v10996_v50 = vpop.f32.mrf.mxu0  ;;  %v11085_v28 = vadd.f32 %v11084_v8, %v11083_v42 }
 0x18b   : > { %11537 = vmatprep.subr.bf16.mxu0 %v12858_v29  ;;  %v15276_v29 = vadd.f32 %v10996_v50, %v10995_v27  ;;  %v11086_v5 = vpop.f32.mrf.mxu1  ;;  %17456 = vst [vmem:[#allocation45_spill] sm:$0xff] %v15282_v35 }
 0x18c   : > { %v10998_v46 = vpop.f32.mrf.mxu0  ;;  %v15279_v45 = vadd.f32 %v11085_v28, %v15234_v31  ;;  %v12887_v31 = vld [vmem:[#allocation9 + $0xc8] sm:$0xff]  }
 0x18d   : > { %12386 = vmatmul.mubr.bf16.gmra.mxu0 %v12848_v1  ;;  %v12872_v1 = vld [vmem:[#allocation9 + $0x98] sm:$0xff]   ;;  %v11087_v38 = vpop.f32.mrf.mxu1 }
 0x18e   : > { %12389 = vmatprep.mubr.bf16.mxu0 %v12854_v54  ;;  %11538 = vmatpush3.bf16.msra.mxu0 %v12859_v20  ;;  %v12878_v54 = vld [vmem:[#allocation9 + $0xd0] sm:$0xff]   ;;  %v10999_v36 = vpop.f32.mrf.mxu0  ;;  %v11088_v27 = vadd.f32 %v11087_v38, %v11086_v5  ;;  %v15292_v5 = vld [vmem:[#allocation2 + $0x120] sm:$0xff] }
 0x18f   : > { %11539 = vmatprep.subr.bf16.mxu0 %v12862_v3  ;;  %v15284_v20 = vadd.f32 %v10999_v36, %v10998_v46  ;;  %v11089_v3 = vpop.f32.mrf.mxu1  ;;  %5406 = vmatmul.mubr.bf16.gmra.mxu1 %v12851_v52  ;;  %v12867_v46 = vld [vmem:[#allocation2 + $0x380] ss:$36 sps:$4 sm:$0xff]   ;;  %v12888_v36 = vld [vmem:[#allocation9 + $0x88] sm:$0xff]  }
 0x190   : > { %v11001_v42 = vpop.f32.mrf.mxu0  ;;  %v15287_v50 = vadd.f32 %v11088_v27, %v15241_v10  ;;  %5413 = vmatprep.mubr.bf16.mxu1 %v15282_v35  ;;  %v15295_v10 = vcombine.low %v13297_v40, %v15292_v5  ;;  %v12891_v27 = vld [vmem:[#allocation9 + $0xc0] sm:$0xff]  }
 0x191   : > { %v11090_v28 = vpop.f32.mrf.mxu1 }
 0x192   : > { %11540 = vmatpush3.bf16.msra.mxu0 %v12863_v24  ;;  %v11002_v8 = vpop.f32.mrf.mxu0  ;;  %v11091_v38 = vadd.f32 %v11090_v28, %v11089_v3  ;;  %17457 = vst [vmem:[#allocation42_spill] sm:$0xff] %v15295_v10  ;;  %v12892_v28 = vld [vmem:[#allocation9 + $0x80] sm:$0xff]  }
 0x193   : > { %11541 = vmatprep.subr.bf16.mxu0 %v12871_v56  ;;  %v15290_v24 = vadd.f32 %v11002_v8, %v11001_v42  ;;  %v12866_v56 = vld [vmem:[#allocation2 + $0x49c] ss:$36 sps:$4 sm:$0xff]  }
 0x194   : > { %v11004_v52 = vpop.f32.mrf.mxu0 }
 0x195   : > { %12390 = vmatmul.mubr.bf16.gmra.mxu0 %v12855_v4  ;;  %v11092_v4 = vpop.f32.mrf.mxu1 }
 0x196   : > { %12393 = vmatprep.mubr.bf16.mxu0 %v12860_v23  ;;  %11542 = vmatpush3.bf16.msra.mxu0 %v12872_v1  ;;  %v15298_v23 = vadd.f32 %v11091_v38, %v15246_v16  ;;  %v11005_v35 = vpop.f32.mrf.mxu0  ;;  %v12899_v16 = vld [vmem:[#allocation9 + $0x1f8] sm:$0xff]  }
 0x197   : > { %11543 = vmatprep.subr.bf16.mxu0 %v12878_v54  ;;  %v11093_v1 = vpop.f32.mrf.mxu1  ;;  %v15300_v42 = vadd.f32 %v11005_v35, %v11004_v52  ;;  %5414 = vmatmul.mubr.bf16.gmra.mxu1 %v15295_v10  ;;  %v12875_v52 = vld [vmem:[#allocation2 + $0x4e4] ss:$36 sps:$4 sm:$0xff]  }
 0x198   : > { %v11094_v3 = vadd.f32 %v11093_v1, %v11092_v4  ;;  %v11007_v54 = vpop.f32.mrf.mxu0  ;;  %5421 = vmatprep.mubr.bf16.mxu1 %v12866_v56  ;;  %v12876_v4 = vld [vmem:[#allocation2 + $0x410] ss:$36 sps:$4 sm:$0xff]  }
 0x199   : > { %v11095_v8 = vpop.f32.mrf.mxu1 }
 0x19a   : > { %11544 = vmatpush3.bf16.msra.mxu0 %v12879_v26  ;;  %v15304_v40 = vadd.f32 %v11094_v3, %v15253_v34  ;;  %v11008_v38 = vpop.f32.mrf.mxu0  ;;  %v12868_v26 = vld [vmem:[#allocation2 + $0x3c8] ss:$36 sps:$4 sm:$0xff]  }
 0x19b   : > { %11545 = vmatprep.subr.bf16.mxu0 %v12887_v31  ;;  %v11096_v0 = vpop.f32.mrf.mxu1  ;;  %v15306_v35 = vadd.f32 %v11008_v38, %v11007_v54 }
 0x19c   : > { %v11097_v31 = vadd.f32 %v11096_v0, %v11095_v8  ;;  %v11010_v1 = vpop.f32.mrf.mxu0  ;;  %v12877_v8 = vld [vmem:[#allocation2 + $0x458] ss:$36 sps:$4 sm:$0xff]  }
 0x19d   : > { %12394 = vmatmul.mubr.bf16.gmra.mxu0 %v12861_v51  ;;  %v11098_v51 = vpop.f32.mrf.mxu1 }
 0x19e   : > { %12397 = vmatprep.mubr.bf16.mxu0 %v12867_v46  ;;  %11546 = vmatpush3.bf16.msra.mxu0 %v12888_v36  ;;  %v15309_v10 = vadd.f32 %v11097_v31, %v15258_v53  ;;  %v11011_v34 = vpop.f32.mrf.mxu0  ;;  %v12873_v53 = vld [vmem:[#allocation2 + $0x4e0] ss:$36 sps:$4 sm:$0xff]  }
 0x19f   : > { %11547 = vmatprep.subr.bf16.mxu0 %v12891_v27  ;;  %v11099_v56 = vpop.f32.mrf.mxu1  ;;  %v15311_v46 = vadd.f32 %v11011_v34, %v11010_v1  ;;  %5422 = vmatmul.mubr.bf16.gmra.mxu1 %v12864_v58  ;;  %v12883_v58 = vld [vmem:[#allocation2 + $0x4a0] ss:$36 sps:$4 sm:$0xff]  }
 0x1a0   : > { %v11100_v3 = vadd.f32 %v11099_v56, %v11098_v51  ;;  %v11013_v30 = vpop.f32.mrf.mxu0  ;;  %5429 = vmatprep.mubr.bf16.mxu1 %v12875_v52  ;;  %v12882_v51 = vld [vmem:[#allocation2 + $0x52c] ss:$36 sps:$4 sm:$0xff]  }
 0x1a1   : > { %v11101_v36 = vpop.f32.mrf.mxu1 }
 0x1a2   : > { %11548 = vmatpush3.bf16.msra.mxu0 %v12892_v28  ;;  %v15314_v0 = vadd.f32 %v11100_v3, %v15262_v12  ;;  %v11014_v27 = vpop.f32.mrf.mxu0 }
 0x1a3   : > { %11757 = vmatprep.subr.bf16.mxu0 %v12899_v16  ;;  %v11102_v54 = vpop.f32.mrf.mxu1  ;;  %v15316_v38 = vadd.f32 %v11014_v27, %v11013_v30  ;;  %v12884_v27 = vld [vmem:[#allocation2 + $0x4e8] ss:$36 sps:$4 sm:$0xff]  }
 0x1a4   : > { %v11103_v28 = vadd.f32 %v11102_v54, %v11101_v36  ;;  %v11016_v31 = vpop.f32.mrf.mxu0 }
 0x1a5   : > { %12398 = vmatmul.mubr.bf16.gmra.mxu0 %v12868_v26  ;;  %v11104_v1 = vpop.f32.mrf.mxu1 }
 0x1a6   : > { %12401 = vmatprep.mubr.bf16.mxu0 %v12876_v4  ;;  %v15319_v16 = vadd.f32 %v11103_v28, %v15266_v25  ;;  %v11017_v26 = vpop.f32.mrf.mxu0  ;;  %v12880_v25 = vld [vmem:[#allocation2 + $0x528] ss:$36 sps:$4 sm:$0xff]  }
 0x1a7   : > { %v11105_v34 = vpop.f32.mrf.mxu1  ;;  %v15321_v12 = vadd.f32 %v11017_v26, %v11016_v31  ;;  %5430 = vmatmul.mubr.bf16.gmra.mxu1 %v12873_v53  ;;  %v13299_v53 = vld [vmem:[#allocation2 + $0x570] sm:$0xff] }
 0x1a8   : > { %v11106_v52 = vadd.f32 %v11105_v34, %v11104_v1  ;;  %v11019_v4 = vpop.f32.mrf.mxu0  ;;  %5437 = vmatprep.mubr.bf16.mxu1 %v12882_v51 }
 0x1a9   : > { %v11107_v56 = vpop.f32.mrf.mxu1 }
 0x1aa   : > { %v15324_v30 = vadd.f32 %v11106_v52, %v15271_v15  ;;  %v11020_v3 = vpop.f32.mrf.mxu0 }
 0x1ab   : > { %v11108_v36 = vpop.f32.mrf.mxu1  ;;  %v15326_v54 = vadd.f32 %v11020_v3, %v11019_v4  ;;  %v12890_v3 = vld [vmem:[#allocation2 + $0x578] ss:$36 sps:$4 sm:$0xff]  }
 0x1ac   : > { %v11109_v28 = vadd.f32 %v11108_v36, %v11107_v56  ;;  %v11022_v31 = vpop.f32.mrf.mxu0 }
 0x1ad   : > { %12402 = vmatmul.mubr.bf16.gmra.mxu0 %v12877_v8  ;;  %v11110_v26 = vpop.f32.mrf.mxu1  ;;  %v10312_v8 = vcombine.high %v13299_v53, %v15292_v5 }
 0x1ae   : > { %12405 = vmatprep.mubr.bf16.mxu0 %v12883_v58  ;;  %v15329_v1 = vadd.f32 %v11109_v28, %v15276_v29  ;;  %v11023_v15 = vpop.f32.mrf.mxu0 }
 0x1af   : > { %v11111_v34 = vpop.f32.mrf.mxu1  ;;  %v15332_v51 = vadd.f32 %v11023_v15, %v11022_v31  ;;  %5438 = vmatmul.mubr.bf16.gmra.mxu1 %v12880_v25  ;;  %v10311_v31 = vcombine.low %v13299_v53, %v15292_v5  ;;  %v13300_v25 = vld [vmem:[#allocation2 + $0x24] sm:$0xff] }
 0x1b0   : > { %v11112_v58 = vadd.f32 %v11111_v34, %v11110_v26  ;;  %v11025_v52 = vpop.f32.mrf.mxu0  ;;  %5445 = vmatprep.mubr.bf16.mxu1 %v10312_v8 }
 0x1b1   : > { %v11113_v47 = vpop.f32.mrf.mxu1 }
 0x1b2   : > { %v15335_v4 = vadd.f32 %v11112_v58, %v15284_v20  ;;  %v11026_v56 = vpop.f32.mrf.mxu0  ;;  %v12896_v20 = vld [vmem:[#allocation2 + $0xc] ss:$36 sps:$4 sm:$0xff]  }
 0x1b3   : > { %v11114_v29 = vpop.f32.mrf.mxu1  ;;  %v15337_v36 = vadd.f32 %v11026_v56, %v11025_v52  ;;  %v12894_v56 = vld [vmem:[#allocation2 + $0x8] ss:$36 sps:$4 sm:$0xff]  }
 0x1b4   : > { %v11115_v28 = vadd.f32 %v11114_v29, %v11113_v47  ;;  %v11028_v9 = vpop.f32.mrf.mxu0 }
 0x1b5   : > { %12406 = vmatmul.mubr.bf16.gmra.mxu0 %v12884_v27  ;;  %v11116_v13 = vpop.f32.mrf.mxu1  ;;  %v10387_v27 = vcombine.high %v15292_v5, %v13300_v25 }
 0x1b6   : > { %12409 = vmatprep.mubr.bf16.mxu0 %v12889_v2  ;;  %v15341_v26 = vadd.f32 %v11115_v28, %v15290_v24  ;;  %v11029_v15 = vpop.f32.mrf.mxu0 }
 0x1b7   : > { %v11117_v8 = vpop.f32.mrf.mxu1  ;;  %v15344_v2 = vadd.f32 %v11029_v15, %v11028_v9  ;;  %5446 = vmatmul.mubr.bf16.gmra.mxu1 %v10311_v31  ;;  %v12911_v31 = vld [vmem:[#allocation9 + $0x170] sm:$0xff]  }
 0x1b8   : > { %17458 = vst [vmem:[#allocation52_spill] sm:$0xff] %v15341_v26  ;;  %v11118_v34 = vadd.f32 %v11117_v8, %v11116_v13  ;;  %6263 = vmatprep.mubr.bf16.mxu1 %v10387_v27  ;;  %v10386_v13 = vcombine.low %v15292_v5, %v13300_v25  ;;  %v12905_v27 = vld [vmem:[#allocation2 + $0x54] ss:$36 sps:$4 sm:$0xff]   ;;  %v12920_v26 = vld [vmem:[#allocation9 + $0x168] sm:$0xff]  }
 0x1b9   : > { %v11119_v52 = vpop.f32.mrf.mxu1 }
 0x1ba   : > { %v15347_v47 = vadd.f32 %v11118_v34, %v15300_v42 }
 0x1bb   : > { %v11120_v53 = vpop.f32.mrf.mxu1 }
 0x1bc   : > { %17459 = vst [vmem:[#allocation31_spill] sm:$0xff] %v15347_v47  ;;  %v11121_v28 = vadd.f32 %v11120_v53, %v11119_v52 }
 0x1bd   : > { %v11031_v58 = vpop.f32.mrf.mxu0  ;;  %12410 = vmatmul.mubr.bf16.gmra.mxu0 %v12890_v3  ;;  %v11122_v9 = vpop.f32.mrf.mxu1  ;;  %v12900_v3 = vld [vmem:[#allocation9 + $0x1b8] sm:$0xff]  }
 0x1be   : > { %6424 = vmatprep.mubr.bf16.mxu0 %v12896_v20  ;;  %v15353_v15 = vadd.f32 %v11121_v28, %v15306_v35  ;;  %v12913_v20 = vld [vmem:[#allocation9 + $0x1f0] sm:$0xff]   ;;  %v12922_v35 = vld [vmem:[#allocation9 + $0x1e8] sm:$0xff]  }
 0x1bf   : > { %v11032_v24 = vpop.f32.mrf.mxu0  ;;  %v11123_v8 = vpop.f32.mrf.mxu1  ;;  %6264 = vmatmul.mubr.bf16.vlgmr.msra.gmra.mxu1 %v10386_v13 }
 0x1c0   : > { %v15349_v29 = vadd.f32 %v11032_v24, %v11031_v58  ;;  %17460 = vst [vmem:[#allocation51_spill] sm:$0xff] %v15353_v15  ;;  %v11124_v47 = vadd.f32 %v11123_v8, %v11122_v9  ;;  %v12912_v58 = vld [vmem:[#allocation9 + $0x130] sm:$0xff]   ;;  %11646 = vmatpush3.bf16.msra.mxu1 %v12898_v49  ;;  %6271 = vmatprep.mubr.bf16.mxu1 %v15134_v17  ;;  %v12924_v17 = vld [vmem:[#allocation9 + $0x160] sm:$0xff]  }
 0x1c1   : > { %v11034_v7 = vpop.f32.mrf.mxu0  ;;  %v12914_v24 = vld [vmem:[#allocation9 + $0x1b0] sm:$0xff]   ;;  %v11125_v52 = vpop.f32.mrf.mxu1  ;;  %11647 = vmatprep.subr.bf16.mxu1 %v12911_v31  ;;  %v12926_v31 = vld [vmem:[#allocation9 + $0x1e0] sm:$0xff]  }
 0x1c2   : > { %v15358_v5 = vadd.f32 %v11124_v47, %v15311_v46  ;;  %v12910_v46 = vld [vmem:[#allocation2 + $0x9c] ss:$36 sps:$4 sm:$0xff]   ;;  %v12923_v47 = vld [vmem:[#allocation9 + $0x1a8] sm:$0xff]  }
 0x1c3   : > { %v11035_v42 = vpop.f32.mrf.mxu0  ;;  %v11126_v25 = vpop.f32.mrf.mxu1 }
 0x1c4   : > { %v15355_v34 = vadd.f32 %v11035_v42, %v11034_v7  ;;  %v12903_v7 = vld [vmem:[#allocation2 + $0x50] ss:$36 sps:$4 sm:$0xff]   ;;  %v11127_v9 = vadd.f32 %v11126_v25, %v11125_v52  ;;  %11648 = vmatpush3.bf16.msra.mxu1 %v12912_v58  ;;  %v12927_v58 = vld [vmem:[#allocation9 + $0x1a0] sm:$0xff]  }
 0x1c5   : > { %v11189_v53 = vpop.f32.mrf.mxu0  ;;  %6425 = vmatmul.mubr.bf16.vlgmr.msra.gmra.mxu0 %v12894_v56  ;;  %v11128_v8 = vpop.f32.mrf.mxu1  ;;  %v12921_v56 = vld [vmem:[#allocation9 + $0x128] sm:$0xff]   ;;  %11649 = vmatprep.subr.bf16.mxu1 %v12920_v26 }
 0x1c6   : > { %11758 = vmatpush3.bf16.msra.mxu0 %v12900_v3  ;;  %6432 = vmatprep.mubr.bf16.mxu0 %v12905_v27  ;;  %v15362_v15 = vadd.f32 %v11127_v9, %v15316_v38  ;;  %v13435_v38 = vpack.c.bf16 %v15140_v21, %v15103_v39  ;;  %v17462_v39 = vrot.slane %v15080_v43, 1  ;;  %v17463_v21 = vrot.slane %v15083_v32, 1 }
 0x1c7   : > { %v11190_v28 = vpop.f32.mrf.mxu0  ;;  %11759 = vmatprep.subr.bf16.mxu0 %v12913_v20  ;;  %v11129_v3 = vpop.f32.mrf.mxu1 }
 0x1c8   : > { %v11191_v42 = vadd.f32 %v11190_v28, %v11189_v53  ;;  %v11130_v20 = vadd.f32 %v11129_v3, %v11128_v8  ;;  %13436 = vmatmul.mubr.msk.bf16.gmra.mxu1 %vm17461_vm6, %v13435_v38 }
 0x1c9   : > { %v11192_v13 = vpop.f32.mrf.mxu0  ;;  %v11131_v53 = vpop.f32.mrf.mxu1  ;;  %6279 = vmatprep.mubr.bf16.mxu1 %v15157_v63  ;;  %11650 = vmatpush3.bf16.msra.mxu1 %v12921_v56  ;;  %v12931_v56 = vld [vmem:[#allocation9 + $0x198] sm:$0xff]  }
 0x1ca   : > { %v15365_v49 = vadd.f32 %v11191_v42, %v15269_v59  ;;  %11760 = vmatpush3.bf16.msra.mxu0 %v12914_v24  ;;  %v12925_v59 = vld [vmem:[#allocation9 + $0x120] sm:$0xff]   ;;  %v15372_v24 = vadd.f32 %v11130_v20, %v15321_v12  ;;  %v12908_v42 = vld [vmem:[#allocation2 + $0x98] ss:$36 sps:$4 sm:$0xff]   ;;  %11651 = vmatprep.subr.bf16.mxu1 %v12924_v17  ;;  %v12934_v17 = vld [vmem:[#allocation9 + $0x1d0] sm:$0xff]  }
 0x1cb   : > { %v11193_v27 = vpop.f32.mrf.mxu0  ;;  %11761 = vmatprep.subr.bf16.mxu0 %v12922_v35  ;;  %v12928_v35 = vld [vmem:[#allocation9 + $0x158] sm:$0xff]   ;;  %v11132_v28 = vpop.f32.mrf.mxu1 }
 0x1cc   : > { %v11194_v52 = vadd.f32 %v11193_v27, %v11192_v13  ;;  %v11133_v12 = vadd.f32 %v11132_v28, %v11131_v53  ;;  %v12919_v13 = vld [vmem:[#allocation2 + $0xe4] ss:$36 sps:$4 sm:$0xff]   ;;  %v12929_v20 = vld [vmem:[#allocation9 + $0x118] sm:$0xff]   ;;  %v12932_v53 = vld [vmem:[#allocation9 + $0x150] sm:$0xff]  }
 0x1cd   : > { %v11195_v25 = vpop.f32.mrf.mxu0  ;;  %6433 = vmatmul.mubr.bf16.gmra.mxu0 %v12903_v7  ;;  %v675_v7 = vsel %vm17464_vm10, %v17463_v21, %v17462_v39  ;;  %v11134_v3 = vpop.f32.mrf.mxu1  ;;  %11652 = vmatpush3.bf16.msra.mxu1 %v12925_v59  ;;  %vm17508_vm10 = vmmov %vm17502_vm2 }
 0x1ce   : > { %v15375_v26 = vadd.f32 %v11194_v52, %v15274_v55  ;;  %6440 = vmatprep.mubr.bf16.mxu0 %v12910_v46  ;;  %11762 = vmatpush3.bf16.msra.mxu0 %v12923_v47  ;;  %v12930_v55 = vld [vmem:[#allocation9 + $0x1d8] sm:$0xff]   ;;  %v683_v46 = vsel %vm14945_vm7, %v675_v7, 0.0  ;;  %v15386_v43 = vadd.f32 %v11133_v12, %v15326_v54  ;;  %v15393_v54 = vpack.c.bf16 %v15172_v57, %v15151_v11  ;;  %v12933_v11 = vld [vmem:[#allocation9 + $0x110] sm:$0xff]   ;;  %v12938_v12 = vld [vmem:[#allocation9 + $0x1c8] sm:$0xff]  }
 0x1cf   : > { %v11196_v9 = vpop.f32.mrf.mxu0  ;;  %11763 = vmatprep.subr.bf16.mxu0 %v12926_v31  ;;  %v10744_v47 = vpack.c.bf16 %v683_v46, %v683_v46  ;;  %11653 = vmatprep.subr.bf16.mxu1 %v12928_v35  ;;  %v12935_v57 = vld [vmem:[#allocation9 + $0x190] sm:$0xff]  }
 0x1d0   : > { %v11197_v8 = vadd.f32 %v11196_v9, %v11195_v25  ;;  %v11135_v25 = vpop.f32.mrf.mxu1  ;;  %13439 = vmatmul.mubr.msk.bf16.gmra.mxu1 %vm17345_vm13, %v15393_v54 }
 0x1d1   : > { %v11198_v27 = vpop.f32.mrf.mxu0  ;;  %923 = vst [vmem:[#allocation2 + $0x110] sm:$0xf] %v10744_v47  ;;  %1017 = vst [vmem:[#allocation2 + $0xf8] sm:$0xf] %v10744_v47  ;;  %v11136_v31 = vadd.f32 %v11135_v25, %v11134_v3  ;;  %6287 = vmatprep.mubr.bf16.mxu1 %v15191_v22  ;;  %11654 = vmatpush3.bf16.msra.mxu1 %v12929_v20  ;;  %v12937_v20 = vld [vmem:[#allocation9 + $0x108] sm:$0xff]  }
 0x1d2   : > { %v15389_v52 = vadd.f32 %v11197_v8, %v15279_v45  ;;  %11764 = vmatpush3.bf16.msra.mxu0 %v12927_v58  ;;  %v11137_v9 = vpop.f32.mrf.mxu1  ;;  %11655 = vmatprep.subr.bf16.mxu1 %v12932_v53 }
 0x1d3   : > { %v11199_v38 = vpop.f32.mrf.mxu0  ;;  %11765 = vmatprep.subr.bf16.mxu0 %v12930_v55  ;;  %v15399_v45 = vadd.f32 %v11136_v31, %v15332_v51  ;;  %v15407_v51 = vpack.c.bf16 %v15083_v32, %v15214_v33  ;;  %v12917_v55 = vld [vmem:[#allocation2 + $0xe0] ss:$36 sps:$4 sm:$0xff]   ;;  %v17466_v31 = vld [vmem:[#allocation35_spill] sm:$0xff] }
 0x1d4   : > { %v11200_v28 = vadd.f32 %v11199_v38, %v11198_v27  ;;  %v11138_v58 = vpop.f32.mrf.mxu1  ;;  %v12940_v32 = vld [vmem:[#allocation9 + $0x140] sm:$0xff]  }
 0x1d5   : > { %v11201_v39 = vpop.f32.mrf.mxu0  ;;  %6441 = vmatmul.mubr.bf16.gmra.mxu0 %v12908_v42  ;;  %v11139_v21 = vadd.f32 %v11138_v58, %v11137_v9  ;;  %v12936_v42 = vld [vmem:[#allocation9 + $0x148] sm:$0xff]   ;;  %11656 = vmatpush3.bf16.msra.mxu1 %v12933_v11  ;;  %v12942_v33 = vld [vmem:[#allocation9 + $0x1c0] sm:$0xff]   ;;  %v15429_v11 = vld [vmem:[#allocation9 + $0x238] sm:$0xff]  }
 0x1d6   : > { %v15402_v59 = vadd.f32 %v11200_v28, %v15287_v50  ;;  %6448 = vmatprep.mubr.bf16.mxu0 %v12919_v13  ;;  %11766 = vmatpush3.bf16.msra.mxu0 %v12931_v56  ;;  %v11140_v50 = vpop.f32.mrf.mxu1  ;;  %v12939_v56 = vld [vmem:[#allocation9 + $0x188] sm:$0xff]  }
 0x1d7   : > { %v11202_v35 = vpop.f32.mrf.mxu0  ;;  %11767 = vmatprep.subr.bf16.mxu0 %v12934_v17  ;;  %v15410_v13 = vadd.f32 %v11139_v21, %v15337_v36  ;;  %11657 = vmatprep.subr.bf16.mxu1 %v12936_v42  ;;  %v15417_v36 = vpack.c.bf16 %v15204_v37, %v15186_v48  ;;  %v13301_v28 = vld [vmem:[#allocation2 + $0x12c] ss:$36 sps:$4 sm:$0xff]   ;;  %v12941_v48 = vld [vmem:[#allocation9 + $0x100] sm:$0xff]  }
 0x1d8   : > { %v11203_v7 = vadd.f32 %v11202_v35, %v11201_v39  ;;  %v11141_v3 = vpop.f32.mrf.mxu1  ;;  %v12943_v37 = vld [vmem:[#allocation9 + $0x180] sm:$0xff]  }
 0x1d9   : > { %v11204_v8 = vpop.f32.mrf.mxu0  ;;  %v11142_v47 = vadd.f32 %v11141_v3, %v11140_v50  ;;  %13442 = vmatmul.mubr.msk.bf16.gmra.mxu1 %vm17465_vm11, %v15417_v36 }
 0x1da   : > { %v15413_v46 = vadd.f32 %v11203_v7, %v15298_v23  ;;  %11768 = vmatpush3.bf16.msra.mxu0 %v12935_v57  ;;  %v11143_v25 = vpop.f32.mrf.mxu1  ;;  %6295 = vmatprep.mubr.bf16.mxu1 %v17466_v31 }
 0x1db   : > { %v11205_v27 = vpop.f32.mrf.mxu0  ;;  %11769 = vmatprep.subr.bf16.mxu0 %v12938_v12  ;;  %v15423_v23 = vadd.f32 %v11142_v47, %v15344_v2  ;;  %11658 = vmatpush3.bf16.msra.mxu1 %v12937_v20  ;;  %v12951_v2 = vld [vmem:[#allocation9 + $0x4f8] sm:$0xff]   ;;  %v13302_v20 = vld [vmem:[#allocation2 + $0x128] ss:$36 sps:$4 sm:$0xff]  }
 0x1dc   : > { %v11206_v53 = vadd.f32 %v11205_v27, %v11204_v8  ;;  %v11144_v9 = vpop.f32.mrf.mxu1  ;;  %11659 = vmatprep.subr.bf16.mxu1 %v12940_v32  ;;  %v17467_v27 = vld [vmem:[#allocation36_spill] sm:$0xff] }
 0x1dd   : > { %v11207_v38 = vpop.f32.mrf.mxu0  ;;  %6449 = vmatmul.mubr.bf16.gmra.mxu0 %v12917_v55  ;;  %v11145_v58 = vadd.f32 %v11144_v9, %v11143_v25  ;;  %v13303_v47 = vld [vmem:[#allocation2 + $0x174] ss:$36 sps:$4 sm:$0xff]  }
 0x1de   : > { %v15426_v17 = vadd.f32 %v11206_v53, %v15304_v40  ;;  %6456 = vmatprep.mubr.bf16.mxu0 %v13301_v28  ;;  %11770 = vmatpush3.bf16.msra.mxu0 %v12939_v56  ;;  %v11146_v57 = vpop.f32.mrf.mxu1  ;;  %v17468_v56 = vld [vmem:[#allocation30_spill] sm:$0xff] }
 0x1df   : > { %v11208_v39 = vpop.f32.mrf.mxu0  ;;  %11771 = vmatprep.subr.bf16.mxu0 %v12942_v33  ;;  %v15432_v21 = vadd.f32 %v11145_v58, %v15349_v29  ;;  %11660 = vmatpush3.bf16.msra.mxu1 %v12941_v48 }
 0x1e0   : > { %v11209_v35 = vadd.f32 %v11208_v39, %v11207_v38  ;;  %v11147_v42 = vpop.f32.mrf.mxu1  ;;  %12413 = vmatprep.subr.bf16.mxu1 %v15429_v11 }
 0x1e1   : > { %v11210_v40 = vpop.f32.mrf.mxu0  ;;  %v11148_v50 = vadd.f32 %v11147_v42, %v11146_v57  ;;  %6296 = vmatmul.mubr.bf16.gmra.mxu1 %v17467_v27 }
 0x1e2   : > { %v15435_v7 = vadd.f32 %v11209_v35, %v15309_v10  ;;  %11772 = vmatpush3.bf16.msra.mxu0 %v12943_v37  ;;  %v11149_v55 = vpop.f32.mrf.mxu1  ;;  %6303 = vmatprep.mubr.bf16.mxu1 %v17468_v56  ;;  %v17469_v35 = vld [vmem:[#allocation50_spill] sm:$0xff] }
 0x1e3   : > { %v11211_v12 = vpop.f32.mrf.mxu0  ;;  %11893 = vmatprep.subr.bf16.mxu0 %v12951_v2  ;;  %v15440_v29 = vadd.f32 %v11148_v50, %v15355_v34  ;;  %v13304_v2 = vld [vmem:[#allocation2 + $0x170] ss:$36 sps:$4 sm:$0xff]  }
 0x1e4   : > { %v11212_v8 = vadd.f32 %v11211_v12, %v11210_v40  ;;  %v11150_v53 = vpop.f32.mrf.mxu1  ;;  %v13305_v40 = vld [vmem:[#allocation2 + $0x1bc] ss:$36 sps:$4 sm:$0xff]  }
 0x1e5   : > { %v11213_v3 = vpop.f32.mrf.mxu0  ;;  %6457 = vmatmul.mubr.bf16.gmra.mxu0 %v13302_v20  ;;  %v11151_v33 = vadd.f32 %v11150_v53, %v11149_v55 }
 0x1e6   : > { %v15443_v10 = vadd.f32 %v11212_v8, %v15314_v0  ;;  %6464 = vmatprep.mubr.bf16.mxu0 %v13303_v47  ;;  %v11152_v38 = vpop.f32.mrf.mxu1 }
 0x1e7   : > { %v11214_v32 = vpop.f32.mrf.mxu0  ;;  %v15447_v28 = vadd.f32 %v11151_v33, %v15228_v6  ;;  %v17471_v33 = vld [vmem:[#allocation58_spill] sm:$0xff] }
 0x1e8   : > { %v11215_v25 = vadd.f32 %v11214_v32, %v11213_v3  ;;  %v11153_v34 = vpop.f32.mrf.mxu1 }
 0x1e9   : > { %v11216_v31 = vpop.f32.mrf.mxu0  ;;  %v11154_v0 = vadd.f32 %v11153_v34, %v11152_v38  ;;  %13445 = vmatmul.mubr.msk.bf16.gmra.mxu1 %vm17461_vm6, %v17469_v35 }
 0x1ea   : > { %v15450_v9 = vadd.f32 %v11215_v25, %v15319_v16  ;;  %v11155_v37 = vpop.f32.mrf.mxu1  ;;  %v17470_v16 = vld [vmem:[#allocation39_spill] sm:$0xff]  ;;  %v13306_v25 = vld [vmem:[#allocation2 + $0x1b8] ss:$36 sps:$4 sm:$0xff]  }
 0x1eb   : > { %v11217_v39 = vpop.f32.mrf.mxu0  ;;  %v15456_v57 = vadd.f32 %v11154_v0, %v15232_v61  ;;  %6311 = vmatprep.mubr.bf16.mxu1 %v17470_v16 }
 0x1ec   : > { %v11218_v48 = vadd.f32 %v11217_v39, %v11216_v31  ;;  %v11156_v42 = vpop.f32.mrf.mxu1  ;;  %v13307_v31 = vld [vmem:[#allocation2 + $0x204] ss:$36 sps:$4 sm:$0xff]  }
 0x1ed   : > { %v11219_v58 = vpop.f32.mrf.mxu0  ;;  %6465 = vmatmul.mubr.bf16.gmra.mxu0 %v13304_v2  ;;  %v11157_v50 = vadd.f32 %v11156_v42, %v11155_v37  ;;  %v17473_v2 = vld [vmem:[#allocation52_spill] sm:$0xff] }
 0x1ee   : > { %v15459_v6 = vadd.f32 %v11218_v48, %v15324_v30  ;;  %6472 = vmatprep.mubr.bf16.mxu0 %v13305_v40  ;;  %v11158_v55 = vpop.f32.mrf.mxu1 }
 0x1ef   : > { %v11220_v12 = vpop.f32.mrf.mxu0  ;;  %v15463_v27 = vadd.f32 %v11157_v50, %v15236_v41 }
 0x1f0   : > { %v11221_v8 = vadd.f32 %v11220_v12, %v11219_v58  ;;  %v11159_v61 = vpop.f32.mrf.mxu1 }
 0x1f1   : > { %v11222_v3 = vpop.f32.mrf.mxu0  ;;  %v11160_v30 = vadd.f32 %v11159_v61, %v11158_v55  ;;  %13448 = vmatmul.mubr.msk.bf16.gmra.mxu1 %vm17345_vm13, %v17471_v33  ;;  %v13308_v55 = vld [vmem:[#allocation2 + $0x200] ss:$36 sps:$4 sm:$0xff]  }
 0x1f2   : > { %v15466_v20 = vadd.f32 %v11221_v8, %v15329_v1  ;;  %v11161_v53 = vpop.f32.mrf.mxu1  ;;  %v17472_v1 = vld [vmem:[#allocation48_spill] sm:$0xff]  ;;  %v17474_v8 = vld [vmem:[#allocation65_spill] sm:$0xff] }
 0x1f3   : > { %v11223_v56 = vpop.f32.mrf.mxu0  ;;  %v15472_v38 = vadd.f32 %v11160_v30, %v15243_v18  ;;  %6319 = vmatprep.mubr.bf16.mxu1 %v17472_v1  ;;  %v17477_v30 = vld [vmem:[#allocation61_spill] sm:$0xff] }
 0x1f4   : > { %v11224_v47 = vadd.f32 %v11223_v56, %v11222_v3  ;;  %v11162_v34 = vpop.f32.mrf.mxu1  ;;  %v17475_v3 = vld [vmem:[#allocation37_spill] sm:$0xff] }
 0x1f5   : > { %v11225_v32 = vpop.f32.mrf.mxu0  ;;  %6473 = vmatmul.mubr.bf16.gmra.mxu0 %v13306_v25  ;;  %v11163_v0 = vadd.f32 %v11162_v34, %v11161_v53  ;;  %v17478_v34 = vld [vmem:[#allocation44_spill] sm:$0xff] }
 0x1f6   : > { %v15475_v41 = vadd.f32 %v11224_v47, %v15335_v4  ;;  %6480 = vmatprep.mubr.bf16.mxu0 %v13307_v31  ;;  %v11164_v37 = vpop.f32.mrf.mxu1  ;;  %v13309_v47 = vld [vmem:[#allocation2 + $0x24c] ss:$36 sps:$4 sm:$0xff]  }
 0x1f7   : > { %v11226_v39 = vpop.f32.mrf.mxu0  ;;  %v15479_v35 = vadd.f32 %v11163_v0, %v15248_v44  ;;  %v17476_v44 = vld [vmem:[#allocation31_spill] sm:$0xff] }
 0x1f8   : > { %v11227_v48 = vadd.f32 %v11226_v39, %v11225_v32  ;;  %v11165_v18 = vpop.f32.mrf.mxu1  ;;  %v17479_v0 = vld [vmem:[#allocation51_spill] sm:$0xff] }
 0x1f9   : > { %v11228_v58 = vpop.f32.mrf.mxu0  ;;  %v11166_v4 = vadd.f32 %v11165_v18, %v11164_v37  ;;  %13451 = vmatmul.mubr.msk.bf16.gmra.mxu1 %vm17465_vm11, %v17474_v8  ;;  %v13310_v8 = vld [vmem:[#allocation2 + $0x248] ss:$36 sps:$4 sm:$0xff]  }
 0x1fa   : > { %v15482_v16 = vadd.f32 %v11227_v48, %v17473_v2  ;;  %v11167_v12 = vpop.f32.mrf.mxu1  ;;  %6327 = vmatprep.mubr.bf16.mxu1 %v17477_v30 }
 0x1fb   : > { %v11229_v40 = vpop.f32.mrf.mxu0  ;;  %v15488_v61 = vadd.f32 %v11166_v4, %v17475_v3  ;;  %v17482_v3 = vld [vmem:[#allocation59_spill] sm:$0xff] }
 0x1fc   : > { %v11230_v42 = vadd.f32 %v11229_v40, %v11228_v58  ;;  %v11168_v53 = vpop.f32.mrf.mxu1 }
 0x1fd   : > { %v11231_v50 = vpop.f32.mrf.mxu0  ;;  %6481 = vmatmul.mubr.bf16.gmra.mxu0 %v13308_v55  ;;  %v11169_v33 = vadd.f32 %v11168_v53, %v11167_v12  ;;  %v17481_v12 = vld [vmem:[#allocation38_spill] sm:$0xff] }
 0x1fe   : > { %v15491_v56 = vadd.f32 %v11230_v42, %v17476_v44  ;;  %6488 = vmatprep.mubr.bf16.mxu0 %v13309_v47  ;;  %v11170_v1 = vpop.f32.mrf.mxu1  ;;  %v17480_v42 = vld [vmem:[#allocation62_spill] sm:$0xff]  ;;  %v13311_v44 = vld [vmem:[#allocation2 + $0x294] ss:$36 sps:$4 sm:$0xff]  }
 0x1ff   : > { %v11232_v32 = vpop.f32.mrf.mxu0  ;;  %v15495_v39 = vadd.f32 %v11169_v33, %v17478_v34 }
 0x200   : > { %v11233_v25 = vadd.f32 %v11232_v32, %v11231_v50  ;;  %v11171_v37 = vpop.f32.mrf.mxu1 }
 0x201   : > { %v11234_v31 = vpop.f32.mrf.mxu0  ;;  %v11172_v2 = vadd.f32 %v11171_v37, %v11170_v1  ;;  %6328 = vmatmul.mubr.bf16.gmra.mxu1 %v17480_v42  ;;  %v13313_v42 = vld [vmem:[#allocation2 + $0x2dc] ss:$36 sps:$4 sm:$0xff]  }
 0x202   : > { %v15498_v48 = vadd.f32 %v11233_v25, %v17479_v0  ;;  %v11301_v4 = vpop.f32.mrf.mxu1  ;;  %6335 = vmatprep.mubr.bf16.mxu1 %v17482_v3 }
 0x203   : > { %v11235_v58 = vpop.f32.mrf.mxu0  ;;  %v15502_v50 = vadd.f32 %v11172_v2, %v17481_v12 }
 0x204   : > { %v11236_v18 = vadd.f32 %v11235_v58, %v11234_v31  ;;  %v11302_v47 = vpop.f32.mrf.mxu1 }
 0x205   : > { %v11237_v40 = vpop.f32.mrf.mxu0  ;;  %6489 = vmatmul.mubr.bf16.gmra.mxu0 %v13310_v8  ;;  %v11303_v32 = vadd.f32 %v11302_v47, %v11301_v4 }
 0x206   : > { %v15505_v55 = vadd.f32 %v11236_v18, %v15358_v5  ;;  %6496 = vmatprep.mubr.bf16.mxu0 %v13311_v44  ;;  %v11304_v25 = vpop.f32.mrf.mxu1  ;;  %v17483_v18 = vld [vmem:[#allocation71_spill] sm:$0xff] }
 0x207   : > { %v11238_v30 = vpop.f32.mrf.mxu0  ;;  %v15512_v31 = vadd.f32 %v11303_v32, %v15365_v49 }
 0x208   : > { %v11239_v53 = vadd.f32 %v11238_v30, %v11237_v40  ;;  %v11305_v0 = vpop.f32.mrf.mxu1  ;;  %v13312_v40 = vld [vmem:[#allocation2 + $0x290] ss:$36 sps:$4 sm:$0xff]  }
 0x209   : > { %v11240_v33 = vpop.f32.mrf.mxu0  ;;  %v11306_v37 = vadd.f32 %v11305_v0, %v11304_v25  ;;  %13454 = vmatmul.mubr.msk.bf16.gmra.mxu1 %vm17461_vm6, %v17483_v18 }
 0x20a   : > { %v15509_v1 = vadd.f32 %v11239_v53, %v15362_v15  ;;  %v11307_v2 = vpop.f32.mrf.mxu1  ;;  %v17484_v15 = vld [vmem:[#allocation60_spill] sm:$0xff] }
 0x20b   : > { %v11241_v34 = vpop.f32.mrf.mxu0  ;;  %6343 = vmatprep.mubr.bf16.mxu1 %v17484_v15  ;;  %v15522_v49 = vadd.f32 %v11306_v37, %v15375_v26  ;;  %v17485_v26 = vld [vmem:[#allocation76_spill] sm:$0xff] }
 0x20c   : > { %v11242_v5 = vadd.f32 %v11241_v34, %v11240_v33  ;;  %v11308_v12 = vpop.f32.mrf.mxu1  ;;  %v13314_v37 = vld [vmem:[#allocation2 + $0x2d8] ss:$36 sps:$4 sm:$0xff]  }
 0x20d   : > { %v11243_v58 = vpop.f32.mrf.mxu0  ;;  %6497 = vmatmul.mubr.bf16.gmra.mxu0 %v13312_v40  ;;  %v11309_v44 = vadd.f32 %v11308_v12, %v11307_v2  ;;  %v13315_v2 = vld [vmem:[#allocation2 + $0x324] ss:$36 sps:$4 sm:$0xff]  }
 0x20e   : > { %v15518_v4 = vadd.f32 %v11242_v5, %v15372_v24  ;;  %6504 = vmatprep.mubr.bf16.mxu0 %v13313_v42  ;;  %v11310_v47 = vpop.f32.mrf.mxu1 }
 0x20f   : > { %v11244_v8 = vpop.f32.mrf.mxu0  ;;  %v15528_v32 = vadd.f32 %v11309_v44, %v15389_v52 }
 0x210   : > { %v11245_v3 = vadd.f32 %v11244_v8, %v11243_v58  ;;  %v11311_v33 = vpop.f32.mrf.mxu1 }
 0x211   : > { %v11246_v30 = vpop.f32.mrf.mxu0  ;;  %v11312_v34 = vadd.f32 %v11311_v33, %v11310_v47  ;;  %13457 = vmatmul.mubr.msk.bf16.gmra.mxu1 %vm17345_vm13, %v17485_v26 }
 0x212   : > { %v15525_v53 = vadd.f32 %v11245_v3, %v15386_v43  ;;  %v11313_v5 = vpop.f32.mrf.mxu1  ;;  %v17486_v43 = vld [vmem:[#allocation67_spill] sm:$0xff] }
 0x213   : > { %v11247_v24 = vpop.f32.mrf.mxu0  ;;  %6351 = vmatprep.mubr.bf16.mxu1 %v17486_v43  ;;  %v15538_v52 = vadd.f32 %v11312_v34, %v15402_v59  ;;  %v17487_v59 = vld [vmem:[#allocation78_spill] sm:$0xff]  ;;  %v13316_v34 = vld [vmem:[#allocation2 + $0x320] ss:$36 sps:$4 sm:$0xff]  }
 0x214   : > { %v11248_v25 = vadd.f32 %v11247_v24, %v11246_v30  ;;  %v11314_v40 = vpop.f32.mrf.mxu1 }
 0x215   : > { %v11249_v0 = vpop.f32.mrf.mxu0  ;;  %6505 = vmatmul.mubr.bf16.gmra.mxu0 %v13314_v37  ;;  %v11315_v42 = vadd.f32 %v11314_v40, %v11313_v5  ;;  %v13317_v5 = vld [vmem:[#allocation2 + $0x36c] ss:$36 sps:$4 sm:$0xff]  }
 0x216   : > { %v15534_v58 = vadd.f32 %v11248_v25, %v15399_v45  ;;  %6512 = vmatprep.mubr.bf16.mxu0 %v13315_v2  ;;  %v11316_v12 = vpop.f32.mrf.mxu1 }
 0x217   : > { %v11250_v18 = vpop.f32.mrf.mxu0  ;;  %v15544_v44 = vadd.f32 %v11315_v42, %v15413_v46 }
 0x218   : > { %v11251_v15 = vadd.f32 %v11250_v18, %v11249_v0  ;;  %v11317_v30 = vpop.f32.mrf.mxu1 }
 0x219   : > { %v11252_v8 = vpop.f32.mrf.mxu0  ;;  %v11318_v24 = vadd.f32 %v11317_v30, %v11316_v12  ;;  %13460 = vmatmul.mubr.msk.bf16.gmra.mxu1 %vm17465_vm11, %v17487_v59 }
 0x21a   : > { %v15541_v3 = vadd.f32 %v11251_v15, %v15410_v13  ;;  %v11319_v25 = vpop.f32.mrf.mxu1  ;;  %v17488_v13 = vld [vmem:[#allocation73_spill] sm:$0xff] }
 0x21b   : > { %v11253_v45 = vpop.f32.mrf.mxu0  ;;  %6359 = vmatprep.mubr.bf16.mxu1 %v17488_v13  ;;  %v15554_v46 = vadd.f32 %v11318_v24, %v15426_v17  ;;  %v17489_v17 = vld [vmem:[#allocation74_spill] sm:$0xff] }
 0x21c   : > { %v11254_v47 = vadd.f32 %v11253_v45, %v11252_v8  ;;  %v11320_v37 = vpop.f32.mrf.mxu1  ;;  %v13318_v24 = vld [vmem:[#allocation2 + $0x368] ss:$36 sps:$4 sm:$0xff]  }
 0x21d   : > { %v11255_v33 = vpop.f32.mrf.mxu0  ;;  %6513 = vmatmul.mubr.bf16.gmra.mxu0 %v13316_v34  ;;  %v11321_v2 = vadd.f32 %v11320_v37, %v11319_v25  ;;  %v17490_v25 = vld [vmem:[#allocation72_spill] sm:$0xff] }
 0x21e   : > { %v15550_v0 = vadd.f32 %v11254_v47, %v15423_v23  ;;  %6520 = vmatprep.mubr.bf16.mxu0 %v13317_v5  ;;  %v11322_v40 = vpop.f32.mrf.mxu1 }
 0x21f   : > { %v11256_v26 = vpop.f32.mrf.mxu0  ;;  %v15560_v42 = vadd.f32 %v11321_v2, %v15435_v7 }
 0x220   : > { %v11257_v43 = vadd.f32 %v11256_v26, %v11255_v33  ;;  %v11323_v8 = vpop.f32.mrf.mxu1 }
 0x221   : > { %v11258_v18 = vpop.f32.mrf.mxu0  ;;  %v11324_v45 = vadd.f32 %v11323_v8, %v11322_v40  ;;  %6360 = vmatmul.mubr.bf16.gmra.mxu1 %v17489_v17 }
 0x222   : > { %v15557_v15 = vadd.f32 %v11257_v43, %v15432_v21  ;;  %v11325_v47 = vpop.f32.mrf.mxu1  ;;  %6367 = vmatprep.mubr.bf16.mxu1 %v17490_v25  ;;  %v13319_v21 = vld [vmem:[#allocation2 + $0x3b4] ss:$36 sps:$4 sm:$0xff]  }
 0x223   : > { %v11259_v23 = vpop.f32.mrf.mxu0  ;;  %v15568_v7 = vadd.f32 %v11324_v45, %v15443_v10  ;;  %v17491_v10 = vld [vmem:[#allocation70_spill] sm:$0xff]  ;;  %v13320_v45 = vld [vmem:[#allocation2 + $0x3b0] ss:$36 sps:$4 sm:$0xff]  }
 0x224   : > { %v11260_v12 = vadd.f32 %v11259_v23, %v11258_v18  ;;  %v11326_v34 = vpop.f32.mrf.mxu1 }
 0x225   : > { %v11261_v30 = vpop.f32.mrf.mxu0  ;;  %6521 = vmatmul.mubr.bf16.gmra.mxu0 %v13318_v24  ;;  %v11327_v5 = vadd.f32 %v11326_v34, %v11325_v47  ;;  %v13321_v47 = vld [vmem:[#allocation2 + $0x3fc] ss:$36 sps:$4 sm:$0xff]  }
 0x226   : > { %v15564_v33 = vadd.f32 %v11260_v12, %v15440_v29  ;;  %6528 = vmatprep.mubr.bf16.mxu0 %v13319_v21  ;;  %v11328_v37 = vpop.f32.mrf.mxu1 }
 0x227   : > { %v11262_v59 = vpop.f32.mrf.mxu0  ;;  %v15574_v2 = vadd.f32 %v11327_v5, %v15450_v9 }
 0x228   : > { %v11263_v13 = vadd.f32 %v11262_v59, %v11261_v30  ;;  %v11329_v18 = vpop.f32.mrf.mxu1 }
 0x229   : > { %v11264_v26 = vpop.f32.mrf.mxu0  ;;  %v11330_v23 = vadd.f32 %v11329_v18, %v11328_v37  ;;  %13463 = vmatmul.mubr.msk.bf16.gmra.mxu1 %vm17461_vm6, %v17491_v10 }
 0x22a   : > { %v15571_v43 = vadd.f32 %v11263_v13, %v15447_v28  ;;  %v11331_v12 = vpop.f32.mrf.mxu1  ;;  %v17492_v28 = vld [vmem:[#allocation75_spill] sm:$0xff] }
 0x22b   : > { %v11265_v29 = vpop.f32.mrf.mxu0  ;;  %6375 = vmatprep.mubr.bf16.mxu1 %v17492_v28  ;;  %v15584_v9 = vadd.f32 %v11330_v23, %v15459_v6  ;;  %v17493_v6 = vld [vmem:[#allocation21_spill] sm:$0xff]  ;;  %v13322_v23 = vld [vmem:[#allocation2 + $0x3f8] ss:$36 sps:$4 sm:$0xff]  }
 0x22c   : > { %v11266_v40 = vadd.f32 %v11265_v29, %v11264_v26  ;;  %v11332_v24 = vpop.f32.mrf.mxu1 }
 0x22d   : > { %v11267_v8 = vpop.f32.mrf.mxu0  ;;  %6529 = vmatmul.mubr.bf16.gmra.mxu0 %v13320_v45  ;;  %v11333_v21 = vadd.f32 %v11332_v24, %v11331_v12  ;;  %v13323_v12 = vld [vmem:[#allocation2 + $0x444] ss:$36 sps:$4 sm:$0xff]  }
 0x22e   : > { %v15580_v30 = vadd.f32 %v11266_v40, %v15456_v57  ;;  %6536 = vmatprep.mubr.bf16.mxu0 %v13321_v47  ;;  %v11334_v34 = vpop.f32.mrf.mxu1 }
 0x22f   : > { %v11268_v17 = vpop.f32.mrf.mxu0  ;;  %v15590_v5 = vadd.f32 %v11333_v21, %v15466_v20  ;;  %v12946_v21 = vld [vmem:[#allocation2 + $0x14] ss:$36 sps:$4 sm:$0xff]  }
 0x230   : > { %v11269_v25 = vadd.f32 %v11268_v17, %v11267_v8  ;;  %v11335_v26 = vpop.f32.mrf.mxu1 }
 0x231   : > { %v11270_v59 = vpop.f32.mrf.mxu0  ;;  %v11336_v29 = vadd.f32 %v11335_v26, %v11334_v34  ;;  %13466 = vmatmul.mubr.msk.bf16.gmra.mxu1 %vm17345_vm13, %v17493_v6  ;;  %v17495_v6 = vld [vmem:[#allocation25_spill] sm:$0xff] }
 0x232   : > { %v15587_v13 = vadd.f32 %v11269_v25, %v15463_v27  ;;  %v11337_v40 = vpop.f32.mrf.mxu1  ;;  %v17494_v27 = vld [vmem:[#allocation77_spill] sm:$0xff] }
 0x233   : > { %v11271_v57 = vpop.f32.mrf.mxu0  ;;  %6383 = vmatprep.mubr.bf16.mxu1 %v17494_v27  ;;  %v15600_v20 = vadd.f32 %v11336_v29, %v15475_v41 }
 0x234   : > { %v11272_v37 = vadd.f32 %v11271_v57, %v11270_v59  ;;  %v11338_v45 = vpop.f32.mrf.mxu1  ;;  %v12949_v59 = vld [vmem:[#allocation2 + $0x1c] ss:$36 sps:$4 sm:$0xff]  }
 0x235   : > { %v11273_v18 = vpop.f32.mrf.mxu0  ;;  %6537 = vmatmul.mubr.bf16.gmra.mxu0 %v13322_v23  ;;  %v11339_v47 = vadd.f32 %v11338_v45, %v11337_v40 }
 0x236   : > { %v15596_v8 = vadd.f32 %v11272_v37, %v15472_v38  ;;  %6544 = vmatprep.mubr.bf16.mxu0 %v13323_v12  ;;  %v11340_v24 = vpop.f32.mrf.mxu1 }
 0x237   : > { %v11274_v10 = vpop.f32.mrf.mxu0  ;;  %v15606_v38 = vadd.f32 %v11339_v47, %v15482_v16  ;;  %v12947_v47 = vld [vmem:[#allocation2 + $0x18] ss:$36 sps:$4 sm:$0xff]  }
 0x238   : > { %v11275_v28 = vadd.f32 %v11274_v10, %v11273_v18  ;;  %v11341_v57 = vpop.f32.mrf.mxu1  ;;  %v13324_v18 = vld [vmem:[#allocation2 + $0x440] ss:$36 sps:$4 sm:$0xff]  }
 0x239   : > { %v11276_v17 = vpop.f32.mrf.mxu0  ;;  %v11342_v37 = vadd.f32 %v11341_v57, %v11340_v24  ;;  %13469 = vmatmul.mubr.msk.bf16.gmra.mxu1 %vm17465_vm11, %v17495_v6  ;;  %v12952_v24 = vld [vmem:[#allocation9 + $0x4b8] sm:$0xff]  }
 0x23a   : > { %v15603_v25 = vadd.f32 %v11275_v28, %v15479_v35  ;;  %v11343_v29 = vpop.f32.mrf.mxu1  ;;  %6585 = vmatprep.mubr.bf16.mxu1 %v12946_v21  ;;  %v12944_v28 = vld [vmem:[#allocation2 + $0x10] ss:$36 sps:$4 sm:$0xff]  }
 0x23b   : > { %v11277_v34 = vpop.f32.mrf.mxu0  ;;  %v15615_v16 = vadd.f32 %v11342_v37, %v15491_v56  ;;  %v12960_v37 = vld [vmem:[#allocation9 + $0x4f0] sm:$0xff]  }
 0x23c   : > { %v11278_v26 = vadd.f32 %v11277_v34, %v11276_v17  ;;  %v11344_v23 = vpop.f32.mrf.mxu1  ;;  %v12955_v34 = vld [vmem:[#allocation2 + $0x5c] ss:$36 sps:$4 sm:$0xff]  }
 0x23d   : > { %v11279_v41 = vpop.f32.mrf.mxu0  ;;  %6545 = vmatmul.mubr.bf16.gmra.mxu0 %v13324_v18  ;;  %v11345_v12 = vadd.f32 %v11344_v23, %v11343_v29 }
 0x23e   : > { %v15612_v35 = vadd.f32 %v11278_v26, %v15488_v61  ;;  %6746 = vmatprep.mubr.bf16.mxu0 %v12949_v59  ;;  %v11346_v45 = vpop.f32.mrf.mxu1  ;;  %v12959_v26 = vld [vmem:[#allocation9 + $0x230] sm:$0xff]  }
 0x23f   : > { %v11280_v40 = vpop.f32.mrf.mxu0  ;;  %v15621_v61 = vadd.f32 %v11345_v12, %v15498_v48  ;;  %v12961_v48 = vld [vmem:[#allocation9 + $0x4b0] sm:$0xff]   ;;  %v12966_v12 = vld [vmem:[#allocation9 + $0x4e8] sm:$0xff]  }
 0x240   : > { %v11281_v27 = vadd.f32 %v11280_v40, %v11279_v41  ;;  %v11347_v59 = vpop.f32.mrf.mxu1 }
 0x241   : > { %v11282_v10 = vpop.f32.mrf.mxu0  ;;  %v11348_v57 = vadd.f32 %v11347_v59, %v11346_v45  ;;  %6586 = vmatmul.mubr.bf16.vlgmr.msra.gmra.mxu1 %v12944_v28  ;;  %v12953_v45 = vld [vmem:[#allocation2 + $0x58] ss:$36 sps:$4 sm:$0xff]  }
 0x242   : > { %v15618_v17 = vadd.f32 %v11281_v27, %v15495_v39  ;;  %v11349_v41 = vpop.f32.mrf.mxu1  ;;  %12414 = vmatpush3.bf16.msra.mxu1 %v15429_v11  ;;  %6593 = vmatprep.mubr.bf16.mxu1 %v12955_v34  ;;  %v12965_v27 = vld [vmem:[#allocation9 + $0x228] sm:$0xff]   ;;  %v12968_v34 = vld [vmem:[#allocation9 + $0x220] sm:$0xff]  }
 0x243   : > { %v11283_v21 = vpop.f32.mrf.mxu0  ;;  %v15631_v18 = vadd.f32 %v11348_v57, %v15505_v55  ;;  %12415 = vmatprep.subr.bf16.mxu1 %v12959_v26  ;;  %v12958_v55 = vld [vmem:[#allocation2 + $0xa4] ss:$36 sps:$4 sm:$0xff]  }
 0x244   : > { %v11284_v56 = vadd.f32 %v11283_v21, %v11282_v10  ;;  %v11350_v40 = vpop.f32.mrf.mxu1 }
 0x245   : > { %v12383_v29 = vpop.f32.mrf.mxu0  ;;  %6747 = vmatmul.mubr.bf16.vlgmr.msra.gmra.mxu0 %v12947_v47  ;;  %v11351_v10 = vadd.f32 %v11350_v40, %v11349_v41  ;;  %v12970_v41 = vld [vmem:[#allocation9 + $0x4a0] sm:$0xff]  }
 0x246   : > { %v15624_v6 = vadd.f32 %v11284_v56, %v15502_v50  ;;  %v15627_v39 = vadd.f32 %v12383_v29, %v15528_v32  ;;  %11894 = vmatpush3.bf16.msra.mxu0 %v12952_v24  ;;  %6754 = vmatprep.mubr.bf16.mxu0 %v15157_v63  ;;  %v11352_v32 = vpop.f32.mrf.mxu1  ;;  %v12969_v56 = vld [vmem:[#allocation9 + $0x4e0] sm:$0xff]  }
 0x247   : > { %v5488_v23 = vpop.f32.mrf.mxu0  ;;  %11895 = vmatprep.subr.bf16.mxu0 %v12960_v37  ;;  %12416 = vmatpush3.bf16.msra.mxu1 %v12959_v26  ;;  %v15641_v47 = vadd.f32 %v11351_v10, %v15509_v1  ;;  %v15662_v10 = vld [vmem:[#allocation2 + $0x120] sm:$0xff] }
 0x248   : > { %v15635_v50 = vadd.f32 %v5488_v23, %v15512_v31  ;;  %v11353_v63 = vpop.f32.mrf.mxu1  ;;  %12417 = vmatprep.subr.bf16.mxu1 %v12965_v27  ;;  %v12967_v31 = vld [vmem:[#allocation9 + $0x4a8] sm:$0xff]  }
 0x249   : > { %v12384_v11 = vpop.f32.mrf.mxu0  ;;  %v11354_v21 = vadd.f32 %v11353_v63, %v11352_v32  ;;  %6594 = vmatmul.mubr.bf16.gmra.mxu1 %v12953_v45  ;;  %v12973_v45 = vld [vmem:[#allocation9 + $0x498] sm:$0xff]  }
 0x24a   : > { %v15638_v28 = vadd.f32 %v12384_v11, %v15538_v52  ;;  %11896 = vmatpush3.bf16.msra.mxu0 %v12961_v48  ;;  %v11355_v57 = vpop.f32.mrf.mxu1  ;;  %6601 = vmatprep.mubr.bf16.mxu1 %v12958_v55 }
 0x24b   : > { %v5491_v24 = vpop.f32.mrf.mxu0  ;;  %11897 = vmatprep.subr.bf16.mxu0 %v12966_v12  ;;  %v15654_v26 = vadd.f32 %v11354_v21, %v15518_v4  ;;  %12418 = vmatpush3.bf16.msra.mxu1 %v12965_v27  ;;  %v12956_v12 = vld [vmem:[#allocation2 + $0xa0] ss:$36 sps:$4 sm:$0xff]   ;;  %v12964_v4 = vld [vmem:[#allocation2 + $0xec] ss:$36 sps:$4 sm:$0xff]   ;;  %v10420_v27 = vcombine.high %v15407_v51, %v15662_v10 }
 0x24c   : > { %v15644_v59 = vadd.f32 %v5491_v24, %v15522_v49  ;;  %v11356_v49 = vpop.f32.mrf.mxu1  ;;  %12419 = vmatprep.subr.bf16.mxu1 %v12968_v34  ;;  %v12975_v24 = vld [vmem:[#allocation9 + $0x4d0] sm:$0xff]  }
 0x24d   : > { %v12387_v52 = vpop.f32.mrf.mxu0  ;;  %13472 = vmatmul.mubr.msk.bf16.gmra.mxu0 %vm17345_vm13, %v15393_v54  ;;  %v11357_v29 = vadd.f32 %v11356_v49, %v11355_v57  ;;  %v12971_v54 = vld [vmem:[#allocation9 + $0x218] sm:$0xff]   ;;  %v12976_v57 = vld [vmem:[#allocation9 + $0x490] sm:$0xff]  }
 0x24e   : > { %v15650_v1 = vadd.f32 %v12387_v52, %v15560_v42  ;;  %6762 = vmatprep.mubr.bf16.mxu0 %v15191_v22  ;;  %11898 = vmatpush3.bf16.msra.mxu0 %v12967_v31  ;;  %v12972_v42 = vld [vmem:[#allocation9 + $0x4d8] sm:$0xff]   ;;  %v11358_v40 = vpop.f32.mrf.mxu1 }
 0x24f   : > { %v5504_v37 = vpop.f32.mrf.mxu0  ;;  %11899 = vmatprep.subr.bf16.mxu0 %v12969_v56  ;;  %v15667_v32 = vadd.f32 %v11357_v29, %v15525_v53  ;;  %12420 = vmatpush3.bf16.msra.mxu1 %v12968_v34  ;;  %v12962_v29 = vld [vmem:[#allocation2 + $0xe8] ss:$36 sps:$4 sm:$0xff]  }
 0x250   : > { %v15657_v48 = vadd.f32 %v5504_v37, %v15544_v44  ;;  %v11359_v44 = vpop.f32.mrf.mxu1  ;;  %12421 = vmatprep.subr.bf16.mxu1 %v12971_v54  ;;  %v12978_v37 = vld [vmem:[#allocation9 + $0x4c8] sm:$0xff]  }
 0x251   : > { %v12388_v23 = vpop.f32.mrf.mxu0  ;;  %v11360_v55 = vadd.f32 %v11359_v44, %v11358_v40  ;;  %6602 = vmatmul.mubr.bf16.gmra.mxu1 %v12956_v12  ;;  %v12981_v44 = vld [vmem:[#allocation9 + $0x4c0] sm:$0xff]  }
 0x252   : > { %v15660_v22 = vadd.f32 %v12388_v23, %v15568_v7  ;;  %11900 = vmatpush3.bf16.msra.mxu0 %v12970_v41  ;;  %v12974_v7 = vld [vmem:[#allocation9 + $0x210] sm:$0xff]   ;;  %v11361_v31 = vpop.f32.mrf.mxu1  ;;  %6609 = vmatprep.mubr.bf16.mxu1 %v12964_v4 }
 0x253   : > { %v5507_v11 = vpop.f32.mrf.mxu0  ;;  %11901 = vmatprep.subr.bf16.mxu0 %v12972_v42  ;;  %v15679_v34 = vadd.f32 %v11360_v55, %v15534_v58  ;;  %12422 = vmatpush3.bf16.msra.mxu1 %v12971_v54  ;;  %v10419_v58 = vcombine.low %v15407_v51, %v15662_v10 }
 0x254   : > { %v15670_v63 = vadd.f32 %v5507_v11, %v15554_v46  ;;  %v11362_v46 = vpop.f32.mrf.mxu1  ;;  %12423 = vmatprep.subr.bf16.mxu1 %v12974_v7 }
 0x255   : > { %v12391_v21 = vpop.f32.mrf.mxu0  ;;  %13475 = vmatmul.mubr.msk.bf16.gmra.mxu0 %vm17465_vm11, %v15417_v36  ;;  %v11363_v52 = vadd.f32 %v11362_v46, %v11361_v31  ;;  %v12977_v36 = vld [vmem:[#allocation9 + $0x208] sm:$0xff]   ;;  %v12987_v46 = vld [vmem:[#allocation9 + $0x5f8] sm:$0xff]  }
 0x256   : > { %v15676_v53 = vadd.f32 %v12391_v21, %v15590_v5  ;;  %6770 = vmatprep.mubr.bf16.mxu0 %v10420_v27  ;;  %11902 = vmatpush3.bf16.msra.mxu0 %v12973_v45  ;;  %v11364_v5 = vpop.f32.mrf.mxu1  ;;  %v12980_v27 = vld [vmem:[#allocation9 + $0x200] sm:$0xff]  }
 0x257   : > { %v5520_v56 = vpop.f32.mrf.mxu0  ;;  %11903 = vmatprep.subr.bf16.mxu0 %v12975_v24  ;;  %v15690_v54 = vadd.f32 %v11363_v52, %v15541_v3  ;;  %12424 = vmatpush3.bf16.msra.mxu1 %v12974_v7  ;;  %v13327_v45 = vld [vmem:[#allocation2 + $0x13c] ss:$36 sps:$4 sm:$0xff]  }
 0x258   : > { %v15682_v49 = vadd.f32 %v5520_v56, %v15574_v2  ;;  %v11365_v40 = vpop.f32.mrf.mxu1  ;;  %v12979_v2 = vld [vmem:[#allocation9 + $0x488] sm:$0xff]   ;;  %12425 = vmatprep.subr.bf16.mxu1 %v12977_v36  ;;  %v12982_v24 = vld [vmem:[#allocation9 + $0x480] sm:$0xff]  }
 0x259   : > { %v12392_v41 = vpop.f32.mrf.mxu0  ;;  %v11366_v12 = vadd.f32 %v11365_v40, %v11364_v5  ;;  %6610 = vmatmul.mubr.bf16.gmra.mxu1 %v12962_v29  ;;  %v13329_v40 = vld [vmem:[#allocation2 + $0x138] ss:$36 sps:$4 sm:$0xff]  }
 0x25a   : > { %v15687_v42 = vadd.f32 %v12392_v41, %v15600_v20  ;;  %11904 = vmatpush3.bf16.msra.mxu0 %v12976_v57  ;;  %v11367_v51 = vpop.f32.mrf.mxu1  ;;  %v13326_v20 = vld [vmem:[#allocation2 + $0x134] ss:$36 sps:$4 sm:$0xff]  }
 0x25b   : > { %v5523_v23 = vpop.f32.mrf.mxu0  ;;  %11905 = vmatprep.subr.bf16.mxu0 %v12978_v37  ;;  %6617 = vmatprep.mubr.bf16.mxu1 %v13326_v20  ;;  %v15699_v55 = vadd.f32 %v11366_v12, %v15550_v0 }
 0x25c   : > { %v15693_v4 = vadd.f32 %v5523_v23, %v15584_v9  ;;  %v11368_v9 = vpop.f32.mrf.mxu1  ;;  %12426 = vmatpush3.bf16.msra.mxu1 %v12977_v36  ;;  %v13331_v23 = vld [vmem:[#allocation2 + $0x184] ss:$36 sps:$4 sm:$0xff]  }
 0x25d   : > { %v12395_v11 = vpop.f32.mrf.mxu0  ;;  %6771 = vmatmul.mubr.bf16.gmra.mxu0 %v10419_v58  ;;  %v11369_v31 = vadd.f32 %v11368_v9, %v11367_v51  ;;  %12427 = vmatprep.subr.bf16.mxu1 %v12980_v27  ;;  %v13328_v58 = vld [vmem:[#allocation2 + $0x130] ss:$36 sps:$4 sm:$0xff]  }
 0x25e   : > { %v15696_v3 = vadd.f32 %v12395_v11, %v15621_v61  ;;  %6778 = vmatprep.mubr.bf16.mxu0 %v13327_v45  ;;  %11906 = vmatpush3.bf16.msra.mxu0 %v12979_v2  ;;  %v12985_v61 = vld [vmem:[#allocation9 + $0x578] sm:$0xff]   ;;  %v11370_v56 = vpop.f32.mrf.mxu1 }
 0x25f   : > { %v5536_v7 = vpop.f32.mrf.mxu0  ;;  %11907 = vmatprep.subr.bf16.mxu0 %v12981_v44  ;;  %v5416_v0 = vadd.f32 %v11369_v31, %v15557_v15  ;;  %v13330_v15 = vld [vmem:[#allocation2 + $0x17c] ss:$36 sps:$4 sm:$0xff]  }
 0x260   : > { %v15702_v21 = vadd.f32 %v5536_v7, %v15606_v38  ;;  %v11371_v37 = vpop.f32.mrf.mxu1  ;;  %12428 = vmatpush3.bf16.msra.mxu1 %v12980_v27 }
 0x261   : > { %v12396_v57 = vpop.f32.mrf.mxu0  ;;  %v11372_v36 = vadd.f32 %v11371_v37, %v11370_v56  ;;  %12005 = vmatprep.subr.bf16.mxu1 %v12985_v61  ;;  %6618 = vmatmul.mubr.bf16.gmra.mxu1 %v13328_v58  ;;  %v13332_v61 = vld [vmem:[#allocation2 + $0x178] ss:$36 sps:$4 sm:$0xff]   ;;  %v13334_v56 = vld [vmem:[#allocation2 + $0x1c4] ss:$36 sps:$4 sm:$0xff]  }
 0x262   : > { %v15705_v52 = vadd.f32 %v12396_v57, %v15631_v18  ;;  %11908 = vmatpush3.bf16.msra.mxu0 %v12982_v24  ;;  %v11373_v38 = vpop.f32.mrf.mxu1  ;;  %6625 = vmatprep.mubr.bf16.mxu1 %v13330_v15 }
 0x263   : > { %v5539_v5 = vpop.f32.mrf.mxu0  ;;  %12117 = vmatprep.subr.bf16.mxu0 %v12987_v46  ;;  %v5419_v2 = vadd.f32 %v11372_v36, %v15564_v33  ;;  %v13333_v46 = vld [vmem:[#allocation2 + $0x180] ss:$36 sps:$4 sm:$0xff]  }
 0x264   : > { %v15709_v41 = vadd.f32 %v5539_v5, %v15615_v16  ;;  %v11374_v12 = vpop.f32.mrf.mxu1 }
 0x265   : > { %v12399_v29 = vpop.f32.mrf.mxu0  ;;  %6779 = vmatmul.mubr.bf16.gmra.mxu0 %v13329_v40  ;;  %v11375_v27 = vadd.f32 %v11374_v12, %v11373_v38 }
 0x266   : > { %v15712_v18 = vadd.f32 %v12399_v29, %v15667_v32  ;;  %6786 = vmatprep.mubr.bf16.mxu0 %v13331_v23  ;;  %v11376_v51 = vpop.f32.mrf.mxu1 }
 0x267   : > { %v5552_v16 = vpop.f32.mrf.mxu0  ;;  %v5424_v32 = vadd.f32 %v11375_v27, %v15571_v43  ;;  %v13337_v27 = vld [vmem:[#allocation2 + $0x1c8] ss:$36 sps:$4 sm:$0xff]  }
 0x268   : > { %v15716_v44 = vadd.f32 %v5552_v16, %v15641_v47  ;;  %v11377_v45 = vpop.f32.mrf.mxu1  ;;  %v13336_v16 = vld [vmem:[#allocation2 + $0x1c0] ss:$36 sps:$4 sm:$0xff]  }
 0x269   : > { %v12400_v11 = vpop.f32.mrf.mxu0  ;;  %v11378_v7 = vadd.f32 %v11377_v45, %v11376_v51  ;;  %6626 = vmatmul.mubr.bf16.gmra.mxu1 %v13332_v61 }
 0x26a   : > { %v15719_v20 = vadd.f32 %v12400_v11, %v15679_v34  ;;  %v11379_v33 = vpop.f32.mrf.mxu1  ;;  %6633 = vmatprep.mubr.bf16.mxu1 %v13334_v56  ;;  %v13335_v34 = vld [vmem:[#allocation2 + $0x1cc] ss:$36 sps:$4 sm:$0xff]  }
 0x26b   : > { %v5555_v9 = vpop.f32.mrf.mxu0  ;;  %v5427_v43 = vadd.f32 %v11378_v7, %v15580_v30  ;;  %v17496_v11 = vld [vmem:[#allocation27_spill] sm:$0xff] }
 0x26c   : > { %v15723_v24 = vadd.f32 %v5555_v9, %v15654_v26  ;;  %v11380_v57 = vpop.f32.mrf.mxu1 }
 0x26d   : > { %v12403_v31 = vpop.f32.mrf.mxu0  ;;  %6787 = vmatmul.mubr.bf16.gmra.mxu0 %v13333_v46  ;;  %v11381_v5 = vadd.f32 %v11380_v57, %v11379_v33 }
 0x26e   : > { %v15725_v47 = vadd.f32 %v12403_v31, %v5416_v0  ;;  %6794 = vmatprep.mubr.bf16.mxu0 %v13335_v34  ;;  %v11382_v36 = vpop.f32.mrf.mxu1 }
 0x26f   : > { %v5568_v37 = vpop.f32.mrf.mxu0  ;;  %v5432_v58 = vadd.f32 %v11381_v5, %v15587_v13  ;;  %v13339_v5 = vld [vmem:[#allocation2 + $0x208] ss:$36 sps:$4 sm:$0xff]  }
 0x270   : > { %v15729_v26 = vadd.f32 %v5568_v37, %v15690_v54  ;;  %v11383_v0 = vpop.f32.mrf.mxu1 }
 0x271   : > { %v12404_v38 = vpop.f32.mrf.mxu0  ;;  %v11384_v15 = vadd.f32 %v11383_v0, %v11382_v36  ;;  %6634 = vmatmul.mubr.bf16.gmra.mxu1 %v13336_v16  ;;  %v17497_v36 = vld [vmem:[#allocation26_spill] sm:$0xff] }
 0x272   : > { %v15731_v29 = vadd.f32 %v12404_v38, %v5419_v2  ;;  %v11385_v12 = vpop.f32.mrf.mxu1  ;;  %v13338_v2 = vld [vmem:[#allocation2 + $0x20c] ss:$36 sps:$4 sm:$0xff]   ;;  %v13340_v38 = vld [vmem:[#allocation2 + $0x254] ss:$36 sps:$4 sm:$0xff]  }
 0x273   : > { %v5571_v40 = vpop.f32.mrf.mxu0  ;;  %v5435_v51 = vadd.f32 %v11384_v15, %v15596_v8  ;;  %6641 = vmatprep.mubr.bf16.mxu1 %v13338_v2 }
 0x274   : > { %v15735_v23 = vadd.f32 %v5571_v40, %v15699_v55  ;;  %v11386_v13 = vpop.f32.mrf.mxu1 }
 0x275   : > { %v12407_v30 = vpop.f32.mrf.mxu0  ;;  %6795 = vmatmul.mubr.bf16.gmra.mxu0 %v13337_v27  ;;  %v11387_v9 = vadd.f32 %v11386_v13, %v11385_v12 }
 0x276   : > { %v15737_v54 = vadd.f32 %v12407_v30, %v5432_v58  ;;  %6802 = vmatprep.mubr.bf16.mxu0 %v17496_v11  ;;  %v11388_v55 = vpop.f32.mrf.mxu1  ;;  %v13341_v58 = vld [vmem:[#allocation2 + $0x25c] ss:$36 sps:$4 sm:$0xff]  }
 0x277   : > { %v5584_v45 = vpop.f32.mrf.mxu0  ;;  %v5440_v61 = vadd.f32 %v11387_v9, %v15603_v25  ;;  %v13343_v9 = vld [vmem:[#allocation2 + $0x258] ss:$36 sps:$4 sm:$0xff]  }
 0x278   : > { %v15741_v7 = vadd.f32 %v5584_v45, %v5424_v32  ;;  %v11389_v46 = vpop.f32.mrf.mxu1  ;;  %v13342_v45 = vld [vmem:[#allocation2 + $0x250] ss:$36 sps:$4 sm:$0xff]  }
 0x279   : > { %v12408_v33 = vpop.f32.mrf.mxu0  ;;  %v11390_v34 = vadd.f32 %v11389_v46, %v11388_v55  ;;  %6642 = vmatmul.mubr.bf16.gmra.mxu1 %v13339_v5 }
 0x27a   : > { %v15743_v31 = vadd.f32 %v12408_v33, %v5435_v51  ;;  %v11391_v8 = vpop.f32.mrf.mxu1  ;;  %6649 = vmatprep.mubr.bf16.mxu1 %v13340_v38  ;;  %v13344_v33 = vld [vmem:[#allocation2 + $0x29c] ss:$36 sps:$4 sm:$0xff]  }
 0x27b   : > { %v5587_v56 = vpop.f32.mrf.mxu0  ;;  %v5443_v32 = vadd.f32 %v11390_v34, %v15612_v35 }
 0x27c   : > { %v15746_v57 = vadd.f32 %v5587_v56, %v5427_v43  ;;  %v11392_v0 = vpop.f32.mrf.mxu1 }
 0x27d   : > { %v12411_v37 = vpop.f32.mrf.mxu0  ;;  %6803 = vmatmul.mubr.bf16.gmra.mxu0 %v17497_v36  ;;  %v11393_v25 = vadd.f32 %v11392_v0, %v11391_v8 }
 0x27e   : > { %6810 = vmatprep.mubr.bf16.mxu0 %v13341_v58  ;;  %v11394_v12 = vpop.f32.mrf.mxu1 }
 0x27f   : > { %v5600_v40 = vpop.f32.mrf.mxu0  ;;  %v5448_v30 = vadd.f32 %v11393_v25, %v15618_v17 }
 0x280   : > { %v15750_v15 = vadd.f32 %v5600_v40, %v5440_v61  ;;  %v11395_v16 = vpop.f32.mrf.mxu1  ;;  %v13345_v61 = vld [vmem:[#allocation2 + $0x2a4] ss:$36 sps:$4 sm:$0xff]  }
 0x281   : > { %v12412_v43 = vpop.f32.mrf.mxu0  ;;  %v11396_v51 = vadd.f32 %v11395_v16, %v11394_v12  ;;  %v15755_v11 = vadd.f32 %v12411_v37, %v5448_v30  ;;  %6650 = vmatmul.mubr.bf16.gmra.mxu1 %v13342_v45  ;;  %v13346_v12 = vld [vmem:[#allocation2 + $0x298] ss:$36 sps:$4 sm:$0xff]   ;;  %v13347_v30 = vld [vmem:[#allocation2 + $0x2a0] ss:$36 sps:$4 sm:$0xff]  }
 0x282   : > { %v11437_v35 = vpop.f32.mrf.mxu1  ;;  %6657 = vmatprep.mubr.bf16.mxu1 %v13344_v33 }
 0x283   : > { %v5603_v27 = vpop.f32.mrf.mxu0  ;;  %v5451_v55 = vadd.f32 %v11396_v51, %v15624_v6 }
 0x284   : > { %v15753_v2 = vadd.f32 %v5603_v27, %v5443_v32  ;;  %v11438_v17 = vpop.f32.mrf.mxu1  ;;  %v13349_v27 = vld [vmem:[#allocation2 + $0x2ec] ss:$36 sps:$4 sm:$0xff]  }
 0x285   : > { %v11549_v13 = vpop.f32.mrf.mxu0  ;;  %6811 = vmatmul.mubr.bf16.gmra.mxu0 %v13343_v9  ;;  %v11439_v56 = vadd.f32 %v11438_v17, %v11437_v35  ;;  %v15758_v8 = vadd.f32 %v12412_v43, %v5451_v55  ;;  %v13348_v43 = vld [vmem:[#allocation2 + $0x2e4] ss:$36 sps:$4 sm:$0xff]  }
 0x286   : > { %6818 = vmatprep.mubr.bf16.mxu0 %v13345_v61  ;;  %v11440_v37 = vpop.f32.mrf.mxu1 }
 0x287   : > { %v11550_v46 = vpop.f32.mrf.mxu0  ;;  %v6266_v36 = vadd.f32 %v11439_v56, %v15635_v50 }
 0x288   : > { %v11551_v34 = vadd.f32 %v11550_v46, %v11549_v13  ;;  %v11441_v32 = vpop.f32.mrf.mxu1 }
 0x289   : > { %v11552_v5 = vpop.f32.mrf.mxu0  ;;  %v11442_v0 = vadd.f32 %v11441_v32, %v11440_v37  ;;  %6658 = vmatmul.mubr.bf16.gmra.mxu1 %v13346_v12 }
 0x28a   : > { %v15761_v58 = vadd.f32 %v11551_v34, %v6266_v36  ;;  %v11443_v40 = vpop.f32.mrf.mxu1  ;;  %6665 = vmatprep.mubr.bf16.mxu1 %v13348_v43  ;;  %v13351_v36 = vld [vmem:[#allocation2 + $0x2e8] ss:$36 sps:$4 sm:$0xff]   ;;  %v15774_v43 = vld [vmem:[%s13919_s15] sm:$0xf] }
 0x28b   : > { %v11553_v38 = vpop.f32.mrf.mxu0  ;;  %v6269_v16 = vadd.f32 %v11442_v0, %v15644_v59  ;;  %v17498_v0 = vld [vmem:[#allocation28_spill] sm:$0xff] }
 0x28c   : > { %v11554_v6 = vadd.f32 %v11553_v38, %v11552_v5  ;;  %v11444_v51 = vpop.f32.mrf.mxu1  ;;  %v13350_v5 = vld [vmem:[#allocation2 + $0x2e0] ss:$36 sps:$4 sm:$0xff]   ;;  %v13352_v38 = vld [vmem:[#allocation2 + $0x32c] ss:$36 sps:$4 sm:$0xff]  }
 0x28d   : > { %v11555_v25 = vpop.f32.mrf.mxu0  ;;  %6819 = vmatmul.mubr.bf16.gmra.mxu0 %v13347_v30  ;;  %v11445_v13 = vadd.f32 %v11444_v51, %v11443_v40 }
 0x28e   : > { %6826 = vmatprep.mubr.bf16.mxu0 %v13349_v27  ;;  %v15764_v35 = vadd.f32 %v11554_v6, %v6269_v16  ;;  %v11446_v9 = vpop.f32.mrf.mxu1  ;;  %v15777_v27 = vld [vmem:[%s13919_s15 + $0x1c] sm:$0xf] }
 0x28f   : > { %v11556_v50 = vpop.f32.mrf.mxu0  ;;  %v6274_v33 = vadd.f32 %v11445_v13, %v15627_v39 }
 0x290   : > { %v11557_v45 = vadd.f32 %v11556_v50, %v11555_v25  ;;  %v11447_v61 = vpop.f32.mrf.mxu1  ;;  %v15784_v50 = vunpack.c.l.bf16 %v15777_v27 }
 0x291   : > { %v11558_v55 = vpop.f32.mrf.mxu0  ;;  %v11448_v56 = vadd.f32 %v11447_v61, %v11446_v9  ;;  %6666 = vmatmul.mubr.bf16.gmra.mxu1 %v13350_v5  ;;  %v13354_v5 = vld [vmem:[#allocation2 + $0x374] ss:$36 sps:$4 sm:$0xff]  }
 0x292   : > { %v15767_v46 = vadd.f32 %v11557_v45, %v6274_v33  ;;  %v11449_v34 = vpop.f32.mrf.mxu1  ;;  %6673 = vmatprep.mubr.bf16.mxu1 %v13352_v38  ;;  %v17172_v61 = vrot.slane %v15784_v50, 7 }
 0x293   : > { %v11559_v17 = vpop.f32.mrf.mxu0  ;;  %v6277_v32 = vadd.f32 %v11448_v56, %v15638_v28  ;;  %v15781_v28 = vunpack.c.l.bf16 %v15774_v43 }
 0x294   : > { %v11560_v59 = vadd.f32 %v11559_v17, %v11558_v55  ;;  %v11450_v39 = vpop.f32.mrf.mxu1 }
 0x295   : > { %v11561_v37 = vpop.f32.mrf.mxu0  ;;  %6827 = vmatmul.mubr.bf16.gmra.mxu0 %v13351_v36  ;;  %v11451_v25 = vadd.f32 %v11450_v39, %v11449_v34  ;;  %v2753_v34 = vrot.slane %v15781_v28, 7  ;;  %v13355_v36 = vld [vmem:[#allocation2 + $0x37c] ss:$36 sps:$4 sm:$0xff]   ;;  %v15796_v39 = vld [vmem:[%s13919_s15 + $0x4] sm:$0xf] }
 0x296   : > { %6834 = vmatprep.mubr.bf16.mxu0 %v17498_v0  ;;  %v15771_v40 = vadd.f32 %v11560_v59, %v6277_v32  ;;  %v11452_v30 = vpop.f32.mrf.mxu1  ;;  %v13353_v59 = vld [vmem:[#allocation2 + $0x328] ss:$36 sps:$4 sm:$0xff]  }
 0x297   : > { %v11562_v6 = vpop.f32.mrf.mxu0  ;;  %v6282_v51 = vadd.f32 %v11451_v25, %v15657_v48  ;;  %v17501_v48 = vld [vmem:[#allocation29_spill] sm:$0xff]  ;;  %v2775_v0 = vsel %vm17502_vm2, %v17172_v61, %v2753_v34  ;;  %v13357_v61 = vld [vmem:[#allocation2 + $0x378] ss:$36 sps:$4 sm:$0xff]  }
 0x298   : > { %17499 = vst [vmem:[#allocation46_spill] sm:$0xff] %v15771_v40  ;;  %v11563_v12 = vadd.f32 %v11562_v6, %v11561_v37  ;;  %v11453_v13 = vpop.f32.mrf.mxu1  ;;  %v15799_v6 = vld [vmem:[%s13919_s15 + $0x8] sm:$0xf] }
 0x299   : > { %v11564_v16 = vpop.f32.mrf.mxu0  ;;  %v11454_v55 = vadd.f32 %v11453_v13, %v11452_v30  ;;  %6674 = vmatmul.mubr.bf16.gmra.mxu1 %v13353_v59  ;;  %v17173_v59 = vunpack.c.l.bf16 %v15799_v6 }
 0x29a   : > { %v15786_v9 = vadd.f32 %v11563_v12, %v6282_v51  ;;  %v11455_v17 = vpop.f32.mrf.mxu1  ;;  %6681 = vmatprep.mubr.bf16.mxu1 %v13354_v5 }
 0x29b   : > { %v11565_v45 = vpop.f32.mrf.mxu0  ;;  %v6285_v37 = vadd.f32 %v11454_v55, %v15670_v63  ;;  %v15805_v63 = vsel %vm17428_vm12, %v2775_v0, 0.0  ;;  %v17174_v55 = vunpack.c.l.bf16 %v15796_v39  ;;  %vm17506_vm12 = vmmov %vm17502_vm2 }
 0x29c   : > { %17500 = vst [vmem:[#allocation54_spill] sm:$0xff] %v15786_v9  ;;  %v11566_v33 = vadd.f32 %v11565_v45, %v11564_v16  ;;  %v11456_v32 = vpop.f32.mrf.mxu1  ;;  %v10912_v45 = vpack.c.bf16 %v15781_v28, %v15805_v63  ;;  %v13356_v16 = vld [vmem:[#allocation2 + $0x370] ss:$36 sps:$4 sm:$0xff]  }
 0x29d   : > { %v11567_v56 = vpop.f32.mrf.mxu0  ;;  %6835 = vmatmul.mubr.bf16.gmra.mxu0 %v17501_v48  ;;  %v11457_v12 = vadd.f32 %v11456_v32, %v11455_v17  ;;  %v2754_v17 = vrot.slane %v17174_v55, 7 }
 0x29e   : > { %6842 = vmatprep.mubr.bf16.mxu0 %v13355_v36  ;;  %v15801_v25 = vadd.f32 %v11566_v33, %v6285_v37  ;;  %v11458_v51 = vpop.f32.mrf.mxu1  ;;  %2947 = vst [vmem:[#allocation2 + $0x5c4] sm:$0xff] %v10912_v45 }
 0x29f   : > { %v11568_v38 = vpop.f32.mrf.mxu0  ;;  %v6290_v48 = vadd.f32 %v11457_v12, %v15650_v1  ;;  %v15819_v1 = vsel %vm17506_vm12, %v2753_v34, %v2754_v17  ;;  %v15837_v34 = vcombine.low %v15796_v39, %v15799_v6 }
 0x2a0   : > { %17503 = vst [vmem:[#allocation69_spill] sm:$0xff] %v15801_v25  ;;  %v11569_v30 = vadd.f32 %v11568_v38, %v11567_v56  ;;  %v11459_v5 = vpop.f32.mrf.mxu1  ;;  %v2756_v56 = vrot.slane %v17173_v59, 7  ;;  %17507 = vst [vmem:[#allocation36_spill] sm:$0xff] %v15819_v1 }
 0x2a1   : > { %v11570_v13 = vpop.f32.mrf.mxu0  ;;  %v11460_v36 = vadd.f32 %v11459_v5, %v11458_v51  ;;  %6682 = vmatmul.mubr.bf16.gmra.mxu1 %v13356_v16  ;;  %v13359_v51 = vld [vmem:[#allocation2 + $0x3c4] ss:$36 sps:$4 sm:$0xff]   ;;  %17513 = vst [vmem:[#allocation50_spill] sm:$0xff] %v15837_v34  ;;  %v15845_v16 = vld [vmem:[%s13919_s15 + $0x10] sm:$0xf] }
 0x2a2   : > { %v15816_v37 = vadd.f32 %v11569_v30, %v6290_v48  ;;  %v11461_v38 = vpop.f32.mrf.mxu1  ;;  %v15822_v12 = vsel %vm17508_vm10, %v2754_v17, %v2756_v56  ;;  %v13358_v30 = vld [vmem:[#allocation2 + $0x3bc] ss:$36 sps:$4 sm:$0xff]   ;;  %v17182_v60 = vunpack.c.l.bf16 %v15845_v16 }
 0x2a3   : > { %v11571_v33 = vpop.f32.mrf.mxu0  ;;  %17509 = vst [vmem:[#allocation30_spill] sm:$0xff] %v15822_v12  ;;  %v6293_v45 = vadd.f32 %v11460_v36, %v15660_v22  ;;  %6689 = vmatprep.mubr.bf16.mxu1 %v13358_v30  ;;  %v15842_v36 = vld [vmem:[%s13919_s15 + $0xc] sm:$0xf] }
 0x2a4   : > { %17505 = vst [vmem:[#allocation35_spill] sm:$0xff] %v15816_v37  ;;  %v11572_v32 = vadd.f32 %v11571_v33, %v11570_v13  ;;  %v17510_v13 = vld [vmem:[#allocation23_spill] sm:$0xff]  ;;  %v11462_v33 = vpop.f32.mrf.mxu1  ;;  %v17183_v5 = vunpack.c.l.bf16 %v15842_v36 }
 0x2a5   : > { %v11573_v0 = vpop.f32.mrf.mxu0  ;;  %6843 = vmatmul.mubr.bf16.gmra.mxu0 %v13357_v61  ;;  %vm17511_vm2 = vnez %v17510_v13  ;;  %v15833_v61 = vsel %vm17436_vm1, %v15822_v12, 0.0  ;;  %vm17516_vm1 = vmmov %vm17508_vm10 }
 0x2a6   : > { %6850 = vmatprep.mubr.bf16.mxu0 %v13359_v51  ;;  %v15828_v48 = vsel %vm17511_vm2, %v15819_v1, 0.0  ;;  %v15847_v30 = vadd.f32 %v11572_v32, %v6293_v45  ;;  %v11463_v51 = vadd.f32 %v11462_v33, %v11461_v38  ;;  %v11464_v59 = vpop.f32.mrf.mxu1  ;;  %v2758_v12 = vrot.slane %v17183_v5, 7  ;;  %vm17518_vm12 = vmmov %vm17516_vm1 }
 0x2a7   : > { %v11574_v22 = vpop.f32.mrf.mxu0  ;;  %v2868_v17 = vpack.c.bf16 %v15833_v61, %v15828_v48  ;;  %v2760_v38 = vrot.slane %v17182_v60, 7 }
 0x2a8   : > { %17514 = vst [vmem:[#allocation39_spill] sm:$0xff] %v15847_v30  ;;  %v11575_v13 = vadd.f32 %v11574_v22, %v11573_v0  ;;  %v6298_v14 = vadd.f32 %v11463_v51, %v15682_v49  ;;  %v11465_v1 = vpop.f32.mrf.mxu1  ;;  %v15861_v22 = vsel %vm17516_vm1, %v2756_v56, %v2758_v12  ;;  %v13360_v49 = vld [vmem:[#allocation2 + $0x3b8] ss:$36 sps:$4 sm:$0xff]   ;;  %v13361_v51 = vld [vmem:[#allocation2 + $0x3c0] ss:$36 sps:$4 sm:$0xff]  }
 0x2a9   : > { %v11576_v55 = vpop.f32.mrf.mxu0  ;;  %v10914_v19 = vcombine.low %v2868_v17, %v15796_v39  ;;  %v10121_v62 = vcombine.high %v2868_v17, %v15837_v34  ;;  %v11466_v45 = vadd.f32 %v11465_v1, %v11464_v59  ;;  %17517 = vst [vmem:[#allocation48_spill] sm:$0xff] %v15861_v22  ;;  %6690 = vmatmul.mubr.bf16.gmra.mxu1 %v13360_v49  ;;  %v13362_v59 = vld [vmem:[#allocation2 + $0x404] ss:$36 sps:$4 sm:$0xff]   ;;  %v13363_v56 = vld [vmem:[#allocation2 + $0x40c] ss:$36 sps:$4 sm:$0xff]  }
 0x2aa   : > { %v15858_v0 = vadd.f32 %v11575_v13, %v6298_v14  ;;  %v11467_v17 = vpop.f32.mrf.mxu1  ;;  %v15869_v14 = vsel %vm17439_vm5, %v15861_v22, 0.0  ;;  %6697 = vmatprep.mubr.bf16.mxu1 %v13362_v59  ;;  %vm17525_vm5 = vmmov %vm17516_vm1 }
 0x2ab   : > { %v11577_v32 = vpop.f32.mrf.mxu0  ;;  %3137 = vst [vmem:[#allocation2 + $0x5b8] sm:$0xff] %v10914_v19  ;;  %3139 = vst [vmem:[#allocation2 + $0x5dc] sm:$0xff] %v10121_v62  ;;  %v15864_v62 = vsel %vm17518_vm12, %v2758_v12, %v2760_v38  ;;  %v15879_v12 = vcombine.low %v15842_v36, %v15845_v16  ;;  %v15884_v19 = vld [vmem:[%s13919_s15 + $0x14] sm:$0xf] }
 0x2ac   : > { %17515 = vst [vmem:[#allocation58_spill] sm:$0xff] %v15858_v0  ;;  %v11578_v33 = vadd.f32 %v11577_v32, %v11576_v55  ;;  %17519 = vst [vmem:[#allocation52_spill] sm:$0xff] %v15864_v62  ;;  %v6301_v55 = vadd.f32 %v11466_v45, %v15693_v4  ;;  %v15875_v13 = vsel %vm17442_vm3, %v15864_v62, 0.0  ;;  %v11468_v32 = vpop.f32.mrf.mxu1  ;;  %v15887_v4 = vld [vmem:[%s13919_s15 + $0x18] sm:$0xf]  ;;  %v17186_v1 = vunpack.c.l.bf16 %v15884_v19 }
 0x2ad   : > { %v11579_v34 = vpop.f32.mrf.mxu0  ;;  %6851 = vmatmul.mubr.bf16.gmra.mxu0 %v13361_v51  ;;  %17522 = vst [vmem:[#allocation65_spill] sm:$0xff] %v15879_v12  ;;  %v2871_v51 = vpack.c.bf16 %v15875_v13, %v15869_v14  ;;  %v11469_v59 = vadd.f32 %v11468_v32, %v11467_v17  ;;  %v17187_v0 = vunpack.c.l.bf16 %v15887_v4  ;;  %vm17527_vm3 = vmmov %vm17516_vm1 }
 0x2ae   : > { %6858 = vmatprep.mubr.bf16.mxu0 %v13363_v56  ;;  %v15889_v45 = vadd.f32 %v11578_v33, %v6301_v55  ;;  %v11470_v60 = vpop.f32.mrf.mxu1  ;;  %v2762_v37 = vrot.slane %v17186_v1, 7  ;;  %v13365_v1 = vld [vmem:[#allocation2 + $0x408] ss:$36 sps:$4 sm:$0xff]  }
 0x2af   : > { %v11580_v49 = vpop.f32.mrf.mxu0  ;;  %v10917_v62 = vcombine.low %v2871_v51, %v15842_v36  ;;  %v10125_v22 = vcombine.high %v2871_v51, %v15879_v12  ;;  %v6306_v30 = vadd.f32 %v11469_v59, %v15676_v53  ;;  %v13364_v59 = vld [vmem:[#allocation2 + $0x400] ss:$36 sps:$4 sm:$0xff]  }
 0x2b0   : > { %17523 = vst [vmem:[#allocation37_spill] sm:$0xff] %v15889_v45  ;;  %v11581_v56 = vadd.f32 %v11580_v49, %v11579_v34  ;;  %v11471_v25 = vpop.f32.mrf.mxu1  ;;  %v15900_v34 = vrot.slane %v17187_v0, 7  ;;  %v15905_v49 = vsel %vm17525_vm5, %v2760_v38, %v2762_v37 }
 0x2b1   : > { %v11582_v5 = vpop.f32.mrf.mxu0  ;;  %3141 = vst [vmem:[#allocation2 + $0x600] sm:$0xff] %v10917_v62  ;;  %3143 = vst [vmem:[#allocation2 + $0x624] sm:$0xff] %v10125_v22  ;;  %v11472_v55 = vadd.f32 %v11471_v25, %v11470_v60  ;;  %6698 = vmatmul.mubr.bf16.gmra.mxu1 %v13364_v59  ;;  %v13366_v25 = vld [vmem:[#allocation2 + $0x44c] ss:$36 sps:$4 sm:$0xff]   ;;  %v7041_v59 = vld [vmem:[#allocation2 + $0x264] sm:$0xff] }
 0x2b2   : > { %v15902_v17 = vadd.f32 %v11581_v56, %v6306_v30  ;;  %17526 = vst [vmem:[#allocation61_spill] sm:$0xff] %v15905_v49  ;;  %v11473_v51 = vpop.f32.mrf.mxu1  ;;  %v15909_v22 = vsel %vm17527_vm3, %v2762_v37, %v15900_v34  ;;  %v15914_v30 = vsel %vm14172_vm8, %v15905_v49, 0.0  ;;  %6705 = vmatprep.mubr.bf16.mxu1 %v13366_v25  ;;  %v15925_v37 = vcombine.low %v15884_v19, %v15887_v4 }
 0x2b3   : > { %v11583_v33 = vpop.f32.mrf.mxu0  ;;  %17528 = vst [vmem:[#allocation44_spill] sm:$0xff] %v15909_v22  ;;  %v6309_v60 = vadd.f32 %v11472_v55, %v15687_v42  ;;  %v15921_v56 = vsel %vm14178_vm9, %v15909_v22, 0.0  ;;  %v10495_v12 = vcombine.high %v15662_v10, %v7041_v59  ;;  %vm17538_vm8 = vcmask 1046528  }
 0x2b4   : > { %17524 = vst [vmem:[#allocation31_spill] sm:$0xff] %v15902_v17  ;;  %v11584_v32 = vadd.f32 %v11583_v33, %v11582_v5  ;;  %v17530_v5 = vld [vmem:[#allocation45_spill] sm:$0xff]  ;;  %17532 = vst [vmem:[#allocation51_spill] sm:$0xff] %v15925_v37  ;;  %v2874_v62 = vpack.c.bf16 %v15921_v56, %v15914_v30 }
 0x2b5   : > { %v11585_v53 = vpop.f32.mrf.mxu0  ;;  %6859 = vmatmul.mubr.bf16.gmra.mxu0 %v13365_v1  ;;  %v11474_v1 = vpop.f32.mrf.mxu1  ;;  %v12983_v17 = vld [vmem:[#allocation2 + $0x20] ss:$36 sps:$4 sm:$0xff]   ;;  %vm17543_vm10 = vmmov %vm17538_vm8 }
 0x2b6   : > { %6866 = vmatprep.mubr.bf16.mxu0 %v17530_v5  ;;  %v15929_v42 = vadd.f32 %v11584_v32, %v6309_v60  ;;  %v11475_v55 = vadd.f32 %v11474_v1, %v11473_v51  ;;  %v10920_v38 = vcombine.low %v2874_v62, %v15884_v19  ;;  %v10129_v22 = vcombine.high %v2874_v62, %v15925_v37  ;;  %v13367_v1 = vld [vmem:[#allocation2 + $0x448] ss:$36 sps:$4 sm:$0xff]   ;;  %vm17544_vm2 = vmmov %vm17538_vm8 }
 0x2b7   : > { %v11586_v33 = vpop.f32.mrf.mxu0  ;;  %v11476_v5 = vpop.f32.mrf.mxu1  ;;  %vm17551_vm5 = vmmov %vm17544_vm2 }
 0x2b8   : > { %v11587_v25 = vadd.f32 %v11586_v33, %v11585_v53  ;;  %v6314_v49 = vadd.f32 %v11475_v55, %v15702_v21  ;;  %3145 = vst [vmem:[#allocation2 + $0x648] sm:$0xff] %v10920_v38  ;;  %3147 = vst [vmem:[#allocation2 + $0x66c] sm:$0xff] %v10129_v22  ;;  %v17534_v33 = vld [vmem:[#allocation42_spill] sm:$0xff] }
 0x2b9   : > { %v11588_v0 = vpop.f32.mrf.mxu0  ;;  %v11477_v45 = vpop.f32.mrf.mxu1  ;;  %6706 = vmatmul.mubr.bf16.gmra.mxu1 %v13367_v1  ;;  %v12988_v1 = vld [vmem:[#allocation9 + $0x5b8] sm:$0xff]   ;;  %vm17552_vm3 = vmmov %vm17544_vm2 }
 0x2ba   : > { %v15935_v40 = vadd.f32 %v11587_v25, %v6314_v49  ;;  %v11478_v32 = vadd.f32 %v11477_v45, %v11476_v5  ;;  %12429 = vmatprep.mubr.bf16.mxu1 %v12983_v17  ;;  %v12986_v5 = vld [vmem:[#allocation9 + $0x538] sm:$0xff]   ;;  %v12992_v17 = vld [vmem:[#allocation2 + $0x28c] ss:$36 sps:$4 sm:$0xff]  }
 0x2bb   : > { %v11589_v9 = vpop.f32.mrf.mxu0  ;;  %v11479_v53 = vpop.f32.mrf.mxu1 }
 0x2bc   : > { %17533 = vst [vmem:[#allocation62_spill] sm:$0xff] %v15935_v40  ;;  %v11590_v51 = vadd.f32 %v11589_v9, %v11588_v0  ;;  %v6317_v62 = vadd.f32 %v11478_v32, %v15709_v41  ;;  %v10494_v9 = vcombine.low %v15662_v10, %v7041_v59  ;;  %v12984_v0 = vld [vmem:[#allocation2 + $0x68] ss:$36 sps:$4 sm:$0xff]   ;;  %v12989_v41 = vld [vmem:[#allocation2 + $0xb0] ss:$36 sps:$4 sm:$0xff]  }
 0x2bd   : > { %v11591_v60 = vpop.f32.mrf.mxu0  ;;  %6867 = vmatmul.mubr.bf16.gmra.mxu0 %v17534_v33  ;;  %v11480_v21 = vpop.f32.mrf.mxu1  ;;  %v13002_v59 = vld [vmem:[#allocation9 + $0x5b0] sm:$0xff]  }
 0x2be   : > { %8541 = vmatprep.mubr.bf16.mxu0 %v10495_v12  ;;  %v15939_v37 = vadd.f32 %v11590_v51, %v6317_v62  ;;  %v11481_v38 = vadd.f32 %v11480_v21, %v11479_v53  ;;  %v12994_v62 = vld [vmem:[#allocation9 + $0x570] sm:$0xff]  }
 0x2bf   : > { %v11592_v55 = vpop.f32.mrf.mxu0  ;;  %v11482_v49 = vpop.f32.mrf.mxu1  ;;  %v13001_v53 = vld [vmem:[#allocation9 + $0x5f0] sm:$0xff]  }
 0x2c0   : > { %v11593_v22 = vadd.f32 %v11592_v55, %v11591_v60  ;;  %v6322_v45 = vadd.f32 %v11481_v38, %v15696_v3  ;;  %v12995_v3 = vld [vmem:[#allocation9 + $0x530] sm:$0xff]  }
 0x2c1   : > { %v11594_v25 = vpop.f32.mrf.mxu0  ;;  %v11483_v33 = vpop.f32.mrf.mxu1  ;;  %12430 = vmatmul.mubr.bf16.vlgmr.msra.gmra.mxu1 %v12984_v0 }
 0x2c2   : > { %v15943_v12 = vadd.f32 %v11593_v22, %v6322_v45  ;;  %v11484_v32 = vadd.f32 %v11483_v33, %v11482_v49  ;;  %12006 = vmatpush3.bf16.msra.mxu1 %v12986_v5  ;;  %12433 = vmatprep.mubr.bf16.mxu1 %v12989_v41  ;;  %v12999_v22 = vld [vmem:[#allocation9 + $0x568] sm:$0xff]  }
 0x2c3   : > { %v11595_v40 = vpop.f32.mrf.mxu0  ;;  %v11485_v60 = vpop.f32.mrf.mxu1  ;;  %v13010_v45 = vld [vmem:[#allocation9 + $0x5e8] sm:$0xff]   ;;  %12007 = vmatprep.subr.bf16.mxu1 %v12994_v62 }
 0x2c4   : > { %v11596_v51 = vadd.f32 %v11595_v40, %v11594_v25  ;;  %v6325_v10 = vadd.f32 %v11484_v32, %v15705_v52  ;;  %v12990_v33 = vld [vmem:[#allocation2 + $0x288] ss:$36 sps:$4 sm:$0xff]   ;;  %v12993_v52 = vld [vmem:[#allocation2 + $0xf8] ss:$36 sps:$4 sm:$0xff]  }
 0x2c5   : > { %v11597_v21 = vpop.f32.mrf.mxu0  ;;  %8542 = vmatmul.mubr.bf16.vlgmr.msra.gmra.mxu0 %v10494_v9  ;;  %v11486_v55 = vpop.f32.mrf.mxu1 }
 0x2c6   : > { %12118 = vmatpush3.bf16.msra.mxu0 %v12988_v1  ;;  %8549 = vmatprep.mubr.bf16.mxu0 %v12992_v17  ;;  %v15946_v49 = vadd.f32 %v11596_v51, %v6325_v10  ;;  %v11487_v40 = vadd.f32 %v11486_v55, %v11485_v60  ;;  %v12998_v1 = vld [vmem:[#allocation2 + $0x2d4] ss:$36 sps:$4 sm:$0xff]   ;;  %v13000_v17 = vld [vmem:[#allocation9 + $0x528] sm:$0xff]  }
 0x2c7   : > { %v11598_v38 = vpop.f32.mrf.mxu0  ;;  %12119 = vmatprep.subr.bf16.mxu0 %v13001_v53  ;;  %v11488_v0 = vpop.f32.mrf.mxu1  ;;  %12008 = vmatpush3.bf16.msra.mxu1 %v12995_v3  ;;  %v13011_v51 = vld [vmem:[#allocation9 + $0x5a8] sm:$0xff]   ;;  %v13006_v53 = vld [vmem:[#allocation9 + $0x560] sm:$0xff]  }
 0x2c8   : > { %v11599_v25 = vadd.f32 %v11598_v38, %v11597_v21  ;;  %v6330_v5 = vadd.f32 %v11487_v40, %v15716_v44  ;;  %12009 = vmatprep.subr.bf16.mxu1 %v12999_v22  ;;  %v13022_v21 = vld [vmem:[#allocation9 + $0x5e0] sm:$0xff]  }
 0x2c9   : > { %v11600_v9 = vpop.f32.mrf.mxu0  ;;  %v11489_v32 = vpop.f32.mrf.mxu1  ;;  %12434 = vmatmul.mubr.bf16.gmra.mxu1 %v12993_v52  ;;  %v13368_v3 = vld [vmem:[#allocation2 + $0x140] ss:$36 sps:$4 sm:$0xff]   ;;  %v13034_v52 = vld [vmem:[#allocation9 + $0x5d8] sm:$0xff]  }
 0x2ca   : > { %12120 = vmatpush3.bf16.msra.mxu0 %v13002_v59  ;;  %v15949_v10 = vadd.f32 %v11599_v25, %v6330_v5  ;;  %v11490_v60 = vadd.f32 %v11489_v32, %v11488_v0  ;;  %12437 = vmatprep.mubr.bf16.mxu1 %v13368_v3  ;;  %v13023_v40 = vld [vmem:[#allocation9 + $0x5a0] sm:$0xff]   ;;  %v13008_v5 = vld [vmem:[#allocation9 + $0x558] sm:$0xff]  }
 0x2cb   : > { %v11601_v41 = vpop.f32.mrf.mxu0  ;;  %12121 = vmatprep.subr.bf16.mxu0 %v13010_v45  ;;  %v11491_v55 = vpop.f32.mrf.mxu1  ;;  %12010 = vmatpush3.bf16.msra.mxu1 %v13000_v17  ;;  %v13007_v45 = vld [vmem:[#allocation9 + $0x520] sm:$0xff]   ;;  %v13009_v17 = vld [vmem:[#allocation9 + $0x518] sm:$0xff]  }
 0x2cc   : > { %v11602_v62 = vadd.f32 %v11601_v41, %v11600_v9  ;;  %v6333_v44 = vadd.f32 %v11490_v60, %v15723_v24  ;;  %12011 = vmatprep.subr.bf16.mxu1 %v13006_v53  ;;  %v12996_v24 = vld [vmem:[#allocation2 + $0x2d0] ss:$36 sps:$4 sm:$0xff]  }
 0x2cd   : > { %v11603_v38 = vpop.f32.mrf.mxu0  ;;  %8550 = vmatmul.mubr.bf16.gmra.mxu0 %v12990_v33  ;;  %v11492_v59 = vpop.f32.mrf.mxu1  ;;  %v13015_v53 = vld [vmem:[#allocation9 + $0x550] sm:$0xff]  }
 0x2ce   : > { %8557 = vmatprep.mubr.bf16.mxu0 %v12998_v1  ;;  %12122 = vmatpush3.bf16.msra.mxu0 %v13011_v51  ;;  %v15952_v25 = vadd.f32 %v11602_v62, %v6333_v44  ;;  %v11493_v0 = vadd.f32 %v11492_v59, %v11491_v55  ;;  %v13005_v1 = vld [vmem:[#allocation2 + $0x31c] ss:$36 sps:$4 sm:$0xff]  }
 0x2cf   : > { %v11604_v22 = vpop.f32.mrf.mxu0  ;;  %12123 = vmatprep.subr.bf16.mxu0 %v13022_v21  ;;  %v11494_v33 = vpop.f32.mrf.mxu1  ;;  %12012 = vmatpush3.bf16.msra.mxu1 %v13007_v45  ;;  %v13035_v51 = vld [vmem:[#allocation9 + $0x598] sm:$0xff]   ;;  %v13050_v21 = vld [vmem:[#allocation9 + $0x5d0] sm:$0xff]   ;;  %v17537_v45 = vunpack.c.l.bf16 %v15796_v39 }
 0x2d0   : > { %17535 = vst [vmem:[#allocation38_spill] sm:$0xff] %v15952_v25  ;;  %v11605_v9 = vadd.f32 %v11604_v22, %v11603_v38  ;;  %v6338_v41 = vadd.f32 %v11493_v0, %v15712_v18  ;;  %12013 = vmatprep.subr.bf16.mxu1 %v13008_v5  ;;  %v13369_v22 = vld [vmem:[#allocation2 + $0x188] ss:$36 sps:$4 sm:$0xff]   ;;  %v17192_v18 = vrot.slane %v15781_v28, 1 }
 0x2d1   : > { %v11606_v32 = vpop.f32.mrf.mxu0  ;;  %v11495_v60 = vpop.f32.mrf.mxu1  ;;  %12438 = vmatmul.mubr.bf16.gmra.mxu1 %v13369_v22  ;;  %v15960_v0 = vrot.slane %v17537_v45, 1  ;;  %v17539_v22 = vld [vmem:[#allocation32_spill] sm:$0xff] }
 0x2d2   : > { %12124 = vmatpush3.bf16.msra.mxu0 %v13023_v40  ;;  %v15955_v62 = vadd.f32 %v11605_v9, %v6338_v41  ;;  %v11496_v55 = vadd.f32 %v11495_v60, %v11494_v33  ;;  %v13370_v9 = vld [vmem:[#allocation2 + $0x1d0] ss:$36 sps:$4 sm:$0xff]   ;;  %v2961_v60 = vpack.c.bf16 %v15828_v48, %v15805_v63  ;;  %vm17540_vm9 = vnez %v17539_v22 }
 0x2d3   : > { %v11607_v3 = vpop.f32.mrf.mxu0  ;;  %12125 = vmatprep.subr.bf16.mxu0 %v13034_v52  ;;  %v11497_v44 = vpop.f32.mrf.mxu1  ;;  %12441 = vmatprep.mubr.bf16.mxu1 %v13370_v9  ;;  %v15963_v52 = vld [vmem:[#allocation2 + $0x384] sm:$0xff]  ;;  %v13051_v41 = vld [vmem:[#allocation9 + $0x590] sm:$0xff]   ;;  %v17542_v22 = vunpack.c.l.bf16 %v15842_v36 }
 0x2d4   : > { %17536 = vst [vmem:[#allocation59_spill] sm:$0xff] %v15955_v62  ;;  %v11608_v38 = vadd.f32 %v11607_v3, %v11606_v32  ;;  %v6341_v40 = vadd.f32 %v11496_v55, %v15719_v20  ;;  %12014 = vmatpush3.bf16.msra.mxu1 %v13009_v17  ;;  %v13016_v32 = vld [vmem:[#allocation9 + $0x510] sm:$0xff]   ;;  %v10131_v20 = vcombine.low %v15774_v43, %v15796_v39  ;;  %v13020_v17 = vld [vmem:[#allocation9 + $0x548] sm:$0xff]  }
 0x2d5   : > { %v11609_v59 = vpop.f32.mrf.mxu0  ;;  %8558 = vmatmul.mubr.bf16.gmra.mxu0 %v12996_v24  ;;  %v11498_v5 = vpop.f32.mrf.mxu1  ;;  %v2786_v24 = vsel %vm17538_vm8, %v17192_v18, %v15960_v0  ;;  %12015 = vmatprep.subr.bf16.mxu1 %v13015_v53  ;;  %v13003_v18 = vld [vmem:[#allocation2 + $0x318] ss:$36 sps:$4 sm:$0xff]   ;;  %v10923_v63 = vcombine.low %v2961_v60, %v15774_v43 }
 0x2d6   : > { %8565 = vmatprep.mubr.bf16.mxu0 %v13005_v1  ;;  %12126 = vmatpush3.bf16.msra.mxu0 %v13035_v51  ;;  %v15973_v1 = vadd.f32 %v11608_v38, %v6341_v40  ;;  %v11499_v3 = vadd.f32 %v11498_v5, %v11497_v44  ;;  %v13063_v51 = vld [vmem:[#allocation9 + $0x5c8] sm:$0xff]   ;;  %v2809_v45 = vsel %vm17540_vm9, %v2786_v24, 0.0  ;;  %v10137_v48 = vcombine.high %v2961_v60, %v10131_v20  ;;  %v15979_v38 = vld [vmem:[#allocation2 + $0x120] sm:$0xff]  ;;  %vm17560_vm9 = vmmov %vm17544_vm2 }
 0x2d7   : > { %v11610_v33 = vpop.f32.mrf.mxu0  ;;  %12127 = vmatprep.subr.bf16.mxu0 %v13050_v21  ;;  %v11500_v9 = vpop.f32.mrf.mxu1  ;;  %v10913_v25 = vpack.c.bf16 %v2809_v45, %v2809_v45  ;;  %v10531_v53 = vcombine.high %v15979_v38, %v15963_v52  ;;  %v13064_v40 = vld [vmem:[#allocation9 + $0x588] sm:$0xff]   ;;  %3041 = vst [vmem:[#allocation2 + $0x5ac] sm:$0xff] %v10923_v63  ;;  %v13075_v24 = vld [vmem:[#allocation9 + $0x5c0] sm:$0xff]   ;;  %v15989_v45 = vrot.slane %v17542_v22, 1 }
 0x2d8   : > { %v11611_v55 = vadd.f32 %v11610_v33, %v11609_v59  ;;  %v6346_v39 = vadd.f32 %v11499_v3, %v15729_v26  ;;  %12016 = vmatpush3.bf16.msra.mxu1 %v13016_v32  ;;  %v13021_v59 = vld [vmem:[#allocation9 + $0x508] sm:$0xff]   ;;  %3043 = vst [vmem:[#allocation2 + $0x5d0] sm:$0xff] %v10137_v48  ;;  %v13027_v26 = vld [vmem:[#allocation9 + $0x540] sm:$0xff]   ;;  %v13372_v3 = vld [vmem:[#allocation2 + $0x218] ss:$36 sps:$4 sm:$0xff]   ;;  %v17541_v32 = vunpack.c.l.bf16 %v15799_v6 }
 0x2d9   : > { %v11612_v62 = vpop.f32.mrf.mxu0  ;;  %v11501_v44 = vpop.f32.mrf.mxu1  ;;  %2948 = vst [vmem:[#allocation2 + $0x5cc] sm:$0xf] %v10913_v25  ;;  %3042 = vst [vmem:[#allocation2 + $0x5b4] sm:$0xf] %v10913_v25  ;;  %12017 = vmatprep.subr.bf16.mxu1 %v13020_v17  ;;  %12442 = vmatmul.mubr.bf16.gmra.mxu1 %v13372_v3  ;;  %v17547_v3 = vld [vmem:[#allocation47_spill] sm:$0xff] }
 0x2da   : > { %12128 = vmatpush3.bf16.msra.mxu0 %v13051_v41  ;;  %v15983_v5 = vadd.f32 %v11611_v55, %v6346_v39  ;;  %v11502_v43 = vadd.f32 %v11501_v44, %v11500_v9  ;;  %v2787_v41 = vrot.slane %v17541_v32, 1  ;;  %v13373_v55 = vld [vmem:[#allocation2 + $0x260] ss:$36 sps:$4 sm:$0xff]   ;;  %vm17548_vm12 = vnez %v17547_v3 }
 0x2db   : > { %v11613_v21 = vpop.f32.mrf.mxu0  ;;  %12129 = vmatprep.subr.bf16.mxu0 %v13063_v51  ;;  %v11503_v60 = vpop.f32.mrf.mxu1  ;;  %12445 = vmatprep.mubr.bf16.mxu1 %v13373_v55  ;;  %v13028_v9 = vld [vmem:[#allocation9 + $0x500] sm:$0xff]  }
 0x2dc   : > { %v11614_v33 = vadd.f32 %v11613_v21, %v11612_v62  ;;  %v6349_v25 = vadd.f32 %v11502_v43, %v15735_v23  ;;  %v10530_v62 = vcombine.low %v15979_v38, %v15963_v52  ;;  %12018 = vmatpush3.bf16.msra.mxu1 %v13021_v59  ;;  %v2788_v63 = vsel %vm17543_vm10, %v15960_v0, %v2787_v41  ;;  %v16002_v21 = vld [vmem:[#allocation9 + $0x6b8] sm:$0xff]   ;;  %v17545_v59 = vld [vmem:[#allocation43_spill] sm:$0xff]  ;;  %vm17561_vm10 = vmmov %vm17544_vm2 }
 0x2dd   : > { %v11615_v20 = vpop.f32.mrf.mxu0  ;;  %8566 = vmatmul.mubr.bf16.gmra.mxu0 %v13003_v18  ;;  %v11504_v17 = vpop.f32.mrf.mxu1  ;;  %v13076_v18 = vld [vmem:[#allocation9 + $0x580] sm:$0xff]   ;;  %v2790_v48 = vsel %vm17544_vm2, %v2787_v41, %v15989_v45  ;;  %v2964_v23 = vpack.c.bf16 %v15869_v14, %v15833_v61  ;;  %12019 = vmatprep.subr.bf16.mxu1 %v13027_v26  ;;  %vm17546_vm1 = vnez %v17545_v59  ;;  %v10132_v61 = vcombine.low %v15799_v6, %v15842_v36  ;;  %v13014_v26 = vld [vmem:[#allocation2 + $0x3ac] ss:$36 sps:$4 sm:$0xff]  }
 0x2de   : > { %8573 = vmatprep.mubr.bf16.mxu0 %v10531_v53  ;;  %12130 = vmatpush3.bf16.msra.mxu0 %v13064_v40  ;;  %v16000_v39 = vadd.f32 %v11614_v33, %v6349_v25  ;;  %v11505_v44 = vadd.f32 %v11504_v17, %v11503_v60  ;;  %v13032_v53 = vld [vmem:[#allocation9 + $0x678] sm:$0xff]   ;;  %v2810_v40 = vsel %vm17546_vm1, %v2788_v63, 0.0  ;;  %v2811_v32 = vsel %vm17548_vm12, %v2790_v48, 0.0  ;;  %v13374_v36 = vld [vmem:[#allocation2 + $0x2a8] ss:$36 sps:$4 sm:$0xff]  }
 0x2df   : > { %v11616_v51 = vpop.f32.mrf.mxu0  ;;  %12131 = vmatprep.subr.bf16.mxu0 %v13075_v24  ;;  %v11506_v43 = vpop.f32.mrf.mxu1  ;;  %v10915_v41 = vpack.c.bf16 %v2810_v40, %v2810_v40  ;;  %v10926_v14 = vcombine.low %v2964_v23, %v15799_v6  ;;  %v10916_v24 = vpack.c.bf16 %v2811_v32, %v2811_v32  ;;  %v10141_v22 = vcombine.high %v2964_v23, %v10132_v61  ;;  %v13375_v23 = vld [vmem:[#allocation2 + $0x2f0] ss:$36 sps:$4 sm:$0xff]  }
 0x2e0   : > { %v11617_v52 = vadd.f32 %v11616_v51, %v11615_v20  ;;  %v6354_v33 = vadd.f32 %v11505_v44, %v15725_v47  ;;  %12020 = vmatpush3.bf16.msra.mxu1 %v13028_v9  ;;  %v17549_v51 = vunpack.c.l.bf16 %v15845_v16  ;;  %v10133_v40 = vcombine.low %v15845_v16, %v15884_v19 }
 0x2e1   : > { %v11618_v0 = vpop.f32.mrf.mxu0  ;;  %v11507_v60 = vpop.f32.mrf.mxu1  ;;  %2950 = vst [vmem:[#allocation2 + $0x5f0] sm:$0xf] %v10915_v41  ;;  %3045 = vst [vmem:[#allocation2 + $0x5f4] sm:$0xff] %v10926_v14  ;;  %12229 = vmatprep.subr.bf16.mxu1 %v13032_v53  ;;  %12446 = vmatmul.mubr.bf16.gmra.mxu1 %v13374_v36  ;;  %v13012_v14 = vld [vmem:[#allocation2 + $0x3a8] ss:$36 sps:$4 sm:$0xff]  }
 0x2e2   : > { %12132 = vmatpush3.bf16.msra.mxu0 %v13076_v18  ;;  %3044 = vst [vmem:[#allocation2 + $0x5d8] sm:$0xf] %v10915_v41  ;;  %3138 = vst [vmem:[#allocation2 + $0x5c0] sm:$0xf] %v10915_v41  ;;  %v16012_v25 = vadd.f32 %v11617_v52, %v6354_v33  ;;  %v11508_v55 = vadd.f32 %v11507_v60, %v11506_v43  ;;  %v2791_v9 = vrot.slane %v17549_v51, 1  ;;  %v17550_v18 = vunpack.c.l.bf16 %v15884_v19  ;;  %v17554_v33 = vld [vmem:[#allocation56_spill] sm:$0xff] }
 0x2e3   : > { %v11619_v20 = vpop.f32.mrf.mxu0  ;;  %12461 = vmatprep.subr.bf16.mxu0 %v16002_v21  ;;  %2952 = vst [vmem:[#allocation2 + $0x614] sm:$0xf] %v10916_v24  ;;  %3046 = vst [vmem:[#allocation2 + $0x5fc] sm:$0xf] %v10916_v24  ;;  %v11509_v47 = vpop.f32.mrf.mxu1  ;;  %12449 = vmatprep.mubr.bf16.mxu1 %v13375_v23  ;;  %vm17555_vm8 = vnez %v17554_v33  ;;  %v13019_v19 = vld [vmem:[#allocation2 + $0x3f4] ss:$36 sps:$4 sm:$0xff]  }
 0x2e4   : > { %v11620_v17 = vadd.f32 %v11619_v20, %v11618_v0  ;;  %3140 = vst [vmem:[#allocation2 + $0x5e4] sm:$0xf] %v10916_v24  ;;  %3047 = vst [vmem:[#allocation2 + $0x618] sm:$0xff] %v10141_v22  ;;  %v2793_v63 = vrot.slane %v17550_v18, 1  ;;  %v6357_v48 = vadd.f32 %v11508_v55, %v15731_v29  ;;  %v2792_v53 = vsel %vm17551_vm5, %v15989_v45, %v2791_v9  ;;  %v13376_v36 = vld [vmem:[#allocation2 + $0x338] ss:$36 sps:$4 sm:$0xff]  }
 0x2e5   : > { %v11621_v6 = vpop.f32.mrf.mxu0  ;;  %8574 = vmatmul.mubr.bf16.gmra.mxu0 %v10530_v62  ;;  %v11510_v44 = vpop.f32.mrf.mxu1  ;;  %v2967_v62 = vpack.c.bf16 %v15914_v30, %v15875_v13  ;;  %v2812_v32 = vsel %vm17350_vm4, %v2792_v53, 0.0  ;;  %vm17557_vm4 = vcmask 1040384  }
 0x2e6   : > { %8581 = vmatprep.mubr.bf16.mxu0 %v13014_v26  ;;  %v2794_v59 = vsel %vm17552_vm3, %v2791_v9, %v2793_v63  ;;  %v16027_v43 = vadd.f32 %v11620_v17, %v6357_v48  ;;  %v11511_v0 = vadd.f32 %v11510_v44, %v11509_v47  ;;  %v10918_v26 = vpack.c.bf16 %v2812_v32, %v2812_v32  ;;  %v13377_v44 = vld [vmem:[#allocation2 + $0x380] ss:$36 sps:$4 sm:$0xff]  }
 0x2e7   : > { %v11622_v52 = vpop.f32.mrf.mxu0  ;;  %v11512_v41 = vpop.f32.mrf.mxu1  ;;  %v2813_v45 = vsel %vm17555_vm8, %v2794_v59, 0.0  ;;  %v10929_v24 = vcombine.low %v2967_v62, %v15845_v16  ;;  %v10145_v13 = vcombine.high %v2967_v62, %v10133_v40  ;;  %v17558_v9 = vunpack.c.l.bf16 %v15887_v4 }
 0x2e8   : > { %v11623_v29 = vadd.f32 %v11622_v52, %v11621_v6  ;;  %v6362_v30 = vadd.f32 %v11511_v0, %v15741_v7  ;;  %v10919_v60 = vpack.c.bf16 %v2813_v45, %v2813_v45  ;;  %2954 = vst [vmem:[#allocation2 + $0x638] sm:$0xf] %v10918_v26  ;;  %3048 = vst [vmem:[#allocation2 + $0x620] sm:$0xf] %v10918_v26  ;;  %v17556_v7 = vrot.slane %v15784_v50, 7 }
 0x2e9   : > { %v11624_v61 = vpop.f32.mrf.mxu0  ;;  %v11513_v20 = vpop.f32.mrf.mxu1  ;;  %3049 = vst [vmem:[#allocation2 + $0x63c] sm:$0xff] %v10929_v24  ;;  %3051 = vst [vmem:[#allocation2 + $0x660] sm:$0xff] %v10145_v13  ;;  %12450 = vmatmul.mubr.bf16.gmra.mxu1 %v13376_v36  ;;  %v2795_v18 = vrot.slane %v17558_v9, 1  ;;  %v2797_v48 = vrot.slane %v15784_v50, 1  ;;  %v13379_v36 = vld [vmem:[#allocation2 + $0x410] ss:$36 sps:$4 sm:$0xff]  }
 0x2ea   : > { %3142 = vst [vmem:[#allocation2 + $0x608] sm:$0xf] %v10918_v26  ;;  %v16035_v55 = vadd.f32 %v11623_v29, %v6362_v30  ;;  %v11514_v17 = vadd.f32 %v11513_v20, %v11512_v41  ;;  %2956 = vst [vmem:[#allocation2 + $0x65c] sm:$0xf] %v10919_v60  ;;  %v2766_v51 = vsel %vm17557_vm4, %v15900_v34, %v17556_v7  ;;  %12453 = vmatprep.mubr.bf16.mxu1 %v13377_v44  ;;  %v7121_v9 = vld [vmem:[#allocation2 + $0x4a4] sm:$0xff] }
 0x2eb   : > { %v11625_v22 = vpop.f32.mrf.mxu0  ;;  %3050 = vst [vmem:[#allocation2 + $0x644] sm:$0xf] %v10919_v60  ;;  %3144 = vst [vmem:[#allocation2 + $0x62c] sm:$0xf] %v10919_v60  ;;  %v11515_v16 = vpop.f32.mrf.mxu1  ;;  %v16047_v53 = vsel %vm17355_vm14, %v2766_v51, 0.0  ;;  %v2796_v40 = vsel %vm17560_vm9, %v2793_v63, %v2795_v18  ;;  %v2798_v34 = vsel %vm17561_vm10, %v2795_v18, %v2797_v48 }
 0x2ec   : > { %v11626_v47 = vadd.f32 %v11625_v22, %v11624_v61  ;;  %v6365_v23 = vadd.f32 %v11514_v17, %v15746_v57  ;;  %v2970_v0 = vpack.c.bf16 %v16047_v53, %v15921_v56  ;;  %v10134_v57 = vcombine.low %v15887_v4, %v15777_v27  ;;  %v13017_v63 = vld [vmem:[#allocation2 + $0x3f0] ss:$36 sps:$4 sm:$0xff]   ;;  %v13026_v27 = vld [vmem:[#allocation2 + $0x43c] ss:$36 sps:$4 sm:$0xff]  }
 0x2ed   : > { %v11627_v6 = vpop.f32.mrf.mxu0  ;;  %8582 = vmatmul.mubr.bf16.gmra.mxu0 %v13012_v14  ;;  %v11516_v59 = vpop.f32.mrf.mxu1  ;;  %v2814_v61 = vsel %vm14496_vm0, %v2796_v40, 0.0  ;;  %v2815_v26 = vsel %vm14583_vm15, %v2798_v34, 0.0  ;;  %v10567_v34 = vcombine.high %v15979_v38, %v7121_v9  ;;  %vm17577_vm0 = vmmov %vm17544_vm2 }
 0x2ee   : > { %8589 = vmatprep.mubr.bf16.mxu0 %v13019_v19  ;;  %v16057_v29 = vadd.f32 %v11626_v47, %v6365_v23  ;;  %v11517_v3 = vadd.f32 %v11516_v59, %v11515_v16  ;;  %v10921_v24 = vpack.c.bf16 %v2814_v61, %v2814_v61  ;;  %v10932_v13 = vcombine.low %v2970_v0, %v15887_v4 }
 0x2ef   : > { %v11628_v62 = vpop.f32.mrf.mxu0  ;;  %v11518_v14 = vpop.f32.mrf.mxu1  ;;  %v10149_v56 = vcombine.high %v2970_v0, %v10134_v57  ;;  %v10922_v19 = vpack.c.bf16 %v2815_v26, %v2815_v26  ;;  %v13031_v0 = vld [vmem:[#allocation2 + $0x24c] ss:$36 sps:$4 sm:$0xff]  }
 0x2f0   : > { %v11629_v32 = vadd.f32 %v11628_v62, %v11627_v6  ;;  %v6370_v30 = vadd.f32 %v11517_v3, %v15737_v54  ;;  %2958 = vst [vmem:[#allocation2 + $0x680] sm:$0xf] %v10921_v24  ;;  %3053 = vst [vmem:[#allocation2 + $0x684] sm:$0xff] %v10932_v13  ;;  %v13378_v6 = vld [vmem:[#allocation2 + $0x3c8] ss:$36 sps:$4 sm:$0xff]  }
 0x2f1   : > { %v11630_v33 = vpop.f32.mrf.mxu0  ;;  %v11519_v60 = vpop.f32.mrf.mxu1  ;;  %3055 = vst [vmem:[#allocation2 + $0x6a8] sm:$0xff] %v10149_v56  ;;  %3052 = vst [vmem:[#allocation2 + $0x668] sm:$0xf] %v10921_v24  ;;  %12454 = vmatmul.mubr.bf16.gmra.mxu1 %v13378_v6  ;;  %v13024_v62 = vld [vmem:[#allocation2 + $0x438] ss:$36 sps:$4 sm:$0xff]  }
 0x2f2   : > { %3146 = vst [vmem:[#allocation2 + $0x650] sm:$0xf] %v10921_v24  ;;  %v16065_v22 = vadd.f32 %v11629_v32, %v6370_v30  ;;  %v11520_v17 = vadd.f32 %v11519_v60, %v11518_v14  ;;  %2960 = vst [vmem:[#allocation2 + $0x6a4] sm:$0xf] %v10922_v19  ;;  %12457 = vmatprep.mubr.bf16.mxu1 %v13379_v36 }
 0x2f3   : > { %v11631_v20 = vpop.f32.mrf.mxu0  ;;  %3054 = vst [vmem:[#allocation2 + $0x68c] sm:$0xf] %v10922_v19  ;;  %3148 = vst [vmem:[#allocation2 + $0x674] sm:$0xf] %v10922_v19  ;;  %v11521_v4 = vpop.f32.mrf.mxu1  ;;  %v13029_v19 = vld [vmem:[#allocation2 + $0x248] ss:$36 sps:$4 sm:$0xff]  }
 0x2f4   : > { %v11632_v47 = vadd.f32 %v11631_v20, %v11630_v33  ;;  %v6373_v54 = vadd.f32 %v11520_v17, %v15743_v31  ;;  %v13380_v33 = vld [vmem:[#allocation2 + $0x458] ss:$36 sps:$4 sm:$0xff]   ;;  %v13038_v17 = vld [vmem:[#allocation2 + $0x4cc] ss:$36 sps:$4 sm:$0xff]  }
 0x2f5   : > { %v11633_v16 = vpop.f32.mrf.mxu0  ;;  %8590 = vmatmul.mubr.bf16.gmra.mxu0 %v13017_v63  ;;  %v11522_v7 = vpop.f32.mrf.mxu1  ;;  %v13033_v20 = vld [vmem:[#allocation9 + $0x638] sm:$0xff]  }
 0x2f6   : > { %8597 = vmatprep.mubr.bf16.mxu0 %v13026_v27  ;;  %v16068_v18 = vadd.f32 %v11632_v47, %v6373_v54  ;;  %v11523_v23 = vadd.f32 %v11522_v7, %v11521_v4  ;;  %v10566_v27 = vcombine.low %v15979_v38, %v7121_v9  ;;  %v13049_v9 = vld [vmem:[#allocation9 + $0x630] sm:$0xff]  }
 0x2f7   : > { %v11634_v51 = vpop.f32.mrf.mxu0  ;;  %v11524_v52 = vpop.f32.mrf.mxu1 }
 0x2f8   : > { %v11635_v44 = vadd.f32 %v11634_v51, %v11633_v16  ;;  %v6378_v40 = vadd.f32 %v11523_v23, %v15750_v15  ;;  %v13048_v16 = vld [vmem:[#allocation9 + $0x670] sm:$0xff]  }
 0x2f9   : > { %v11636_v59 = vpop.f32.mrf.mxu0  ;;  %v11525_v57 = vpop.f32.mrf.mxu1  ;;  %12458 = vmatmul.mubr.bf16.gmra.mxu1 %v13380_v33  ;;  %v13062_v33 = vld [vmem:[#allocation9 + $0x628] sm:$0xff]  }
 0x2fa   : > { %v16072_v3 = vadd.f32 %v11635_v44, %v6378_v40  ;;  %v11526_v32 = vadd.f32 %v11525_v57, %v11524_v52  ;;  %8702 = vmatprep.mubr.bf16.mxu1 %v13031_v0  ;;  %v13061_v52 = vld [vmem:[#allocation9 + $0x668] sm:$0xff]  }
 0x2fb   : > { %v11637_v31 = vpop.f32.mrf.mxu0  ;;  %v11527_v61 = vpop.f32.mrf.mxu1  ;;  %v13036_v57 = vld [vmem:[#allocation2 + $0x4c8] ss:$36 sps:$4 sm:$0xff]  }
 0x2fc   : > { %v11638_v41 = vadd.f32 %v11637_v31, %v11636_v59  ;;  %v6381_v63 = vadd.f32 %v11526_v32, %v15753_v2  ;;  %v13041_v2 = vld [vmem:[#allocation2 + $0x294] ss:$36 sps:$4 sm:$0xff]  }
 0x2fd   : > { %v11639_v14 = vpop.f32.mrf.mxu0  ;;  %8598 = vmatmul.mubr.bf16.gmra.mxu0 %v13024_v62  ;;  %v11528_v45 = vpop.f32.mrf.mxu1  ;;  %v13039_v31 = vld [vmem:[#allocation2 + $0x290] ss:$36 sps:$4 sm:$0xff]  }
 0x2fe   : > { %8605 = vmatprep.mubr.bf16.mxu0 %v10567_v34  ;;  %v16075_v26 = vadd.f32 %v11638_v41, %v6381_v63  ;;  %v11529_v24 = vadd.f32 %v11528_v45, %v11527_v61  ;;  %v13044_v41 = vld [vmem:[#allocation2 + $0x514] ss:$36 sps:$4 sm:$0xff]  }
 0x2ff   : > { %v11640_v15 = vpop.f32.mrf.mxu0  ;;  %v11530_v56 = vpop.f32.mrf.mxu1 }
 0x300   : > { %v11641_v13 = vadd.f32 %v11640_v15, %v11639_v14  ;;  %v6386_v60 = vadd.f32 %v11529_v24, %v15755_v11  ;;  %v13073_v15 = vld [vmem:[#allocation9 + $0x660] sm:$0xff]  }
 0x301   : > { %v11642_v30 = vpop.f32.mrf.mxu0  ;;  %v11531_v47 = vpop.f32.mrf.mxu1  ;;  %8703 = vmatmul.mubr.bf16.vlgmr.msra.gmra.mxu1 %v13029_v19  ;;  %v13074_v19 = vld [vmem:[#allocation9 + $0x620] sm:$0xff]  }
 0x302   : > { %v16079_v6 = vadd.f32 %v11641_v13, %v6386_v60  ;;  %v11532_v54 = vadd.f32 %v11531_v47, %v11530_v56  ;;  %12230 = vmatpush3.bf16.msra.mxu1 %v13033_v20  ;;  %8710 = vmatprep.mubr.bf16.mxu1 %v13041_v2 }
 0x303   : > { %v11643_v4 = vpop.f32.mrf.mxu0  ;;  %v11661_v7 = vpop.f32.mrf.mxu1  ;;  %12231 = vmatprep.subr.bf16.mxu1 %v13048_v16  ;;  %v13042_v16 = vld [vmem:[#allocation2 + $0x510] ss:$36 sps:$4 sm:$0xff]  }
 0x304   : > { %v11644_v36 = vadd.f32 %v11643_v4, %v11642_v30  ;;  %v6389_v23 = vadd.f32 %v11532_v54, %v15758_v8  ;;  %v13047_v8 = vld [vmem:[#allocation2 + $0x2dc] ss:$36 sps:$4 sm:$0xff]  }
 0x305   : > { %v11773_v51 = vpop.f32.mrf.mxu0  ;;  %8606 = vmatmul.mubr.bf16.gmra.mxu0 %v10566_v27  ;;  %v11662_v11 = vpop.f32.mrf.mxu1  ;;  %v13045_v54 = vld [vmem:[#allocation2 + $0x2d8] ss:$36 sps:$4 sm:$0xff]  }
 0x306   : > { %8613 = vmatprep.mubr.bf16.mxu0 %v13038_v17  ;;  %v16082_v59 = vadd.f32 %v11644_v36, %v6389_v23  ;;  %v11663_v62 = vadd.f32 %v11662_v11, %v11661_v7  ;;  %12232 = vmatpush3.bf16.msra.mxu1 %v13049_v9  ;;  %v13087_v17 = vld [vmem:[#allocation9 + $0x658] sm:$0xff]  }
 0x307   : > { %v11774_v44 = vpop.f32.mrf.mxu0  ;;  %v11664_v34 = vpop.f32.mrf.mxu1  ;;  %12233 = vmatprep.subr.bf16.mxu1 %v13061_v52  ;;  %v13054_v7 = vld [vmem:[#allocation2 + $0x55c] ss:$36 sps:$4 sm:$0xff]   ;;  %v13102_v52 = vld [vmem:[#allocation9 + $0x650] sm:$0xff]  }
 0x308   : > { %v11775_v40 = vadd.f32 %v11774_v44, %v11773_v51  ;;  %v6588_v32 = vadd.f32 %v11663_v62, %v15761_v58  ;;  %v13088_v9 = vld [vmem:[#allocation9 + $0x618] sm:$0xff]  }
 0x309   : > { %v11776_v0 = vpop.f32.mrf.mxu0  ;;  %v11665_v61 = vpop.f32.mrf.mxu1  ;;  %8711 = vmatmul.mubr.bf16.gmra.mxu1 %v13039_v31 }
 0x30a   : > { %v11666_v63 = vadd.f32 %v11665_v61, %v11664_v34  ;;  %v16085_v24 = vadd.f32 %v11775_v40, %v6588_v32  ;;  %8718 = vmatprep.mubr.bf16.mxu1 %v13047_v8  ;;  %12234 = vmatpush3.bf16.msra.mxu1 %v13062_v33  ;;  %v13103_v32 = vld [vmem:[#allocation9 + $0x610] sm:$0xff]   ;;  %v13118_v61 = vld [vmem:[#allocation9 + $0x648] sm:$0xff]  }
 0x30b   : > { %v11777_v14 = vpop.f32.mrf.mxu0  ;;  %v11667_v13 = vpop.f32.mrf.mxu1  ;;  %12235 = vmatprep.subr.bf16.mxu1 %v13073_v15  ;;  %v13055_v15 = vld [vmem:[#allocation2 + $0x320] ss:$36 sps:$4 sm:$0xff]  }
 0x30c   : > { %v11778_v45 = vadd.f32 %v11777_v14, %v11776_v0  ;;  %v6591_v30 = vadd.f32 %v11666_v63, %v15764_v35  ;;  %v13057_v35 = vld [vmem:[#allocation2 + $0x324] ss:$36 sps:$4 sm:$0xff]  }
 0x30d   : > { %v11779_v56 = vpop.f32.mrf.mxu0  ;;  %8614 = vmatmul.mubr.bf16.gmra.mxu0 %v13036_v57  ;;  %v11668_v58 = vpop.f32.mrf.mxu1  ;;  %v17564_v0 = vld [vmem:[#allocation46_spill] sm:$0xff] }
 0x30e   : > { %8621 = vmatprep.mubr.bf16.mxu0 %v13044_v41  ;;  %v11669_v60 = vadd.f32 %v11668_v58, %v11667_v13  ;;  %v16088_v47 = vadd.f32 %v11778_v45, %v6591_v30  ;;  %12236 = vmatpush3.bf16.msra.mxu1 %v13074_v19  ;;  %v13052_v45 = vld [vmem:[#allocation2 + $0x558] ss:$36 sps:$4 sm:$0xff]   ;;  %v17565_v13 = vld [vmem:[#allocation54_spill] sm:$0xff] }
 0x30f   : > { %v11780_v27 = vpop.f32.mrf.mxu0  ;;  %v11670_v4 = vpop.f32.mrf.mxu1  ;;  %12237 = vmatprep.subr.bf16.mxu1 %v13087_v17  ;;  %v13381_v30 = vld [vmem:[#allocation2 + $0x5c4] sm:$0xff] }
 0x310   : > { %v11781_v20 = vadd.f32 %v11780_v27, %v11779_v56  ;;  %v6596_v36 = vadd.f32 %v11669_v60, %v15767_v46  ;;  %v10603_v58 = vcombine.high %v15979_v38, %v13381_v30  ;;  %v13060_v27 = vld [vmem:[#allocation2 + $0x36c] ss:$36 sps:$4 sm:$0xff]  }
 0x311   : > { %v11782_v2 = vpop.f32.mrf.mxu0  ;;  %v11671_v51 = vpop.f32.mrf.mxu1  ;;  %8719 = vmatmul.mubr.bf16.gmra.mxu1 %v13045_v54 }
 0x312   : > { %v11672_v11 = vadd.f32 %v11671_v51, %v11670_v4  ;;  %v16091_v62 = vadd.f32 %v11781_v20, %v6596_v36  ;;  %8726 = vmatprep.mubr.bf16.mxu1 %v13057_v35  ;;  %12238 = vmatpush3.bf16.msra.mxu1 %v13088_v9  ;;  %v13119_v20 = vld [vmem:[#allocation9 + $0x608] sm:$0xff]   ;;  %v13136_v9 = vld [vmem:[#allocation9 + $0x600] sm:$0xff]  }
 0x313   : > { %v11783_v23 = vpop.f32.mrf.mxu0  ;;  %v11673_v40 = vpop.f32.mrf.mxu1  ;;  %12239 = vmatprep.subr.bf16.mxu1 %v13102_v52 }
 0x314   : > { %v11784_v44 = vadd.f32 %v11783_v23, %v11782_v2  ;;  %v6599_v57 = vadd.f32 %v11672_v11, %v17564_v0  ;;  %v13135_v2 = vld [vmem:[#allocation9 + $0x640] sm:$0xff]   ;;  %v10602_v0 = vcombine.low %v15979_v38, %v13381_v30 }
 0x315   : > { %v11785_v34 = vpop.f32.mrf.mxu0  ;;  %8622 = vmatmul.mubr.bf16.gmra.mxu0 %v13042_v16  ;;  %v11674_v46 = vpop.f32.mrf.mxu1 }
 0x316   : > { %8629 = vmatprep.mubr.bf16.mxu0 %v13054_v7  ;;  %v11675_v41 = vadd.f32 %v11674_v46, %v11673_v40  ;;  %v16094_v14 = vadd.f32 %v11784_v44, %v6599_v57  ;;  %12240 = vmatpush3.bf16.msra.mxu1 %v13103_v32  ;;  %v17566_v7 = vld [vmem:[#allocation69_spill] sm:$0xff]  ;;  %v13058_v57 = vld [vmem:[#allocation2 + $0x368] ss:$36 sps:$4 sm:$0xff]   ;;  %v17567_v46 = vld [vmem:[#allocation35_spill] sm:$0xff] }
 0x317   : > { %v11786_v31 = vpop.f32.mrf.mxu0  ;;  %v11676_v33 = vpop.f32.mrf.mxu1  ;;  %12241 = vmatprep.subr.bf16.mxu1 %v13118_v61  ;;  %v13068_v32 = vld [vmem:[#allocation2 + $0x3b4] ss:$36 sps:$4 sm:$0xff]  }
 0x318   : > { %v11787_v8 = vadd.f32 %v11786_v31, %v11785_v34  ;;  %v6604_v56 = vadd.f32 %v11675_v41, %v17565_v13  ;;  %v17568_v13 = vld [vmem:[#allocation39_spill] sm:$0xff] }
 0x319   : > { %v11788_v63 = vpop.f32.mrf.mxu0  ;;  %v11677_v19 = vpop.f32.mrf.mxu1  ;;  %8727 = vmatmul.mubr.bf16.gmra.mxu1 %v13055_v15 }
 0x31a   : > { %v11678_v17 = vadd.f32 %v11677_v19, %v11676_v33  ;;  %v16098_v16 = vadd.f32 %v11787_v8, %v6604_v56  ;;  %8734 = vmatprep.mubr.bf16.mxu1 %v13060_v27  ;;  %12242 = vmatpush3.bf16.msra.mxu1 %v13119_v20 }
 0x31b   : > { %v11789_v60 = vpop.f32.mrf.mxu0  ;;  %v11679_v54 = vpop.f32.mrf.mxu1  ;;  %12243 = vmatprep.subr.bf16.mxu1 %v13135_v2  ;;  %v17570_v2 = vld [vmem:[#allocation58_spill] sm:$0xff] }
 0x31c   : > { %v11790_v4 = vadd.f32 %v11789_v60, %v11788_v63  ;;  %v6607_v35 = vadd.f32 %v11678_v17, %v17566_v7 }
 0x31d   : > { %v11791_v36 = vpop.f32.mrf.mxu0  ;;  %8630 = vmatmul.mubr.bf16.gmra.mxu0 %v13052_v45  ;;  %v11680_v51 = vpop.f32.mrf.mxu1 }
 0x31e   : > { %8637 = vmatprep.mubr.bf16.mxu0 %v10603_v58  ;;  %v11681_v11 = vadd.f32 %v11680_v51, %v11679_v54  ;;  %v16101_v52 = vadd.f32 %v11790_v4, %v6607_v35  ;;  %12244 = vmatpush3.bf16.msra.mxu1 %v13136_v9  ;;  %v17569_v58 = vld [vmem:[#allocation50_spill] sm:$0xff]  ;;  %v13066_v4 = vld [vmem:[#allocation2 + $0x3b0] ss:$36 sps:$4 sm:$0xff]  }
 0x31f   : > { %v11792_v23 = vpop.f32.mrf.mxu0  ;;  %v11682_v40 = vpop.f32.mrf.mxu1 }
 0x320   : > { %v11793_v44 = vadd.f32 %v11792_v23, %v11791_v36  ;;  %v6612_v31 = vadd.f32 %v11681_v11, %v17567_v46  ;;  %v13072_v36 = vld [vmem:[#allocation2 + $0x3fc] ss:$36 sps:$4 sm:$0xff]  }
 0x321   : > { %v11794_v34 = vpop.f32.mrf.mxu0  ;;  %v11683_v41 = vpop.f32.mrf.mxu1  ;;  %8735 = vmatmul.mubr.bf16.gmra.mxu1 %v13058_v57  ;;  %v17574_v46 = vld [vmem:[#allocation37_spill] sm:$0xff] }
 0x322   : > { %v11684_v61 = vadd.f32 %v11683_v41, %v11682_v40  ;;  %v16105_v63 = vadd.f32 %v11793_v44, %v6612_v31  ;;  %8742 = vmatprep.mubr.bf16.mxu1 %v13068_v32  ;;  %v17571_v40 = vld [vmem:[#allocation36_spill] sm:$0xff]  ;;  %v17575_v32 = vld [vmem:[#allocation65_spill] sm:$0xff] }
 0x323   : > { %v11795_v8 = vpop.f32.mrf.mxu0  ;;  %v11685_v45 = vpop.f32.mrf.mxu1 }
 0x324   : > { %v11796_v33 = vadd.f32 %v11795_v8, %v11794_v34  ;;  %v6615_v56 = vadd.f32 %v11684_v61, %v17568_v13  ;;  %v17572_v34 = vld [vmem:[#allocation30_spill] sm:$0xff]  ;;  %v17576_v61 = vrot.slane %v15781_v28, 1 }
 0x325   : > { %v11797_v15 = vpop.f32.mrf.mxu0  ;;  %8638 = vmatmul.mubr.bf16.gmra.mxu0 %v10602_v0  ;;  %v11686_v38 = vpop.f32.mrf.mxu1  ;;  %v13480_v0 = vpack.c.bf16 %v17572_v34, %v17571_v40  ;;  %v17583_v34 = vld [vmem:[#allocation51_spill] sm:$0xff] }
 0x326   : > { %8645 = vmatprep.mubr.bf16.mxu0 %v17569_v58  ;;  %v11687_v27 = vadd.f32 %v11686_v38, %v11685_v45  ;;  %v16109_v60 = vadd.f32 %v11796_v33, %v6615_v56  ;;  %v2808_v33 = vsel %vm17577_vm0, %v2797_v48, %v17576_v61  ;;  %v13078_v61 = vld [vmem:[#allocation2 + $0x440] ss:$36 sps:$4 sm:$0xff]   ;;  %v13086_v56 = vld [vmem:[#allocation2 + $0x254] ss:$36 sps:$4 sm:$0xff]  }
 0x327   : > { %v11798_v30 = vpop.f32.mrf.mxu0  ;;  %v11688_v20 = vpop.f32.mrf.mxu1  ;;  %v2816_v58 = vsel %vm14945_vm7, %v2808_v33, 0.0  ;;  %v17584_v33 = vld [vmem:[#allocation62_spill] sm:$0xff] }
 0x328   : > { %v11799_v19 = vadd.f32 %v11798_v30, %v11797_v15  ;;  %v6620_v54 = vadd.f32 %v11687_v27, %v17570_v2  ;;  %v13070_v27 = vld [vmem:[#allocation2 + $0x3f8] ss:$36 sps:$4 sm:$0xff]  }
 0x329   : > { %v11800_v17 = vpop.f32.mrf.mxu0  ;;  %v11689_v7 = vpop.f32.mrf.mxu1  ;;  %8743 = vmatmul.mubr.bf16.gmra.mxu1 %v13066_v4  ;;  %v13080_v4 = vld [vmem:[#allocation2 + $0x444] ss:$36 sps:$4 sm:$0xff]  }
 0x32a   : > { %v11690_v51 = vadd.f32 %v11689_v7, %v11688_v20  ;;  %v16112_v9 = vadd.f32 %v11799_v19, %v6620_v54  ;;  %8750 = vmatprep.mubr.bf16.mxu1 %v13072_v36  ;;  %v10934_v19 = vpack.c.bf16 %v2816_v58, %v2816_v58  ;;  %v17579_v20 = vld [vmem:[#allocation31_spill] sm:$0xff] }
 0x32b   : > { %v11801_v35 = vpop.f32.mrf.mxu0  ;;  %v11691_v11 = vpop.f32.mrf.mxu1 }
 0x32c   : > { %v11802_v23 = vadd.f32 %v11801_v35, %v11800_v17  ;;  %v6623_v31 = vadd.f32 %v11690_v51, %v17574_v46  ;;  %3056 = vst [vmem:[#allocation2 + $0x6b0] sm:$0xf] %v10934_v19  ;;  %3150 = vst [vmem:[#allocation2 + $0x698] sm:$0xf] %v10934_v19  ;;  %v17580_v51 = vld [vmem:[#allocation48_spill] sm:$0xff] }
 0x32d   : > { %v11803_v44 = vpop.f32.mrf.mxu0  ;;  %13481 = vmatmul.mubr.msk.bf16.gmra.mxu0 %vm17461_vm6, %v13480_v0  ;;  %v11692_v41 = vpop.f32.mrf.mxu1 }
 0x32e   : > { %8653 = vmatprep.mubr.bf16.mxu0 %v17575_v32  ;;  %v11693_v45 = vadd.f32 %v11692_v41, %v11691_v11  ;;  %v16125_v13 = vadd.f32 %v11802_v23, %v6623_v31  ;;  %v17581_v23 = vld [vmem:[#allocation52_spill] sm:$0xff] }
 0x32f   : > { %v11804_v8 = vpop.f32.mrf.mxu0  ;;  %v11694_v38 = vpop.f32.mrf.mxu1  ;;  %v13483_v11 = vpack.c.bf16 %v17581_v23, %v17580_v51 }
 0x330   : > { %v11805_v15 = vadd.f32 %v11804_v8, %v11803_v44  ;;  %v6628_v17 = vadd.f32 %v11693_v45, %v17579_v20 }
 0x331   : > { %v11806_v30 = vpop.f32.mrf.mxu0  ;;  %v11695_v2 = vpop.f32.mrf.mxu1  ;;  %8751 = vmatmul.mubr.bf16.gmra.mxu1 %v13070_v27 }
 0x332   : > { %v11696_v54 = vadd.f32 %v11695_v2, %v11694_v38  ;;  %v16130_v36 = vadd.f32 %v11805_v15, %v6628_v17  ;;  %8758 = vmatprep.mubr.bf16.mxu1 %v13080_v4  ;;  %v13083_v15 = vld [vmem:[#allocation2 + $0x48c] ss:$36 sps:$4 sm:$0xff]   ;;  %v17585_v17 = vld [vmem:[#allocation61_spill] sm:$0xff]  ;;  %v17586_v4 = vld [vmem:[#allocation44_spill] sm:$0xff] }
 0x333   : > { %v11807_v28 = vpop.f32.mrf.mxu0  ;;  %v11697_v7 = vpop.f32.mrf.mxu1  ;;  %v13486_v2 = vpack.c.bf16 %v17586_v4, %v17585_v17  ;;  %v13090_v4 = vld [vmem:[#allocation2 + $0x4d0] ss:$36 sps:$4 sm:$0xff]  }
 0x334   : > { %v11808_v48 = vadd.f32 %v11807_v28, %v11806_v30  ;;  %v6631_v40 = vadd.f32 %v11696_v54, %v15929_v42 }
 0x335   : > { %v11809_v35 = vpop.f32.mrf.mxu0  ;;  %13484 = vmatmul.mubr.msk.bf16.gmra.mxu0 %vm17345_vm13, %v13483_v11  ;;  %v11698_v0 = vpop.f32.mrf.mxu1 }
 0x336   : > { %8661 = vmatprep.mubr.bf16.mxu0 %v17583_v34  ;;  %v11699_v46 = vadd.f32 %v11698_v0, %v11697_v7  ;;  %v16138_v32 = vadd.f32 %v11808_v48, %v6631_v40  ;;  %v13081_v40 = vld [vmem:[#allocation2 + $0x488] ss:$36 sps:$4 sm:$0xff]   ;;  %v13084_v34 = vld [vmem:[#allocation2 + $0x250] ss:$36 sps:$4 sm:$0xff]  }
 0x337   : > { %v11810_v57 = vpop.f32.mrf.mxu0  ;;  %v11700_v41 = vpop.f32.mrf.mxu1 }
 0x338   : > { %v11811_v31 = vadd.f32 %v11810_v57, %v11809_v35  ;;  %v6636_v45 = vadd.f32 %v11699_v46, %v17584_v33  ;;  %v13092_v57 = vld [vmem:[#allocation2 + $0x4d4] ss:$36 sps:$4 sm:$0xff]  }
 0x339   : > { %v11812_v8 = vpop.f32.mrf.mxu0  ;;  %v11701_v58 = vpop.f32.mrf.mxu1  ;;  %8759 = vmatmul.mubr.bf16.gmra.mxu1 %v13078_v61 }
 0x33a   : > { %v11702_v30 = vadd.f32 %v11701_v58, %v11700_v41  ;;  %v16141_v27 = vadd.f32 %v11811_v31, %v6636_v45  ;;  %8766 = vmatprep.mubr.bf16.mxu1 %v13083_v15  ;;  %v13095_v41 = vld [vmem:[#allocation2 + $0x29c] ss:$36 sps:$4 sm:$0xff]  }
 0x33b   : > { %v11813_v38 = vpop.f32.mrf.mxu0  ;;  %v11703_v19 = vpop.f32.mrf.mxu1 }
 0x33c   : > { %v11814_v42 = vadd.f32 %v11813_v38, %v11812_v8  ;;  %v6639_v54 = vadd.f32 %v11702_v30, %v15939_v37  ;;  %v13104_v8 = vld [vmem:[#allocation9 + $0x6b0] sm:$0xff]   ;;  %v13120_v38 = vld [vmem:[#allocation9 + $0x6a8] sm:$0xff]  }
 0x33d   : > { %v11815_v20 = vpop.f32.mrf.mxu0  ;;  %13487 = vmatmul.mubr.msk.bf16.gmra.mxu0 %vm17465_vm11, %v13486_v2  ;;  %v11704_v48 = vpop.f32.mrf.mxu1  ;;  %v13093_v2 = vld [vmem:[#allocation2 + $0x298] ss:$36 sps:$4 sm:$0xff]  }
 0x33e   : > { %8863 = vmatprep.mubr.bf16.mxu0 %v13086_v56  ;;  %v11705_v35 = vadd.f32 %v11704_v48, %v11703_v19  ;;  %v16148_v23 = vadd.f32 %v11814_v42, %v6639_v54  ;;  %v13098_v54 = vld [vmem:[#allocation2 + $0x51c] ss:$36 sps:$4 sm:$0xff]  }
 0x33f   : > { %v11816_v7 = vpop.f32.mrf.mxu0  ;;  %v11706_v11 = vpop.f32.mrf.mxu1 }
 0x340   : > { %v11817_v51 = vadd.f32 %v11816_v7, %v11815_v20  ;;  %v6644_v0 = vadd.f32 %v11705_v35, %v15943_v12 }
 0x341   : > { %v11818_v44 = vpop.f32.mrf.mxu0  ;;  %v11707_v46 = vpop.f32.mrf.mxu1  ;;  %8767 = vmatmul.mubr.bf16.gmra.mxu1 %v13081_v40 }
 0x342   : > { %v11708_v37 = vadd.f32 %v11707_v46, %v11706_v11  ;;  %v16151_v33 = vadd.f32 %v11817_v51, %v6644_v0  ;;  %8774 = vmatprep.mubr.bf16.mxu1 %v13092_v57  ;;  %v13137_v51 = vld [vmem:[#allocation9 + $0x6a0] sm:$0xff]  }
 0x343   : > { %v11819_v31 = vpop.f32.mrf.mxu0  ;;  %v11709_v45 = vpop.f32.mrf.mxu1 }
 0x344   : > { %v11820_v61 = vadd.f32 %v11819_v31, %v11818_v44  ;;  %v6647_v56 = vadd.f32 %v11708_v37, %v15946_v49  ;;  %v13101_v49 = vld [vmem:[#allocation2 + $0x2e4] ss:$36 sps:$4 sm:$0xff]  }
 0x345   : > { %v11821_v15 = vpop.f32.mrf.mxu0  ;;  %8864 = vmatmul.mubr.bf16.vlgmr.msra.gmra.mxu0 %v13084_v34  ;;  %v11710_v58 = vpop.f32.mrf.mxu1  ;;  %v17588_v34 = vld [vmem:[#allocation38_spill] sm:$0xff] }
 0x346   : > { %12462 = vmatpush3.bf16.msra.mxu0 %v16002_v21  ;;  %8871 = vmatprep.mubr.bf16.mxu0 %v13095_v41  ;;  %v11711_v30 = vadd.f32 %v11710_v58, %v11709_v45  ;;  %v16155_v19 = vadd.f32 %v11820_v61, %v6647_v56  ;;  %v13151_v41 = vld [vmem:[#allocation9 + $0x698] sm:$0xff]   ;;  %v17589_v56 = vld [vmem:[#allocation59_spill] sm:$0xff] }
 0x347   : > { %v11822_v12 = vpop.f32.mrf.mxu0  ;;  %12463 = vmatprep.subr.bf16.mxu0 %v13104_v8  ;;  %v11712_v20 = vpop.f32.mrf.mxu1  ;;  %v13096_v45 = vld [vmem:[#allocation2 + $0x518] ss:$36 sps:$4 sm:$0xff]  }
 0x348   : > { %v11823_v42 = vadd.f32 %v11822_v12, %v11821_v15  ;;  %v6652_v28 = vadd.f32 %v11711_v30, %v15949_v10  ;;  %v13099_v15 = vld [vmem:[#allocation2 + $0x2e0] ss:$36 sps:$4 sm:$0xff]   ;;  %v13110_v30 = vld [vmem:[#allocation2 + $0x32c] ss:$36 sps:$4 sm:$0xff]  }
 0x349   : > { %v11824_v17 = vpop.f32.mrf.mxu0  ;;  %v11713_v21 = vpop.f32.mrf.mxu1  ;;  %8775 = vmatmul.mubr.bf16.gmra.mxu1 %v13090_v4  ;;  %v13107_v12 = vld [vmem:[#allocation2 + $0x564] ss:$36 sps:$4 sm:$0xff]  }
 0x34a   : > { %12464 = vmatpush3.bf16.msra.mxu0 %v13104_v8  ;;  %v11714_v7 = vadd.f32 %v11713_v21, %v11712_v20  ;;  %v16158_v11 = vadd.f32 %v11823_v42, %v6652_v28  ;;  %8782 = vmatprep.mubr.bf16.mxu1 %v13098_v54 }
 0x34b   : > { %v11825_v48 = vpop.f32.mrf.mxu0  ;;  %12465 = vmatprep.subr.bf16.mxu0 %v13120_v38  ;;  %v11715_v44 = vpop.f32.mrf.mxu1 }
 0x34c   : > { %v11826_v35 = vadd.f32 %v11825_v48, %v11824_v17  ;;  %v6655_v0 = vadd.f32 %v11714_v7, %v17588_v34 }
 0x34d   : > { %v11827_v40 = vpop.f32.mrf.mxu0  ;;  %8872 = vmatmul.mubr.bf16.gmra.mxu0 %v13093_v2  ;;  %v11716_v10 = vpop.f32.mrf.mxu1 }
 0x34e   : > { %8879 = vmatprep.mubr.bf16.mxu0 %v13101_v49  ;;  %12466 = vmatpush3.bf16.msra.mxu0 %v13120_v38  ;;  %v11717_v46 = vadd.f32 %v11716_v10, %v11715_v44  ;;  %v16161_v8 = vadd.f32 %v11826_v35, %v6655_v0  ;;  %v13164_v38 = vld [vmem:[#allocation9 + $0x690] sm:$0xff]   ;;  %v13174_v44 = vld [vmem:[#allocation9 + $0x688] sm:$0xff]   ;;  %v13105_v0 = vld [vmem:[#allocation2 + $0x560] ss:$36 sps:$4 sm:$0xff]  }
 0x34f   : > { %v11828_v57 = vpop.f32.mrf.mxu0  ;;  %12467 = vmatprep.subr.bf16.mxu0 %v13137_v51  ;;  %v11718_v37 = vpop.f32.mrf.mxu1  ;;  %v13108_v10 = vld [vmem:[#allocation2 + $0x328] ss:$36 sps:$4 sm:$0xff]  }
 0x350   : > { %v11829_v31 = vadd.f32 %v11828_v57, %v11827_v40  ;;  %v6660_v58 = vadd.f32 %v11717_v46, %v17589_v56  ;;  %v13114_v46 = vld [vmem:[#allocation2 + $0x5ac] ss:$36 sps:$4 sm:$0xff]  }
 0x351   : > { %v11830_v61 = vpop.f32.mrf.mxu0  ;;  %v11719_v42 = vpop.f32.mrf.mxu1  ;;  %8783 = vmatmul.mubr.bf16.gmra.mxu1 %v13096_v45 }
 0x352   : > { %12468 = vmatpush3.bf16.msra.mxu0 %v13137_v51  ;;  %v11720_v17 = vadd.f32 %v11719_v42, %v11718_v37  ;;  %v16164_v2 = vadd.f32 %v11829_v31, %v6660_v58  ;;  %8790 = vmatprep.mubr.bf16.mxu1 %v13107_v12  ;;  %v13117_v31 = vld [vmem:[#allocation2 + $0x374] ss:$36 sps:$4 sm:$0xff]  }
 0x353   : > { %v11831_v20 = vpop.f32.mrf.mxu0  ;;  %12469 = vmatprep.subr.bf16.mxu0 %v13151_v41  ;;  %v11721_v28 = vpop.f32.mrf.mxu1 }
 0x354   : > { %v11832_v4 = vadd.f32 %v11831_v20, %v11830_v61  ;;  %v6663_v49 = vadd.f32 %v11720_v17, %v15973_v1 }
 0x355   : > { %v11833_v54 = vpop.f32.mrf.mxu0  ;;  %8880 = vmatmul.mubr.bf16.gmra.mxu0 %v13099_v15  ;;  %v11722_v21 = vpop.f32.mrf.mxu1  ;;  %v13187_v15 = vld [vmem:[#allocation9 + $0x680] sm:$0xff]  }
 0x356   : > { %8887 = vmatprep.mubr.bf16.mxu0 %v13110_v30  ;;  %12470 = vmatpush3.bf16.msra.mxu0 %v13151_v41  ;;  %v11723_v7 = vadd.f32 %v11722_v21, %v11721_v28  ;;  %v16167_v51 = vadd.f32 %v11832_v4, %v6663_v49  ;;  %v13112_v28 = vld [vmem:[#allocation2 + $0x5a8] ss:$36 sps:$4 sm:$0xff]   ;;  %v13124_v21 = vld [vmem:[#allocation2 + $0x5f4] ss:$36 sps:$4 sm:$0xff]  }
 0x357   : > { %v11834_v48 = vpop.f32.mrf.mxu0  ;;  %12471 = vmatprep.subr.bf16.mxu0 %v13164_v38  ;;  %v11724_v40 = vpop.f32.mrf.mxu1 }
 0x358   : > { %v11835_v35 = vadd.f32 %v11834_v48, %v11833_v54  ;;  %v6668_v57 = vadd.f32 %v11723_v7, %v15983_v5  ;;  %v13115_v54 = vld [vmem:[#allocation2 + $0x370] ss:$36 sps:$4 sm:$0xff]   ;;  %v13127_v48 = vld [vmem:[#allocation2 + $0x3bc] ss:$36 sps:$4 sm:$0xff]  }
 0x359   : > { %v11836_v34 = vpop.f32.mrf.mxu0  ;;  %v11725_v1 = vpop.f32.mrf.mxu1  ;;  %8791 = vmatmul.mubr.bf16.gmra.mxu1 %v13105_v0 }
 0x35a   : > { %12472 = vmatpush3.bf16.msra.mxu0 %v13164_v38  ;;  %v11726_v61 = vadd.f32 %v11725_v1, %v11724_v40  ;;  %v16170_v41 = vadd.f32 %v11835_v35, %v6668_v57  ;;  %8798 = vmatprep.mubr.bf16.mxu1 %v13114_v46 }
 0x35b   : > { %v11837_v37 = vpop.f32.mrf.mxu0  ;;  %12473 = vmatprep.subr.bf16.mxu0 %v13174_v44  ;;  %v11727_v56 = vpop.f32.mrf.mxu1 }
 0x35c   : > { %v11838_v45 = vadd.f32 %v11837_v37, %v11836_v34  ;;  %v6671_v12 = vadd.f32 %v11726_v61, %v16000_v39 }
 0x35d   : > { %v11839_v58 = vpop.f32.mrf.mxu0  ;;  %8888 = vmatmul.mubr.bf16.gmra.mxu0 %v13108_v10  ;;  %v11728_v5 = vpop.f32.mrf.mxu1 }
 0x35e   : > { %8895 = vmatprep.mubr.bf16.mxu0 %v13117_v31  ;;  %12474 = vmatpush3.bf16.msra.mxu0 %v13174_v44  ;;  %v11729_v42 = vadd.f32 %v11728_v5, %v11727_v56  ;;  %v16173_v17 = vadd.f32 %v11838_v45, %v6671_v12  ;;  %v13122_v45 = vld [vmem:[#allocation2 + $0x5f0] ss:$36 sps:$4 sm:$0xff]   ;;  %v13134_v12 = vld [vmem:[#allocation2 + $0x404] ss:$36 sps:$4 sm:$0xff]  }
 0x35f   : > { %v11840_v30 = vpop.f32.mrf.mxu0  ;;  %12475 = vmatprep.subr.bf16.mxu0 %v13187_v15  ;;  %v11730_v4 = vpop.f32.mrf.mxu1 }
 0x360   : > { %v11841_v20 = vadd.f32 %v11840_v30, %v11839_v58  ;;  %v6676_v49 = vadd.f32 %v11729_v42, %v16012_v25  ;;  %v13131_v58 = vld [vmem:[#allocation2 + $0x63c] ss:$36 sps:$4 sm:$0xff]  }
 0x361   : > { %v11842_v38 = vpop.f32.mrf.mxu0  ;;  %v11731_v7 = vpop.f32.mrf.mxu1  ;;  %8799 = vmatmul.mubr.bf16.gmra.mxu1 %v13112_v28 }
 0x362   : > { %12476 = vmatpush3.bf16.msra.mxu0 %v13187_v15  ;;  %v11732_v35 = vadd.f32 %v11731_v7, %v11730_v4  ;;  %v16176_v34 = vadd.f32 %v11841_v20, %v6676_v49  ;;  %8806 = vmatprep.mubr.bf16.mxu1 %v13124_v21  ;;  %v13125_v15 = vld [vmem:[#allocation2 + $0x3b8] ss:$36 sps:$4 sm:$0xff]  }
 0x363   : > { %v11843_v39 = vpop.f32.mrf.mxu0  ;;  %v11733_v44 = vpop.f32.mrf.mxu1 }
 0x364   : > { %v11844_v40 = vadd.f32 %v11843_v39, %v11842_v38  ;;  %v6679_v10 = vadd.f32 %v11732_v35, %v16027_v43  ;;  %v13129_v35 = vld [vmem:[#allocation2 + $0x638] ss:$36 sps:$4 sm:$0xff]  }
 0x365   : > { %v11845_v0 = vpop.f32.mrf.mxu0  ;;  %8896 = vmatmul.mubr.bf16.gmra.mxu0 %v13115_v54  ;;  %v11734_v57 = vpop.f32.mrf.mxu1 }
 0x366   : > { %8903 = vmatprep.mubr.bf16.mxu0 %v13127_v48  ;;  %v11735_v25 = vadd.f32 %v11734_v57, %v11733_v44  ;;  %v16179_v1 = vadd.f32 %v11844_v40, %v6679_v10  ;;  %v13132_v40 = vld [vmem:[#allocation2 + $0x400] ss:$36 sps:$4 sm:$0xff]   ;;  %v13144_v10 = vld [vmem:[#allocation2 + $0x44c] ss:$36 sps:$4 sm:$0xff]  }
 0x367   : > { %v11846_v46 = vpop.f32.mrf.mxu0  ;;  %v11736_v37 = vpop.f32.mrf.mxu1 }
 0x368   : > { %v11847_v31 = vadd.f32 %v11846_v46, %v11845_v0  ;;  %v6684_v56 = vadd.f32 %v11735_v25, %v16035_v55  ;;  %v13141_v0 = vld [vmem:[#allocation2 + $0x684] ss:$36 sps:$4 sm:$0xff]  }
 0x369   : > { %v11848_v61 = vpop.f32.mrf.mxu0  ;;  %v11737_v5 = vpop.f32.mrf.mxu1  ;;  %8807 = vmatmul.mubr.bf16.gmra.mxu1 %v13122_v45 }
 0x36a   : > { %v11738_v42 = vadd.f32 %v11737_v5, %v11736_v37  ;;  %v16182_v20 = vadd.f32 %v11847_v31, %v6684_v56  ;;  %8814 = vmatprep.mubr.bf16.mxu1 %v13131_v58  ;;  %v16195_v5 = vpack.c.bf16 %v15784_v50, %v16047_v53 }
 0x36b   : > { %v11849_v30 = vpop.f32.mrf.mxu0  ;;  %v11739_v4 = vpop.f32.mrf.mxu1 }
 0x36c   : > { %v11850_v43 = vadd.f32 %v11849_v30, %v11848_v61  ;;  %v6687_v28 = vadd.f32 %v11738_v42, %v16057_v29 }
 0x36d   : > { %v11851_v38 = vpop.f32.mrf.mxu0  ;;  %8904 = vmatmul.mubr.bf16.gmra.mxu0 %v13125_v15  ;;  %v11740_v54 = vpop.f32.mrf.mxu1 }
 0x36e   : > { %8911 = vmatprep.mubr.bf16.mxu0 %v13134_v12  ;;  %v11741_v21 = vadd.f32 %v11740_v54, %v11739_v4  ;;  %v16185_v48 = vadd.f32 %v11850_v43, %v6687_v28  ;;  %v13139_v43 = vld [vmem:[#allocation2 + $0x680] ss:$36 sps:$4 sm:$0xff]   ;;  %v13142_v4 = vld [vmem:[#allocation2 + $0x448] ss:$36 sps:$4 sm:$0xff]   ;;  %v13147_v28 = vld [vmem:[#allocation2 + $0x494] ss:$36 sps:$4 sm:$0xff]  }
 0x36f   : > { %v11852_v49 = vpop.f32.mrf.mxu0  ;;  %v11742_v7 = vpop.f32.mrf.mxu1 }
 0x370   : > { %v11853_v55 = vadd.f32 %v11852_v49, %v11851_v38  ;;  %v6692_v44 = vadd.f32 %v11741_v21, %v16065_v22 }
 0x371   : > { %v11854_v39 = vpop.f32.mrf.mxu0  ;;  %v11743_v57 = vpop.f32.mrf.mxu1  ;;  %8815 = vmatmul.mubr.bf16.gmra.mxu1 %v13129_v35 }
 0x372   : > { %v11744_v25 = vadd.f32 %v11743_v57, %v11742_v7  ;;  %v16188_v31 = vadd.f32 %v11853_v55, %v6692_v44  ;;  %8822 = vmatprep.mubr.bf16.mxu1 %v13141_v0 }
 0x373   : > { %v11855_v46 = vpop.f32.mrf.mxu0  ;;  %v11745_v37 = vpop.f32.mrf.mxu1 }
 0x374   : > { %v11856_v29 = vadd.f32 %v11855_v46, %v11854_v39  ;;  %v6695_v45 = vadd.f32 %v11744_v25, %v16068_v18  ;;  %v13150_v18 = vld [vmem:[#allocation2 + $0x25c] ss:$36 sps:$4 sm:$0xff]   ;;  %v13145_v46 = vld [vmem:[#allocation2 + $0x490] ss:$36 sps:$4 sm:$0xff]  }
 0x375   : > { %v11857_v61 = vpop.f32.mrf.mxu0  ;;  %8912 = vmatmul.mubr.bf16.gmra.mxu0 %v13132_v40  ;;  %v11746_v15 = vpop.f32.mrf.mxu1  ;;  %v13148_v25 = vld [vmem:[#allocation2 + $0x258] ss:$36 sps:$4 sm:$0xff]  }
 0x376   : > { %8919 = vmatprep.mubr.bf16.mxu0 %v13144_v10  ;;  %v11747_v58 = vadd.f32 %v11746_v15, %v11745_v37  ;;  %v16191_v12 = vadd.f32 %v11856_v29, %v6695_v45  ;;  %v13154_v37 = vld [vmem:[#allocation2 + $0x4dc] ss:$36 sps:$4 sm:$0xff]  }
 0x377   : > { %v11858_v56 = vpop.f32.mrf.mxu0  ;;  %v11748_v30 = vpop.f32.mrf.mxu1 }
 0x378   : > { %v11859_v22 = vadd.f32 %v11858_v56, %v11857_v61  ;;  %v6700_v38 = vadd.f32 %v11747_v58, %v16072_v3  ;;  %v13157_v61 = vld [vmem:[#allocation2 + $0x2a4] ss:$36 sps:$4 sm:$0xff]  }
 0x379   : > { %v11860_v42 = vpop.f32.mrf.mxu0  ;;  %v11749_v54 = vpop.f32.mrf.mxu1  ;;  %8823 = vmatmul.mubr.bf16.gmra.mxu1 %v13139_v43 }
 0x37a   : > { %v11750_v21 = vadd.f32 %v11749_v54, %v11748_v30  ;;  %v16198_v7 = vadd.f32 %v11859_v22, %v6700_v38  ;;  %9024 = vmatprep.mubr.bf16.mxu1 %v13150_v18 }
 0x37b   : > { %v11861_v49 = vpop.f32.mrf.mxu0  ;;  %v11751_v39 = vpop.f32.mrf.mxu1 }
 0x37c   : > { %v11862_v55 = vadd.f32 %v11861_v49, %v11860_v42  ;;  %v6703_v50 = vadd.f32 %v11750_v21, %v16075_v26  ;;  %v13152_v21 = vld [vmem:[#allocation2 + $0x4d8] ss:$36 sps:$4 sm:$0xff]  }
 0x37d   : > { %v11863_v35 = vpop.f32.mrf.mxu0  ;;  %8920 = vmatmul.mubr.bf16.gmra.mxu0 %v13142_v4  ;;  %v11752_v53 = vpop.f32.mrf.mxu1 }
 0x37e   : > { %8927 = vmatprep.mubr.bf16.mxu0 %v13147_v28  ;;  %v11753_v44 = vadd.f32 %v11752_v53, %v11751_v39  ;;  %v16201_v0 = vadd.f32 %v11862_v55, %v6703_v50  ;;  %v13155_v55 = vld [vmem:[#allocation2 + $0x2a0] ss:$36 sps:$4 sm:$0xff]   ;;  %v13163_v39 = vld [vmem:[#allocation2 + $0x2ec] ss:$36 sps:$4 sm:$0xff]  }
 0x37f   : > { %v11864_v40 = vpop.f32.mrf.mxu0  ;;  %v11754_v10 = vpop.f32.mrf.mxu1 }
 0x380   : > { %v11865_v3 = vadd.f32 %v11864_v40, %v11863_v35  ;;  %v6708_v29 = vadd.f32 %v11753_v44, %v16079_v6 }
 0x381   : > { %v11866_v57 = vpop.f32.mrf.mxu0  ;;  %v11755_v45 = vpop.f32.mrf.mxu1  ;;  %9025 = vmatmul.mubr.bf16.vlgmr.msra.gmra.mxu1 %v13148_v25 }
 0x382   : > { %v11756_v56 = vadd.f32 %v11755_v45, %v11754_v10  ;;  %v16204_v58 = vadd.f32 %v11865_v3, %v6708_v29  ;;  %9032 = vmatprep.mubr.bf16.mxu1 %v13157_v61  ;;  %v13161_v61 = vld [vmem:[#allocation2 + $0x2e8] ss:$36 sps:$4 sm:$0xff]  }
 0x383   : > { %v11867_v15 = vpop.f32.mrf.mxu0  ;;  %v12431_v22 = vpop.f32.mrf.mxu1 }
 0x384   : > { %v11868_v26 = vadd.f32 %v11867_v15, %v11866_v57  ;;  %v6711_v42 = vadd.f32 %v11756_v56, %v16082_v59  ;;  %v16208_v43 = vadd.f32 %v12431_v22, %v16091_v62  ;;  %v13160_v62 = vld [vmem:[#allocation2 + $0x524] ss:$36 sps:$4 sm:$0xff]   ;;  %v7069_v57 = vld [vmem:[#allocation2 + $0x330] sm:$0xff] }
 0x385   : > { %v11909_v30 = vpop.f32.mrf.mxu0  ;;  %8928 = vmatmul.mubr.bf16.gmra.mxu0 %v13145_v46  ;;  %v6909_v6 = vpop.f32.mrf.mxu1  ;;  %v13167_v15 = vld [vmem:[#allocation2 + $0x56c] ss:$36 sps:$4 sm:$0xff]  }
 0x386   : > { %8935 = vmatprep.mubr.bf16.mxu0 %v13154_v37  ;;  %v16211_v38 = vadd.f32 %v6909_v6, %v16085_v24  ;;  %v16215_v18 = vadd.f32 %v11868_v26, %v6711_v42  ;;  %v13158_v37 = vld [vmem:[#allocation2 + $0x520] ss:$36 sps:$4 sm:$0xff]  }
 0x387   : > { %v11910_v4 = vpop.f32.mrf.mxu0  ;;  %v12432_v54 = vpop.f32.mrf.mxu1 }
 0x388   : > { %v16213_v28 = vadd.f32 %v11910_v4, %v11909_v30  ;;  %v16218_v59 = vadd.f32 %v12432_v54, %v16094_v14 }
 0x389   : > { %v11912_v49 = vpop.f32.mrf.mxu0  ;;  %v6912_v35 = vpop.f32.mrf.mxu1  ;;  %9033 = vmatmul.mubr.bf16.gmra.mxu1 %v13155_v55 }
 0x38a   : > { %v16221_v53 = vadd.f32 %v6912_v35, %v16088_v47  ;;  %9040 = vmatprep.mubr.bf16.mxu1 %v13163_v39 }
 0x38b   : > { %v11913_v50 = vpop.f32.mrf.mxu0  ;;  %v12435_v40 = vpop.f32.mrf.mxu1 }
 0x38c   : > { %v16223_v24 = vadd.f32 %v11913_v50, %v11912_v49  ;;  %v16226_v3 = vadd.f32 %v12435_v40, %v16105_v63  ;;  %v16236_v63 = vld [vmem:[#allocation2 + $0x120] sm:$0xff]  ;;  %v13170_v50 = vld [vmem:[#allocation2 + $0x5b4] ss:$36 sps:$4 sm:$0xff]  }
 0x38d   : > { %v11915_v44 = vpop.f32.mrf.mxu0  ;;  %8936 = vmatmul.mubr.bf16.gmra.mxu0 %v13152_v21  ;;  %v6925_v14 = vpop.f32.mrf.mxu1  ;;  %v10528_v56 = vcombine.high %v7069_v57, %v16236_v63  ;;  %v10527_v39 = vcombine.low %v7069_v57, %v16236_v63 }
 0x38e   : > { %17590 = vst [vmem:[#allocation71_spill] sm:$0xff] %v16226_v3  ;;  %8943 = vmatprep.mubr.bf16.mxu0 %v13160_v62  ;;  %v16229_v46 = vadd.f32 %v6925_v14, %v16098_v16  ;;  %v13165_v62 = vld [vmem:[#allocation2 + $0x568] ss:$36 sps:$4 sm:$0xff]  }
 0x38f   : > { %v11916_v10 = vpop.f32.mrf.mxu0  ;;  %v12436_v47 = vpop.f32.mrf.mxu1 }
 0x390   : > { %17591 = vst [vmem:[#allocation60_spill] sm:$0xff] %v16229_v46  ;;  %v16231_v25 = vadd.f32 %v11916_v10, %v11915_v44  ;;  %v16234_v45 = vadd.f32 %v12436_v47, %v16109_v60 }
 0x391   : > { %v11918_v29 = vpop.f32.mrf.mxu0  ;;  %v6928_v26 = vpop.f32.mrf.mxu1  ;;  %9041 = vmatmul.mubr.bf16.gmra.mxu1 %v13161_v61 }
 0x392   : > { %17592 = vst [vmem:[#allocation76_spill] sm:$0xff] %v16234_v45  ;;  %v16240_v30 = vadd.f32 %v6928_v26, %v16101_v52  ;;  %9048 = vmatprep.mubr.bf16.mxu1 %v10528_v56  ;;  %v13168_v56 = vld [vmem:[#allocation2 + $0x5b0] ss:$36 sps:$4 sm:$0xff]   ;;  %v13171_v26 = vld [vmem:[#allocation2 + $0x378] ss:$36 sps:$4 sm:$0xff]  }
 0x393   : > { %v11919_v22 = vpop.f32.mrf.mxu0  ;;  %v12439_v42 = vpop.f32.mrf.mxu1 }
 0x394   : > { %17593 = vst [vmem:[#allocation67_spill] sm:$0xff] %v16240_v30  ;;  %v16242_v16 = vadd.f32 %v11919_v22, %v11918_v29  ;;  %v16245_v4 = vadd.f32 %v12439_v42, %v16130_v36  ;;  %v13173_v36 = vld [vmem:[#allocation2 + $0x37c] ss:$36 sps:$4 sm:$0xff]  }
 0x395   : > { %v11921_v6 = vpop.f32.mrf.mxu0  ;;  %8944 = vmatmul.mubr.bf16.gmra.mxu0 %v13158_v37  ;;  %v6941_v60 = vpop.f32.mrf.mxu1  ;;  %v13177_v42 = vld [vmem:[#allocation2 + $0x5fc] ss:$36 sps:$4 sm:$0xff]  }
 0x396   : > { %17594 = vst [vmem:[#allocation78_spill] sm:$0xff] %v16245_v4  ;;  %8951 = vmatprep.mubr.bf16.mxu0 %v13167_v15  ;;  %v16248_v49 = vadd.f32 %v6941_v60, %v16112_v9 }
 0x397   : > { %v11922_v54 = vpop.f32.mrf.mxu0  ;;  %v12440_v52 = vpop.f32.mrf.mxu1 }
 0x398   : > { %17595 = vst [vmem:[#allocation73_spill] sm:$0xff] %v16248_v49  ;;  %v16250_v21 = vadd.f32 %v11922_v54, %v11921_v6  ;;  %v16254_v35 = vadd.f32 %v12440_v52, %v16138_v32  ;;  %v13180_v6 = vld [vmem:[#allocation2 + $0x3c4] ss:$36 sps:$4 sm:$0xff]  }
 0x399   : > { %v11924_v55 = vpop.f32.mrf.mxu0  ;;  %v6944_v40 = vpop.f32.mrf.mxu1  ;;  %9049 = vmatmul.mubr.bf16.gmra.mxu1 %v10527_v39 }
 0x39a   : > { %17596 = vst [vmem:[#allocation74_spill] sm:$0xff] %v16254_v35  ;;  %v16257_v14 = vadd.f32 %v6944_v40, %v16125_v13  ;;  %9056 = vmatprep.mubr.bf16.mxu1 %v13173_v36 }
 0x39b   : > { %v11925_v44 = vpop.f32.mrf.mxu0  ;;  %v12443_v9 = vpop.f32.mrf.mxu1 }
 0x39c   : > { %17597 = vst [vmem:[#allocation72_spill] sm:$0xff] %v16257_v14  ;;  %v16259_v10 = vadd.f32 %v11925_v44, %v11924_v55  ;;  %v16262_v29 = vadd.f32 %v12443_v9, %v16151_v33  ;;  %v13175_v44 = vld [vmem:[#allocation2 + $0x5f8] ss:$36 sps:$4 sm:$0xff]   ;;  %v13178_v9 = vld [vmem:[#allocation2 + $0x3c0] ss:$36 sps:$4 sm:$0xff]  }
 0x39d   : > { %v11927_v47 = vpop.f32.mrf.mxu0  ;;  %8952 = vmatmul.mubr.bf16.gmra.mxu0 %v13165_v62  ;;  %v6957_v32 = vpop.f32.mrf.mxu1 }
 0x39e   : > { %17598 = vst [vmem:[#allocation70_spill] sm:$0xff] %v16262_v29  ;;  %8959 = vmatprep.mubr.bf16.mxu0 %v13170_v50  ;;  %v16265_v37 = vadd.f32 %v6957_v32, %v16141_v27  ;;  %v13183_v32 = vld [vmem:[#allocation2 + $0x644] ss:$36 sps:$4 sm:$0xff]  }
 0x39f   : > { %v11928_v57 = vpop.f32.mrf.mxu0  ;;  %v12444_v13 = vpop.f32.mrf.mxu1 }
 0x3a0   : > { %17599 = vst [vmem:[#allocation75_spill] sm:$0xff] %v16265_v37  ;;  %v16267_v61 = vadd.f32 %v11928_v57, %v11927_v47  ;;  %v16270_v22 = vadd.f32 %v12444_v13, %v16155_v19  ;;  %v13186_v57 = vld [vmem:[#allocation2 + $0x40c] ss:$36 sps:$4 sm:$0xff]  }
 0x3a1   : > { %v11930_v15 = vpop.f32.mrf.mxu0  ;;  %v6960_v33 = vpop.f32.mrf.mxu1  ;;  %9057 = vmatmul.mubr.bf16.gmra.mxu1 %v13171_v26 }
 0x3a2   : > { %17600 = vst [vmem:[#allocation21_spill] sm:$0xff] %v16270_v22  ;;  %v16273_v54 = vadd.f32 %v6960_v33, %v16148_v23  ;;  %9064 = vmatprep.mubr.bf16.mxu1 %v13180_v6  ;;  %v7109_v33 = vld [vmem:[#allocation2 + $0x450] sm:$0xff] }
 0x3a3   : > { %v11931_v60 = vpop.f32.mrf.mxu0  ;;  %v12447_v27 = vpop.f32.mrf.mxu1 }
 0x3a4   : > { %17601 = vst [vmem:[#allocation77_spill] sm:$0xff] %v16273_v54  ;;  %v16275_v52 = vadd.f32 %v11931_v60, %v11930_v15  ;;  %v16278_v62 = vadd.f32 %v12447_v27, %v16164_v2 }
 0x3a5   : > { %v11933_v55 = vpop.f32.mrf.mxu0  ;;  %8960 = vmatmul.mubr.bf16.gmra.mxu0 %v13168_v56  ;;  %v6973_v19 = vpop.f32.mrf.mxu1 }
 0x3a6   : > { %17602 = vst [vmem:[#allocation25_spill] sm:$0xff] %v16278_v62  ;;  %8967 = vmatprep.mubr.bf16.mxu0 %v13177_v42  ;;  %v16281_v50 = vadd.f32 %v6973_v19, %v16158_v11  ;;  %v13181_v19 = vld [vmem:[#allocation2 + $0x640] ss:$36 sps:$4 sm:$0xff]  }
 0x3a7   : > { %v11934_v39 = vpop.f32.mrf.mxu0  ;;  %v12448_v23 = vpop.f32.mrf.mxu1 }
 0x3a8   : > { %17603 = vst [vmem:[#allocation27_spill] sm:$0xff] %v16281_v50  ;;  %v16283_v36 = vadd.f32 %v11934_v39, %v11933_v55  ;;  %v16286_v47 = vadd.f32 %v12448_v23, %v16167_v51  ;;  %v13184_v39 = vld [vmem:[#allocation2 + $0x408] ss:$36 sps:$4 sm:$0xff]  }
 0x3a9   : > { %v11936_v40 = vpop.f32.mrf.mxu0  ;;  %v6976_v2 = vpop.f32.mrf.mxu1  ;;  %9065 = vmatmul.mubr.bf16.gmra.mxu1 %v13178_v9  ;;  %v13218_v50 = vld [vmem:[#allocation2 + $0x648] ss:$36 sps:$4 sm:$0xff]  }
 0x3aa   : > { %17604 = vst [vmem:[#allocation26_spill] sm:$0xff] %v16286_v47  ;;  %v16289_v15 = vadd.f32 %v6976_v2, %v16161_v8  ;;  %9072 = vmatprep.mubr.bf16.mxu1 %v13186_v57 }
 0x3ab   : > { %v11937_v13 = vpop.f32.mrf.mxu0  ;;  %v12451_v11 = vpop.f32.mrf.mxu1 }
 0x3ac   : > { %17605 = vst [vmem:[#allocation28_spill] sm:$0xff] %v16289_v15  ;;  %v16291_v56 = vadd.f32 %v11937_v13, %v11936_v40  ;;  %v16294_v42 = vadd.f32 %v12451_v11, %v16176_v34  ;;  %v13190_v40 = vld [vmem:[#allocation2 + $0x68c] ss:$36 sps:$4 sm:$0xff]   ;;  %v10564_v34 = vcombine.high %v7109_v33, %v16236_v63  ;;  %v13213_v15 = vld [vmem:[#allocation2 + $0x600] ss:$36 sps:$4 sm:$0xff]  }
 0x3ad   : > { %v11939_v26 = vpop.f32.mrf.mxu0  ;;  %8968 = vmatmul.mubr.bf16.gmra.mxu0 %v13175_v44  ;;  %v6989_v51 = vpop.f32.mrf.mxu1 }
 0x3ae   : > { %17606 = vst [vmem:[#allocation29_spill] sm:$0xff] %v16294_v42  ;;  %8975 = vmatprep.mubr.bf16.mxu0 %v13183_v32  ;;  %v16297_v60 = vadd.f32 %v6989_v51, %v16170_v41 }
 0x3af   : > { %v11940_v6 = vpop.f32.mrf.mxu0  ;;  %v12452_v8 = vpop.f32.mrf.mxu1 }
 0x3b0   : > { %17607 = vst [vmem:[#allocation22_spill] sm:$0xff] %v16297_v60  ;;  %v16299_v27 = vadd.f32 %v11940_v6, %v11939_v26  ;;  %v16302_v23 = vadd.f32 %v12452_v8, %v16179_v1  ;;  %v13188_v8 = vld [vmem:[#allocation2 + $0x688] ss:$36 sps:$4 sm:$0xff]   ;;  %v13208_v60 = vld [vmem:[#allocation2 + $0x5b8] ss:$36 sps:$4 sm:$0xff]  }
 0x3b1   : > { %v11942_v55 = vpop.f32.mrf.mxu0  ;;  %v6992_v44 = vpop.f32.mrf.mxu1  ;;  %9073 = vmatmul.mubr.bf16.gmra.mxu1 %v13184_v39  ;;  %v13193_v39 = vld [vmem:[#allocation2 + $0x49c] ss:$36 sps:$4 sm:$0xff]  }
 0x3b2   : > { %17608 = vst [vmem:[#allocation23_spill] sm:$0xff] %v16302_v23  ;;  %v16306_v32 = vadd.f32 %v6992_v44, %v16173_v17  ;;  %9080 = vmatprep.mubr.bf16.mxu1 %v10564_v34 }
 0x3b3   : > { %v11943_v9 = vpop.f32.mrf.mxu0  ;;  %v12455_v41 = vpop.f32.mrf.mxu1 }
 0x3b4   : > { %17609 = vst [vmem:[#allocation24_spill] sm:$0xff] %v16306_v32  ;;  %v16308_v57 = vadd.f32 %v11943_v9, %v11942_v55  ;;  %v16311_v13 = vadd.f32 %v12455_v41, %v16188_v31  ;;  %v10563_v55 = vcombine.low %v7109_v33, %v16236_v63  ;;  %v13194_v31 = vld [vmem:[#allocation2 + $0x260] ss:$36 sps:$4 sm:$0xff]  }
 0x3b5   : > { %v11945_v2 = vpop.f32.mrf.mxu0  ;;  %8976 = vmatmul.mubr.bf16.gmra.mxu0 %v13181_v19  ;;  %v7005_v1 = vpop.f32.mrf.mxu1 }
 0x3b6   : > { %17610 = vst [vmem:[#allocation33_spill] sm:$0xff] %v16311_v13  ;;  %8983 = vmatprep.mubr.bf16.mxu0 %v13190_v40  ;;  %v16314_v26 = vadd.f32 %v7005_v1, %v16182_v20 }
 0x3b7   : > { %v11946_v11 = vpop.f32.mrf.mxu0  ;;  %v12456_v17 = vpop.f32.mrf.mxu1 }
 0x3b8   : > { %17611 = vst [vmem:[#allocation34_spill] sm:$0xff] %v16314_v26  ;;  %v16316_v51 = vadd.f32 %v11946_v11, %v11945_v2  ;;  %v16320_v19 = vadd.f32 %v12456_v17, %v16191_v12 }
 0x3b9   : > { %v11948_v6 = vpop.f32.mrf.mxu0  ;;  %v7008_v44 = vpop.f32.mrf.mxu1  ;;  %9081 = vmatmul.mubr.bf16.gmra.mxu1 %v10563_v55  ;;  %v13199_v55 = vld [vmem:[#allocation2 + $0x2f0] ss:$36 sps:$4 sm:$0xff]  }
 0x3ba   : > { %17612 = vst [vmem:[#allocation40_spill] sm:$0xff] %v16320_v19  ;;  %v16323_v34 = vadd.f32 %v7008_v44, %v16185_v48  ;;  %9088 = vmatprep.mubr.bf16.mxu1 %v13193_v39  ;;  %v13195_v44 = vld [vmem:[#allocation2 + $0x2a8] ss:$36 sps:$4 sm:$0xff]  }
 0x3bb   : > { %v11949_v40 = vpop.f32.mrf.mxu0  ;;  %v12459_v20 = vpop.f32.mrf.mxu1 }
 0x3bc   : > { %17613 = vst [vmem:[#allocation45_spill] sm:$0xff] %v16323_v34  ;;  %v16325_v9 = vadd.f32 %v11949_v40, %v11948_v6  ;;  %v16328_v2 = vadd.f32 %v12459_v20, %v16204_v58  ;;  %v13191_v6 = vld [vmem:[#allocation2 + $0x498] ss:$36 sps:$4 sm:$0xff]  }
 0x3bd   : > { %v11951_v41 = vpop.f32.mrf.mxu0  ;;  %8984 = vmatmul.mubr.bf16.gmra.mxu0 %v13188_v8  ;;  %v7021_v12 = vpop.f32.mrf.mxu1  ;;  %v13198_v8 = vld [vmem:[#allocation2 + $0x4e4] ss:$36 sps:$4 sm:$0xff]   ;;  %v13200_v34 = vld [vmem:[#allocation2 + $0x338] ss:$36 sps:$4 sm:$0xff]  }
 0x3be   : > { %17614 = vst [vmem:[#allocation41_spill] sm:$0xff] %v16328_v2  ;;  %12477 = vmatprep.mubr.bf16.mxu0 %v13194_v31  ;;  %v16331_v1 = vadd.f32 %v7021_v12, %v16198_v7 }
 0x3bf   : > { %v11952_v33 = vpop.f32.mrf.mxu0  ;;  %v12460_v48 = vpop.f32.mrf.mxu1 }
 0x3c0   : > { %17615 = vst [vmem:[#allocation42_spill] sm:$0xff] %v16331_v1  ;;  %v16333_v11 = vadd.f32 %v11952_v33, %v11951_v41  ;;  %v16336_v40 = vadd.f32 %v12460_v48, %v16215_v18  ;;  %v13196_v1 = vld [vmem:[#allocation2 + $0x4e0] ss:$36 sps:$4 sm:$0xff]  }
 0x3c1   : > { %v11954_v17 = vpop.f32.mrf.mxu0  ;;  %v7024_v58 = vpop.f32.mrf.mxu1  ;;  %9089 = vmatmul.mubr.bf16.gmra.mxu1 %v13191_v6 }
 0x3c2   : > { %17616 = vst [vmem:[#allocation32_spill] sm:$0xff] %v16336_v40  ;;  %v16339_v39 = vadd.f32 %v7024_v58, %v16201_v0  ;;  %9096 = vmatprep.mubr.bf16.mxu1 %v13198_v8  ;;  %v13204_v58 = vld [vmem:[#allocation2 + $0x380] ss:$36 sps:$4 sm:$0xff]  }
 0x3c3   : > { %v11955_v20 = vpop.f32.mrf.mxu0  ;;  %v12021_v12 = vpop.f32.mrf.mxu1 }
 0x3c4   : > { %17617 = vst [vmem:[#allocation43_spill] sm:$0xff] %v16339_v39  ;;  %v16341_v31 = vadd.f32 %v11955_v20, %v11954_v17  ;;  %v13203_v17 = vld [vmem:[#allocation2 + $0x52c] ss:$36 sps:$4 sm:$0xff]  }
 0x3c5   : > { %v11957_v7 = vpop.f32.mrf.mxu0  ;;  %12478 = vmatmul.mubr.bf16.vlgmr.msra.gmra.mxu0 %v13195_v44  ;;  %v12022_v33 = vpop.f32.mrf.mxu1 }
 0x3c6   : > { %12481 = vmatprep.mubr.bf16.mxu0 %v13199_v55  ;;  %v12023_v18 = vadd.f32 %v12022_v33, %v12021_v12 }
 0x3c7   : > { %v11958_v41 = vpop.f32.mrf.mxu0  ;;  %v12024_v40 = vpop.f32.mrf.mxu1 }
 0x3c8   : > { %v16343_v2 = vadd.f32 %v11958_v41, %v11957_v7  ;;  %v16346_v0 = vadd.f32 %v12023_v18, %v16213_v28  ;;  %v7149_v28 = vld [vmem:[#allocation2 + $0x570] sm:$0xff] }
 0x3c9   : > { %v11960_v48 = vpop.f32.mrf.mxu0  ;;  %v12025_v39 = vpop.f32.mrf.mxu1  ;;  %9097 = vmatmul.mubr.bf16.gmra.mxu1 %v13196_v1  ;;  %v13206_v1 = vld [vmem:[#allocation2 + $0x410] ss:$36 sps:$4 sm:$0xff]  }
 0x3ca   : > { %v12026_v44 = vadd.f32 %v12025_v39, %v12024_v40  ;;  %9104 = vmatprep.mubr.bf16.mxu1 %v13203_v17 }
 0x3cb   : > { %v11961_v20 = vpop.f32.mrf.mxu0  ;;  %v12027_v55 = vpop.f32.mrf.mxu1 }
 0x3cc   : > { %v16348_v6 = vadd.f32 %v11961_v20, %v11960_v48  ;;  %v16351_v7 = vadd.f32 %v12026_v44, %v16223_v24  ;;  %v13201_v48 = vld [vmem:[#allocation2 + $0x528] ss:$36 sps:$4 sm:$0xff]  }
 0x3cd   : > { %v11963_v8 = vpop.f32.mrf.mxu0  ;;  %12482 = vmatmul.mubr.bf16.gmra.mxu0 %v13200_v34  ;;  %v12028_v41 = vpop.f32.mrf.mxu1  ;;  %v13205_v20 = vld [vmem:[#allocation2 + $0x3c8] ss:$36 sps:$4 sm:$0xff]   ;;  %v10600_v34 = vcombine.high %v7149_v28, %v16236_v63 }
 0x3ce   : > { %12485 = vmatprep.mubr.bf16.mxu0 %v13204_v58  ;;  %v12029_v18 = vadd.f32 %v12028_v41, %v12027_v55 }
 0x3cf   : > { %v11964_v12 = vpop.f32.mrf.mxu0  ;;  %v12030_v26 = vpop.f32.mrf.mxu1 }
 0x3d0   : > { %v16353_v33 = vadd.f32 %v11964_v12, %v11963_v8  ;;  %v16356_v40 = vadd.f32 %v12029_v18, %v16231_v25 }
 0x3d1   : > { %v11966_v19 = vpop.f32.mrf.mxu0  ;;  %v12031_v39 = vpop.f32.mrf.mxu1  ;;  %9105 = vmatmul.mubr.bf16.gmra.mxu1 %v13201_v48  ;;  %v13210_v48 = vld [vmem:[#allocation2 + $0x5bc] ss:$36 sps:$4 sm:$0xff]  }
 0x3d2   : > { %v12032_v58 = vadd.f32 %v12031_v39, %v12030_v26  ;;  %9112 = vmatprep.mubr.bf16.mxu1 %v10600_v34 }
 0x3d3   : > { %v11967_v24 = vpop.f32.mrf.mxu0  ;;  %v12033_v13 = vpop.f32.mrf.mxu1 }
 0x3d4   : > { %v16359_v17 = vadd.f32 %v11967_v24, %v11966_v19  ;;  %v16362_v8 = vadd.f32 %v12032_v58, %v16242_v16  ;;  %v10599_v19 = vcombine.low %v7149_v28, %v16236_v63  ;;  %v13207_v24 = vld [vmem:[#allocation2 + $0x458] ss:$36 sps:$4 sm:$0xff]  }
 0x3d5   : > { %v11969_v44 = vpop.f32.mrf.mxu0  ;;  %12486 = vmatmul.mubr.bf16.gmra.mxu0 %v13205_v20  ;;  %v12034_v25 = vpop.f32.mrf.mxu1  ;;  %v13211_v20 = vld [vmem:[#allocation2 + $0x4a0] ss:$36 sps:$4 sm:$0xff]  }
 0x3d6   : > { %12489 = vmatprep.mubr.bf16.mxu0 %v13206_v1  ;;  %v12035_v41 = vadd.f32 %v12034_v25, %v12033_v13 }
 0x3d7   : > { %v11970_v55 = vpop.f32.mrf.mxu0  ;;  %v12036_v32 = vpop.f32.mrf.mxu1 }
 0x3d8   : > { %v16364_v12 = vadd.f32 %v11970_v55, %v11969_v44  ;;  %v16368_v26 = vadd.f32 %v12035_v41, %v16250_v21 }
 0x3d9   : > { %v11972_v18 = vpop.f32.mrf.mxu0  ;;  %v12037_v16 = vpop.f32.mrf.mxu1  ;;  %9113 = vmatmul.mubr.bf16.gmra.mxu1 %v10599_v19  ;;  %v13216_v19 = vld [vmem:[#allocation2 + $0x530] ss:$36 sps:$4 sm:$0xff]  }
 0x3da   : > { %v12038_v34 = vadd.f32 %v12037_v16, %v12036_v32  ;;  %9120 = vmatprep.mubr.bf16.mxu1 %v13210_v48 }
 0x3db   : > { %v11973_v39 = vpop.f32.mrf.mxu0  ;;  %v12039_v23 = vpop.f32.mrf.mxu1 }
 0x3dc   : > { %v16370_v58 = vadd.f32 %v11973_v39, %v11972_v18  ;;  %v16373_v13 = vadd.f32 %v12038_v34, %v16259_v10  ;;  %v13212_v18 = vld [vmem:[#allocation2 + $0x4e8] ss:$36 sps:$4 sm:$0xff]  }
 0x3dd   : > { %v11975_v1 = vpop.f32.mrf.mxu0  ;;  %12490 = vmatmul.mubr.bf16.gmra.mxu0 %v13207_v24  ;;  %v12040_v44 = vpop.f32.mrf.mxu1  ;;  %v13215_v39 = vld [vmem:[#allocation2 + $0x604] ss:$36 sps:$4 sm:$0xff]  }
 0x3de   : > { %12493 = vmatprep.mubr.bf16.mxu0 %v13211_v20  ;;  %v12041_v55 = vadd.f32 %v12040_v44, %v12039_v23 }
 0x3df   : > { %v11976_v28 = vpop.f32.mrf.mxu0  ;;  %v12042_v41 = vpop.f32.mrf.mxu1 }
 0x3e0   : > { %v16375_v21 = vadd.f32 %v11976_v28, %v11975_v1  ;;  %v16378_v32 = vadd.f32 %v12041_v55, %v16267_v61 }
 0x3e1   : > { %v11978_v25 = vpop.f32.mrf.mxu0  ;;  %v12043_v16 = vpop.f32.mrf.mxu1  ;;  %9121 = vmatmul.mubr.bf16.gmra.mxu1 %v13208_v60  ;;  %v13221_v60 = vld [vmem:[#allocation2 + $0x5c0] ss:$36 sps:$4 sm:$0xff]  }
 0x3e2   : > { %v12044_v48 = vadd.f32 %v12043_v16, %v12042_v41  ;;  %9128 = vmatprep.mubr.bf16.mxu1 %v13215_v39 }
 0x3e3   : > { %v11979_v24 = vpop.f32.mrf.mxu0  ;;  %v12045_v34 = vpop.f32.mrf.mxu1 }
 0x3e4   : > { %v16380_v10 = vadd.f32 %v11979_v24, %v11978_v25  ;;  %v16383_v23 = vadd.f32 %v12044_v48, %v16275_v52  ;;  %v13217_v25 = vld [vmem:[#allocation2 + $0x578] ss:$36 sps:$4 sm:$0xff]   ;;  %v13220_v24 = vld [vmem:[#allocation2 + $0x64c] ss:$36 sps:$4 sm:$0xff]  }
 0x3e5   : > { %v11981_v20 = vpop.f32.mrf.mxu0  ;;  %12494 = vmatmul.mubr.bf16.gmra.mxu0 %v13212_v18  ;;  %v12046_v28 = vpop.f32.mrf.mxu1 }
 0x3e6   : > { %12497 = vmatprep.mubr.bf16.mxu0 %v13216_v19  ;;  %v12047_v44 = vadd.f32 %v12046_v28, %v12045_v34 }
 0x3e7   : > { %v11982_v1 = vpop.f32.mrf.mxu0  ;;  %v12048_v42 = vpop.f32.mrf.mxu1 }
 0x3e8   : > { %v16385_v61 = vadd.f32 %v11982_v1, %v11981_v20  ;;  %v16388_v41 = vadd.f32 %v12047_v44, %v16283_v36 }
 0x3e9   : > { %v11984_v55 = vpop.f32.mrf.mxu0  ;;  %v12049_v16 = vpop.f32.mrf.mxu1  ;;  %9129 = vmatmul.mubr.bf16.gmra.mxu1 %v13213_v15  ;;  %v10636_v15 = vcombine.high %v16195_v5, %v16236_v63 }
 0x3ea   : > { %v12050_v39 = vadd.f32 %v12049_v16, %v12048_v42  ;;  %9136 = vmatprep.mubr.bf16.mxu1 %v13220_v24 }
 0x3eb   : > { %v11985_v18 = vpop.f32.mrf.mxu0  ;;  %v12051_v48 = vpop.f32.mrf.mxu1 }
 0x3ec   : > { %v16390_v52 = vadd.f32 %v11985_v18, %v11984_v55  ;;  %v16393_v20 = vadd.f32 %v12050_v39, %v16291_v56  ;;  %v13222_v55 = vld [vmem:[#allocation2 + $0x608] ss:$36 sps:$4 sm:$0xff]  }
 0x3ed   : > { %v11987_v19 = vpop.f32.mrf.mxu0  ;;  %12498 = vmatmul.mubr.bf16.gmra.mxu0 %v13217_v25  ;;  %v12052_v1 = vpop.f32.mrf.mxu1  ;;  %v13223_v25 = vld [vmem:[#allocation2 + $0x650] ss:$36 sps:$4 sm:$0xff]  }
 0x3ee   : > { %12501 = vmatprep.mubr.bf16.mxu0 %v13221_v60  ;;  %v12053_v28 = vadd.f32 %v12052_v1, %v12051_v48 }
 0x3ef   : > { %v11988_v34 = vpop.f32.mrf.mxu0  ;;  %v12054_v47 = vpop.f32.mrf.mxu1 }
 0x3f0   : > { %v16395_v36 = vadd.f32 %v11988_v34, %v11987_v19  ;;  %v16398_v42 = vadd.f32 %v12053_v28, %v16299_v27 }
 0x3f1   : > { %v11990_v44 = vpop.f32.mrf.mxu0  ;;  %v12055_v18 = vpop.f32.mrf.mxu1  ;;  %9137 = vmatmul.mubr.bf16.gmra.mxu1 %v13218_v50 }
 0x3f2   : > { %v12056_v60 = vadd.f32 %v12055_v18, %v12054_v47  ;;  %9144 = vmatprep.mubr.bf16.mxu1 %v10636_v15  ;;  %v13224_v47 = vld [vmem:[#allocation2 + $0x698] ss:$36 sps:$4 sm:$0xff]  }
 0x3f3   : > { %v11991_v56 = vpop.f32.mrf.mxu0  ;;  %v12057_v39 = vpop.f32.mrf.mxu1 }
 0x3f4   : > { %v16402_v24 = vadd.f32 %v11991_v56, %v11990_v44  ;;  %v16405_v19 = vadd.f32 %v12056_v60, %v16308_v57  ;;  %v10635_v44 = vcombine.low %v16195_v5, %v16236_v63 }
 0x3f5   : > { %v11993_v16 = vpop.f32.mrf.mxu0  ;;  %12502 = vmatmul.mubr.bf16.gmra.mxu0 %v13222_v55  ;;  %v12058_v48 = vpop.f32.mrf.mxu1 }
 0x3f6   : > { %12505 = vmatprep.mubr.bf16.mxu0 %v13223_v25  ;;  %v12059_v1 = vadd.f32 %v12058_v48, %v12057_v39 }
 0x3f7   : > { %v11994_v27 = vpop.f32.mrf.mxu0  ;;  %v12060_v62 = vpop.f32.mrf.mxu1 }
 0x3f8   : > { %v16407_v34 = vadd.f32 %v11994_v27, %v11993_v16  ;;  %v16412_v56 = vadd.f32 %v12059_v1, %v16316_v51 }
 0x3f9   : > { %v11996_v28 = vpop.f32.mrf.mxu0  ;;  %v12061_v55 = vpop.f32.mrf.mxu1  ;;  %9145 = vmatmul.mubr.bf16.gmra.mxu1 %v10635_v44 }
 0x3fa   : > { %v12062_v15 = vadd.f32 %v12061_v55, %v12060_v62 }
 0x3fb   : > { %v11997_v50 = vpop.f32.mrf.mxu0  ;;  %v12063_v18 = vpop.f32.mrf.mxu1 }
 0x3fc   : > { %v16414_v57 = vadd.f32 %v11997_v50, %v11996_v28  ;;  %v16417_v60 = vadd.f32 %v12062_v15, %v16325_v9 }
 0x3fd   : > { %v11999_v25 = vpop.f32.mrf.mxu0  ;;  %12506 = vmatmul.mubr.bf16.gmra.mxu0 %v13224_v47  ;;  %v12064_v39 = vpop.f32.mrf.mxu1 }
 0x3fe   : > { %v12065_v5 = vadd.f32 %v12064_v39, %v12063_v18 }
 0x3ff   : > { %v12000_v16 = vpop.f32.mrf.mxu0  ;;  %v12066_v51 = vpop.f32.mrf.mxu1 }
 0x400   : > { %v16419_v27 = vadd.f32 %v12000_v16, %v11999_v25  ;;  %v16422_v48 = vadd.f32 %v12065_v5, %v16333_v11 }
 0x401   : > { %v12002_v63 = vpop.f32.mrf.mxu0  ;;  %v12067_v28 = vpop.f32.mrf.mxu1 }
 0x402   : > { %v12068_v50 = vadd.f32 %v12067_v28, %v12066_v51 }
 0x403   : > { %v12003_v1 = vpop.f32.mrf.mxu0  ;;  %v12069_v44 = vpop.f32.mrf.mxu1 }
 0x404   : > { %v16424_v62 = vadd.f32 %v12003_v1, %v12002_v63  ;;  %v16427_v9 = vadd.f32 %v12068_v50, %v16341_v31 }
 0x405   : > { %v12133_v47 = vpop.f32.mrf.mxu0  ;;  %v12070_v55 = vpop.f32.mrf.mxu1 }
 0x406   : > { %v12071_v25 = vadd.f32 %v12070_v55, %v12069_v44 }
 0x407   : > { %v12134_v15 = vpop.f32.mrf.mxu0  ;;  %v12072_v18 = vpop.f32.mrf.mxu1 }
 0x408   : > { %v12135_v16 = vadd.f32 %v12134_v15, %v12133_v47  ;;  %v16430_v54 = vadd.f32 %v12071_v25, %v16343_v2 }
 0x409   : > { %v12136_v39 = vpop.f32.mrf.mxu0  ;;  %v12073_v5 = vpop.f32.mrf.mxu1 }
 0x40a   : > { %v16433_v11 = vadd.f32 %v12135_v16, %v16346_v0  ;;  %v12074_v51 = vadd.f32 %v12073_v5, %v12072_v18 }
 0x40b   : > { %v12137_v63 = vpop.f32.mrf.mxu0  ;;  %v12075_v28 = vpop.f32.mrf.mxu1 }
 0x40c   : > { %v12138_v1 = vadd.f32 %v12137_v63, %v12136_v39  ;;  %v16436_v31 = vadd.f32 %v12074_v51, %v16348_v6 }
 0x40d   : > { %v12139_v22 = vpop.f32.mrf.mxu0  ;;  %v12076_v44 = vpop.f32.mrf.mxu1 }
 0x40e   : > { %v16439_v50 = vadd.f32 %v12138_v1, %v16351_v7  ;;  %v12077_v55 = vadd.f32 %v12076_v44, %v12075_v28 }
 0x40f   : > { %v12140_v47 = vpop.f32.mrf.mxu0  ;;  %v12078_v15 = vpop.f32.mrf.mxu1 }
 0x410   : > { %v12141_v2 = vadd.f32 %v12140_v47, %v12139_v22  ;;  %v16442_v0 = vadd.f32 %v12077_v55, %v16353_v33 }
 0x411   : > { %v12142_v25 = vpop.f32.mrf.mxu0  ;;  %v12079_v18 = vpop.f32.mrf.mxu1 }
 0x412   : > { %v16445_v16 = vadd.f32 %v12141_v2, %v16356_v40  ;;  %v12080_v5 = vadd.f32 %v12079_v18, %v12078_v15 }
 0x413   : > { %v12143_v39 = vpop.f32.mrf.mxu0  ;;  %v12081_v63 = vpop.f32.mrf.mxu1 }
 0x414   : > { %v12144_v6 = vadd.f32 %v12143_v39, %v12142_v25  ;;  %v16448_v7 = vadd.f32 %v12080_v5, %v16359_v17 }
 0x415   : > { %v12145_v51 = vpop.f32.mrf.mxu0  ;;  %v12082_v22 = vpop.f32.mrf.mxu1 }
 0x416   : > { %v16451_v1 = vadd.f32 %v12144_v6, %v16362_v8  ;;  %v12083_v44 = vadd.f32 %v12082_v22, %v12081_v63 }
 0x417   : > { %v12146_v28 = vpop.f32.mrf.mxu0  ;;  %v12084_v47 = vpop.f32.mrf.mxu1 }
 0x418   : > { %v12147_v33 = vadd.f32 %v12146_v28, %v12145_v51  ;;  %v16454_v40 = vadd.f32 %v12083_v44, %v16364_v12 }
 0x419   : > { %v12148_v55 = vpop.f32.mrf.mxu0  ;;  %v12085_v15 = vpop.f32.mrf.mxu1 }
 0x41a   : > { %v16457_v2 = vadd.f32 %v12147_v33, %v16368_v26  ;;  %v12086_v18 = vadd.f32 %v12085_v15, %v12084_v47 }
 0x41b   : > { %v12149_v25 = vpop.f32.mrf.mxu0  ;;  %v12087_v39 = vpop.f32.mrf.mxu1 }
 0x41c   : > { %v12150_v17 = vadd.f32 %v12149_v25, %v12148_v55  ;;  %v16460_v8 = vadd.f32 %v12086_v18, %v16370_v58 }
 0x41d   : > { %v12151_v5 = vpop.f32.mrf.mxu0  ;;  %v12088_v63 = vpop.f32.mrf.mxu1 }
 0x41e   : > { %v16463_v6 = vadd.f32 %v12150_v17, %v16373_v13  ;;  %v12089_v22 = vadd.f32 %v12088_v63, %v12087_v39 }
 0x41f   : > { %v12152_v51 = vpop.f32.mrf.mxu0  ;;  %v12090_v28 = vpop.f32.mrf.mxu1 }
 0x420   : > { %v12153_v12 = vadd.f32 %v12152_v51, %v12151_v5  ;;  %v16466_v26 = vadd.f32 %v12089_v22, %v16375_v21 }
 0x421   : > { %v12154_v44 = vpop.f32.mrf.mxu0  ;;  %v12091_v47 = vpop.f32.mrf.mxu1 }
 0x422   : > { %v16469_v33 = vadd.f32 %v12153_v12, %v16378_v32  ;;  %v12092_v15 = vadd.f32 %v12091_v47, %v12090_v28 }
 0x423   : > { %v12155_v55 = vpop.f32.mrf.mxu0  ;;  %v12093_v25 = vpop.f32.mrf.mxu1 }
 0x424   : > { %v12156_v58 = vadd.f32 %v12155_v55, %v12154_v44  ;;  %v16472_v13 = vadd.f32 %v12092_v15, %v16380_v10 }
 0x425   : > { %v12157_v18 = vpop.f32.mrf.mxu0  ;;  %v12094_v39 = vpop.f32.mrf.mxu1 }
 0x426   : > { %v16475_v17 = vadd.f32 %v12156_v58, %v16383_v23  ;;  %v12095_v63 = vadd.f32 %v12094_v39, %v12093_v25 }
 0x427   : > { %v12158_v5 = vpop.f32.mrf.mxu0  ;;  %v12096_v51 = vpop.f32.mrf.mxu1 }
 0x428   : > { %v12159_v21 = vadd.f32 %v12158_v5, %v12157_v18  ;;  %v16478_v32 = vadd.f32 %v12095_v63, %v16385_v61 }
 0x429   : > { %v12160_v22 = vpop.f32.mrf.mxu0  ;;  %v12097_v28 = vpop.f32.mrf.mxu1 }
 0x42a   : > { %v16481_v12 = vadd.f32 %v12159_v21, %v16388_v41  ;;  %v12098_v47 = vadd.f32 %v12097_v28, %v12096_v51 }
 0x42b   : > { %v12161_v44 = vpop.f32.mrf.mxu0  ;;  %v12099_v55 = vpop.f32.mrf.mxu1 }
 0x42c   : > { %v12162_v10 = vadd.f32 %v12161_v44, %v12160_v22  ;;  %v16484_v23 = vadd.f32 %v12098_v47, %v16390_v52 }
 0x42d   : > { %v12163_v15 = vpop.f32.mrf.mxu0  ;;  %v12100_v25 = vpop.f32.mrf.mxu1 }
 0x42e   : > { %v16487_v58 = vadd.f32 %v12162_v10, %v16393_v20  ;;  %v12101_v39 = vadd.f32 %v12100_v25, %v12099_v55 }
 0x42f   : > { %v12164_v18 = vpop.f32.mrf.mxu0  ;;  %v12102_v5 = vpop.f32.mrf.mxu1 }
 0x430   : > { %v12165_v61 = vadd.f32 %v12164_v18, %v12163_v15  ;;  %v16490_v41 = vadd.f32 %v12101_v39, %v16395_v36 }
 0x431   : > { %v12166_v63 = vpop.f32.mrf.mxu0  ;;  %v12103_v51 = vpop.f32.mrf.mxu1 }
 0x432   : > { %v16493_v21 = vadd.f32 %v12165_v61, %v16398_v42  ;;  %v12104_v28 = vadd.f32 %v12103_v51, %v12102_v5 }
 0x433   : > { %v12167_v22 = vpop.f32.mrf.mxu0  ;;  %v12105_v44 = vpop.f32.mrf.mxu1 }
 0x434   : > { %v12168_v52 = vadd.f32 %v12167_v22, %v12166_v63  ;;  %v16496_v20 = vadd.f32 %v12104_v28, %v16402_v24 }
 0x435   : > { %v12169_v47 = vpop.f32.mrf.mxu0  ;;  %v12106_v55 = vpop.f32.mrf.mxu1 }
 0x436   : > { %v16499_v10 = vadd.f32 %v12168_v52, %v16405_v19  ;;  %v12107_v25 = vadd.f32 %v12106_v55, %v12105_v44 }
 0x437   : > { %v12170_v15 = vpop.f32.mrf.mxu0  ;;  %v12108_v18 = vpop.f32.mrf.mxu1 }
 0x438   : > { %v12171_v36 = vadd.f32 %v12170_v15, %v12169_v47  ;;  %v16502_v42 = vadd.f32 %v12107_v25, %v16407_v34 }
 0x439   : > { %v12172_v39 = vpop.f32.mrf.mxu0  ;;  %v12109_v5 = vpop.f32.mrf.mxu1 }
 0x43a   : > { %v16505_v61 = vadd.f32 %v12171_v36, %v16412_v56  ;;  %v12110_v51 = vadd.f32 %v12109_v5, %v12108_v18 }
 0x43b   : > { %v12173_v63 = vpop.f32.mrf.mxu0  ;;  %v12111_v22 = vpop.f32.mrf.mxu1 }
 0x43c   : > { %v12174_v24 = vadd.f32 %v12173_v63, %v12172_v39  ;;  %v16508_v19 = vadd.f32 %v12110_v51, %v16414_v57 }
 0x43d   : > { %v12175_v28 = vpop.f32.mrf.mxu0  ;;  %v12112_v44 = vpop.f32.mrf.mxu1 }
 0x43e   : > { %v16511_v52 = vadd.f32 %v12174_v24, %v16417_v60  ;;  %v12113_v55 = vadd.f32 %v12112_v44, %v12111_v22 }
 0x43f   : > { %v12176_v47 = vpop.f32.mrf.mxu0  ;;  %v12114_v15 = vpop.f32.mrf.mxu1 }
 0x440   : > { %17618 = vst [vmem:[#allocation47_spill] sm:$0xff] %v16511_v52  ;;  %v12177_v34 = vadd.f32 %v12176_v47, %v12175_v28  ;;  %v16514_v56 = vadd.f32 %v12113_v55, %v16419_v27 }
 0x441   : > { %v12178_v25 = vpop.f32.mrf.mxu0  ;;  %v12115_v18 = vpop.f32.mrf.mxu1 }
 0x442   : > { %v16517_v36 = vadd.f32 %v12177_v34, %v16422_v48  ;;  %v12116_v5 = vadd.f32 %v12115_v18, %v12114_v15 }
 0x443   : > { %v12179_v39 = vpop.f32.mrf.mxu0  ;;  %v16519_v51 = vpop.f32.mrf.mxu1 }
 0x444   : > { %17619 = vst [vmem:[#allocation55_spill] sm:$0xff] %v16517_v36  ;;  %v12180_v57 = vadd.f32 %v12179_v39, %v12178_v25  ;;  %v16522_v60 = vadd.f32 %v12116_v5, %v16424_v62 }
 0x445   : > { %v12181_v63 = vpop.f32.mrf.mxu0  ;;  %v16527_v28 = vpop.f32.mrf.mxu1 }
 0x446   : > { %v16525_v24 = vadd.f32 %v12180_v57, %v16427_v9 }
 0x447   : > { %v12182_v22 = vpop.f32.mrf.mxu0  ;;  %v16529_v48 = vpop.f32.mrf.mxu1 }
 0x448   : > { %17620 = vst [vmem:[#allocation56_spill] sm:$0xff] %v16525_v24  ;;  %v12183_v27 = vadd.f32 %v12182_v22, %v12181_v63 }
 0x449   : > { %v12184_v44 = vpop.f32.mrf.mxu0  ;;  %v16534_v34 = vpop.f32.mrf.mxu1 }
 0x44a   : > { %v16532_v47 = vadd.f32 %v12183_v27, %v16430_v54 }
 0x44b   : > { %v12185_v55 = vpop.f32.mrf.mxu0  ;;  %v16536_v62 = vpop.f32.mrf.mxu1 }
 0x44c   : > { %17621 = vst [vmem:[#allocation66_spill] sm:$0xff] %v16532_v47  ;;  %v12186_v15 = vadd.f32 %v12185_v55, %v12184_v44 }
 0x44d   : > { %v12187_v25 = vpop.f32.mrf.mxu0  ;;  %v16541_v39 = vpop.f32.mrf.mxu1 }
 0x44e   : > { %v16539_v9 = vadd.f32 %v12186_v15, %v16436_v31 }
 0x44f   : > { %v12188_v18 = vpop.f32.mrf.mxu0  ;;  %v16543_v63 = vpop.f32.mrf.mxu1 }
 0x450   : > { %17622 = vst [vmem:[#allocation63_spill] sm:$0xff] %v16539_v9  ;;  %v12189_v5 = vadd.f32 %v12188_v18, %v12187_v25 }
 0x451   : > { %v12190_v57 = vpop.f32.mrf.mxu0  ;;  %v16548_v27 = vpop.f32.mrf.mxu1 }
 0x452   : > { %v16546_v54 = vadd.f32 %v12189_v5, %v16442_v0 }
 0x453   : > { %v12191_v22 = vpop.f32.mrf.mxu0  ;;  %v16550_v37 = vpop.f32.mrf.mxu1 }
 0x454   : > { %17623 = vst [vmem:[#allocation68_spill] sm:$0xff] %v16546_v54  ;;  %v12192_v44 = vadd.f32 %v12191_v22, %v12190_v57 }
 0x455   : > { %v12193_v55 = vpop.f32.mrf.mxu0  ;;  %v16555_v29 = vpop.f32.mrf.mxu1 }
 0x456   : > { %v16553_v31 = vadd.f32 %v12192_v44, %v16448_v7 }
 0x457   : > { %v12194_v15 = vpop.f32.mrf.mxu0  ;;  %v16557_v14 = vpop.f32.mrf.mxu1 }
 0x458   : > { %17624 = vst [vmem:[#allocation46_spill] sm:$0xff] %v16553_v31  ;;  %v12195_v25 = vadd.f32 %v12194_v15, %v12193_v55 }
 0x459   : > { %v12196_v18 = vpop.f32.mrf.mxu0  ;;  %v16562_v35 = vpop.f32.mrf.mxu1 }
 0x45a   : > { %v16560_v0 = vadd.f32 %v12195_v25, %v16454_v40 }
 0x45b   : > { %v12197_v5 = vpop.f32.mrf.mxu0  ;;  %v16564_v49 = vpop.f32.mrf.mxu1 }
 0x45c   : > { %17625 = vst [vmem:[#allocation54_spill] sm:$0xff] %v16560_v0  ;;  %v12198_v57 = vadd.f32 %v12197_v5, %v12196_v18 }
 0x45d   : > { %v12199_v22 = vpop.f32.mrf.mxu0  ;;  %v16569_v31 = vpop.f32.mrf.mxu1 }
 0x45e   : > { %v16567_v7 = vadd.f32 %v12198_v57, %v16460_v8 }
 0x45f   : > { %v12200_v44 = vpop.f32.mrf.mxu0  ;;  %v16571_v54 = vpop.f32.mrf.mxu1 }
 0x460   : > { %17626 = vst [vmem:[#allocation69_spill] sm:$0xff] %v16567_v7  ;;  %v12201_v55 = vadd.f32 %v12200_v44, %v12199_v22 }
 0x461   : > { %v12202_v15 = vpop.f32.mrf.mxu0  ;;  %v12267_v0 = vpop.f32.mrf.mxu1 }
 0x462   : > { %v16574_v40 = vadd.f32 %v12201_v55, %v16466_v26 }
 0x463   : > { %v12203_v25 = vpop.f32.mrf.mxu0  ;;  %v12269_v5 = vpop.f32.mrf.mxu1 }
 0x464   : > { %17627 = vst [vmem:[#allocation35_spill] sm:$0xff] %v16574_v40  ;;  %v12204_v4 = vadd.f32 %v12203_v25, %v12202_v15 }
 0x465   : > { %v12205_v18 = vpop.f32.mrf.mxu0  ;;  %v12270_v57 = vpop.f32.mrf.mxu1 }
 0x466   : > { %v16577_v30 = vadd.f32 %v12204_v4, %v16472_v13 }
 0x467   : > { %v12206_v8 = vpop.f32.mrf.mxu0  ;;  %v12272_v45 = vpop.f32.mrf.mxu1 }
 0x468   : > { %17628 = vst [vmem:[#allocation39_spill] sm:$0xff] %v16577_v30  ;;  %v12207_v7 = vadd.f32 %v12206_v8, %v12205_v18 }
 0x469   : > { %v12208_v9 = vpop.f32.mrf.mxu0  ;;  %v12273_v46 = vpop.f32.mrf.mxu1 }
 0x46a   : > { %v16580_v22 = vadd.f32 %v12207_v7, %v16478_v32 }
 0x46b   : > { %v12209_v44 = vpop.f32.mrf.mxu0  ;;  %v12275_v40 = vpop.f32.mrf.mxu1 }
 0x46c   : > { %17629 = vst [vmem:[#allocation50_spill] sm:$0xff] %v16580_v22  ;;  %v12210_v26 = vadd.f32 %v12209_v44, %v12208_v9 }
 0x46d   : > { %v12211_v55 = vpop.f32.mrf.mxu0  ;;  %v12276_v47 = vpop.f32.mrf.mxu1 }
 0x46e   : > { %v16583_v15 = vadd.f32 %v12210_v26, %v16484_v23 }
 0x46f   : > { %v12212_v25 = vpop.f32.mrf.mxu0  ;;  %v12278_v30 = vpop.f32.mrf.mxu1 }
 0x470   : > { %17630 = vst [vmem:[#allocation58_spill] sm:$0xff] %v16583_v15  ;;  %v12213_v4 = vadd.f32 %v12212_v25, %v12211_v55 }
 0x471   : > { %v12214_v13 = vpop.f32.mrf.mxu0  ;;  %v12279_v24 = vpop.f32.mrf.mxu1 }
 0x472   : > { %v16586_v18 = vadd.f32 %v12213_v4, %v16490_v41 }
 0x473   : > { %v12215_v8 = vpop.f32.mrf.mxu0  ;;  %v12281_v22 = vpop.f32.mrf.mxu1 }
 0x474   : > { %17631 = vst [vmem:[#allocation36_spill] sm:$0xff] %v16586_v18  ;;  %v12216_v32 = vadd.f32 %v12215_v8, %v12214_v13 }
 0x475   : > { %v12217_v7 = vpop.f32.mrf.mxu0  ;;  %v12282_v3 = vpop.f32.mrf.mxu1 }
 0x476   : > { %v16589_v9 = vadd.f32 %v12216_v32, %v16496_v20  ;;  %v12253_v20 = vadd.f32 %v16541_v39, %v16536_v62  ;;  %v12259_v62 = vadd.f32 %v16555_v29, %v16550_v37  ;;  %v12271_v29 = vadd.f32 %v12270_v57, %v12269_v5 }
 0x477   : > { %v12218_v44 = vpop.f32.mrf.mxu0  ;;  %v12284_v15 = vpop.f32.mrf.mxu1  ;;  %v12274_v37 = vadd.f32 %v12273_v46, %v12272_v45  ;;  %v12283_v5 = vadd.f32 %v12282_v3, %v12281_v22  ;;  %v16632_v46 = vld [vmem:[%s17022_s5] ss:$0 sm:$0xff] }
 0x478   : > { %v12219_v23 = vadd.f32 %v12218_v44, %v12217_v7  ;;  %v16640_v22 = vadd.f32 %v12271_v29, %v16481_v12  ;;  %v17635_v29 = vld [vmem:[#allocation56_spill] sm:$0xff] }
 0x479   : > { %v12220_v26 = vpop.f32.mrf.mxu0  ;;  %v12285_v52 = vpop.f32.mrf.mxu1  ;;  %v16653_v12 = vadd.f32 %v12283_v5, %v16505_v61 }
 0x47a   : > { %v16592_v55 = vadd.f32 %v12219_v23, %v16502_v42  ;;  %v12247_v42 = vadd.f32 %v16527_v28, %v16519_v51  ;;  %v12262_v51 = vadd.f32 %v16562_v35, %v16557_v14 }
 0x47b   : > { %v12221_v25 = vpop.f32.mrf.mxu0  ;;  %v12287_v18 = vpop.f32.mrf.mxu1 }
 0x47c   : > { %v12222_v41 = vadd.f32 %v12221_v25, %v12220_v26  ;;  %v12250_v26 = vadd.f32 %v16534_v34, %v16529_v48  ;;  %v12268_v48 = vadd.f32 %v12267_v0, %v16571_v54  ;;  %v12277_v54 = vadd.f32 %v12276_v47, %v12275_v40 }
 0x47d   : > { %v12223_v4 = vpop.f32.mrf.mxu0  ;;  %v12288_v36 = vpop.f32.mrf.mxu1 }
 0x47e   : > { %v16595_v13 = vadd.f32 %v12222_v41, %v16508_v19  ;;  %v12256_v19 = vadd.f32 %v16548_v27, %v16543_v63  ;;  %v9027_v27 = vadd.f32 %v12247_v42, %v16433_v11  ;;  %v12280_v11 = vadd.f32 %v12279_v24, %v12278_v30 }
 0x47f   : > { %v12224_v8 = vpop.f32.mrf.mxu0  ;;  %v12290_v44 = vpop.f32.mrf.mxu1  ;;  %v12286_v30 = vadd.f32 %v12285_v52, %v12284_v15  ;;  %v12289_v3 = vadd.f32 %v12288_v36, %v12287_v18 }
 0x480   : > { %v12225_v32 = vadd.f32 %v12224_v8, %v12223_v4  ;;  %v9035_v4 = vadd.f32 %v12253_v20, %v16445_v16  ;;  %v16623_v16 = vld [vmem:[%s17021_s4] ss:$0 sm:$0xff]  ;;  %v9043_v20 = vadd.f32 %v12259_v62, %v16457_v2  ;;  %v9054_v2 = vadd.f32 %v12268_v48, %v16475_v17 }
 0x481   : > { %v12226_v7 = vpop.f32.mrf.mxu0  ;;  %v12291_v41 = vpop.f32.mrf.mxu1  ;;  %v16650_v15 = vadd.f32 %v12280_v11, %v16499_v10  ;;  %v17637_v11 = vld [vmem:[#allocation60_spill] sm:$0xff] }
 0x482   : > { %v16602_v23 = vadd.f32 %v12225_v32, %v16514_v56  ;;  %v12265_v56 = vadd.f32 %v16569_v31, %v16564_v49  ;;  %v9038_v49 = vadd.f32 %v12256_v19, %v16451_v1  ;;  %v9030_v31 = vadd.f32 %v12250_v26, %v16439_v50 }
 0x483   : > { %v12227_v25 = vpop.f32.mrf.mxu0  ;;  %v12293_v28 = vpop.f32.mrf.mxu1  ;;  %v9046_v1 = vadd.f32 %v12262_v51, %v16463_v6  ;;  %v12292_v26 = vadd.f32 %v12291_v41, %v12290_v44  ;;  %v17632_v41 = vld [vmem:[#allocation55_spill] sm:$0xff] }
 0x484   : > { %v12228_v39 = vadd.f32 %v12227_v25, %v12226_v7  ;;  %v9051_v32 = vadd.f32 %v12265_v56, %v16469_v33  ;;  %v16643_v7 = vadd.f32 %v12274_v37, %v16487_v58 }
 0x485   : > { %v12479_v8 = vpop.f32.mrf.mxu0  ;;  %v12294_v35 = vpop.f32.mrf.mxu1  ;;  %v16668_v37 = vadd.f32 %v12292_v26, %v17635_v29  ;;  %v17640_v26 = vld [vmem:[#allocation67_spill] sm:$0xff] }
 0x486   : > { %v16617_v34 = vadd.f32 %v12228_v39, %v16522_v60  ;;  %v9196_v63 = vadd.f32 %v12479_v8, %v9035_v4  ;;  %v12295_v18 = vadd.f32 %v12294_v35, %v12293_v28  ;;  %v16659_v39 = vadd.f32 %v12289_v3, %v17632_v41  ;;  %v17633_v4 = vld [vmem:[#allocation47_spill] sm:$0xff] }
 0x487   : > { %v9187_v14 = vpop.f32.mrf.mxu0  ;;  %v12296_v45 = vpop.f32.mrf.mxu1  ;;  %v16662_v10 = vadd.f32 %v12286_v30, %v17633_v4  ;;  %v17634_v8 = vld [vmem:[#allocation71_spill] sm:$0xff] }
 0x488   : > { %v9316_v60 = vadd.f32 %v9196_v63, %v16208_v43  ;;  %v9188_v0 = vadd.f32 %v9187_v14, %v9027_v27 }
 0x489   : > { %v12480_v57 = vpop.f32.mrf.mxu0  ;;  %v12297_v24 = vpop.f32.mrf.mxu1 }
 0x48a   : > { %v9355_v50 = vmul.f32 %v16623_v16, %v9316_v60  ;;  %v9314_v43 = vadd.f32 %v9188_v0, %v16211_v38  ;;  %v9199_v47 = vadd.f32 %v12480_v57, %v9038_v49  ;;  %v9067_v38 = vadd.f32 %v12277_v54, %v16493_v21  ;;  %v17636_v49 = vld [vmem:[#allocation66_spill] sm:$0xff]  ;;  %v17638_v57 = vld [vmem:[#allocation76_spill] sm:$0xff] }
 0x48b   : > { %v9190_v40 = vpop.f32.mrf.mxu0  ;;  %v12299_v52 = vpop.f32.mrf.mxu1  ;;  %v12298_v56 = vadd.f32 %v12297_v24, %v12296_v45 }
 0x48c   : > { %v9394_v33 = vadd.f32 %v16632_v46, %v9355_v50  ;;  %v9353_v6 = vmul.f32 %v16623_v16, %v9314_v43  ;;  %v9317_v42 = vadd.f32 %v9199_v47, %v16218_v59  ;;  %v9191_v17 = vadd.f32 %v9190_v40, %v9030_v31  ;;  %v17639_v43 = vld [vmem:[#allocation63_spill] sm:$0xff] }
 0x48d   : > { %v12483_v36 = vpop.f32.mrf.mxu0  ;;  %v12300_v21 = vpop.f32.mrf.mxu1  ;;  %v16671_v31 = vadd.f32 %v12295_v18, %v17636_v49  ;;  %v16680_v47 = vadd.f32 %v12298_v56, %v17639_v43  ;;  %v17642_v56 = vld [vmem:[#allocation68_spill] sm:$0xff] }
 0x48e   : > { %v9458_v58 = vmul.f32 0.70710677, %v9394_v33  ;;  %v9392_v19 = vadd.f32 %v16632_v46, %v9353_v6  ;;  %v9356_v25 = vmul.f32 %v16623_v16, %v9317_v42  ;;  %v9315_v59 = vadd.f32 %v9191_v17, %v16221_v53 }
 0x48f   : > { %v9212_v62 = vadd.f32 %v12483_v36, %v9051_v32  ;;  %v9203_v44 = vpop.f32.mrf.mxu0  ;;  %v12302_v53 = vpop.f32.mrf.mxu1  ;;  %v16673_v54 = vmul.f32 0.5, %v9394_v33  ;;  %v12301_v3 = vadd.f32 %v12300_v21, %v12299_v52 }
 0x490   : > { %13225 = verf.f32 %v9458_v58  ;;  %v9456_v61 = vmul.f32 0.70710677, %v9392_v19  ;;  %v9395_v51 = vadd.f32 %v16632_v46, %v9356_v25  ;;  %v9354_v28 = vmul.f32 %v16623_v16, %v9315_v59 }
 0x491   : > { %v9320_v48 = vadd.f32 %v9212_v62, %v17634_v8  ;;  %v9204_v63 = vadd.f32 %v9203_v44, %v9043_v20  ;;  %v12484_v27 = vpop.f32.mrf.mxu0  ;;  %v12303_v20 = vpop.f32.mrf.mxu1  ;;  %v16684_v6 = vmul.f32 0.5, %v9392_v19  ;;  %v17641_v19 = vld [vmem:[#allocation78_spill] sm:$0xff] }
 0x492   : > { %13227 = verf.f32 %v9456_v61  ;;  %v9459_v35 = vmul.f32 0.70710677, %v9395_v51  ;;  %v9215_v14 = vadd.f32 %v12484_v27, %v9054_v2  ;;  %v9393_v60 = vadd.f32 %v16632_v46, %v9354_v28 }
 0x493   : > { %v9359_v0 = vmul.f32 %v16623_v16, %v9320_v48  ;;  %v9318_v5 = vadd.f32 %v9204_v63, %v17637_v11  ;;  %v9206_v45 = vpop.f32.mrf.mxu0  ;;  %v12305_v40 = vpop.f32.mrf.mxu1  ;;  %v12304_v18 = vadd.f32 %v12303_v20, %v12302_v53  ;;  %v16689_v62 = vmul.f32 0.5, %v9395_v51  ;;  %v17643_v53 = vld [vmem:[#allocation73_spill] sm:$0xff] }
 0x494   : > { %13229 = verf.f32 %v9459_v35  ;;  %v9321_v32 = vadd.f32 %v9215_v14, %v17638_v57  ;;  %v9207_v50 = vadd.f32 %v9206_v45, %v9046_v1  ;;  %v9457_v2 = vmul.f32 0.70710677, %v9393_v60  ;;  %v17644_v14 = vld [vmem:[#allocation46_spill] sm:$0xff] }
 0x495   : > { %v9398_v30 = vadd.f32 %v16632_v46, %v9359_v0  ;;  %v9357_v24 = vmul.f32 %v16623_v16, %v9318_v5  ;;  %v12487_v33 = vpop.f32.mrf.mxu0  ;;  %v12306_v25 = vpop.f32.mrf.mxu1  ;;  %v16698_v28 = vadd.f32 %v12301_v3, %v17642_v56  ;;  %v16700_v8 = vmul.f32 0.5, %v9393_v60  ;;  %v17645_v57 = vld [vmem:[#allocation74_spill] sm:$0xff] }
 0x496   : > { %v9360_v42 = vmul.f32 %v16623_v16, %v9321_v32  ;;  %v9319_v17 = vadd.f32 %v9207_v50, %v17640_v26  ;;  %v9228_v36 = vadd.f32 %v12487_v33, %v9067_v38  ;;  %13231 = verf.f32 %v9457_v2 }
 0x497   : > { %v9462_v1 = vmul.f32 0.70710677, %v9398_v30  ;;  %v9396_v58 = vadd.f32 %v16632_v46, %v9357_v24  ;;  %v9219_v59 = vpop.f32.mrf.mxu0  ;;  %v16695_v4 = vpop.f32.mrf.mxu1  ;;  %v16707_v49 = vadd.f32 %v12304_v18, %v17644_v14  ;;  %v16710_v0 = vmul.f32 0.5, %v9398_v30 }
 0x498   : > { %v9399_v52 = vadd.f32 %v16632_v46, %v9360_v42  ;;  %v9358_v21 = vmul.f32 %v16623_v16, %v9319_v17  ;;  %v9324_v44 = vadd.f32 %v9228_v36, %v17641_v19  ;;  %v9220_v38 = vadd.f32 %v9219_v59, %v16640_v22 }
 0x499   : > { %13233 = verf.f32 %v9462_v1  ;;  %v9460_v41 = vmul.f32 0.70710677, %v9396_v58  ;;  %v12488_v61 = vpop.f32.mrf.mxu0  ;;  %v12309_v35 = vpop.f32.mrf.mxu1  ;;  %v12307_v20 = vadd.f32 %v12306_v25, %v12305_v40  ;;  %v16716_v3 = vmul.f32 0.5, %v9396_v58  ;;  %v17646_v40 = vld [vmem:[#allocation72_spill] sm:$0xff] }
 0x49a   : > { %v9463_v51 = vmul.f32 0.70710677, %v9399_v52  ;;  %v9397_v48 = vadd.f32 %v16632_v46, %v9358_v21  ;;  %v9363_v63 = vmul.f32 %v16623_v16, %v9324_v44  ;;  %v9322_v27 = vadd.f32 %v9220_v38, %v17643_v53 }
 0x49b   : > { %13235 = verf.f32 %v9460_v41  ;;  %v9231_v29 = vadd.f32 %v12488_v61, %v16650_v15  ;;  %v9222_v22 = vpop.f32.mrf.mxu0  ;;  %v12311_v50 = vpop.f32.mrf.mxu1  ;;  %v16725_v58 = vmul.f32 0.5, %v9399_v52  ;;  %v17648_v61 = vld [vmem:[#allocation70_spill] sm:$0xff] }
 0x49c   : > { %13237 = verf.f32 %v9463_v51  ;;  %v9461_v60 = vmul.f32 0.70710677, %v9397_v48  ;;  %v9402_v11 = vadd.f32 %v16632_v46, %v9363_v63  ;;  %v9361_v45 = vmul.f32 %v16623_v16, %v9322_v27 }
 0x49d   : > { %v13226_v5 = vpop.eup %13225  ;;  %v9325_v32 = vadd.f32 %v9231_v29, %v17645_v57  ;;  %v9223_v15 = vadd.f32 %v9222_v22, %v16643_v7  ;;  %v12491_v43 = vpop.f32.mrf.mxu0  ;;  %v16745_v63 = vmul.f32 0.5, %v9397_v48 }
 0x49e   : > { %v9522_v2 = vadd.f32 1.0, %v13226_v5  ;;  %13239 = verf.f32 %v9461_v60  ;;  %v9466_v30 = vmul.f32 0.70710677, %v9402_v11  ;;  %v16719_v33 = vadd.f32 %v16632_v46, %v9361_v45  ;;  %v12312_v36 = vpop.f32.mrf.mxu1  ;;  %v17649_v5 = vld [vmem:[#allocation75_spill] sm:$0xff] }
 0x49f   : > { %v13228_v24 = vpop.eup %13227  ;;  %v9364_v42 = vmul.f32 %v16623_v16, %v9325_v32  ;;  %v9323_v26 = vadd.f32 %v9223_v15, %v17646_v40  ;;  %v9244_v17 = vadd.f32 %v12491_v43, %v16659_v39  ;;  %v9235_v7 = vpop.f32.mrf.mxu0  ;;  %v17647_v39 = vld [vmem:[#allocation54_spill] sm:$0xff]  ;;  %v16757_v45 = vadd.f32 %v12309_v35, %v16695_v4 }
 0x4a0   : > { %v9554_v1 = vmul.f32 %v9522_v2, %v16673_v54  ;;  %v9520_v18 = vadd.f32 1.0, %v13228_v24  ;;  %13241 = verf.f32 %v9466_v30  ;;  %v9464_v59 = vmul.f32 0.70710677, %v16719_v33  ;;  %v16732_v44 = vpop.f32.mrf.mxu1  ;;  %v17650_v24 = vld [vmem:[#allocation21_spill] sm:$0xff] }
 0x4a1   : > { %v13230_v25 = vpop.eup %13229  ;;  %v16729_v21 = vadd.f32 %v16632_v46, %v9364_v42  ;;  %v9362_v19 = vmul.f32 %v16623_v16, %v9323_v26  ;;  %v12492_v41 = vpop.f32.mrf.mxu0  ;;  %v16735_v38 = vadd.f32 %v12307_v20, %v17647_v39  ;;  %v9328_v56 = vadd.f32 %v9244_v17, %v17648_v61 }
 0x4a2   : > { %9586 = vst [vmem:[%s16739_s11 + $0x10] sm:$0xff] %v9554_v1  ;;  %v9552_v54 = vmul.f32 %v9520_v18, %v16684_v6  ;;  %v9523_v52 = vadd.f32 1.0, %v13230_v25  ;;  %v9236_v51 = vadd.f32 %v9235_v7, %v16653_v12  ;;  %13243 = verf.f32 %v9464_v59  ;;  %v16749_v29 = vpop.f32.mrf.mxu1 }
 0x4a3   : > { %v9467_v53 = vmul.f32 0.70710677, %v16729_v21  ;;  %v9401_v27 = vadd.f32 %v16632_v46, %v9362_v19  ;;  %v9238_v22 = vpop.f32.mrf.mxu0  ;;  %v13232_v14 = vpop.eup %13231  ;;  %v9367_v60 = vmul.f32 %v16623_v16, %v9328_v56  ;;  %v9247_v12 = vadd.f32 %v12492_v41, %v16668_v37  ;;  %v17651_v19 = vld [vmem:[#allocation77_spill] sm:$0xff] }
 0x4a4   : > { %9584 = vst [vmem:[%s16739_s11] sm:$0xff] %v9552_v54  ;;  %v9555_v6 = vmul.f32 %v9523_v52, %v16689_v62  ;;  %v9326_v20 = vadd.f32 %v9236_v51, %v17649_v5  ;;  %v9521_v48 = vadd.f32 1.0, %v13232_v14  ;;  %v16759_v32 = vpop.f32.mrf.mxu1  ;;  %v9434_v2 = vmul.f32 0.5, %v9402_v11 }
 0x4a5   : > { %13245 = verf.f32 %v9467_v53  ;;  %v9465_v57 = vmul.f32 0.70710677, %v9401_v27  ;;  %v12495_v15 = vpop.f32.mrf.mxu0  ;;  %v9406_v62 = vadd.f32 %v16632_v46, %v9367_v60  ;;  %v9329_v42 = vadd.f32 %v9247_v12, %v17650_v24  ;;  %v17652_v53 = vld [vmem:[#allocation25_spill] sm:$0xff] }
 0x4a6   : > { %v13234_v43 = vpop.eup %13233  ;;  %9587 = vst [vmem:[%s16739_s11 + $0x18] sm:$0xff] %v9555_v6  ;;  %v9365_v30 = vmul.f32 %v16623_v16, %v9326_v20  ;;  %v9553_v37 = vmul.f32 %v9521_v48, %v16700_v8  ;;  %v9239_v4 = vadd.f32 %v9238_v22, %v16662_v10  ;;  %v16767_v35 = vpop.f32.mrf.mxu1  ;;  %v16769_v1 = vadd.f32 %v12312_v36, %v12311_v50 }
 0x4a7   : > { %v9526_v40 = vadd.f32 1.0, %v13234_v43  ;;  %13247 = verf.f32 %v9465_v57  ;;  %v9251_v26 = vpop.f32.mrf.mxu0  ;;  %v9470_v7 = vmul.f32 0.70710677, %v9406_v62  ;;  %v9368_v18 = vmul.f32 %v16623_v16, %v9329_v42 }
 0x4a8   : > { %v13236_v17 = vpop.eup %13235  ;;  %v9404_v11 = vadd.f32 %v16632_v46, %v9365_v30  ;;  %9585 = vst [vmem:[%s16739_s11 + $0x8] sm:$0xff] %v9553_v37  ;;  %v9327_v41 = vadd.f32 %v9239_v4, %v17651_v19  ;;  %v9260_v10 = vadd.f32 %v12495_v15, %v16698_v28  ;;  %v16777_v39 = vpop.f32.mrf.mxu1  ;;  %v9432_v50 = vmul.f32 0.5, %v16719_v33 }
 0x4a9   : > { %v13238_v25 = vpop.eup %13237  ;;  %v9558_v8 = vmul.f32 %v9526_v40, %v16710_v0  ;;  %v9524_v59 = vadd.f32 1.0, %v13236_v17  ;;  %v12496_v54 = vpop.f32.mrf.mxu0  ;;  %13249 = verf.f32 %v9470_v7  ;;  %v9407_v0 = vadd.f32 %v16632_v46, %v9368_v18  ;;  %v17653_v7 = vld [vmem:[#allocation27_spill] sm:$0xff] }
 0x4aa   : > { %v9527_v52 = vadd.f32 1.0, %v13238_v25  ;;  %v9468_v36 = vmul.f32 0.70710677, %v9404_v11  ;;  %v9366_v51 = vmul.f32 %v16623_v16, %v9327_v41  ;;  %v9332_v28 = vadd.f32 %v9260_v10, %v17652_v53  ;;  %v16785_v22 = vpop.f32.mrf.mxu1  ;;  %v17655_v41 = vld [vmem:[#allocation35_spill] sm:$0xff]  ;;  %v17656_v53 = vld [vmem:[#allocation28_spill] sm:$0xff] }
 0x4ab   : > { %v13240_v61 = vpop.eup %13239  ;;  %9590 = vst [vmem:[%s16739_s11 + $0x30] sm:$0xff] %v9558_v8  ;;  %v9556_v56 = vmul.f32 %v9524_v59, %v16716_v3  ;;  %v9254_v14 = vpop.f32.mrf.mxu0  ;;  %v9435_v60 = vmul.f32 0.5, %v16729_v21  ;;  %v9433_v20 = vmul.f32 0.5, %v9401_v27  ;;  %v9471_v3 = vmul.f32 0.70710677, %v9407_v0 }
 0x4ac   : > { %v9559_v6 = vmul.f32 %v9527_v52, %v16725_v58  ;;  %v9525_v33 = vadd.f32 1.0, %v13240_v61  ;;  %13251 = verf.f32 %v9468_v36  ;;  %v9405_v12 = vadd.f32 %v16632_v46, %v9366_v51  ;;  %v16792_v57 = vpop.f32.mrf.mxu1 }
 0x4ad   : > { %v13242_v5 = vpop.eup %13241  ;;  %9588 = vst [vmem:[%s16739_s11 + $0x20] sm:$0xff] %v9556_v56  ;;  %v9371_v48 = vmul.f32 %v16623_v16, %v9332_v28  ;;  %v12499_v15 = vpop.f32.mrf.mxu0  ;;  %v9252_v30 = vadd.f32 %v9251_v26, %v16671_v31  ;;  %v9263_v21 = vadd.f32 %v12496_v54, %v16707_v49  ;;  %13253 = verf.f32 %v9471_v3  ;;  %v17654_v31 = vld [vmem:[#allocation26_spill] sm:$0xff] }
 0x4ae   : > { %9591 = vst [vmem:[%s16739_s11 + $0x38] sm:$0xff] %v9559_v6  ;;  %v9557_v43 = vmul.f32 %v9525_v33, %v16745_v63  ;;  %v9530_v58 = vadd.f32 1.0, %v13242_v5  ;;  %v12316_v27 = vadd.f32 %v16749_v29, %v16732_v44  ;;  %v9469_v24 = vmul.f32 0.70710677, %v9405_v12  ;;  %v12324_v37 = vpop.f32.mrf.mxu1 }
 0x4af   : > { %v16801_v42 = vadd.f32 %v16632_v46, %v9371_v48  ;;  %v9267_v40 = vpop.f32.mrf.mxu0  ;;  %v13244_v4 = vpop.eup %13243  ;;  %v9438_v63 = vmul.f32 0.5, %v9406_v62  ;;  %v9330_v18 = vadd.f32 %v9252_v30, %v17653_v7  ;;  %v9333_v26 = vadd.f32 %v9263_v21, %v17654_v31 }
 0x4b0   : > { %9589 = vst [vmem:[%s16739_s11 + $0x28] sm:$0xff] %v9557_v43  ;;  %v9562_v17 = vmul.f32 %v9530_v58, %v9434_v2  ;;  %v9528_v49 = vadd.f32 1.0, %v13244_v4  ;;  %v16806_v25 = vmul.f32 0.5, %v9404_v11  ;;  %13255 = verf.f32 %v9469_v24  ;;  %v16809_v29 = vpop.f32.mrf.mxu1  ;;  %v17657_v43 = vld [vmem:[#allocation39_spill] sm:$0xff] }
 0x4b1   : > { %v9474_v44 = vmul.f32 0.70710677, %v16801_v42  ;;  %v12500_v8 = vpop.f32.mrf.mxu0  ;;  %v9369_v19 = vmul.f32 %v16623_v16, %v9330_v18  ;;  %v9372_v2 = vmul.f32 %v16623_v16, %v9333_v26  ;;  %v9255_v62 = vadd.f32 %v9254_v14, %v16680_v47 }
 0x4b2   : > { %v13246_v59 = vpop.eup %13245  ;;  %9594 = vst [vmem:[%s16739_s11 + $0x50] sm:$0xff] %v9562_v17  ;;  %v9115_v10 = vadd.f32 %v16769_v1, %v17655_v41  ;;  %v9560_v11 = vmul.f32 %v9528_v49, %v9432_v50  ;;  %v16819_v52 = vadd.f32 %v16767_v35, %v16759_v32  ;;  %v16821_v36 = vpop.f32.mrf.mxu1  ;;  %v9439_v6 = vmul.f32 0.5, %v9407_v0  ;;  %v17658_v0 = vld [vmem:[#allocation29_spill] sm:$0xff] }
 0x4b3   : > { %v9531_v54 = vadd.f32 1.0, %v13246_v59  ;;  %13257 = verf.f32 %v9474_v44  ;;  %v9270_v61 = vpop.f32.mrf.mxu0  ;;  %v16824_v51 = vadd.f32 %v16632_v46, %v9369_v19  ;;  %v16827_v47 = vadd.f32 %v16632_v46, %v9372_v2  ;;  %v17660_v19 = vld [vmem:[#allocation23_spill] sm:$0xff] }
 0x4b4   : > { %v13248_v56 = vpop.eup %13247  ;;  %v9331_v1 = vadd.f32 %v9255_v62, %v17656_v53  ;;  %v9276_v50 = vadd.f32 %v12499_v15, %v9115_v10  ;;  %9592 = vst [vmem:[%s16739_s11 + $0x40] sm:$0xff] %v9560_v11  ;;  %v9268_v32 = vadd.f32 %v9267_v40, %v16735_v38  ;;  %v16832_v35 = vpop.f32.mrf.mxu1  ;;  %v16834_v5 = vmul.f32 0.5, %v9405_v12  ;;  %v17659_v38 = vld [vmem:[#allocation22_spill] sm:$0xff]  ;;  %v17661_v62 = vld [vmem:[#allocation69_spill] sm:$0xff] }
 0x4b5   : > { %v9563_v28 = vmul.f32 %v9531_v54, %v9435_v60  ;;  %v9529_v14 = vadd.f32 1.0, %v13248_v56  ;;  %v12503_v33 = vpop.f32.mrf.mxu0  ;;  %v9472_v3 = vmul.f32 0.70710677, %v16824_v51  ;;  %v9475_v48 = vmul.f32 0.70710677, %v16827_v47 }
 0x4b6   : > { %v9118_v58 = vadd.f32 %v12316_v27, %v17657_v43  ;;  %v13250_v30 = vpop.eup %13249  ;;  %v9370_v60 = vmul.f32 %v16623_v16, %v9331_v1  ;;  %v9336_v21 = vadd.f32 %v9276_v50, %v17658_v0  ;;  %v9334_v24 = vadd.f32 %v9268_v32, %v17659_v38  ;;  %v16843_v40 = vpop.f32.mrf.mxu1  ;;  %v17662_v50 = vld [vmem:[#allocation36_spill] sm:$0xff] }
 0x4b7   : > { %9595 = vst [vmem:[%s16739_s11 + $0x58] sm:$0xff] %v9563_v28  ;;  %v9561_v15 = vmul.f32 %v9529_v14, %v9433_v20  ;;  %v16845_v12 = vpop.f32.mrf.mxu0  ;;  %v9534_v4 = vadd.f32 1.0, %v13250_v30  ;;  %13259 = verf.f32 %v9472_v3  ;;  %v12325_v17 = vadd.f32 %v12324_v37, %v16792_v57 }
 0x4b8   : > { %v9279_v7 = vadd.f32 %v12500_v8, %v9118_v58  ;;  %13261 = verf.f32 %v9475_v48  ;;  %v9409_v20 = vadd.f32 %v16632_v46, %v9370_v60  ;;  %v9375_v27 = vmul.f32 %v16623_v16, %v9336_v21  ;;  %v16852_v26 = vpop.f32.mrf.mxu1 }
 0x4b9   : > { %v13252_v18 = vpop.eup %13251  ;;  %9593 = vst [vmem:[%s16739_s11 + $0x48] sm:$0xff] %v9561_v15  ;;  %v9373_v31 = vmul.f32 %v16623_v16, %v9334_v24  ;;  %v12504_v49 = vpop.f32.mrf.mxu0  ;;  %v9566_v44 = vmul.f32 %v9534_v4, %v9438_v63  ;;  %v9110_v57 = vadd.f32 %v16757_v45, %v17661_v62  ;;  %v12322_v37 = vadd.f32 %v16785_v22, %v16777_v39  ;;  %v17664_v4 = vld [vmem:[#allocation33_spill] sm:$0xff] }
 0x4ba   : > { %v9532_v59 = vadd.f32 1.0, %v13252_v18  ;;  %v9337_v2 = vadd.f32 %v9279_v7, %v17660_v19  ;;  %v9473_v8 = vmul.f32 0.70710677, %v9409_v20  ;;  %v16860_v41 = vadd.f32 %v16632_v46, %v9375_v27  ;;  %v12333_v11 = vpop.f32.mrf.mxu1  ;;  %v13254_v54 = vpop.eup %13253 }
 0x4bb   : > { %v16863_v10 = vadd.f32 %v16632_v46, %v9373_v31  ;;  %9598 = vst [vmem:[%s16739_s11 + $0x70] sm:$0xff] %v9566_v44  ;;  %v9442_v56 = vmul.f32 0.5, %v16801_v42  ;;  %v9271_v53 = vadd.f32 %v9270_v61, %v9110_v57  ;;  %v9286_v1 = vpop.f32.mrf.mxu0  ;;  %v9535_v39 = vadd.f32 1.0, %v13254_v54  ;;  %v17663_v61 = vld [vmem:[#allocation24_spill] sm:$0xff] }
 0x4bc   : > { %v9564_v63 = vmul.f32 %v9532_v59, %v16806_v25  ;;  %v9376_v45 = vmul.f32 %v16623_v16, %v9337_v2  ;;  %13263 = verf.f32 %v9473_v8  ;;  %v9478_v22 = vmul.f32 0.70710677, %v16860_v41  ;;  %v12335_v14 = vpop.f32.mrf.mxu1 }
 0x4bd   : > { %v9131_v28 = vadd.f32 %v12325_v17, %v17662_v50  ;;  %v13256_v32 = vpop.eup %13255  ;;  %v9476_v3 = vmul.f32 0.70710677, %v16863_v10  ;;  %v12328_v42 = vadd.f32 %v16821_v36, %v16809_v29  ;;  %v9335_v48 = vadd.f32 %v9271_v53, %v17663_v61  ;;  %v12507_v38 = vpop.f32.mrf.mxu0 }
 0x4be   : > { %9596 = vst [vmem:[%s16739_s11 + $0x60] sm:$0xff] %v9564_v63  ;;  %v16874_v25 = vadd.f32 %v16632_v46, %v9376_v45  ;;  %v9567_v43 = vmul.f32 %v9535_v39, %v9439_v6  ;;  %v9533_v58 = vadd.f32 1.0, %v13256_v32  ;;  %13265 = verf.f32 %v9478_v22  ;;  %v12336_v24 = vpop.f32.mrf.mxu1  ;;  %v17668_v45 = vld [vmem:[#allocation40_spill] sm:$0xff]  ;;  %v17669_v39 = vld [vmem:[#allocation45_spill] sm:$0xff] }
 0x4bf   : > { %v9292_v30 = vadd.f32 %v12503_v33, %v9131_v28  ;;  %v9440_v60 = vmul.f32 0.5, %v16824_v51  ;;  %13267 = verf.f32 %v9476_v3  ;;  %v9374_v21 = vmul.f32 %v16623_v16, %v9335_v48  ;;  %v17665_v51 = vld [vmem:[#allocation50_spill] sm:$0xff]  ;;  %v9299_v57 = vpop.f32.mrf.mxu0 }
 0x4c0   : > { %v13258_v15 = vpop.eup %13257  ;;  %v9479_v0 = vmul.f32 0.70710677, %v16874_v25  ;;  %9599 = vst [vmem:[%s16739_s11 + $0x78] sm:$0xff] %v9567_v43  ;;  %v9565_v29 = vmul.f32 %v9533_v58, %v16834_v5  ;;  %v9443_v6 = vmul.f32 0.5, %v16827_v47  ;;  %v9123_v7 = vadd.f32 %v16819_v52, %v17665_v51  ;;  %v17666_v47 = vld [vmem:[#allocation58_spill] sm:$0xff]  ;;  %v12338_v8 = vpop.f32.mrf.mxu1 }
 0x4c1   : > { %v9538_v36 = vadd.f32 1.0, %v13258_v15  ;;  %v9340_v17 = vadd.f32 %v9292_v30, %v17664_v4  ;;  %v16887_v33 = vadd.f32 %v16632_v46, %v9374_v21  ;;  %v9134_v18 = vadd.f32 %v12328_v42, %v16589_v9 }
 0x4c2   : > { %13269 = verf.f32 %v9479_v0  ;;  %9597 = vst [vmem:[%s16739_s11 + $0x68] sm:$0xff] %v9565_v29  ;;  %v12331_v5 = vadd.f32 %v16843_v40, %v16832_v35  ;;  %v9126_v44 = vadd.f32 %v12322_v37, %v17666_v47  ;;  %v9441_v59 = vmul.f32 0.5, %v9409_v20  ;;  %v17667_v20 = vld [vmem:[#allocation34_spill] sm:$0xff]  ;;  %v12339_v32 = vpop.f32.mrf.mxu1 }
 0x4c3   : > { %v9570_v27 = vmul.f32 %v9538_v36, %v9442_v56  ;;  %v9379_v31 = vmul.f32 %v16623_v16, %v9340_v17  ;;  %v9477_v19 = vmul.f32 0.70710677, %v16887_v33  ;;  %v9284_v2 = vadd.f32 %v16845_v12, %v9123_v7 }
 0x4c4   : > { %v9295_v62 = vadd.f32 %v12504_v49, %v9134_v18  ;;  %v13260_v52 = vpop.eup %13259  ;;  %v12334_v54 = vadd.f32 %v12333_v11, %v16852_v26  ;;  %v9287_v63 = vadd.f32 %v9286_v1, %v9126_v44  ;;  %v12337_v56 = vadd.f32 %v12336_v24, %v12335_v14  ;;  %v12508_v14 = vpop.f32.mrf.mxu0 }
 0x4c5   : > { %9602 = vst [vmem:[%s16739_s11 + $0x90] sm:$0xff] %v9570_v27  ;;  %v16901_v9 = vadd.f32 %v16632_v46, %v9379_v31  ;;  %v13262_v35 = vpop.eup %13261  ;;  %v9536_v40 = vadd.f32 1.0, %v13260_v52  ;;  %13271 = verf.f32 %v9477_v19  ;;  %v9338_v37 = vadd.f32 %v9284_v2, %v17667_v20  ;;  %v17671_v31 = vld [vmem:[#allocation41_spill] sm:$0xff] }
 0x4c6   : > { %v9341_v53 = vadd.f32 %v9295_v62, %v17668_v45  ;;  %v9539_v12 = vadd.f32 1.0, %v13262_v35  ;;  %v9339_v22 = vadd.f32 %v9287_v63, %v17669_v39  ;;  %v9139_v50 = vadd.f32 %v12331_v5, %v16592_v55  ;;  %v9302_v4 = vpop.f32.mrf.mxu0 }
 0x4c7   : > { %v9482_v49 = vmul.f32 0.70710677, %v16901_v9  ;;  %v9568_v28 = vmul.f32 %v9536_v40, %v9440_v60  ;;  %v9377_v26 = vmul.f32 %v16623_v16, %v9338_v37  ;;  %v9147_v1 = vadd.f32 %v12337_v56, %v16602_v23  ;;  %v17670_v60 = vld [vmem:[#allocation42_spill] sm:$0xff] }
 0x4c8   : > { %v9380_v11 = vmul.f32 %v16623_v16, %v9341_v53  ;;  %v9571_v3 = vmul.f32 %v9539_v12, %v9443_v6  ;;  %v9378_v42 = vmul.f32 %v16623_v16, %v9339_v22  ;;  %v9300_v61 = vadd.f32 %v9299_v57, %v9139_v50 }
 0x4c9   : > { %13273 = verf.f32 %v9482_v49  ;;  %v13264_v48 = vpop.eup %13263  ;;  %9600 = vst [vmem:[%s16739_s11 + $0x80] sm:$0xff] %v9568_v28  ;;  %v9446_v43 = vmul.f32 0.5, %v16860_v41  ;;  %v16916_v55 = vadd.f32 %v16632_v46, %v9377_v26  ;;  %v9308_v30 = vadd.f32 %v12507_v38, %v9147_v1 }
 0x4ca   : > { %v16919_v58 = vadd.f32 %v16632_v46, %v9380_v11  ;;  %9603 = vst [vmem:[%s16739_s11 + $0x98] sm:$0xff] %v9571_v3  ;;  %v9537_v23 = vadd.f32 1.0, %v13264_v48  ;;  %v16923_v15 = vadd.f32 %v16632_v46, %v9378_v42  ;;  %v9342_v0 = vadd.f32 %v9300_v61, %v17670_v60 }
 0x4cb   : > { %v12340_v21 = vadd.f32 %v12339_v32, %v12338_v8  ;;  %v13266_v24 = vpop.eup %13265  ;;  %v9444_v29 = vmul.f32 0.5, %v16863_v10  ;;  %v9447_v41 = vmul.f32 0.5, %v16874_v25  ;;  %v9480_v36 = vmul.f32 0.70710677, %v16916_v55  ;;  %v17672_v8 = vld [vmem:[#allocation43_spill] sm:$0xff] }
 0x4cc   : > { %v9483_v6 = vmul.f32 0.70710677, %v16919_v58  ;;  %v13268_v38 = vpop.eup %13267  ;;  %v9569_v17 = vmul.f32 %v9537_v23, %v9441_v59  ;;  %v9542_v51 = vadd.f32 1.0, %v13266_v24  ;;  %v9481_v7 = vmul.f32 0.70710677, %v16923_v15 }
 0x4cd   : > { %v9142_v18 = vadd.f32 %v12334_v54, %v16595_v13  ;;  %v9540_v27 = vadd.f32 1.0, %v13268_v38  ;;  %13275 = verf.f32 %v9480_v36  ;;  %v9344_v5 = vadd.f32 %v9308_v30, %v17671_v31 }
 0x4ce   : > { %v9381_v10 = vmul.f32 %v16623_v16, %v9342_v0  ;;  %9601 = vst [vmem:[%s16739_s11 + $0x88] sm:$0xff] %v9569_v17  ;;  %v9574_v47 = vmul.f32 %v9542_v51, %v9446_v43  ;;  %13277 = verf.f32 %v9483_v6  ;;  %v9150_v44 = vadd.f32 %v12340_v21, %v16617_v34  ;;  %v17673_v34 = vld [vmem:[#allocation32_spill] sm:$0xff] }
 0x4cf   : > { %v13270_v25 = vpop.eup %13269  ;;  %v9303_v59 = vadd.f32 %v9302_v4, %v9142_v18  ;;  %v9572_v19 = vmul.f32 %v9540_v27, %v9444_v29  ;;  %13279 = verf.f32 %v9481_v7  ;;  %v9383_v13 = vmul.f32 %v16623_v16, %v9344_v5 }
 0x4d0   : > { %v9543_v2 = vadd.f32 1.0, %v13270_v25  ;;  %9606 = vst [vmem:[%s16739_s11 + $0xb0] sm:$0xff] %v9574_v47  ;;  %v9420_v62 = vadd.f32 %v16632_v46, %v9381_v10  ;;  %v9311_v57 = vadd.f32 %v12508_v14, %v9150_v44  ;;  %v9445_v37 = vmul.f32 0.5, %v16887_v33 }
 0x4d1   : > { %v9343_v52 = vadd.f32 %v9303_v59, %v17672_v8  ;;  %9604 = vst [vmem:[%s16739_s11 + $0xa0] sm:$0xff] %v9572_v19  ;;  %v9422_v63 = vadd.f32 %v16632_v46, %v9383_v13  ;;  %v9450_v50 = vmul.f32 0.5, %v16901_v9  ;;  %v9448_v32 = vmul.f32 0.5, %v16916_v55 }
 0x4d2   : > { %v9575_v54 = vmul.f32 %v9543_v2, %v9447_v41  ;;  %v13272_v56 = vpop.eup %13271  ;;  %v9484_v35 = vmul.f32 0.70710677, %v9420_v62  ;;  %v9345_v40 = vadd.f32 %v9311_v57, %v17673_v34  ;;  %v9451_v9 = vmul.f32 0.5, %v16919_v58 }
 0x4d3   : > { %v9382_v20 = vmul.f32 %v16623_v16, %v9343_v52  ;;  %v9541_v45 = vadd.f32 1.0, %v13272_v56  ;;  %v9486_v53 = vmul.f32 0.70710677, %v9422_v63  ;;  %v9449_v48 = vmul.f32 0.5, %v16923_v15 }
 0x4d4   : > { %9607 = vst [vmem:[%s16739_s11 + $0xb8] sm:$0xff] %v9575_v54  ;;  %13281 = verf.f32 %v9484_v35  ;;  %v9384_v12 = vmul.f32 %v16623_v16, %v9345_v40  ;;  %v9452_v0 = vmul.f32 0.5, %v9420_v62  ;;  %v9454_v24 = vmul.f32 0.5, %v9422_v63 }
 0x4d5   : > { %v9421_v49 = vadd.f32 %v16632_v46, %v9382_v20  ;;  %v9573_v22 = vmul.f32 %v9541_v45, %v9445_v37  ;;  %13283 = verf.f32 %v9486_v53 }
 0x4d6   : > { %v13274_v39 = vpop.eup %13273  ;;  %v9423_v26 = vadd.f32 %v16632_v46, %v9384_v12 }
 0x4d7   : > { %v9546_v28 = vadd.f32 1.0, %v13274_v39  ;;  %v9485_v11 = vmul.f32 0.70710677, %v9421_v49  ;;  %9605 = vst [vmem:[%s16739_s11 + $0xa8] sm:$0xff] %v9573_v22  ;;  %v9453_v36 = vmul.f32 0.5, %v9421_v49 }
 0x4d8   : > { %v9487_v33 = vmul.f32 0.70710677, %v9423_v26  ;;  %v9455_v38 = vmul.f32 0.5, %v9423_v26 }
 0x4d9   : > { %v9578_v1 = vmul.f32 %v9546_v28, %v9450_v50  ;;  %13285 = verf.f32 %v9485_v11 }
 0x4da   : > { %v13276_v14 = vpop.eup %13275  ;;  %13287 = verf.f32 %v9487_v33 }
 0x4db   : > { %9610 = vst [vmem:[%s16739_s11 + $0xd0] sm:$0xff] %v9578_v1  ;;  %v13278_v16 = vpop.eup %13277  ;;  %v9544_v3 = vadd.f32 1.0, %v13276_v14 }
 0x4dc   : > { %v13280_v42 = vpop.eup %13279  ;;  %v9547_v61 = vadd.f32 1.0, %v13278_v16 }
 0x4dd   : > { %v9576_v46 = vmul.f32 %v9544_v3, %v9448_v32  ;;  %v9545_v43 = vadd.f32 1.0, %v13280_v42 }
 0x4de   : > { %v9579_v30 = vmul.f32 %v9547_v61, %v9451_v9 }
 0x4df   : > { %9608 = vst [vmem:[%s16739_s11 + $0xc0] sm:$0xff] %v9576_v46  ;;  %v9577_v23 = vmul.f32 %v9545_v43, %v9449_v48 }
 0x4e0   : > { %9611 = vst [vmem:[%s16739_s11 + $0xd8] sm:$0xff] %v9579_v30 }
 0x4e1   : > { %v13282_v60 = vpop.eup %13281  ;;  %9609 = vst [vmem:[%s16739_s11 + $0xc8] sm:$0xff] %v9577_v23 }
 0x4e2   : > { %v13284_v55 = vpop.eup %13283  ;;  %v9548_v21 = vadd.f32 1.0, %v13282_v60 }
 0x4e3   : > { %v9550_v58 = vadd.f32 1.0, %v13284_v55 }
 0x4e4   : > { %v9580_v29 = vmul.f32 %v9548_v21, %v9452_v0 }
 0x4e5   : > { %v9582_v15 = vmul.f32 %v9550_v58, %v9454_v24 }
 0x4e6   : > { %v13286_v41 = vpop.eup %13285  ;;  %9612 = vst [vmem:[%s16739_s11 + $0xe0] sm:$0xff] %v9580_v29 }
 0x4e7   : > { %v9549_v6 = vadd.f32 1.0, %v13286_v41  ;;  %v13288_v4 = vpop.eup %13287  ;;  %9614 = vst [vmem:[%s16739_s11 + $0xf0] sm:$0xff] %v9582_v15 }
 0x4e8   : > { %v9551_v17 = vadd.f32 1.0, %v13288_v4 }
 0x4e9   : > { %v9581_v51 = vmul.f32 %v9549_v6, %v9453_v36 }
 0x4ea   : > { %v9583_v7 = vmul.f32 %v9551_v17, %v9455_v38 }
 0x4eb   : > { %9613 = vst [vmem:[%s16739_s11 + $0xe8] sm:$0xff] %v9581_v51 }
 0x4ec   : > { %9615 = vst [vmem:[%s16739_s11 + $0xf8] sm:$0xff] %v9583_v7 }
 0x4ed   : > { %13611 = shalt.err (!%p13608_p6)
}
 0x4ee   : > { %s13612_s30 = scalar_lea.hbm %s16965_s0, 4096  ;;  %s13616_s7 = scalar_lea.hbm %s17023_s6, 8192 }
 0x4ef   : > { %p13613_p4 = scmp.ne.s32.totalorder %s16965_s0, %s13612_s30  ;;  %p13617_p7 = scmp.lt.s32.totalorder %s16965_s0, %s17023_s6 }
 0x4f0   : > { %p13618_p2 = scmp.lt.s32.totalorder %s13616_s7, %s13612_s30 }
 0x4f1   : > { %p13614_p9 = pnand %p13613_p4, %p13824_p12 }
 0x4f2   : > { %p13619_p11 = por %p13618_p2, %p13617_p7 }
 0x4f3   : > { %p13615_p10 = pneg %p13614_p9 }
 0x4f5   : > { %p13620_p0 = pnand %p13619_p11, %p13615_p10 }
 0x4f7   : > { %13623 = shalt.err (!%p13620_p0)
}
 0x4f8   : > { %s13696_s10 = smov 128   ;;  %s13697_s12 = smov 8  }
 0x4f9   : > { %12535 = dma.vmem_to_hbm [thread:$0]  (%p13824_p12), %s16967_s19, 4096, %s16965_s0, %s9617_s24, %s13696_s10, %s13696_s10, %s13697_s12  }
 0x4fa PF: > { %s17675_s16 = sld [smem:[#allocation17_spill]]  ;;  %s9647_s29 = sand.u32 1, %s13666_s21  }
 0x4fb   : > { %s9648_s11 = scalar_lea.sflag [#allocation5], %s9647_s29 }
 0x500   : > { %p17676_p1 = scmp.ge.s32.totalorder %s17675_s16, 2 }
 0x502   : > { %p12552_p3 = pnand %p17676_p1, %p13828_p13 }
 0x504   : > { %p12553_p5 = pneg %p12552_p3 }
 0x506   : > { %13661 = dma.done.wait (%p12553_p5), %s9648_s11, 4096  }
 0x507   : > { %13663 = vsyncadd (%p12553_p5), %s9648_s11, 4294963200  ;;  %s26_s26 = sadd.s32 1, %s17675_s16   ;;  %s17677_s18 = sld [smem:[#allocation16_spill]] }
 0x508   : > { %p23_p8 = scmp.ge.s32.totalorder %s26_s26, 4   ;;  %s17678_s23 = sld [smem:[#allocation19_spill]] }
 0x509   : > { %s17679_s13 = sld [smem:[#allocation18_spill]]  ;;  %s17680_s21 = smov %s13670_s22 }
 0x50a   : > { %s17682_s24 = smov %s13682_s25 }
 0x50b   :  { %25 = sbr.rel (!%p23_p8) target bundleno = 13 (0xd), region = 122 }
 0x50d   : > { %s17681_s22 = smov %s17677_s18 }
 0x50f   : > { %s17683_s25 = smov %s17679_s13 }
 0x510   :  { %9653 = vsyncpa [#allocation4], 1 }
 0x511   :  { %9655 = vsyncpa [#allocation4 + $0x1], 1 }
 0x512   :  { %9656 = vsyncpa [#allocation7], 1 }
 0x513   :  { %9658 = vsyncpa [#allocation7 + $0x1], 1 }
 0x514   :  { %9659 = vsyncpa [#allocation10], 1 }
 0x515   :  { %9660 = vsyncpa [#allocation5], 1 }
 0x516   :  { %9662 = vsyncpa [#allocation5 + $0x1], 1 }

</bundles_post_ra>
